<compile_context>
chip_gen: v7x
topology: tpu7x:2x2x1
jax: 0.10.0
libtpu: 0.0.40
codegen_flags: <defaults>
</compile_context>

<pallas_src>
import jax
import jax.numpy as jnp
from jax.experimental import pallas as pl
from jax.experimental.pallas import tpu as pltpu

NUM_NETS = 10          # 10 nets x 100 sliced logits -> 1000 classifier input
NUM_CLASSES = 1000
SLICE = 100
PAD_N = 1024           # 1000 padded up to 8 x 128 lanes / 4 x 256 MXU tiles


# ----------------------------------------------------------------------------
# Fused kernel (one batch tile per grid step):
#   y   = x @ W_cat + b_cat                      (TM, 1024)  == cat of y_i[:, :100] (zero-padded)
#   h   = relu(y @ w1 + b1)                      (TM, 1024)
#   out = h @ w2 + b2                            (TM, 1024)
# Weights are bf16 and VMEM-resident across all grid steps; accumulation is
# f32 on the MXU; intermediates live in VMEM/vregs only.
# ----------------------------------------------------------------------------
def fused_kernel(x_ref, wc_ref, bc_ref, w1_ref, b1_ref, w2_ref, b2_ref, o_ref):
    # x: (TM, D) f32   wc: (D, 1024) bf16   bc/b1/b2: (1, 1024) f32
    # w1/w2: (1024, 1024) bf16              o: (TM, 1024) f32
    x = x_ref[...].astype(jnp.bfloat16)          # cast hidden under MXU work
    y = jnp.dot(x, wc_ref[...], preferred_element_type=jnp.float32)
    y = y + bc_ref[...]

    h = jnp.dot(y.astype(jnp.bfloat16), w1_ref[...],
                preferred_element_type=jnp.float32)
    h = jnp.maximum(h + b1_ref[...], 0.0)

    o = jnp.dot(h.astype(jnp.bfloat16), w2_ref[...],
                preferred_element_type=jnp.float32)
    o_ref[...] = o + b2_ref[...]


def prepare_params(net_ws, net_bs, w1, b1, w2, b2):
    """Model-load-time preprocessing (done ONCE, outside the hot path).

    Slices each frozen sub-net's classifier to its first 100 output columns,
    concatenates them in net order (matching torch.cat(ys, dim=1)), zero-pads
    every 1000-wide dim to 1024 (zeros survive bias-add + ReLU exactly), and
    casts the frozen weight matrices to bf16 for inference.
    """
    n, d, _ = net_ws.shape
    # W_cat[:, i*100:(i+1)*100] = net_ws[i][:, :100]
    w_cat = jnp.transpose(net_ws[:, :, :SLICE], (1, 0, 2)).reshape(d, n * SLICE)
    b_cat = net_bs[:, 0, :SLICE].reshape(1, n * SLICE)

    def pad_cols(a):
        return jnp.pad(a, ((0, 0), (0, PAD_N - a.shape[1])))

    w_cat_p = pad_cols(w_cat)                                     # (D, 1024)
    b_cat_p = pad_cols(b_cat)                                     # (1, 1024)
    w1_p = jnp.pad(w1, ((0, PAD_N - w1.shape[0]), (0, PAD_N - w1.shape[1])))
    b1_p = pad_cols(b1)
    w2_p = jnp.pad(w2, ((0, PAD_N - w2.shape[0]), (0, PAD_N - w2.shape[1])))
    b2_p = pad_cols(b2)

    return (w_cat_p.astype(jnp.bfloat16), b_cat_p.astype(jnp.float32),
            w1_p.astype(jnp.bfloat16), b1_p.astype(jnp.float32),
            w2_p.astype(jnp.bfloat16), b2_p.astype(jnp.float32))


@jax.jit
def dycs_stack_forward(x, w_cat, b_cat, w1, b1, w2, b2):
    """x: (B, C, H, W) f32.  Returns (B, 1000) f32."""
    B = x.shape[0]
    D = 1
    for s in x.shape[1:]:
        D *= s
    x_flat = x.reshape(B, D)                       # f32; bf16 cast done in-kernel

    # Batch tile: 256 rows (matches the 256-row MXU on v6e/v7x) once B is big
    # enough; otherwise a single sublane-aligned tile (>=16 rows for bf16
    # packing).  B is padded with zero rows so the grid divides exactly.
    TM = 256 if B >= 256 else max(16, ((B + 7) // 8) * 8)
    B_pad = pl.cdiv(B, TM) * TM
    if B_pad != B:
        x_flat = jnp.pad(x_flat, ((0, B_pad - B), (0, 0)))
    grid = (B_pad // TM,)

    # Advisory cost for XLA scheduling around this ~us kernel.
    weight_bytes = ((w_cat.size + w1.size + w2.size) * 2
                    + (b_cat.size + b1.size + b2.size) * 4)
    cost = pl.CostEstimate(
        flops=2 * B_pad * (D + PAD_N + PAD_N) * PAD_N,
        transcendentals=0,
        bytes_accessed=weight_bytes + B_pad * D * 4 + B_pad * PAD_N * 4)

    # Weights use a constant index_map -> DMA'd once, resident across the grid.
    # TODO(synk): single-buffer the weight specs (pl.Buffered(1)) to reclaim
    # ~6 MB of VMEM once the batch tile TM grows large.
    const = lambda i: (0, 0)
    out = pl.pallas_call(
        fused_kernel,
        out_shape=jax.ShapeDtypeStruct((B_pad, PAD_N), jnp.float32),
        grid=grid,
        in_specs=[
            pl.BlockSpec((TM, D), lambda i: (i, 0)),       # x tile (pipelined)
            pl.BlockSpec((D, PAD_N), const),               # W_cat   (resident)
            pl.BlockSpec((1, PAD_N), const),               # b_cat
            pl.BlockSpec((PAD_N, PAD_N), const),           # w1
            pl.BlockSpec((1, PAD_N), const),               # b1
            pl.BlockSpec((PAD_N, PAD_N), const),           # w2
            pl.BlockSpec((1, PAD_N), const),               # b2
        ],
        out_specs=pl.BlockSpec((TM, PAD_N), lambda i: (i, 0)),   # lane-dense
        compiler_params=pltpu.CompilerParams(
            dimension_semantics=("parallel",),             # use both TCs on v7x
            vmem_limit_bytes=40 * 1024 * 1024),            # > v5e 16 MiB default
        cost_estimate=cost,
    )(x_flat, w_cat, b_cat, w1, b1, w2, b2)

    # Drop batch padding and the 24 zero padding lanes.
    return out[:B, :NUM_CLASSES]


def _reference(x, net_ws, net_bs, w1, b1, w2, b2):
    """Pure-JAX f32 reference of the original module's forward pass."""
    B = x.shape[0]
    xf = x.reshape(B, -1)
    ys = [xf @ net_ws[i] + net_bs[i, 0] for i in range(net_ws.shape[0])]
    ys = [y[:, :SLICE] for y in ys]
    y = jnp.concatenate(ys, axis=1)
    h = jnp.maximum(y @ w1 + b1, 0.0)
    return h @ w2 + b2


if __name__ == "__main__":
    B, C, H, W = 2, 4, 16, 16
    D = C * H * W

    key = jax.random.PRNGKey(0)
    ks = jax.random.split(key, 6)

    # Deterministic parameter init (torch-Linear-style uniform bounds), f32
    # "as loaded"; synthetic sub-nets are Linear(C*H*W -> 1000) heads.
    lim_net = 1.0 / jnp.sqrt(jnp.float32(D))
    net_ws = jax.random.uniform(ks[0], (NUM_NETS, D, NUM_CLASSES),
                                jnp.float32, -lim_net, lim_net)
    net_bs = jax.random.uniform(ks[1], (NUM_NETS, 1, NUM_CLASSES),
                                jnp.float32, -lim_net, lim_net)

    lim_cls = 1.0 / jnp.sqrt(jnp.float32(NUM_CLASSES))
    w1 = jax.random.uniform(ks[2], (NUM_CLASSES, NUM_CLASSES),
                            jnp.float32, -lim_cls, lim_cls)
    b1 = jax.random.uniform(ks[3], (1, NUM_CLASSES), jnp.float32, -lim_cls, lim_cls)
    w2 = jax.random.uniform(ks[4], (NUM_CLASSES, NUM_CLASSES),
                            jnp.float32, -lim_cls, lim_cls)
    b2 = jax.random.uniform(ks[5], (1, NUM_CLASSES), jnp.float32, -lim_cls, lim_cls)

    x = jax.random.normal(jax.random.PRNGKey(1), (B, C, H, W), jnp.float32)

    # One-time model-load preprocessing (slice + concat + pad-to-1024 + bf16).
    params = prepare_params(net_ws, net_bs, w1, b1, w2, b2)

    out = jax.block_until_ready(dycs_stack_forward(x, *params))
    ref = jax.block_until_ready(_reference(x, net_ws, net_bs, w1, b1, w2, b2))

    assert out.shape == (B, NUM_CLASSES), out.shape
    # bf16 frozen weights + bf16 activation hand-off -> loosened tolerance.
    assert jnp.allclose(out, ref, atol=3e-2, rtol=3e-2), \
        float(jnp.max(jnp.abs(out - ref)))
    print("KERNEL_OK")
</pallas_src>

<mosaic_0001>
module attributes {stable_mosaic.version = 11 : i64} {
  func.func @fused_kernel(%arg0: i32, %arg1: memref<16x1024xf32, #tpu.memory_space<vmem>>, %arg2: memref<1024x1024xbf16, #tpu.memory_space<vmem>>, %arg3: memref<1x1024xf32, #tpu.memory_space<vmem>>, %arg4: memref<1024x1024xbf16, #tpu.memory_space<vmem>>, %arg5: memref<1x1024xf32, #tpu.memory_space<vmem>>, %arg6: memref<1024x1024xbf16, #tpu.memory_space<vmem>>, %arg7: memref<1x1024xf32, #tpu.memory_space<vmem>>, %arg8: memref<16x1024xf32, #tpu.memory_space<vmem>>) attributes {dimension_semantics = [#tpu.dimension_semantics<parallel>], iteration_bounds = array<i64: 1>, scalar_prefetch = 0 : i64, scratch_operands = 0 : i64, tpu.core_type = #tpu.core_type<tc>, window_params = [{transform_indices = @transform_0, window_bounds = array<i64: 16, 1024>}, {pipeline_mode = #tpu.pipeline_mode<synchronous>, transform_indices = @transform_1, window_bounds = array<i64: 1024, 1024>}, {pipeline_mode = #tpu.pipeline_mode<synchronous>, transform_indices = @transform_2, window_bounds = array<i64: 1, 1024>}, {pipeline_mode = #tpu.pipeline_mode<synchronous>, transform_indices = @transform_3, window_bounds = array<i64: 1024, 1024>}, {pipeline_mode = #tpu.pipeline_mode<synchronous>, transform_indices = @transform_4, window_bounds = array<i64: 1, 1024>}, {pipeline_mode = #tpu.pipeline_mode<synchronous>, transform_indices = @transform_5, window_bounds = array<i64: 1024, 1024>}, {pipeline_mode = #tpu.pipeline_mode<synchronous>, transform_indices = @transform_6, window_bounds = array<i64: 1, 1024>}, {transform_indices = @transform_7, window_bounds = array<i64: 16, 1024>}]} {
    %c0 = arith.constant 0 : index
    %c0_0 = arith.constant 0 : index
    %0 = vector.load %arg1[%c0, %c0_0] : memref<16x1024xf32, #tpu.memory_space<vmem>>, vector<16x1024xf32>
    %1 = arith.truncf %0 : vector<16x1024xf32> to vector<16x1024xbf16>
    %c0_1 = arith.constant 0 : index
    %c0_2 = arith.constant 0 : index
    %2 = vector.load %arg2[%c0_1, %c0_2] : memref<1024x1024xbf16, #tpu.memory_space<vmem>>, vector<1024x1024xbf16>
    %cst = arith.constant dense<0.000000e+00> : vector<16x1024xf32>
    %3 = tpu.matmul %1, %2, %cst {dimension_numbers = #tpu.dot_dimension_numbers<[1], [0], [0], [1], [0, 0, 1, 1], [], []>} : vector<16x1024xbf16>, vector<1024x1024xbf16>, vector<16x1024xf32> -> vector<16x1024xf32>
    %c0_3 = arith.constant 0 : index
    %c0_4 = arith.constant 0 : index
    %4 = vector.load %arg3[%c0_3, %c0_4] : memref<1x1024xf32, #tpu.memory_space<vmem>>, vector<1x1024xf32>
    %5 = vector.broadcast %4 : vector<1x1024xf32> to vector<16x1024xf32>
    %6 = arith.addf %3, %5 : vector<16x1024xf32>
    %7 = arith.truncf %6 : vector<16x1024xf32> to vector<16x1024xbf16>
    %c0_5 = arith.constant 0 : index
    %c0_6 = arith.constant 0 : index
    %8 = vector.load %arg4[%c0_5, %c0_6] : memref<1024x1024xbf16, #tpu.memory_space<vmem>>, vector<1024x1024xbf16>
    %cst_7 = arith.constant dense<0.000000e+00> : vector<16x1024xf32>
    %9 = tpu.matmul %7, %8, %cst_7 {dimension_numbers = #tpu.dot_dimension_numbers<[1], [0], [0], [1], [0, 0, 1, 1], [], []>} : vector<16x1024xbf16>, vector<1024x1024xbf16>, vector<16x1024xf32> -> vector<16x1024xf32>
    %c0_8 = arith.constant 0 : index
    %c0_9 = arith.constant 0 : index
    %10 = vector.load %arg5[%c0_8, %c0_9] : memref<1x1024xf32, #tpu.memory_space<vmem>>, vector<1x1024xf32>
    %11 = vector.broadcast %10 : vector<1x1024xf32> to vector<16x1024xf32>
    %12 = arith.addf %9, %11 : vector<16x1024xf32>
    %cst_10 = arith.constant 0.000000e+00 : f32
    %13 = vector.broadcast %cst_10 : f32 to vector<16x1024xf32>
    %14 = arith.maximumf %12, %13 : vector<16x1024xf32>
    %15 = arith.truncf %14 : vector<16x1024xf32> to vector<16x1024xbf16>
    %c0_11 = arith.constant 0 : index
    %c0_12 = arith.constant 0 : index
    %16 = vector.load %arg6[%c0_11, %c0_12] : memref<1024x1024xbf16, #tpu.memory_space<vmem>>, vector<1024x1024xbf16>
    %cst_13 = arith.constant dense<0.000000e+00> : vector<16x1024xf32>
    %17 = tpu.matmul %15, %16, %cst_13 {dimension_numbers = #tpu.dot_dimension_numbers<[1], [0], [0], [1], [0, 0, 1, 1], [], []>} : vector<16x1024xbf16>, vector<1024x1024xbf16>, vector<16x1024xf32> -> vector<16x1024xf32>
    %c0_14 = arith.constant 0 : index
    %c0_15 = arith.constant 0 : index
    %18 = vector.load %arg7[%c0_14, %c0_15] : memref<1x1024xf32, #tpu.memory_space<vmem>>, vector<1x1024xf32>
    %19 = vector.broadcast %18 : vector<1x1024xf32> to vector<16x1024xf32>
    %20 = arith.addf %17, %19 : vector<16x1024xf32>
    %c0_16 = arith.constant 0 : index
    %c0_17 = arith.constant 0 : index
    %21 = vector.load %arg8[%c0_16, %c0_17] : memref<16x1024xf32, #tpu.memory_space<vmem>>, vector<16x1024xf32>
    tpu.vector_store %arg8[%c0_16, %c0_17], %20 {strides = array<i32>} : memref<16x1024xf32, #tpu.memory_space<vmem>>, vector<16x1024xf32>,
    return
  }
  func.func @transform_0(%arg0: i32) -> (i32, i32) {
    %c0_i32 = arith.constant 0 : i32
    %c0_i32_0 = arith.constant 0 : i32
    return %arg0, %c0_i32 : i32, i32
  }
  func.func @transform_1(%arg0: i32) -> (i32, i32) {
    %c0_i32 = arith.constant 0 : i32
    %c0_i32_0 = arith.constant 0 : i32
    %c0_i32_1 = arith.constant 0 : i32
    return %c0_i32, %c0_i32_0 : i32, i32
  }
  func.func @transform_2(%arg0: i32) -> (i32, i32) {
    %c0_i32 = arith.constant 0 : i32
    %c0_i32_0 = arith.constant 0 : i32
    %c0_i32_1 = arith.constant 0 : i32
    return %c0_i32, %c0_i32_0 : i32, i32
  }
  func.func @transform_3(%arg0: i32) -> (i32, i32) {
    %c0_i32 = arith.constant 0 : i32
    %c0_i32_0 = arith.constant 0 : i32
    %c0_i32_1 = arith.constant 0 : i32
    return %c0_i32, %c0_i32_0 : i32, i32
  }
  func.func @transform_4(%arg0: i32) -> (i32, i32) {
    %c0_i32 = arith.constant 0 : i32
    %c0_i32_0 = arith.constant 0 : i32
    %c0_i32_1 = arith.constant 0 : i32
    return %c0_i32, %c0_i32_0 : i32, i32
  }
  func.func @transform_5(%arg0: i32) -> (i32, i32) {
    %c0_i32 = arith.constant 0 : i32
    %c0_i32_0 = arith.constant 0 : i32
    %c0_i32_1 = arith.constant 0 : i32
    return %c0_i32, %c0_i32_0 : i32, i32
  }
  func.func @transform_6(%arg0: i32) -> (i32, i32) {
    %c0_i32 = arith.constant 0 : i32
    %c0_i32_0 = arith.constant 0 : i32
    %c0_i32_1 = arith.constant 0 : i32
    return %c0_i32, %c0_i32_0 : i32, i32
  }
  func.func @transform_7(%arg0: i32) -> (i32, i32) {
    %c0_i32 = arith.constant 0 : i32
    %c0_i32_0 = arith.constant 0 : i32
    return %arg0, %c0_i32 : i32, i32
  }
}

</mosaic_0001>

<bundles_post_ra>
// kernel: dycs_stack_forward.1
= control target key start
LH: loop header
LB: loop body
LE: loop exit
PB: predicated region body
PF: predicated region fallthrough
CT: control target
= control target key end

     0   :  { %12 = vsyncpa [#allocation3], 0  ;;  %s13911_s0 = inlined_call_operand.vmem [shape: f32[16,1024], index: 0, kind: input, shape index: {}]   ;;  %s13912_s1 = inlined_call_operand.hbm [shape: bf16[1024,1024], index: 1, kind: input, shape index: {}]   ;;  %s13913_s2 = inlined_call_operand.hbm [shape: f32[1,1024], index: 2, kind: input, shape index: {}]   ;;  %s13914_s3 = inlined_call_operand.hbm [shape: bf16[1024,1024], index: 3, kind: input, shape index: {}]   ;;  %s13915_s4 = inlined_call_operand.hbm [shape: f32[1,1024], index: 4, kind: input, shape index: {}]   ;;  %s13916_s5 = inlined_call_operand.hbm [shape: bf16[1024,1024], index: 5, kind: input, shape index: {}]   ;;  %s13917_s6 = inlined_call_operand.hbm [shape: f32[1,1024], index: 6, kind: input, shape index: {}]   ;;  %s13918_s7 = inlined_call_operand.vmem [shape: f32[16,1024], index: 7, kind: output, shape index: {}]  }
   0x1   :  { %13 = vsyncpa [#allocation5], 0 }
   0x2   :  { %14 = vsyncpa [#allocation8], 0 }
   0x3   :  { %15 = vsyncpa [#allocation11], 0  ;;  %s13466_s24 = smov [#allocation4]   ;;  %s13467_s26 = smov [#allocation7]  }
   0x4   :  { %s36_s25 = sshll.u32 %s13466_s24, 4  ;;  %s58_s27 = sshll.u32 %s13467_s26, 4  ;;  %s37_s25 = int_to_ptr.vmem [resolvable:$true] %s36_s25  ;;  %s59_s27 = int_to_ptr.vmem [resolvable:$true] %s58_s27 }
   0x5   :  { %s13326_s30 = scalar_lea.hbm %s13913_s2, 128 }
   0x6   :  { %p13327_p0 = scmp.ne.s32.totalorder %s13913_s2, %s13326_s30  ;;  %p13330_p1 = scmp.lt.u32.totalorder %s13326_s30, %s13913_s2 }
   0x8   :  { %p13332_p2 = pnand %p13330_p1, %p13327_p0 }
   0xa   :  { %13335 = shalt.err (!%p13332_p2)
}
   0xb   :  { %s13336_s12 = scalar_lea.vmem %s37_s25, 128  ;;  %p13341_p4 = scmp.lt.s32.totalorder %s37_s25, %s37_s25 }
   0xc   :  { %p13337_p3 = scmp.ne.s32.totalorder %s37_s25, %s13336_s12  ;;  %p13342_p5 = scmp.lt.s32.totalorder %s13336_s12, %s13336_s12 }
   0xe   :  { %p13343_p6 = por %p13342_p5, %p13341_p4 }
  0x10   :  { %p13344_p7 = pnand %p13343_p6, %p13337_p3 }
  0x12   :  { %13347 = shalt.err (!%p13344_p7)
}
  0x13   :  { %39 = dma.hbm_to_vmem [thread:$0]  %s13913_s2, 128, %s37_s25, [#allocation5]  }
  0x14   :  { %s13348_s17 = scalar_lea.hbm %s13915_s4, 128 }
  0x15   :  { %p13349_p8 = scmp.ne.s32.totalorder %s13915_s4, %s13348_s17  ;;  %p13352_p9 = scmp.lt.u32.totalorder %s13348_s17, %s13915_s4 }
  0x17   :  { %p13354_p10 = pnand %p13352_p9, %p13349_p8 }
  0x19   :  { %13357 = shalt.err (!%p13354_p10)
}
  0x1a   :  { %s13358_s22 = scalar_lea.vmem %s59_s27, 128  ;;  %p13363_p12 = scmp.lt.s32.totalorder %s59_s27, %s59_s27 }
  0x1b   :  { %p13359_p11 = scmp.ne.s32.totalorder %s59_s27, %s13358_s22  ;;  %p13364_p13 = scmp.lt.s32.totalorder %s13358_s22, %s13358_s22 }
  0x1d   :  { %p13365_p0 = por %p13364_p13, %p13363_p12 }
  0x1f   :  { %p13366_p1 = pnand %p13365_p0, %p13359_p11 }
  0x21   :  { %13369 = shalt.err (!%p13366_p1)
}
  0x22   :  { %61 = dma.hbm_to_vmem [thread:$0]  %s13915_s4, 128, %s59_s27, [#allocation8]  }
  0x23   :  { %s13468_s24 = smov [#allocation2]   ;;  %s13370_s29 = scalar_lea.hbm %s13912_s1, 65536 }
  0x24   :  { %s23_s25 = sshll.u32 %s13468_s24, 4  ;;  %p13371_p2 = scmp.ne.s32.totalorder %s13912_s1, %s13370_s29  ;;  %s24_s25 = int_to_ptr.vmem [resolvable:$true] %s23_s25 }
  0x25   :  { %p13374_p3 = scmp.lt.u32.totalorder %s13370_s29, %s13912_s1 }
  0x27   :  { %p13376_p4 = pnand %p13374_p3, %p13371_p2 }
  0x29   :  { %13379 = shalt.err (!%p13376_p4)
}
  0x2a   :  { %s13380_s11 = scalar_lea.vmem %s24_s25, 65536  ;;  %p13385_p6 = scmp.lt.s32.totalorder %s24_s25, %s24_s25 }
  0x2b   :  { %p13381_p5 = scmp.ne.s32.totalorder %s24_s25, %s13380_s11  ;;  %p13386_p7 = scmp.lt.s32.totalorder %s13380_s11, %s13380_s11 }
  0x2d   :  { %p13387_p8 = por %p13386_p7, %p13385_p6 }
  0x2f   :  { %p13388_p9 = pnand %p13387_p8, %p13381_p5 }
  0x31   :  { %13391 = shalt.err (!%p13388_p9)
}
  0x32   :  { %s13469_s4 = smov 512   ;;  %s13470_s27 = smov 32  }
  0x33   :  { %29 = dma.hbm_to_vmem [thread:$0]  %s13912_s1, 65536, %s24_s25, [#allocation3], %s13469_s4, %s13469_s4, %s13470_s27  }
  0x34   :  { %s13471_s14 = smov [#allocation6]   ;;  %s13472_s16 = smov [#allocation9]  }
  0x35   :  { %s45_s15 = sshll.u32 %s13471_s14, 4  ;;  %s67_s17 = sshll.u32 %s13472_s16, 4  ;;  %s46_s15 = int_to_ptr.vmem [resolvable:$true] %s45_s15  ;;  %s68_s17 = int_to_ptr.vmem [resolvable:$true] %s67_s17 }
  0x36   :  { %s13392_s20 = scalar_lea.hbm %s13914_s3, 65536 }
  0x37   :  { %p13393_p10 = scmp.ne.s32.totalorder %s13914_s3, %s13392_s20  ;;  %p13396_p11 = scmp.lt.u32.totalorder %s13392_s20, %s13914_s3 }
  0x39   :  { %p13398_p12 = pnand %p13396_p11, %p13393_p10 }
  0x3b   :  { %13401 = shalt.err (!%p13398_p12)
}
  0x3c   :  { %s13402_s1 = scalar_lea.vmem %s46_s15, 65536  ;;  %p13407_p0 = scmp.lt.s32.totalorder %s46_s15, %s46_s15 }
  0x3d   :  { %p13403_p13 = scmp.ne.s32.totalorder %s46_s15, %s13402_s1  ;;  %p13408_p1 = scmp.lt.s32.totalorder %s13402_s1, %s13402_s1 }
  0x3f   :  { %p13409_p2 = por %p13408_p1, %p13407_p0 }
  0x41   :  { %p13410_p3 = pnand %p13409_p2, %p13403_p13 }
  0x43   :  { %13413 = shalt.err (!%p13410_p3)
}
  0x44   :  { %51 = dma.hbm_to_vmem [thread:$0]  %s13914_s3, 65536, %s46_s15, [#allocation5], %s13469_s4, %s13469_s4, %s13470_s27  }
  0x45   :  { %s13414_s29 = scalar_lea.hbm %s13916_s5, 65536 }
  0x46   :  { %p13415_p4 = scmp.ne.s32.totalorder %s13916_s5, %s13414_s29  ;;  %p13418_p5 = scmp.lt.u32.totalorder %s13414_s29, %s13916_s5 }
  0x48   :  { %p13420_p6 = pnand %p13418_p5, %p13415_p4 }
  0x4a   :  { %13423 = shalt.err (!%p13420_p6)
}
  0x4b   :  { %s13424_s11 = scalar_lea.vmem %s68_s17, 65536  ;;  %p13429_p8 = scmp.lt.s32.totalorder %s68_s17, %s68_s17 }
  0x4c   :  { %p13425_p7 = scmp.ne.s32.totalorder %s68_s17, %s13424_s11  ;;  %p13430_p9 = scmp.lt.s32.totalorder %s13424_s11, %s13424_s11 }
  0x4e   :  { %p13431_p10 = por %p13430_p9, %p13429_p8 }
  0x50   :  { %p13432_p11 = pnand %p13431_p10, %p13425_p7 }
  0x52   :  { %13435 = shalt.err (!%p13432_p11)
}
  0x53   :  { %73 = dma.hbm_to_vmem [thread:$0]  %s13916_s5, 65536, %s68_s17, [#allocation8], %s13469_s4, %s13469_s4, %s13470_s27  }
  0x54   :  { %s13473_s13 = smov [#allocation10]   ;;  %s13436_s18 = scalar_lea.hbm %s13917_s6, 128 }
  0x55   :  { %s80_s14 = sshll.u32 %s13473_s13, 4  ;;  %p13437_p12 = scmp.ne.s32.totalorder %s13917_s6, %s13436_s18  ;;  %s81_s14 = int_to_ptr.vmem [resolvable:$true] %s80_s14 }
  0x56   :  { %p13440_p13 = scmp.lt.u32.totalorder %s13436_s18, %s13917_s6 }
  0x58   :  { %p13442_p0 = pnand %p13440_p13, %p13437_p12 }
  0x5a   :  { %13445 = shalt.err (!%p13442_p0)
}
  0x5b   :  { %s13446_s2 = scalar_lea.vmem %s81_s14, 128  ;;  %p13451_p2 = scmp.lt.s32.totalorder %s81_s14, %s81_s14 }
  0x5c   :  { %p13447_p1 = scmp.ne.s32.totalorder %s81_s14, %s13446_s2  ;;  %p13452_p3 = scmp.lt.s32.totalorder %s13446_s2, %s13446_s2 }
  0x5e   :  { %p13453_p4 = por %p13452_p3, %p13451_p2 }
  0x60   :  { %p13454_p5 = pnand %p13453_p4, %p13447_p1 }
  0x62   :  { %13457 = shalt.err (!%p13454_p5)
}
  0x63   :  { %83 = dma.hbm_to_vmem [thread:$0]  %s13917_s6, 128, %s81_s14, [#allocation11]  }
  0x64   :  { %13458 = dma.done.wait [#allocation3], 65536  }
  0x65   :  { %13459 = vsyncadd [#allocation3], 4294901760 }
  0x66   :  { %13460 = dma.done.wait [#allocation5], 65664  }
  0x67   :  { %13461 = vsyncadd [#allocation5], 4294901632 }
  0x68   :  { %13462 = dma.done.wait [#allocation8], 65664  }
  0x69   :  { %13463 = vsyncadd [#allocation8], 4294901632 }
  0x6a   :  { %13464 = dma.done.wait [#allocation11], 128  }
  0x6b   :  { %13465 = vsyncadd [#allocation11], 4294967168  ;;  %v126_v0 = vld [vmem:[#allocation2] sm:$0xff]  ;;  %v127_v2 = vld [vmem:[#allocation2 + $0x8] sm:$0xff] }
  0x6c   :  { %v130_v1 = vld [vmem:[#allocation2 + $0x20] sm:$0xff]  ;;  %v131_v4 = vld [vmem:[#allocation2 + $0x28] sm:$0xff] }
  0x6d   :  { %v11589_v3 = vcombine.high %v126_v0, %v130_v1  ;;  %v11588_v5 = vcombine.low %v126_v0, %v130_v1  ;;  %v134_v6 = vld [vmem:[#allocation2 + $0x40] sm:$0xff]  ;;  %v11591_v8 = vcombine.high %v127_v2, %v131_v4  ;;  %v11590_v9 = vcombine.low %v127_v2, %v131_v4  ;;  %v135_v11 = vld [vmem:[#allocation2 + $0x48] sm:$0xff] }
  0x6e   :  { %v138_v7 = vld [vmem:[#allocation2 + $0x60] sm:$0xff]  ;;  %v139_v12 = vld [vmem:[#allocation2 + $0x68] sm:$0xff] }
  0x6f   :  { %v11597_v10 = vcombine.high %v134_v6, %v138_v7  ;;  %v142_v13 = vld [vmem:[#allocation2 + $0x80] sm:$0xff]  ;;  %3240 = vmatprep.subr.bf16.mxu0 %v11589_v3  ;;  %v11599_v14 = vcombine.high %v135_v11, %v139_v12  ;;  %v143_v16 = vld [vmem:[#allocation2 + $0x88] sm:$0xff]  ;;  %3412 = vmatprep.subr.bf16.mxu1 %v11591_v8  ;;  %v11596_v18 = vcombine.low %v134_v6, %v138_v7 }
  0x70   :  { %v146_v15 = vld [vmem:[#allocation2 + $0xa0] sm:$0xff]  ;;  %v147_v17 = vld [vmem:[#allocation2 + $0xa8] sm:$0xff]  ;;  %3241 = vmatpush1.bf16.msra.mxu0 %v11588_v5  ;;  %3413 = vmatpush1.bf16.msra.mxu1 %v11590_v9  ;;  %v11598_v19 = vcombine.low %v135_v11, %v139_v12 }
  0x71   :  { %3242 = vmatprep.subr.bf16.mxu0 %v11597_v10  ;;  %v11605_v20 = vcombine.high %v142_v13, %v146_v15  ;;  %3414 = vmatprep.subr.bf16.mxu1 %v11599_v14  ;;  %v11607_v21 = vcombine.high %v143_v16, %v147_v17  ;;  %v150_v22 = vld [vmem:[#allocation2 + $0xc0] sm:$0xff]  ;;  %v151_v24 = vld [vmem:[#allocation2 + $0xc8] sm:$0xff]  ;;  %v11604_v26 = vcombine.low %v142_v13, %v146_v15 }
  0x72   :  { %v154_v23 = vld [vmem:[#allocation2 + $0xe0] sm:$0xff]  ;;  %v155_v25 = vld [vmem:[#allocation2 + $0xe8] sm:$0xff]  ;;  %v11606_v27 = vcombine.low %v143_v16, %v147_v17 }
  0x73   :  { %v11613_v28 = vcombine.high %v150_v22, %v154_v23  ;;  %v11615_v29 = vcombine.high %v151_v24, %v155_v25  ;;  %v158_v30 = vld [vmem:[#allocation2 + $0x100] sm:$0xff]  ;;  %v159_v32 = vld [vmem:[#allocation2 + $0x108] sm:$0xff]  ;;  %v11612_v34 = vcombine.low %v150_v22, %v154_v23  ;;  %v11614_v35 = vcombine.low %v151_v24, %v155_v25 }
  0x74   :  { %3243 = vmatpush1.bf16.msra.mxu0 %v11596_v18  ;;  %3415 = vmatpush1.bf16.msra.mxu1 %v11598_v19  ;;  %v162_v31 = vld [vmem:[#allocation2 + $0x120] sm:$0xff]  ;;  %v163_v33 = vld [vmem:[#allocation2 + $0x128] sm:$0xff] }
  0x75   :  { %3244 = vmatprep.subr.bf16.mxu0 %v11605_v20  ;;  %3416 = vmatprep.subr.bf16.mxu1 %v11607_v21  ;;  %v11621_v36 = vcombine.high %v158_v30, %v162_v31  ;;  %v11623_v37 = vcombine.high %v159_v32, %v163_v33  ;;  %v166_v38 = vld [vmem:[#allocation2 + $0x140] sm:$0xff]  ;;  %v167_v40 = vld [vmem:[#allocation2 + $0x148] sm:$0xff]  ;;  %v11620_v42 = vcombine.low %v158_v30, %v162_v31 }
  0x76   :  { %v170_v39 = vld [vmem:[#allocation2 + $0x160] sm:$0xff]  ;;  %v171_v41 = vld [vmem:[#allocation2 + $0x168] sm:$0xff]  ;;  %v11622_v43 = vcombine.low %v159_v32, %v163_v33 }
  0x77   :  { %v11629_v44 = vcombine.high %v166_v38, %v170_v39  ;;  %v11631_v45 = vcombine.high %v167_v40, %v171_v41  ;;  %v174_v46 = vld [vmem:[#allocation2 + $0x180] sm:$0xff]  ;;  %v175_v48 = vld [vmem:[#allocation2 + $0x188] sm:$0xff]  ;;  %v11628_v50 = vcombine.low %v166_v38, %v170_v39  ;;  %v11630_v51 = vcombine.low %v167_v40, %v171_v41 }
  0x78   :  { %3245 = vmatpush1.bf16.msra.mxu0 %v11604_v26  ;;  %3417 = vmatpush1.bf16.msra.mxu1 %v11606_v27  ;;  %v178_v47 = vld [vmem:[#allocation2 + $0x1a0] sm:$0xff]  ;;  %v179_v49 = vld [vmem:[#allocation2 + $0x1a8] sm:$0xff] }
  0x79   :  { %3246 = vmatprep.subr.bf16.mxu0 %v11613_v28  ;;  %3418 = vmatprep.subr.bf16.mxu1 %v11615_v29  ;;  %v11637_v52 = vcombine.high %v174_v46, %v178_v47  ;;  %v103_v53 = vld [vmem:[%s13911_s0 + $0x8] sm:$0xff]  ;;  %v11639_v55 = vcombine.high %v175_v48, %v179_v49  ;;  %v182_v56 = vld [vmem:[#allocation2 + $0x1c0] sm:$0xff]  ;;  %v11636_v61 = vcombine.low %v174_v46, %v178_v47 }
  0x7a   :  { %v111_v54 = vld [vmem:[%s13911_s0 + $0x48] sm:$0xff]  ;;  %v186_v57 = vld [vmem:[#allocation2 + $0x1e0] sm:$0xff]  ;;  %v11638_v62 = vcombine.low %v175_v48, %v179_v49 }
  0x7b   :  { %v13601_v58 = vpack.c.bf16 %v111_v54, %v103_v53  ;;  %v183_v59 = vld [vmem:[#allocation2 + $0x1c8] sm:$0xff]  ;;  %v11645_v63 = vcombine.high %v182_v56, %v186_v57  ;;  %v190_v1 = vld [vmem:[#allocation2 + $0x200] sm:$0xff]  ;;  %v11644_v5 = vcombine.low %v182_v56, %v186_v57 }
  0x7c   :  { %3247 = vmatpush1.bf16.msra.mxu0 %v11612_v34  ;;  %3419 = vmatpush1.bf16.msra.mxu1 %v11614_v35  ;;  %v187_v60 = vld [vmem:[#allocation2 + $0x1e8] sm:$0xff]  ;;  %v194_v2 = vld [vmem:[#allocation2 + $0x220] sm:$0xff] }
  0x7d   :  { %3248 = vmatprep.subr.bf16.mxu0 %v11621_v36  ;;  %3420 = vmatprep.subr.bf16.mxu1 %v11623_v37  ;;  %v11647_v0 = vcombine.high %v183_v59, %v187_v60  ;;  %v191_v3 = vld [vmem:[#allocation2 + $0x208] sm:$0xff]  ;;  %v11646_v6 = vcombine.low %v183_v59, %v187_v60  ;;  %v11653_v7 = vcombine.high %v190_v1, %v194_v2  ;;  %v198_v9 = vld [vmem:[#allocation2 + $0x240] sm:$0xff] }
  0x7e   :  { %3272 = vmatprep.mubr.bf16.mxu0 %v13601_v58  ;;  %3444 = vmatprep.mubr.bf16.mxu1 %v13601_v58  ;;  %v195_v4 = vld [vmem:[#allocation2 + $0x228] sm:$0xff]  ;;  %v202_v10 = vld [vmem:[#allocation2 + $0x260] sm:$0xff]  ;;  %v11652_v13 = vcombine.low %v190_v1, %v194_v2 }
  0x7f   :  { %v11655_v8 = vcombine.high %v191_v3, %v195_v4  ;;  %v199_v11 = vld [vmem:[#allocation2 + $0x248] sm:$0xff]  ;;  %v11654_v14 = vcombine.low %v191_v3, %v195_v4  ;;  %v11661_v15 = vcombine.high %v198_v9, %v202_v10  ;;  %v206_v17 = vld [vmem:[#allocation2 + $0x280] sm:$0xff]  ;;  %v11660_v21 = vcombine.low %v198_v9, %v202_v10 }
  0x80   :  { %3249 = vmatpush1.bf16.msra.mxu0 %v11620_v42  ;;  %3421 = vmatpush1.bf16.msra.mxu1 %v11622_v43  ;;  %v203_v12 = vld [vmem:[#allocation2 + $0x268] sm:$0xff]  ;;  %v210_v18 = vld [vmem:[#allocation2 + $0x2a0] sm:$0xff] }
  0x81   :  { %3250 = vmatprep.subr.bf16.mxu0 %v11629_v44  ;;  %3422 = vmatprep.subr.bf16.mxu1 %v11631_v45  ;;  %v11663_v16 = vcombine.high %v199_v11, %v203_v12  ;;  %v207_v19 = vld [vmem:[#allocation2 + $0x288] sm:$0xff]  ;;  %v11662_v22 = vcombine.low %v199_v11, %v203_v12  ;;  %v11669_v23 = vcombine.high %v206_v17, %v210_v18  ;;  %v214_v25 = vld [vmem:[#allocation2 + $0x2c0] sm:$0xff] }
  0x82   :  { %v211_v20 = vld [vmem:[#allocation2 + $0x2a8] sm:$0xff]  ;;  %v218_v26 = vld [vmem:[#allocation2 + $0x2e0] sm:$0xff]  ;;  %v11668_v29 = vcombine.low %v206_v17, %v210_v18  ;;  %v105_v17 = vld [vmem:[%s13911_s0 + $0x18] sm:$0xff] }
  0x83   :  { %v11671_v24 = vcombine.high %v207_v19, %v211_v20  ;;  %v215_v27 = vld [vmem:[#allocation2 + $0x2c8] sm:$0xff]  ;;  %v11670_v30 = vcombine.low %v207_v19, %v211_v20  ;;  %v11677_v31 = vcombine.high %v214_v25, %v218_v26  ;;  %v222_v33 = vld [vmem:[#allocation2 + $0x300] sm:$0xff]  ;;  %v11676_v37 = vcombine.low %v214_v25, %v218_v26  ;;  %v113_v18 = vld [vmem:[%s13911_s0 + $0x58] sm:$0xff] }
  0x84   :  { %3251 = vmatpush1.bf16.msra.mxu0 %v11628_v50  ;;  %3423 = vmatpush1.bf16.msra.mxu1 %v11630_v51  ;;  %v219_v28 = vld [vmem:[#allocation2 + $0x2e8] sm:$0xff]  ;;  %v226_v34 = vld [vmem:[#allocation2 + $0x320] sm:$0xff]  ;;  %v13619_v25 = vpack.c.bf16 %v113_v18, %v105_v17 }
  0x85   :  { %3252 = vmatprep.subr.bf16.mxu0 %v11637_v52  ;;  %3424 = vmatprep.subr.bf16.mxu1 %v11639_v55  ;;  %v11679_v32 = vcombine.high %v215_v27, %v219_v28  ;;  %v223_v35 = vld [vmem:[#allocation2 + $0x308] sm:$0xff]  ;;  %v11678_v38 = vcombine.low %v215_v27, %v219_v28  ;;  %v11685_v39 = vcombine.high %v222_v33, %v226_v34  ;;  %v230_v41 = vld [vmem:[#allocation2 + $0x340] sm:$0xff] }
  0x86   :  { %v227_v36 = vld [vmem:[#allocation2 + $0x328] sm:$0xff]  ;;  %v234_v42 = vld [vmem:[#allocation2 + $0x360] sm:$0xff]  ;;  %v11684_v45 = vcombine.low %v222_v33, %v226_v34 }
  0x87   :  { %v11687_v40 = vcombine.high %v223_v35, %v227_v36  ;;  %v231_v43 = vld [vmem:[#allocation2 + $0x348] sm:$0xff]  ;;  %v11686_v46 = vcombine.low %v223_v35, %v227_v36  ;;  %v11693_v47 = vcombine.high %v230_v41, %v234_v42  ;;  %v238_v49 = vld [vmem:[#allocation2 + $0x380] sm:$0xff]  ;;  %v11692_v53 = vcombine.low %v230_v41, %v234_v42 }
  0x88   :  { %3253 = vmatpush1.bf16.msra.mxu0 %v11636_v61  ;;  %3425 = vmatpush1.bf16.msra.mxu1 %v11638_v62  ;;  %v235_v44 = vld [vmem:[#allocation2 + $0x368] sm:$0xff]  ;;  %v242_v50 = vld [vmem:[#allocation2 + $0x3a0] sm:$0xff] }
  0x89   :  { %3254 = vmatprep.subr.bf16.mxu0 %v11645_v63  ;;  %3426 = vmatprep.subr.bf16.mxu1 %v11647_v0  ;;  %v11695_v48 = vcombine.high %v231_v43, %v235_v44  ;;  %v239_v51 = vld [vmem:[#allocation2 + $0x388] sm:$0xff]  ;;  %v11694_v54 = vcombine.low %v231_v43, %v235_v44  ;;  %v11701_v55 = vcombine.high %v238_v49, %v242_v50  ;;  %v246_v57 = vld [vmem:[#allocation2 + $0x3c0] sm:$0xff] }
  0x8a   :  { %v243_v52 = vld [vmem:[#allocation2 + $0x3a8] sm:$0xff]  ;;  %v250_v59 = vld [vmem:[#allocation2 + $0x3e0] sm:$0xff]  ;;  %v11700_v62 = vcombine.low %v238_v49, %v242_v50 }
  0x8b   :  { %v11703_v56 = vcombine.high %v239_v51, %v243_v52  ;;  %v247_v60 = vld [vmem:[#allocation2 + $0x3c8] sm:$0xff]  ;;  %v11702_v63 = vcombine.low %v239_v51, %v243_v52  ;;  %v11709_v0 = vcombine.high %v246_v57, %v250_v59  ;;  %v254_v2 = vld [vmem:[#allocation2 + $0x400] sm:$0xff] }
  0x8c   :  { %3255 = vmatpush1.bf16.msra.mxu0 %v11644_v5  ;;  %3427 = vmatpush1.bf16.msra.mxu1 %v11646_v6  ;;  %v251_v61 = vld [vmem:[#allocation2 + $0x3e8] sm:$0xff]  ;;  %v258_v3 = vld [vmem:[#allocation2 + $0x420] sm:$0xff]  ;;  %v11708_v6 = vcombine.low %v246_v57, %v250_v59 }
  0x8d   :  { %3256 = vmatprep.subr.bf16.mxu0 %v11653_v7  ;;  %3428 = vmatprep.subr.bf16.mxu1 %v11655_v8  ;;  %v11711_v1 = vcombine.high %v247_v60, %v251_v61  ;;  %v255_v4 = vld [vmem:[#allocation2 + $0x408] sm:$0xff]  ;;  %v102_v7 = vld [vmem:[%s13911_s0] sm:$0xff]  ;;  %v11710_v9 = vcombine.low %v247_v60, %v251_v61  ;;  %v11717_v10 = vcombine.high %v254_v2, %v258_v3 }
  0x8e   :  { %v259_v5 = vld [vmem:[#allocation2 + $0x428] sm:$0xff]  ;;  %v110_v8 = vld [vmem:[%s13911_s0 + $0x40] sm:$0xff]  ;;  %v11716_v19 = vcombine.low %v254_v2, %v258_v3 }
  0x8f   :  { %v11719_v11 = vcombine.high %v255_v4, %v259_v5  ;;  %v262_v12 = vld [vmem:[#allocation2 + $0x440] sm:$0xff]  ;;  %v11718_v20 = vcombine.low %v255_v4, %v259_v5  ;;  %v271_v26 = vld [vmem:[#allocation2 + $0x488] sm:$0xff] }
  0x90   :  { %3257 = vmatpush1.bf16.msra.mxu0 %v11652_v13  ;;  %3429 = vmatpush1.bf16.msra.mxu1 %v11654_v14  ;;  %v266_v13 = vld [vmem:[#allocation2 + $0x460] sm:$0xff]  ;;  %v263_v14 = vld [vmem:[#allocation2 + $0x448] sm:$0xff] }
  0x91   :  { %3258 = vmatprep.subr.bf16.mxu0 %v11661_v15  ;;  %3430 = vmatprep.subr.bf16.mxu1 %v11663_v16  ;;  %v13611_v15 = vpack.c.bf16 %v110_v8, %v102_v7  ;;  %v267_v16 = vld [vmem:[#allocation2 + $0x468] sm:$0xff]  ;;  %v11724_v28 = vcombine.low %v262_v12, %v266_v13  ;;  %v282_v33 = vld [vmem:[#allocation2 + $0x4e0] sm:$0xff] }
  0x92   :  { %v275_v27 = vld [vmem:[#allocation2 + $0x4a8] sm:$0xff]  ;;  %v290_v41 = vld [vmem:[#allocation2 + $0x520] sm:$0xff] }
  0x93   :  { %v279_v34 = vld [vmem:[#allocation2 + $0x4c8] sm:$0xff]  ;;  %v298_v49 = vld [vmem:[#allocation2 + $0x560] sm:$0xff] }
  0x94   :  { %3259 = vmatpush1.bf16.msra.mxu0 %v11660_v21  ;;  %3431 = vmatpush1.bf16.msra.mxu1 %v11662_v22  ;;  %v11725_v21 = vcombine.high %v262_v12, %v266_v13  ;;  %v11727_v22 = vcombine.high %v263_v14, %v267_v16  ;;  %v283_v35 = vld [vmem:[#allocation2 + $0x4e8] sm:$0xff]  ;;  %v306_v57 = vld [vmem:[#allocation2 + $0x5a0] sm:$0xff] }
  0x95   :  { %3260 = vmatprep.subr.bf16.mxu0 %v11669_v23  ;;  %3432 = vmatprep.subr.bf16.mxu1 %v11671_v24  ;;  %v270_v23 = vld [vmem:[#allocation2 + $0x480] sm:$0xff]  ;;  %v287_v42 = vld [vmem:[#allocation2 + $0x508] sm:$0xff] }
  0x96   :  { %v274_v24 = vld [vmem:[#allocation2 + $0x4a0] sm:$0xff]  ;;  %v291_v43 = vld [vmem:[#allocation2 + $0x528] sm:$0xff] }
  0x97   :  { %v11732_v36 = vcombine.low %v270_v23, %v274_v24  ;;  %v295_v50 = vld [vmem:[#allocation2 + $0x548] sm:$0xff]  ;;  %v314_v2 = vld [vmem:[#allocation2 + $0x5e0] sm:$0xff] }
  0x98   :  { %3261 = vmatpush1.bf16.msra.mxu0 %v11668_v29  ;;  %3433 = vmatpush1.bf16.msra.mxu1 %v11670_v30  ;;  %v11726_v29 = vcombine.low %v263_v14, %v267_v16  ;;  %v11733_v30 = vcombine.high %v270_v23, %v274_v24  ;;  %v299_v51 = vld [vmem:[#allocation2 + $0x568] sm:$0xff]  ;;  %v326_v18 = vld [vmem:[#allocation2 + $0x640] sm:$0xff] }
  0x99   :  { %3262 = vmatprep.subr.bf16.mxu0 %v11677_v31  ;;  %3434 = vmatprep.subr.bf16.mxu1 %v11679_v32  ;;  %v11735_v31 = vcombine.high %v271_v26, %v275_v27  ;;  %v278_v32 = vld [vmem:[#allocation2 + $0x4c0] sm:$0xff]  ;;  %v303_v59 = vld [vmem:[#allocation2 + $0x588] sm:$0xff] }
  0x9a   :  { %v11740_v44 = vcombine.low %v278_v32, %v282_v33  ;;  %v307_v60 = vld [vmem:[#allocation2 + $0x5a8] sm:$0xff] }
  0x9b   :  { %v311_v3 = vld [vmem:[#allocation2 + $0x5c8] sm:$0xff] }
  0x9c   :  { %3263 = vmatpush1.bf16.msra.mxu0 %v11676_v37  ;;  %3435 = vmatpush1.bf16.msra.mxu1 %v11678_v38  ;;  %v11734_v37 = vcombine.low %v271_v26, %v275_v27  ;;  %v11741_v38 = vcombine.high %v278_v32, %v282_v33  ;;  %v315_v4 = vld [vmem:[#allocation2 + $0x5e8] sm:$0xff]  ;;  %v334_v27 = vld [vmem:[#allocation2 + $0x680] sm:$0xff] }
  0x9d   :  { %3264 = vmatprep.subr.bf16.mxu0 %v11685_v39  ;;  %3436 = vmatprep.subr.bf16.mxu1 %v11687_v40  ;;  %v11743_v39 = vcombine.high %v279_v34, %v283_v35  ;;  %v286_v40 = vld [vmem:[#allocation2 + $0x500] sm:$0xff]  ;;  %v11775_v8 = vcombine.high %v311_v3, %v315_v4  ;;  %v323_v12 = vld [vmem:[#allocation2 + $0x628] sm:$0xff]  ;;  %v11774_v14 = vcombine.low %v311_v3, %v315_v4 }
  0x9e   :  { %v11748_v52 = vcombine.low %v286_v40, %v290_v41  ;;  %v374_v4 = vld [vmem:[#allocation2 + $0x7c0] sm:$0xff] }
  0xa0   :  { %3265 = vmatpush1.bf16.msra.mxu0 %v11684_v45  ;;  %3437 = vmatpush1.bf16.msra.mxu1 %v11686_v46  ;;  %v11742_v45 = vcombine.low %v279_v34, %v283_v35  ;;  %v11749_v46 = vcombine.high %v286_v40, %v290_v41  ;;  %v342_v35 = vld [vmem:[#allocation2 + $0x6c0] sm:$0xff] }
  0xa1   :  { %3266 = vmatprep.subr.bf16.mxu0 %v11693_v47  ;;  %3438 = vmatprep.subr.bf16.mxu1 %v11695_v48  ;;  %v11751_v47 = vcombine.high %v287_v42, %v291_v43  ;;  %v294_v48 = vld [vmem:[#allocation2 + $0x540] sm:$0xff] }
  0xa2   :  { %v11756_v61 = vcombine.low %v294_v48, %v298_v49 }
  0xa4   :  { %3267 = vmatpush1.bf16.msra.mxu0 %v11692_v53  ;;  %3439 = vmatpush1.bf16.msra.mxu1 %v11694_v54  ;;  %v11750_v53 = vcombine.low %v287_v42, %v291_v43  ;;  %v11757_v54 = vcombine.high %v294_v48, %v298_v49  ;;  %v350_v43 = vld [vmem:[#allocation2 + $0x700] sm:$0xff] }
  0xa5   :  { %3268 = vmatprep.subr.bf16.mxu0 %v11701_v55  ;;  %3440 = vmatprep.subr.bf16.mxu1 %v11703_v56  ;;  %v11759_v55 = vcombine.high %v295_v50, %v299_v51  ;;  %v302_v56 = vld [vmem:[#allocation2 + $0x580] sm:$0xff] }
  0xa6   :  { %v11764_v5 = vcombine.low %v302_v56, %v306_v57 }
  0xa8   :  { %3269 = vmatpush1.bf16.msra.mxu0 %v11700_v62  ;;  %3441 = vmatpush1.bf16.msra.mxu1 %v11702_v63  ;;  %v11758_v62 = vcombine.low %v295_v50, %v299_v51  ;;  %v11765_v63 = vcombine.high %v302_v56, %v306_v57  ;;  %v358_v51 = vld [vmem:[#allocation2 + $0x740] sm:$0xff] }
  0xa9   :  { %3270 = vmatprep.subr.bf16.mxu0 %v11709_v0  ;;  %3442 = vmatprep.subr.bf16.mxu1 %v11711_v1  ;;  %v11767_v0 = vcombine.high %v303_v59, %v307_v60  ;;  %v310_v1 = vld [vmem:[#allocation2 + $0x5c0] sm:$0xff] }
  0xaa   :  { %v11773_v7 = vcombine.high %v310_v1, %v314_v2  ;;  %v11772_v13 = vcombine.low %v310_v1, %v314_v2 }
  0xac   :  { %3271 = vmatpush1.bf16.msra.mxu0 %v11708_v6  ;;  %3443 = vmatpush1.bf16.msra.mxu1 %v11710_v9  ;;  %v11766_v6 = vcombine.low %v303_v59, %v307_v60  ;;  %v318_v9 = vld [vmem:[#allocation2 + $0x600] sm:$0xff] }
  0xad   :  { %3283 = vmatprep.subr.bf16.mxu0 %v11717_v10  ;;  %3455 = vmatprep.subr.bf16.mxu1 %v11719_v11  ;;  %v322_v10 = vld [vmem:[#allocation2 + $0x620] sm:$0xff]  ;;  %v319_v11 = vld [vmem:[#allocation2 + $0x608] sm:$0xff] }
  0xae   :  { %v11781_v16 = vcombine.high %v318_v9, %v322_v10  ;;  %v11783_v17 = vcombine.high %v319_v11, %v323_v12  ;;  %v11782_v23 = vcombine.low %v319_v11, %v323_v12  ;;  %v366_v60 = vld [vmem:[#allocation2 + $0x780] sm:$0xff] }
  0xaf   :  { %3273 = vmatmul.mubr.bf16.vlgmr.msra.gmra.mrb[0].mxu0 %v13611_v15  ;;  %3445 = vmatmul.mubr.bf16.vlgmr.msra.gmra.mrb[0].mxu1 %v13611_v15  ;;  %v382_v12 = vld [vmem:[#allocation2 + $0x800] sm:$0xff] }
  0xb0   :  { %3284 = vmatpush1.bf16.msra.mxu0 %v11716_v19  ;;  %3456 = vmatpush1.bf16.msra.mxu1 %v11718_v20  ;;  %v330_v19 = vld [vmem:[#allocation2 + $0x660] sm:$0xff]  ;;  %v327_v20 = vld [vmem:[#allocation2 + $0x648] sm:$0xff] }
  0xb1   :  { %3285 = vmatprep.subr.bf16.mxu0 %v11725_v21  ;;  %3457 = vmatprep.subr.bf16.mxu1 %v11727_v22  ;;  %v331_v21 = vld [vmem:[#allocation2 + $0x668] sm:$0xff]  ;;  %v11780_v22 = vcombine.low %v318_v9, %v322_v10  ;;  %v11789_v24 = vcombine.high %v326_v18, %v330_v19 }
  0xb2   :  { %3315 = vmatprep.mubr.bf16.mxu0 %v13619_v25  ;;  %3487 = vmatprep.mubr.bf16.mxu1 %v13619_v25  ;;  %v11791_v26 = vcombine.high %v327_v20, %v331_v21  ;;  %v11790_v32 = vcombine.low %v327_v20, %v331_v21 }
  0xb4   :  { %3286 = vmatpush1.bf16.msra.mxu0 %v11724_v28  ;;  %3458 = vmatpush1.bf16.msra.mxu1 %v11726_v29  ;;  %v338_v28 = vld [vmem:[#allocation2 + $0x6a0] sm:$0xff]  ;;  %v335_v29 = vld [vmem:[#allocation2 + $0x688] sm:$0xff] }
  0xb5   :  { %3287 = vmatprep.subr.bf16.mxu0 %v11733_v30  ;;  %3459 = vmatprep.subr.bf16.mxu1 %v11735_v31  ;;  %v339_v30 = vld [vmem:[#allocation2 + $0x6a8] sm:$0xff]  ;;  %v11788_v31 = vcombine.low %v326_v18, %v330_v19  ;;  %v11797_v33 = vcombine.high %v334_v27, %v338_v28  ;;  %v104_v18 = vld [vmem:[%s13911_s0 + $0x10] sm:$0xff] }
  0xb6   :  { %v11799_v34 = vcombine.high %v335_v29, %v339_v30  ;;  %v11798_v40 = vcombine.low %v335_v29, %v339_v30  ;;  %v112_v19 = vld [vmem:[%s13911_s0 + $0x50] sm:$0xff]  ;;  %v107_v29 = vld [vmem:[%s13911_s0 + $0x28] sm:$0xff] }
  0xb7   :  { %v115_v30 = vld [vmem:[%s13911_s0 + $0x68] sm:$0xff] }
  0xb8   :  { %3288 = vmatpush1.bf16.msra.mxu0 %v11732_v36  ;;  %3460 = vmatpush1.bf16.msra.mxu1 %v11734_v37  ;;  %v346_v36 = vld [vmem:[#allocation2 + $0x6e0] sm:$0xff]  ;;  %v343_v37 = vld [vmem:[#allocation2 + $0x6c8] sm:$0xff] }
  0xb9   :  { %3289 = vmatprep.subr.bf16.mxu0 %v11741_v38  ;;  %3461 = vmatprep.subr.bf16.mxu1 %v11743_v39  ;;  %v347_v38 = vld [vmem:[#allocation2 + $0x6e8] sm:$0xff]  ;;  %v11796_v39 = vcombine.low %v334_v27, %v338_v28  ;;  %v11805_v41 = vcombine.high %v342_v35, %v346_v36  ;;  %v13631_v27 = vpack.c.bf16 %v112_v19, %v104_v18 }
  0xba   :  { %v11807_v42 = vcombine.high %v343_v37, %v347_v38  ;;  %v11806_v48 = vcombine.low %v343_v37, %v347_v38  ;;  %v395_v28 = vld [vmem:[#allocation2 + $0x868] sm:$0xff]  ;;  %v13639_v37 = vpack.c.bf16 %v115_v30, %v107_v29 }
  0xbb   :  { %v399_v38 = vld [vmem:[#allocation2 + $0x888] sm:$0xff] }
  0xbc   :  { %3290 = vmatpush1.bf16.msra.mxu0 %v11740_v44  ;;  %3462 = vmatpush1.bf16.msra.mxu1 %v11742_v45  ;;  %v354_v44 = vld [vmem:[#allocation2 + $0x720] sm:$0xff]  ;;  %v351_v45 = vld [vmem:[#allocation2 + $0x708] sm:$0xff] }
  0xbd   :  { %3291 = vmatprep.subr.bf16.mxu0 %v11749_v46  ;;  %3463 = vmatprep.subr.bf16.mxu1 %v11751_v47  ;;  %v355_v46 = vld [vmem:[#allocation2 + $0x728] sm:$0xff]  ;;  %v11804_v47 = vcombine.low %v342_v35, %v346_v36  ;;  %v11813_v49 = vcombine.high %v350_v43, %v354_v44  ;;  %v398_v35 = vld [vmem:[#allocation2 + $0x880] sm:$0xff] }
  0xbe   :  { %v11815_v50 = vcombine.high %v351_v45, %v355_v46  ;;  %v11814_v56 = vcombine.low %v351_v45, %v355_v46  ;;  %v402_v36 = vld [vmem:[#allocation2 + $0x8a0] sm:$0xff]  ;;  %v407_v46 = vld [vmem:[#allocation2 + $0x8c8] sm:$0xff] }
  0xbf   :  { %v410_v45 = vld [vmem:[#allocation2 + $0x8e0] sm:$0xff] }
  0xc0   :  { %3292 = vmatpush1.bf16.msra.mxu0 %v11748_v52  ;;  %3464 = vmatpush1.bf16.msra.mxu1 %v11750_v53  ;;  %v362_v52 = vld [vmem:[#allocation2 + $0x760] sm:$0xff]  ;;  %v359_v53 = vld [vmem:[#allocation2 + $0x748] sm:$0xff] }
  0xc1   :  { %3293 = vmatprep.subr.bf16.mxu0 %v11757_v54  ;;  %3465 = vmatprep.subr.bf16.mxu1 %v11759_v55  ;;  %v363_v54 = vld [vmem:[#allocation2 + $0x768] sm:$0xff]  ;;  %v11812_v55 = vcombine.low %v350_v43, %v354_v44  ;;  %v11821_v57 = vcombine.high %v358_v51, %v362_v52  ;;  %v406_v44 = vld [vmem:[#allocation2 + $0x8c0] sm:$0xff] }
  0xc2   :  { %v11823_v59 = vcombine.high %v359_v53, %v363_v54  ;;  %v11822_v1 = vcombine.low %v359_v53, %v363_v54  ;;  %v418_v53 = vld [vmem:[#allocation2 + $0x920] sm:$0xff]  ;;  %v415_v54 = vld [vmem:[#allocation2 + $0x908] sm:$0xff] }
  0xc4   :  { %3294 = vmatpush1.bf16.msra.mxu0 %v11756_v61  ;;  %3466 = vmatpush1.bf16.msra.mxu1 %v11758_v62  ;;  %v370_v61 = vld [vmem:[#allocation2 + $0x7a0] sm:$0xff]  ;;  %v367_v62 = vld [vmem:[#allocation2 + $0x788] sm:$0xff] }
  0xc5   :  { %3295 = vmatprep.subr.bf16.mxu0 %v11765_v63  ;;  %3467 = vmatprep.subr.bf16.mxu1 %v11767_v0  ;;  %v371_v63 = vld [vmem:[#allocation2 + $0x7a8] sm:$0xff]  ;;  %v11820_v0 = vcombine.low %v358_v51, %v362_v52  ;;  %v11829_v2 = vcombine.high %v366_v60, %v370_v61  ;;  %v414_v52 = vld [vmem:[#allocation2 + $0x900] sm:$0xff] }
  0xc6   :  { %v11831_v3 = vcombine.high %v367_v62, %v371_v63  ;;  %v11830_v9 = vcombine.low %v367_v62, %v371_v63  ;;  %v426_v62 = vld [vmem:[#allocation2 + $0x960] sm:$0xff]  ;;  %v423_v63 = vld [vmem:[#allocation2 + $0x948] sm:$0xff] }
  0xc8   :  { %3296 = vmatpush1.bf16.msra.mxu0 %v11764_v5  ;;  %3468 = vmatpush1.bf16.msra.mxu1 %v11766_v6  ;;  %v378_v5 = vld [vmem:[#allocation2 + $0x7e0] sm:$0xff]  ;;  %v375_v6 = vld [vmem:[#allocation2 + $0x7c8] sm:$0xff] }
  0xc9   :  { %3297 = vmatprep.subr.bf16.mxu0 %v11773_v7  ;;  %3469 = vmatprep.subr.bf16.mxu1 %v11775_v8  ;;  %v379_v7 = vld [vmem:[#allocation2 + $0x7e8] sm:$0xff]  ;;  %v11828_v8 = vcombine.low %v366_v60, %v370_v61  ;;  %v11837_v10 = vcombine.high %v374_v4, %v378_v5  ;;  %v422_v61 = vld [vmem:[#allocation2 + $0x940] sm:$0xff] }
  0xca   :  { %v11839_v11 = vcombine.high %v375_v6, %v379_v7  ;;  %v11838_v20 = vcombine.low %v375_v6, %v379_v7  ;;  %v434_v6 = vld [vmem:[#allocation2 + $0x9a0] sm:$0xff]  ;;  %v431_v7 = vld [vmem:[#allocation2 + $0x988] sm:$0xff] }
  0xcc   :  { %3298 = vmatpush1.bf16.msra.mxu0 %v11772_v13  ;;  %3470 = vmatpush1.bf16.msra.mxu1 %v11774_v14  ;;  %v386_v13 = vld [vmem:[#allocation2 + $0x820] sm:$0xff]  ;;  %v383_v14 = vld [vmem:[#allocation2 + $0x808] sm:$0xff] }
  0xcd   :  { %3299 = vmatprep.subr.bf16.mxu0 %v11781_v16  ;;  %3471 = vmatprep.subr.bf16.mxu1 %v11783_v17  ;;  %v387_v16 = vld [vmem:[#allocation2 + $0x828] sm:$0xff]  ;;  %v11836_v17 = vcombine.low %v374_v4, %v378_v5  ;;  %v11845_v21 = vcombine.high %v382_v12, %v386_v13  ;;  %v430_v5 = vld [vmem:[#allocation2 + $0x980] sm:$0xff] }
  0xce   :  { %v11892_v18 = vcombine.low %v430_v5, %v434_v6 }
  0xd0   :  { %3300 = vmatpush1.bf16.msra.mxu0 %v11780_v22  ;;  %3472 = vmatpush1.bf16.msra.mxu1 %v11782_v23  ;;  %v11847_v22 = vcombine.high %v383_v14, %v387_v16  ;;  %v390_v23 = vld [vmem:[#allocation2 + $0x840] sm:$0xff] }
  0xd1   :  { %3301 = vmatprep.subr.bf16.mxu0 %v11789_v24  ;;  %3473 = vmatprep.subr.bf16.mxu1 %v11791_v26  ;;  %v394_v24 = vld [vmem:[#allocation2 + $0x860] sm:$0xff]  ;;  %v391_v26 = vld [vmem:[#allocation2 + $0x848] sm:$0xff] }
  0xd4   :  { %3302 = vmatpush1.bf16.msra.mxu0 %v11788_v31  ;;  %3474 = vmatpush1.bf16.msra.mxu1 %v11790_v32  ;;  %v11844_v31 = vcombine.low %v382_v12, %v386_v13  ;;  %v11846_v32 = vcombine.low %v383_v14, %v387_v16  ;;  %v438_v13 = vld [vmem:[#allocation2 + $0x9c0] sm:$0xff]  ;;  %v439_v16 = vld [vmem:[#allocation2 + $0x9c8] sm:$0xff] }
  0xd5   :  { %3303 = vmatprep.subr.bf16.mxu0 %v11797_v33  ;;  %3475 = vmatprep.subr.bf16.mxu1 %v11799_v34  ;;  %v11853_v33 = vcombine.high %v390_v23, %v394_v24  ;;  %v11855_v34 = vcombine.high %v391_v26, %v395_v28  ;;  %v442_v14 = vld [vmem:[#allocation2 + $0x9e0] sm:$0xff] }
  0xd8   :  { %3304 = vmatpush1.bf16.msra.mxu0 %v11796_v39  ;;  %3476 = vmatpush1.bf16.msra.mxu1 %v11798_v40  ;;  %v403_v39 = vld [vmem:[#allocation2 + $0x8a8] sm:$0xff]  ;;  %v11852_v40 = vcombine.low %v390_v23, %v394_v24  ;;  %v450_v23 = vld [vmem:[#allocation2 + $0xa20] sm:$0xff] }
  0xd9   :  { %3305 = vmatprep.subr.bf16.mxu0 %v11805_v41  ;;  %3477 = vmatprep.subr.bf16.mxu1 %v11807_v42  ;;  %v11854_v41 = vcombine.low %v391_v26, %v395_v28  ;;  %v11861_v42 = vcombine.high %v398_v35, %v402_v36  ;;  %v11863_v43 = vcombine.high %v399_v38, %v403_v39  ;;  %v447_v24 = vld [vmem:[#allocation2 + $0xa08] sm:$0xff] }
  0xda   :  { %v451_v26 = vld [vmem:[#allocation2 + $0xa28] sm:$0xff]  ;;  %v11900_v28 = vcombine.low %v438_v13, %v442_v14 }
  0xdc   :  { %3306 = vmatpush1.bf16.msra.mxu0 %v11804_v47  ;;  %3478 = vmatpush1.bf16.msra.mxu1 %v11806_v48  ;;  %v411_v47 = vld [vmem:[#allocation2 + $0x8e8] sm:$0xff]  ;;  %v11860_v48 = vcombine.low %v398_v35, %v402_v36 }
  0xdd   :  { %3307 = vmatprep.subr.bf16.mxu0 %v11813_v49  ;;  %3479 = vmatprep.subr.bf16.mxu1 %v11815_v50  ;;  %v11862_v49 = vcombine.low %v399_v38, %v403_v39  ;;  %v11869_v50 = vcombine.high %v406_v44, %v410_v45  ;;  %v11871_v51 = vcombine.high %v407_v46, %v411_v47  ;;  %v459_v35 = vld [vmem:[#allocation2 + $0xa68] sm:$0xff] }
  0xde   :  { %v11910_v38 = vcombine.low %v447_v24, %v451_v26 }
  0xe0   :  { %3308 = vmatpush1.bf16.msra.mxu0 %v11812_v55  ;;  %3480 = vmatpush1.bf16.msra.mxu1 %v11814_v56  ;;  %v419_v55 = vld [vmem:[#allocation2 + $0x928] sm:$0xff]  ;;  %v11868_v56 = vcombine.low %v406_v44, %v410_v45 }
  0xe1   :  { %3309 = vmatprep.subr.bf16.mxu0 %v11821_v57  ;;  %3481 = vmatprep.subr.bf16.mxu1 %v11823_v59  ;;  %v11870_v57 = vcombine.low %v407_v46, %v411_v47  ;;  %v11877_v59 = vcombine.high %v414_v52, %v418_v53  ;;  %v11879_v60 = vcombine.high %v415_v54, %v419_v55  ;;  %v467_v44 = vld [vmem:[#allocation2 + $0xaa8] sm:$0xff] }
  0xe4   :  { %3310 = vmatpush1.bf16.msra.mxu0 %v11820_v0  ;;  %3482 = vmatpush1.bf16.msra.mxu1 %v11822_v1  ;;  %v427_v0 = vld [vmem:[#allocation2 + $0x968] sm:$0xff]  ;;  %v11876_v1 = vcombine.low %v414_v52, %v418_v53 }
  0xe5   :  { %3311 = vmatprep.subr.bf16.mxu0 %v11829_v2  ;;  %3483 = vmatprep.subr.bf16.mxu1 %v11831_v3  ;;  %v11878_v2 = vcombine.low %v415_v54, %v419_v55  ;;  %v11885_v3 = vcombine.high %v422_v61, %v426_v62  ;;  %v11887_v4 = vcombine.high %v423_v63, %v427_v0  ;;  %v475_v52 = vld [vmem:[#allocation2 + $0xae8] sm:$0xff] }
  0xe8   :  { %3312 = vmatpush1.bf16.msra.mxu0 %v11828_v8  ;;  %3484 = vmatpush1.bf16.msra.mxu1 %v11830_v9  ;;  %v435_v8 = vld [vmem:[#allocation2 + $0x9a8] sm:$0xff]  ;;  %v11884_v9 = vcombine.low %v422_v61, %v426_v62 }
  0xe9   :  { %3313 = vmatprep.subr.bf16.mxu0 %v11837_v10  ;;  %3485 = vmatprep.subr.bf16.mxu1 %v11839_v11  ;;  %v11886_v10 = vcombine.low %v423_v63, %v427_v0  ;;  %v11893_v11 = vcombine.high %v430_v5, %v434_v6  ;;  %v11895_v12 = vcombine.high %v431_v7, %v435_v8  ;;  %v483_v61 = vld [vmem:[#allocation2 + $0xb28] sm:$0xff] }
  0xea   :  { %v11894_v19 = vcombine.low %v431_v7, %v435_v8  ;;  %v491_v5 = vld [vmem:[#allocation2 + $0xb68] sm:$0xff] }
  0xec   :  { %3314 = vmatpush1.bf16.msra.mxu0 %v11836_v17  ;;  %3486 = vmatpush1.bf16.msra.mxu1 %v11838_v20  ;;  %v443_v17 = vld [vmem:[#allocation2 + $0x9e8] sm:$0xff]  ;;  %v11901_v20 = vcombine.high %v438_v13, %v442_v14 }
  0xed   :  { %3326 = vmatprep.subr.bf16.mxu0 %v11845_v21  ;;  %3498 = vmatprep.subr.bf16.mxu1 %v11847_v22  ;;  %v11903_v21 = vcombine.high %v439_v16, %v443_v17  ;;  %v446_v22 = vld [vmem:[#allocation2 + $0xa00] sm:$0xff]  ;;  %v11902_v29 = vcombine.low %v439_v16, %v443_v17  ;;  %v499_v13 = vld [vmem:[#allocation2 + $0xba8] sm:$0xff] }
  0xee   :  { %v11909_v30 = vcombine.high %v446_v22, %v450_v23  ;;  %v11908_v36 = vcombine.low %v446_v22, %v450_v23  ;;  %v507_v22 = vld [vmem:[#allocation2 + $0xbe8] sm:$0xff] }
  0xef   :  { %3316 = vmatmul.mubr.bf16.vlgmr.msra.gmra.mrb[0].mxu0 %v13631_v27  ;;  %3488 = vmatmul.mubr.bf16.vlgmr.msra.gmra.mrb[0].mxu1 %v13631_v27 }
  0xf0   :  { %3327 = vmatpush1.bf16.msra.mxu0 %v11844_v31  ;;  %3499 = vmatpush1.bf16.msra.mxu1 %v11846_v32  ;;  %v11911_v31 = vcombine.high %v447_v24, %v451_v26  ;;  %v454_v32 = vld [vmem:[#allocation2 + $0xa40] sm:$0xff] }
  0xf1   :  { %3328 = vmatprep.subr.bf16.mxu0 %v11853_v33  ;;  %3500 = vmatprep.subr.bf16.mxu1 %v11855_v34  ;;  %v458_v33 = vld [vmem:[#allocation2 + $0xa60] sm:$0xff]  ;;  %v455_v34 = vld [vmem:[#allocation2 + $0xa48] sm:$0xff] }
  0xf2   :  { %3358 = vmatprep.mubr.bf16.mxu0 %v13639_v37  ;;  %3530 = vmatprep.mubr.bf16.mxu1 %v13639_v37  ;;  %v11917_v39 = vcombine.high %v454_v32, %v458_v33  ;;  %v11916_v45 = vcombine.low %v454_v32, %v458_v33  ;;  %v11918_v46 = vcombine.low %v455_v34, %v459_v35  ;;  %v515_v32 = vld [vmem:[#allocation2 + $0xc28] sm:$0xff] }
  0xf4   :  { %3329 = vmatpush1.bf16.msra.mxu0 %v11852_v40  ;;  %3501 = vmatpush1.bf16.msra.mxu1 %v11854_v41  ;;  %v11919_v40 = vcombine.high %v455_v34, %v459_v35  ;;  %v462_v41 = vld [vmem:[#allocation2 + $0xa80] sm:$0xff] }
  0xf5   :  { %3330 = vmatprep.subr.bf16.mxu0 %v11861_v42  ;;  %3502 = vmatprep.subr.bf16.mxu1 %v11863_v43  ;;  %v466_v42 = vld [vmem:[#allocation2 + $0xaa0] sm:$0xff]  ;;  %v463_v43 = vld [vmem:[#allocation2 + $0xa88] sm:$0xff] }
  0xf6   :  { %v11925_v47 = vcombine.high %v462_v41, %v466_v42  ;;  %v11924_v53 = vcombine.low %v462_v41, %v466_v42  ;;  %v11926_v54 = vcombine.low %v463_v43, %v467_v44  ;;  %v106_v34 = vld [vmem:[%s13911_s0 + $0x20] sm:$0xff]  ;;  %v519_v42 = vld [vmem:[#allocation2 + $0xc48] sm:$0xff] }
  0xf7   :  { %v114_v35 = vld [vmem:[%s13911_s0 + $0x60] sm:$0xff] }
  0xf8   :  { %3331 = vmatpush1.bf16.msra.mxu0 %v11860_v48  ;;  %3503 = vmatpush1.bf16.msra.mxu1 %v11862_v49  ;;  %v11927_v48 = vcombine.high %v463_v43, %v467_v44  ;;  %v470_v49 = vld [vmem:[#allocation2 + $0xac0] sm:$0xff]  ;;  %v13651_v43 = vpack.c.bf16 %v114_v35, %v106_v34  ;;  %v523_v44 = vld [vmem:[#allocation2 + $0xc68] sm:$0xff] }
  0xf9   :  { %3332 = vmatprep.subr.bf16.mxu0 %v11869_v50  ;;  %3504 = vmatprep.subr.bf16.mxu1 %v11871_v51  ;;  %v474_v50 = vld [vmem:[#allocation2 + $0xae0] sm:$0xff]  ;;  %v471_v51 = vld [vmem:[#allocation2 + $0xac8] sm:$0xff] }
  0xfa   :  { %v11933_v55 = vcombine.high %v470_v49, %v474_v50  ;;  %v11932_v62 = vcombine.low %v470_v49, %v474_v50  ;;  %v11934_v63 = vcombine.low %v471_v51, %v475_v52  ;;  %v522_v41 = vld [vmem:[#allocation2 + $0xc60] sm:$0xff]  ;;  %v11983_v50 = vcombine.high %v519_v42, %v523_v44  ;;  %v567_v34 = vld [vmem:[#allocation2 + $0xdc8] sm:$0xff] }
  0xfb   :  { %v571_v35 = vld [vmem:[#allocation2 + $0xde8] sm:$0xff] }
  0xfc   :  { %3333 = vmatpush1.bf16.msra.mxu0 %v11868_v56  ;;  %3505 = vmatpush1.bf16.msra.mxu1 %v11870_v57  ;;  %v11935_v56 = vcombine.high %v471_v51, %v475_v52  ;;  %v478_v57 = vld [vmem:[#allocation2 + $0xb00] sm:$0xff] }
  0xfd   :  { %3334 = vmatprep.subr.bf16.mxu0 %v11877_v59  ;;  %3506 = vmatprep.subr.bf16.mxu1 %v11879_v60  ;;  %v482_v59 = vld [vmem:[#allocation2 + $0xb20] sm:$0xff]  ;;  %v479_v60 = vld [vmem:[#allocation2 + $0xb08] sm:$0xff] }
  0xfe   :  { %v11941_v0 = vcombine.high %v478_v57, %v482_v59  ;;  %v11940_v6 = vcombine.low %v478_v57, %v482_v59  ;;  %v11942_v7 = vcombine.low %v479_v60, %v483_v61  ;;  %v526_v51 = vld [vmem:[#allocation2 + $0xc80] sm:$0xff]  ;;  %v11982_v57 = vcombine.low %v519_v42, %v523_v44  ;;  %v575_v44 = vld [vmem:[#allocation2 + $0xe08] sm:$0xff] }
  0xff   :  { %v530_v52 = vld [vmem:[#allocation2 + $0xca0] sm:$0xff] }
 0x100   :  { %3335 = vmatpush1.bf16.msra.mxu0 %v11876_v1  ;;  %3507 = vmatpush1.bf16.msra.mxu1 %v11878_v2  ;;  %v11943_v1 = vcombine.high %v479_v60, %v483_v61  ;;  %v486_v2 = vld [vmem:[#allocation2 + $0xb40] sm:$0xff]  ;;  %v11989_v59 = vcombine.high %v526_v51, %v530_v52 }
 0x101   :  { %3336 = vmatprep.subr.bf16.mxu0 %v11885_v3  ;;  %3508 = vmatprep.subr.bf16.mxu1 %v11887_v4  ;;  %v490_v3 = vld [vmem:[#allocation2 + $0xb60] sm:$0xff]  ;;  %v487_v4 = vld [vmem:[#allocation2 + $0xb48] sm:$0xff] }
 0x102   :  { %v11949_v8 = vcombine.high %v486_v2, %v490_v3  ;;  %v11948_v14 = vcombine.low %v486_v2, %v490_v3  ;;  %v11950_v16 = vcombine.low %v487_v4, %v491_v5  ;;  %v534_v61 = vld [vmem:[#allocation2 + $0xcc0] sm:$0xff] }
 0x103   :  { %v578_v42 = vld [vmem:[#allocation2 + $0xe20] sm:$0xff] }
 0x104   :  { %3337 = vmatpush1.bf16.msra.mxu0 %v11884_v9  ;;  %3509 = vmatpush1.bf16.msra.mxu1 %v11886_v10  ;;  %v11951_v9 = vcombine.high %v487_v4, %v491_v5  ;;  %v494_v10 = vld [vmem:[#allocation2 + $0xb80] sm:$0xff] }
 0x105   :  { %3338 = vmatprep.subr.bf16.mxu0 %v11893_v11  ;;  %3510 = vmatprep.subr.bf16.mxu1 %v11895_v12  ;;  %v498_v11 = vld [vmem:[#allocation2 + $0xba0] sm:$0xff]  ;;  %v495_v12 = vld [vmem:[#allocation2 + $0xb88] sm:$0xff] }
 0x106   :  { %v11957_v17 = vcombine.high %v494_v10, %v498_v11  ;;  %v11956_v23 = vcombine.low %v494_v10, %v498_v11  ;;  %v11958_v24 = vcombine.low %v495_v12, %v499_v13  ;;  %v542_v5 = vld [vmem:[#allocation2 + $0xd00] sm:$0xff] }
 0x108   :  { %3339 = vmatpush1.bf16.msra.mxu0 %v11892_v18  ;;  %3511 = vmatpush1.bf16.msra.mxu1 %v11894_v19  ;;  %v11959_v18 = vcombine.high %v495_v12, %v499_v13  ;;  %v502_v19 = vld [vmem:[#allocation2 + $0xbc0] sm:$0xff] }
 0x109   :  { %3340 = vmatprep.subr.bf16.mxu0 %v11901_v20  ;;  %3512 = vmatprep.subr.bf16.mxu1 %v11903_v21  ;;  %v506_v20 = vld [vmem:[#allocation2 + $0xbe0] sm:$0xff]  ;;  %v503_v21 = vld [vmem:[#allocation2 + $0xbc8] sm:$0xff] }
 0x10a   :  { %v11965_v26 = vcombine.high %v502_v19, %v506_v20  ;;  %v11964_v33 = vcombine.low %v502_v19, %v506_v20  ;;  %v550_v13 = vld [vmem:[#allocation2 + $0xd40] sm:$0xff] }
 0x10c   :  { %3341 = vmatpush1.bf16.msra.mxu0 %v11900_v28  ;;  %3513 = vmatpush1.bf16.msra.mxu1 %v11902_v29  ;;  %v11967_v28 = vcombine.high %v503_v21, %v507_v22  ;;  %v510_v29 = vld [vmem:[#allocation2 + $0xc00] sm:$0xff] }
 0x10d   :  { %3342 = vmatprep.subr.bf16.mxu0 %v11909_v30  ;;  %3514 = vmatprep.subr.bf16.mxu1 %v11911_v31  ;;  %v514_v30 = vld [vmem:[#allocation2 + $0xc20] sm:$0xff]  ;;  %v511_v31 = vld [vmem:[#allocation2 + $0xc08] sm:$0xff] }
 0x110   :  { %3343 = vmatpush1.bf16.msra.mxu0 %v11908_v36  ;;  %3515 = vmatpush1.bf16.msra.mxu1 %v11910_v38  ;;  %v11966_v36 = vcombine.low %v503_v21, %v507_v22  ;;  %v11973_v38 = vcombine.high %v510_v29, %v514_v30  ;;  %v558_v22 = vld [vmem:[#allocation2 + $0xd80] sm:$0xff] }
 0x111   :  { %3344 = vmatprep.subr.bf16.mxu0 %v11917_v39  ;;  %3516 = vmatprep.subr.bf16.mxu1 %v11919_v40  ;;  %v11975_v39 = vcombine.high %v511_v31, %v515_v32  ;;  %v518_v40 = vld [vmem:[#allocation2 + $0xc40] sm:$0xff] }
 0x112   :  { %v11981_v49 = vcombine.high %v518_v40, %v522_v41 }
 0x114   :  { %3345 = vmatpush1.bf16.msra.mxu0 %v11916_v45  ;;  %3517 = vmatpush1.bf16.msra.mxu1 %v11918_v46  ;;  %v109_v45 = vld [vmem:[%s13911_s0 + $0x38] sm:$0xff] }
 0x115   :  { %3346 = vmatprep.subr.bf16.mxu0 %v11925_v47  ;;  %3518 = vmatprep.subr.bf16.mxu1 %v11927_v48  ;;  %v117_v46 = vld [vmem:[%s13911_s0 + $0x78] sm:$0xff]  ;;  %v11972_v47 = vcombine.low %v510_v29, %v514_v30  ;;  %v11974_v48 = vcombine.low %v511_v31, %v515_v32  ;;  %v566_v32 = vld [vmem:[#allocation2 + $0xdc0] sm:$0xff] }
 0x118   :  { %3347 = vmatpush1.bf16.msra.mxu0 %v11924_v53  ;;  %3519 = vmatpush1.bf16.msra.mxu1 %v11926_v54  ;;  %v13659_v53 = vpack.c.bf16 %v117_v46, %v109_v45  ;;  %v527_v54 = vld [vmem:[#allocation2 + $0xc88] sm:$0xff] }
 0x119   :  { %3348 = vmatprep.subr.bf16.mxu0 %v11933_v55  ;;  %3520 = vmatprep.subr.bf16.mxu1 %v11935_v56  ;;  %v531_v55 = vld [vmem:[#allocation2 + $0xca8] sm:$0xff]  ;;  %v11980_v56 = vcombine.low %v518_v40, %v522_v41  ;;  %v12031_v40 = vcombine.high %v567_v34, %v571_v35  ;;  %v574_v41 = vld [vmem:[#allocation2 + $0xe00] sm:$0xff] }
 0x11a   :  { %v11991_v60 = vcombine.high %v527_v54, %v531_v55  ;;  %v11990_v2 = vcombine.low %v527_v54, %v531_v55  ;;  %v579_v45 = vld [vmem:[#allocation2 + $0xe28] sm:$0xff]  ;;  %v12036_v55 = vcombine.low %v574_v41, %v578_v42 }
 0x11b   :  { %v587_v54 = vld [vmem:[#allocation2 + $0xe68] sm:$0xff] }
 0x11c   :  { %3349 = vmatpush1.bf16.msra.mxu0 %v11932_v62  ;;  %3521 = vmatpush1.bf16.msra.mxu1 %v11934_v63  ;;  %v538_v62 = vld [vmem:[#allocation2 + $0xce0] sm:$0xff]  ;;  %v535_v63 = vld [vmem:[#allocation2 + $0xcc8] sm:$0xff] }
 0x11d   :  { %3350 = vmatprep.subr.bf16.mxu0 %v11941_v0  ;;  %3522 = vmatprep.subr.bf16.mxu1 %v11943_v1  ;;  %v539_v0 = vld [vmem:[#allocation2 + $0xce8] sm:$0xff]  ;;  %v11988_v1 = vcombine.low %v526_v51, %v530_v52  ;;  %v11997_v3 = vcombine.high %v534_v61, %v538_v62  ;;  %v586_v51 = vld [vmem:[#allocation2 + $0xe60] sm:$0xff] }
 0x11e   :  { %v11999_v4 = vcombine.high %v535_v63, %v539_v0  ;;  %v11998_v10 = vcombine.low %v535_v63, %v539_v0  ;;  %v583_v52 = vld [vmem:[#allocation2 + $0xe48] sm:$0xff] }
 0x11f   :  { %v595_v63 = vld [vmem:[#allocation2 + $0xea8] sm:$0xff] }
 0x120   :  { %3351 = vmatpush1.bf16.msra.mxu0 %v11940_v6  ;;  %3523 = vmatpush1.bf16.msra.mxu1 %v11942_v7  ;;  %v546_v6 = vld [vmem:[#allocation2 + $0xd20] sm:$0xff]  ;;  %v543_v7 = vld [vmem:[#allocation2 + $0xd08] sm:$0xff] }
 0x121   :  { %3352 = vmatprep.subr.bf16.mxu0 %v11949_v8  ;;  %3524 = vmatprep.subr.bf16.mxu1 %v11951_v9  ;;  %v547_v8 = vld [vmem:[#allocation2 + $0xd28] sm:$0xff]  ;;  %v11996_v9 = vcombine.low %v534_v61, %v538_v62  ;;  %v12005_v11 = vcombine.high %v542_v5, %v546_v6  ;;  %v594_v61 = vld [vmem:[#allocation2 + $0xea0] sm:$0xff] }
 0x122   :  { %v12007_v12 = vcombine.high %v543_v7, %v547_v8  ;;  %v12006_v19 = vcombine.low %v543_v7, %v547_v8  ;;  %v591_v62 = vld [vmem:[#allocation2 + $0xe88] sm:$0xff] }
 0x123   :  { %v603_v7 = vld [vmem:[#allocation2 + $0xee8] sm:$0xff] }
 0x124   :  { %3353 = vmatpush1.bf16.msra.mxu0 %v11948_v14  ;;  %3525 = vmatpush1.bf16.msra.mxu1 %v11950_v16  ;;  %v554_v14 = vld [vmem:[#allocation2 + $0xd60] sm:$0xff]  ;;  %v551_v16 = vld [vmem:[#allocation2 + $0xd48] sm:$0xff] }
 0x125   :  { %3354 = vmatprep.subr.bf16.mxu0 %v11957_v17  ;;  %3526 = vmatprep.subr.bf16.mxu1 %v11959_v18  ;;  %v555_v17 = vld [vmem:[#allocation2 + $0xd68] sm:$0xff]  ;;  %v12004_v18 = vcombine.low %v542_v5, %v546_v6  ;;  %v12013_v20 = vcombine.high %v550_v13, %v554_v14  ;;  %v602_v5 = vld [vmem:[#allocation2 + $0xee0] sm:$0xff] }
 0x126   :  { %v12015_v21 = vcombine.high %v551_v16, %v555_v17  ;;  %v12014_v29 = vcombine.low %v551_v16, %v555_v17  ;;  %v599_v6 = vld [vmem:[#allocation2 + $0xec8] sm:$0xff] }
 0x127   :  { %v611_v16 = vld [vmem:[#allocation2 + $0xf28] sm:$0xff] }
 0x128   :  { %3355 = vmatpush1.bf16.msra.mxu0 %v11956_v23  ;;  %3527 = vmatpush1.bf16.msra.mxu1 %v11958_v24  ;;  %v562_v23 = vld [vmem:[#allocation2 + $0xda0] sm:$0xff]  ;;  %v559_v24 = vld [vmem:[#allocation2 + $0xd88] sm:$0xff] }
 0x129   :  { %3356 = vmatprep.subr.bf16.mxu0 %v11965_v26  ;;  %3528 = vmatprep.subr.bf16.mxu1 %v11967_v28  ;;  %v563_v26 = vld [vmem:[#allocation2 + $0xda8] sm:$0xff]  ;;  %v12012_v28 = vcombine.low %v550_v13, %v554_v14  ;;  %v12021_v30 = vcombine.high %v558_v22, %v562_v23  ;;  %v610_v13 = vld [vmem:[#allocation2 + $0xf20] sm:$0xff] }
 0x12a   :  { %v12023_v31 = vcombine.high %v559_v24, %v563_v26  ;;  %v607_v14 = vld [vmem:[#allocation2 + $0xf08] sm:$0xff] }
 0x12c   :  { %3357 = vmatpush1.bf16.msra.mxu0 %v11964_v33  ;;  %3529 = vmatpush1.bf16.msra.mxu1 %v11966_v36  ;;  %v570_v33 = vld [vmem:[#allocation2 + $0xde0] sm:$0xff]  ;;  %v12020_v36 = vcombine.low %v558_v22, %v562_v23  ;;  %v615_v23 = vld [vmem:[#allocation2 + $0xf48] sm:$0xff] }
 0x12d   :  { %3369 = vmatprep.subr.bf16.mxu0 %v11973_v38  ;;  %3541 = vmatprep.subr.bf16.mxu1 %v11975_v39  ;;  %v12022_v38 = vcombine.low %v559_v24, %v563_v26  ;;  %v12029_v39 = vcombine.high %v566_v32, %v570_v33  ;;  %v12028_v46 = vcombine.low %v566_v32, %v570_v33  ;;  %v618_v22 = vld [vmem:[#allocation2 + $0xf60] sm:$0xff]  ;;  %v619_v24 = vld [vmem:[#allocation2 + $0xf68] sm:$0xff] }
 0x12e   :  { %v626_v32 = vld [vmem:[#allocation2 + $0xfa0] sm:$0xff]  ;;  %v623_v33 = vld [vmem:[#allocation2 + $0xf88] sm:$0xff] }
 0x12f   :  { %3359 = vmatmul.mubr.bf16.vlgmr.msra.gmra.mrb[0].mxu0 %v13651_v43  ;;  %3531 = vmatmul.mubr.bf16.vlgmr.msra.gmra.mrb[0].mxu1 %v13651_v43 }
 0x130   :  { %3370 = vmatpush1.bf16.msra.mxu0 %v11972_v47  ;;  %3542 = vmatpush1.bf16.msra.mxu1 %v11974_v48  ;;  %v12030_v47 = vcombine.low %v567_v34, %v571_v35  ;;  %v12037_v48 = vcombine.high %v574_v41, %v578_v42  ;;  %v627_v34 = vld [vmem:[#allocation2 + $0xfa8] sm:$0xff]  ;;  %v634_v41 = vld [vmem:[#allocation2 + $0xfe0] sm:$0xff] }
 0x131   :  { %3371 = vmatprep.subr.bf16.mxu0 %v11981_v49  ;;  %3543 = vmatprep.subr.bf16.mxu1 %v11983_v50  ;;  %v12039_v49 = vcombine.high %v575_v44, %v579_v45  ;;  %v582_v50 = vld [vmem:[#allocation2 + $0xe40] sm:$0xff]  ;;  %v631_v42 = vld [vmem:[#allocation2 + $0xfc8] sm:$0xff] }
 0x132   :  { %3401 = vmatprep.mubr.bf16.mxu0 %v13659_v53  ;;  %3573 = vmatprep.mubr.bf16.mxu1 %v13659_v53  ;;  %v12044_v0 = vcombine.low %v582_v50, %v586_v51 }
 0x134   :  { %3372 = vmatpush1.bf16.msra.mxu0 %v11980_v56  ;;  %3544 = vmatpush1.bf16.msra.mxu1 %v11982_v57  ;;  %v12038_v56 = vcombine.low %v575_v44, %v579_v45  ;;  %v12045_v57 = vcombine.high %v582_v50, %v586_v51  ;;  %v635_v44 = vld [vmem:[#allocation2 + $0xfe8] sm:$0xff]  ;;  %v132_v50 = vld [vmem:[#allocation2 + $0x30] sm:$0xff]  ;;  %v129_v51 = vld [vmem:[#allocation2 + $0x18] sm:$0xff] }
 0x135   :  { %3373 = vmatprep.subr.bf16.mxu0 %v11989_v59  ;;  %3545 = vmatprep.subr.bf16.mxu1 %v11991_v60  ;;  %v12047_v59 = vcombine.high %v583_v52, %v587_v54  ;;  %v590_v60 = vld [vmem:[#allocation2 + $0xe80] sm:$0xff] }
 0x136   :  { %v12052_v8 = vcombine.low %v590_v60, %v594_v61 }
 0x138   :  { %3374 = vmatpush1.bf16.msra.mxu0 %v11988_v1  ;;  %3546 = vmatpush1.bf16.msra.mxu1 %v11990_v2  ;;  %v12046_v1 = vcombine.low %v583_v52, %v587_v54  ;;  %v12053_v2 = vcombine.high %v590_v60, %v594_v61  ;;  %v133_v52 = vld [vmem:[#allocation2 + $0x38] sm:$0xff]  ;;  %v136_v61 = vld [vmem:[#allocation2 + $0x50] sm:$0xff] }
 0x139   :  { %3375 = vmatprep.subr.bf16.mxu0 %v11997_v3  ;;  %3547 = vmatprep.subr.bf16.mxu1 %v11999_v4  ;;  %v12055_v3 = vcombine.high %v591_v62, %v595_v63  ;;  %v598_v4 = vld [vmem:[#allocation2 + $0xec0] sm:$0xff]  ;;  %v11595_v60 = vcombine.high %v129_v51, %v133_v52 }
 0x13a   :  { %v12060_v17 = vcombine.low %v598_v4, %v602_v5 }
 0x13c   :  { %3376 = vmatpush1.bf16.msra.mxu0 %v11996_v9  ;;  %3548 = vmatpush1.bf16.msra.mxu1 %v11998_v10  ;;  %v12054_v9 = vcombine.low %v591_v62, %v595_v63  ;;  %v12061_v10 = vcombine.high %v598_v4, %v602_v5  ;;  %v140_v62 = vld [vmem:[#allocation2 + $0x70] sm:$0xff] }
 0x13d   :  { %3377 = vmatprep.subr.bf16.mxu0 %v12005_v11  ;;  %3549 = vmatprep.subr.bf16.mxu1 %v12007_v12  ;;  %v12063_v11 = vcombine.high %v599_v6, %v603_v7  ;;  %v606_v12 = vld [vmem:[#allocation2 + $0xf00] sm:$0xff]  ;;  %v11601_v4 = vcombine.high %v136_v61, %v140_v62 }
 0x13e   :  { %v12068_v26 = vcombine.low %v606_v12, %v610_v13 }
 0x140   :  { %3378 = vmatpush1.bf16.msra.mxu0 %v12004_v18  ;;  %3550 = vmatpush1.bf16.msra.mxu1 %v12006_v19  ;;  %v12062_v18 = vcombine.low %v599_v6, %v603_v7  ;;  %v12069_v19 = vcombine.high %v606_v12, %v610_v13  ;;  %v144_v6 = vld [vmem:[#allocation2 + $0x90] sm:$0xff] }
 0x141   :  { %3379 = vmatprep.subr.bf16.mxu0 %v12013_v20  ;;  %3551 = vmatprep.subr.bf16.mxu1 %v12015_v21  ;;  %v12071_v20 = vcombine.high %v607_v14, %v611_v16  ;;  %v614_v21 = vld [vmem:[#allocation2 + $0xf40] sm:$0xff]  ;;  %v148_v7 = vld [vmem:[#allocation2 + $0xb0] sm:$0xff] }
 0x142   :  { %v12076_v35 = vcombine.low %v614_v21, %v618_v22  ;;  %v11609_v12 = vcombine.high %v144_v6, %v148_v7 }
 0x144   :  { %3380 = vmatpush1.bf16.msra.mxu0 %v12012_v28  ;;  %3552 = vmatpush1.bf16.msra.mxu1 %v12014_v29  ;;  %v12070_v28 = vcombine.low %v607_v14, %v611_v16  ;;  %v12077_v29 = vcombine.high %v614_v21, %v618_v22  ;;  %v152_v14 = vld [vmem:[#allocation2 + $0xd0] sm:$0xff] }
 0x145   :  { %3381 = vmatprep.subr.bf16.mxu0 %v12021_v30  ;;  %3553 = vmatprep.subr.bf16.mxu1 %v12023_v31  ;;  %v12079_v30 = vcombine.high %v615_v23, %v619_v24  ;;  %v622_v31 = vld [vmem:[#allocation2 + $0xf80] sm:$0xff]  ;;  %v156_v16 = vld [vmem:[#allocation2 + $0xf0] sm:$0xff] }
 0x146   :  { %v12084_v45 = vcombine.low %v622_v31, %v626_v32  ;;  %v11617_v21 = vcombine.high %v152_v14, %v156_v16 }
 0x148   :  { %3382 = vmatpush1.bf16.msra.mxu0 %v12020_v36  ;;  %3554 = vmatpush1.bf16.msra.mxu1 %v12022_v38  ;;  %v12078_v36 = vcombine.low %v615_v23, %v619_v24  ;;  %v12085_v38 = vcombine.high %v622_v31, %v626_v32  ;;  %v160_v23 = vld [vmem:[#allocation2 + $0x110] sm:$0xff] }
 0x149   :  { %3383 = vmatprep.subr.bf16.mxu0 %v12029_v39  ;;  %3555 = vmatprep.subr.bf16.mxu1 %v12031_v40  ;;  %v12087_v39 = vcombine.high %v623_v33, %v627_v34  ;;  %v630_v40 = vld [vmem:[#allocation2 + $0xfc0] sm:$0xff]  ;;  %v164_v24 = vld [vmem:[#allocation2 + $0x130] sm:$0xff] }
 0x14a   :  { %v12092_v54 = vcombine.low %v630_v40, %v634_v41  ;;  %v11625_v31 = vcombine.high %v160_v23, %v164_v24  ;;  %v168_v32 = vld [vmem:[#allocation2 + $0x150] sm:$0xff] }
 0x14c   :  { %3384 = vmatpush1.bf16.msra.mxu0 %v12028_v46  ;;  %3556 = vmatpush1.bf16.msra.mxu1 %v12030_v47  ;;  %v12086_v46 = vcombine.low %v623_v33, %v627_v34  ;;  %v12093_v47 = vcombine.high %v630_v40, %v634_v41  ;;  %v172_v33 = vld [vmem:[#allocation2 + $0x170] sm:$0xff]  ;;  %v169_v34 = vld [vmem:[#allocation2 + $0x158] sm:$0xff] }
 0x14d   :  { %3385 = vmatprep.subr.bf16.mxu0 %v12037_v48  ;;  %3557 = vmatprep.subr.bf16.mxu1 %v12039_v49  ;;  %v12095_v48 = vcombine.high %v631_v42, %v635_v44  ;;  %v128_v49 = vld [vmem:[#allocation2 + $0x10] sm:$0xff] }
 0x14e   :  { %v176_v41 = vld [vmem:[#allocation2 + $0x190] sm:$0xff] }
 0x150   :  { %3386 = vmatpush1.bf16.msra.mxu0 %v12036_v55  ;;  %3558 = vmatpush1.bf16.msra.mxu1 %v12038_v56  ;;  %v108_v55 = vld [vmem:[%s13911_s0 + $0x30] sm:$0xff] }
 0x151   :  { %3387 = vmatprep.subr.bf16.mxu0 %v12045_v57  ;;  %3559 = vmatprep.subr.bf16.mxu1 %v12047_v59  ;;  %v116_v56 = vld [vmem:[%s13911_s0 + $0x70] sm:$0xff]  ;;  %v12094_v57 = vcombine.low %v631_v42, %v635_v44  ;;  %v11593_v59 = vcombine.high %v128_v49, %v132_v50  ;;  %v177_v44 = vld [vmem:[#allocation2 + $0x198] sm:$0xff] }
 0x152   :  { %v13671_v63 = vpack.c.bf16 %v116_v56, %v108_v55  ;;  %v180_v42 = vld [vmem:[#allocation2 + $0x1b0] sm:$0xff] }
 0x153   :  { %v11640_v55 = vcombine.low %v176_v41, %v180_v42 }
 0x154   :  { %3388 = vmatpush1.bf16.msra.mxu0 %v12044_v0  ;;  %3560 = vmatpush1.bf16.msra.mxu1 %v12046_v1  ;;  %v137_v0 = vld [vmem:[#allocation2 + $0x58] sm:$0xff] }
 0x155   :  { %3389 = vmatprep.subr.bf16.mxu0 %v12053_v2  ;;  %3561 = vmatprep.subr.bf16.mxu1 %v12055_v3  ;;  %v141_v1 = vld [vmem:[#allocation2 + $0x78] sm:$0xff]  ;;  %v11592_v2 = vcombine.low %v128_v49, %v132_v50  ;;  %v11594_v3 = vcombine.low %v129_v51, %v133_v52  ;;  %v184_v50 = vld [vmem:[#allocation2 + $0x1d0] sm:$0xff] }
 0x156   :  { %v11603_v5 = vcombine.high %v137_v0, %v141_v1  ;;  %v188_v51 = vld [vmem:[#allocation2 + $0x1f0] sm:$0xff]  ;;  %v185_v52 = vld [vmem:[#allocation2 + $0x1d8] sm:$0xff] }
 0x158   :  { %3390 = vmatpush1.bf16.msra.mxu0 %v12052_v8  ;;  %3562 = vmatpush1.bf16.msra.mxu1 %v12054_v9  ;;  %v145_v8 = vld [vmem:[#allocation2 + $0x98] sm:$0xff] }
 0x159   :  { %3391 = vmatprep.subr.bf16.mxu0 %v12061_v10  ;;  %3563 = vmatprep.subr.bf16.mxu1 %v12063_v11  ;;  %v149_v9 = vld [vmem:[#allocation2 + $0xb8] sm:$0xff]  ;;  %v11600_v10 = vcombine.low %v136_v61, %v140_v62  ;;  %v11602_v11 = vcombine.low %v137_v0, %v141_v1  ;;  %v196_v61 = vld [vmem:[#allocation2 + $0x230] sm:$0xff]  ;;  %v11648_v1 = vcombine.low %v184_v50, %v188_v51 }
 0x15a   :  { %v11611_v13 = vcombine.high %v145_v8, %v149_v9  ;;  %v193_v62 = vld [vmem:[#allocation2 + $0x218] sm:$0xff] }
 0x15b   :  { %v197_v0 = vld [vmem:[#allocation2 + $0x238] sm:$0xff] }
 0x15c   :  { %3392 = vmatpush1.bf16.msra.mxu0 %v12060_v17  ;;  %3564 = vmatpush1.bf16.msra.mxu1 %v12062_v18  ;;  %v153_v17 = vld [vmem:[#allocation2 + $0xd8] sm:$0xff] }
 0x15d   :  { %3393 = vmatprep.subr.bf16.mxu0 %v12069_v19  ;;  %3565 = vmatprep.subr.bf16.mxu1 %v12071_v20  ;;  %v157_v18 = vld [vmem:[#allocation2 + $0xf8] sm:$0xff]  ;;  %v11608_v19 = vcombine.low %v144_v6, %v148_v7  ;;  %v11610_v20 = vcombine.low %v145_v8, %v149_v9  ;;  %v204_v6 = vld [vmem:[#allocation2 + $0x270] sm:$0xff] }
 0x15e   :  { %v11619_v22 = vcombine.high %v153_v17, %v157_v18  ;;  %v201_v7 = vld [vmem:[#allocation2 + $0x258] sm:$0xff] }
 0x15f   :  { %v205_v8 = vld [vmem:[#allocation2 + $0x278] sm:$0xff] }
 0x160   :  { %3394 = vmatpush1.bf16.msra.mxu0 %v12068_v26  ;;  %3566 = vmatpush1.bf16.msra.mxu1 %v12070_v28  ;;  %v161_v26 = vld [vmem:[#allocation2 + $0x118] sm:$0xff] }
 0x161   :  { %3395 = vmatprep.subr.bf16.mxu0 %v12077_v29  ;;  %3567 = vmatprep.subr.bf16.mxu1 %v12079_v30  ;;  %v165_v28 = vld [vmem:[#allocation2 + $0x138] sm:$0xff]  ;;  %v11616_v29 = vcombine.low %v152_v14, %v156_v16  ;;  %v11618_v30 = vcombine.low %v153_v17, %v157_v18  ;;  %v212_v14 = vld [vmem:[#allocation2 + $0x2b0] sm:$0xff] }
 0x162   :  { %v209_v16 = vld [vmem:[#allocation2 + $0x298] sm:$0xff] }
 0x163   :  { %v213_v17 = vld [vmem:[#allocation2 + $0x2b8] sm:$0xff] }
 0x164   :  { %3396 = vmatpush1.bf16.msra.mxu0 %v12076_v35  ;;  %3568 = vmatpush1.bf16.msra.mxu1 %v12078_v36  ;;  %v173_v35 = vld [vmem:[#allocation2 + $0x178] sm:$0xff]  ;;  %v11624_v36 = vcombine.low %v160_v23, %v164_v24  ;;  %v220_v23 = vld [vmem:[#allocation2 + $0x2f0] sm:$0xff] }
 0x165   :  { %3397 = vmatprep.subr.bf16.mxu0 %v12085_v38  ;;  %3569 = vmatprep.subr.bf16.mxu1 %v12087_v39  ;;  %v11626_v38 = vcombine.low %v161_v26, %v165_v28  ;;  %v11633_v39 = vcombine.high %v168_v32, %v172_v33  ;;  %v11635_v40 = vcombine.high %v169_v34, %v173_v35  ;;  %v217_v24 = vld [vmem:[#allocation2 + $0x2d8] sm:$0xff] }
 0x168   :  { %3398 = vmatpush1.bf16.msra.mxu0 %v12084_v45  ;;  %3570 = vmatpush1.bf16.msra.mxu1 %v12086_v46  ;;  %v181_v45 = vld [vmem:[#allocation2 + $0x1b8] sm:$0xff]  ;;  %v11632_v46 = vcombine.low %v168_v32, %v172_v33  ;;  %v228_v32 = vld [vmem:[#allocation2 + $0x330] sm:$0xff] }
 0x169   :  { %3399 = vmatprep.subr.bf16.mxu0 %v12093_v47  ;;  %3571 = vmatprep.subr.bf16.mxu1 %v12095_v48  ;;  %v11634_v47 = vcombine.low %v169_v34, %v173_v35  ;;  %v11641_v48 = vcombine.high %v176_v41, %v180_v42  ;;  %v11643_v49 = vcombine.high %v177_v44, %v181_v45  ;;  %v225_v33 = vld [vmem:[#allocation2 + $0x318] sm:$0xff]  ;;  %v236_v41 = vld [vmem:[#allocation2 + $0x370] sm:$0xff] }
 0x16a   :  { %v11642_v56 = vcombine.low %v177_v44, %v181_v45  ;;  %v229_v34 = vld [vmem:[#allocation2 + $0x338] sm:$0xff] }
 0x16b   :  { %v233_v42 = vld [vmem:[#allocation2 + $0x358] sm:$0xff] }
 0x16c   :  { %3400 = vmatpush1.bf16.msra.mxu0 %v12092_v54  ;;  %3572 = vmatpush1.bf16.msra.mxu1 %v12094_v57  ;;  %v189_v54 = vld [vmem:[#allocation2 + $0x1f8] sm:$0xff]  ;;  %v11649_v57 = vcombine.high %v184_v50, %v188_v51  ;;  %v244_v50 = vld [vmem:[#allocation2 + $0x3b0] sm:$0xff] }
 0x16d   :  { %3584 = vmatprep.subr.bf16.mxu0 %v11593_v59  ;;  %3756 = vmatprep.subr.bf16.mxu1 %v11595_v60  ;;  %v11651_v59 = vcombine.high %v185_v52, %v189_v54  ;;  %v192_v60 = vld [vmem:[#allocation2 + $0x210] sm:$0xff]  ;;  %v237_v44 = vld [vmem:[#allocation2 + $0x378] sm:$0xff] }
 0x16e   :  { %v11656_v9 = vcombine.low %v192_v60, %v196_v61  ;;  %v241_v51 = vld [vmem:[#allocation2 + $0x398] sm:$0xff] }
 0x16f   :  { %3402 = vmatmul.mubr.bf16.vlgmr.msra.gmra.mrb[0].mxu0 %v13671_v63  ;;  %3574 = vmatmul.mubr.bf16.vlgmr.msra.gmra.mrb[0].mxu1 %v13671_v63 }
 0x170   :  { %3585 = vmatpush1.bf16.msra.mxu0 %v11592_v2  ;;  %3757 = vmatpush1.bf16.msra.mxu1 %v11594_v3  ;;  %v11650_v2 = vcombine.low %v185_v52, %v189_v54  ;;  %v11657_v3 = vcombine.high %v192_v60, %v196_v61  ;;  %v245_v52 = vld [vmem:[#allocation2 + $0x3b8] sm:$0xff]  ;;  %v252_v60 = vld [vmem:[#allocation2 + $0x3f0] sm:$0xff] }
 0x171   :  { %3586 = vmatprep.subr.bf16.mxu0 %v11601_v4  ;;  %3758 = vmatprep.subr.bf16.mxu1 %v11603_v5  ;;  %v11659_v4 = vcombine.high %v193_v62, %v197_v0  ;;  %v200_v5 = vld [vmem:[#allocation2 + $0x250] sm:$0xff]  ;;  %v249_v61 = vld [vmem:[#allocation2 + $0x3d8] sm:$0xff] }
 0x172   :  { %3616 = vmatprep.mubr.bf16.mxu0 %v13601_v58  ;;  %3788 = vmatprep.mubr.bf16.mxu1 %v13601_v58  ;;  %v11627_v58 = vcombine.high %v161_v26, %v165_v28  ;;  %v11664_v18 = vcombine.low %v200_v5, %v204_v6  ;;  %v221_v26 = vld [vmem:[#allocation2 + $0x2f8] sm:$0xff] }
 0x174   :  { %3587 = vmatpush1.bf16.msra.mxu0 %v11600_v10  ;;  %3759 = vmatpush1.bf16.msra.mxu1 %v11602_v11  ;;  %v11658_v10 = vcombine.low %v193_v62, %v197_v0  ;;  %v11665_v11 = vcombine.high %v200_v5, %v204_v6  ;;  %v253_v62 = vld [vmem:[#allocation2 + $0x3f8] sm:$0xff]  ;;  %v260_v5 = vld [vmem:[#allocation2 + $0x430] sm:$0xff] }
 0x175   :  { %3588 = vmatprep.subr.bf16.mxu0 %v11609_v12  ;;  %3760 = vmatprep.subr.bf16.mxu1 %v11611_v13  ;;  %v11667_v12 = vcombine.high %v201_v7, %v205_v8  ;;  %v208_v13 = vld [vmem:[#allocation2 + $0x290] sm:$0xff]  ;;  %v257_v6 = vld [vmem:[#allocation2 + $0x418] sm:$0xff] }
 0x176   :  { %v11672_v28 = vcombine.low %v208_v13, %v212_v14 }
 0x178   :  { %3589 = vmatpush1.bf16.msra.mxu0 %v11608_v19  ;;  %3761 = vmatpush1.bf16.msra.mxu1 %v11610_v20  ;;  %v11666_v19 = vcombine.low %v201_v7, %v205_v8  ;;  %v11673_v20 = vcombine.high %v208_v13, %v212_v14  ;;  %v261_v7 = vld [vmem:[#allocation2 + $0x438] sm:$0xff]  ;;  %v268_v13 = vld [vmem:[#allocation2 + $0x470] sm:$0xff] }
 0x179   :  { %3590 = vmatprep.subr.bf16.mxu0 %v11617_v21  ;;  %3762 = vmatprep.subr.bf16.mxu1 %v11619_v22  ;;  %v11675_v21 = vcombine.high %v209_v16, %v213_v17  ;;  %v216_v22 = vld [vmem:[#allocation2 + $0x2d0] sm:$0xff]  ;;  %v265_v14 = vld [vmem:[#allocation2 + $0x458] sm:$0xff] }
 0x17a   :  { %v11680_v35 = vcombine.low %v216_v22, %v220_v23 }
 0x17c   :  { %3591 = vmatpush1.bf16.msra.mxu0 %v11616_v29  ;;  %3763 = vmatpush1.bf16.msra.mxu1 %v11618_v30  ;;  %v11674_v29 = vcombine.low %v209_v16, %v213_v17  ;;  %v11681_v30 = vcombine.high %v216_v22, %v220_v23  ;;  %v269_v16 = vld [vmem:[#allocation2 + $0x478] sm:$0xff]  ;;  %v276_v22 = vld [vmem:[#allocation2 + $0x4b0] sm:$0xff] }
 0x17d   :  { %3592 = vmatprep.subr.bf16.mxu0 %v11625_v31  ;;  %3764 = vmatprep.subr.bf16.mxu1 %v11627_v58  ;;  %v11683_v31 = vcombine.high %v217_v24, %v221_v26  ;;  %v224_v58 = vld [vmem:[#allocation2 + $0x310] sm:$0xff]  ;;  %v273_v23 = vld [vmem:[#allocation2 + $0x498] sm:$0xff] }
 0x17e   :  { %v11688_v45 = vcombine.low %v224_v58, %v228_v32 }
 0x180   :  { %3593 = vmatpush1.bf16.msra.mxu0 %v11624_v36  ;;  %3765 = vmatpush1.bf16.msra.mxu1 %v11626_v38  ;;  %v11682_v36 = vcombine.low %v217_v24, %v221_v26  ;;  %v11689_v38 = vcombine.high %v224_v58, %v228_v32  ;;  %v277_v24 = vld [vmem:[#allocation2 + $0x4b8] sm:$0xff]  ;;  %v284_v58 = vld [vmem:[#allocation2 + $0x4f0] sm:$0xff] }
 0x181   :  { %3594 = vmatprep.subr.bf16.mxu0 %v11633_v39  ;;  %3766 = vmatprep.subr.bf16.mxu1 %v11635_v40  ;;  %v11691_v39 = vcombine.high %v225_v33, %v229_v34  ;;  %v232_v40 = vld [vmem:[#allocation2 + $0x350] sm:$0xff]  ;;  %v281_v32 = vld [vmem:[#allocation2 + $0x4d8] sm:$0xff] }
 0x182   :  { %v11696_v54 = vcombine.low %v232_v40, %v236_v41 }
 0x184   :  { %3595 = vmatpush1.bf16.msra.mxu0 %v11632_v46  ;;  %3767 = vmatpush1.bf16.msra.mxu1 %v11634_v47  ;;  %v11690_v46 = vcombine.low %v225_v33, %v229_v34  ;;  %v11697_v47 = vcombine.high %v232_v40, %v236_v41  ;;  %v285_v33 = vld [vmem:[#allocation2 + $0x4f8] sm:$0xff] }
 0x185   :  { %3596 = vmatprep.subr.bf16.mxu0 %v11641_v48  ;;  %3768 = vmatprep.subr.bf16.mxu1 %v11643_v49  ;;  %v11699_v48 = vcombine.high %v233_v42, %v237_v44  ;;  %v240_v49 = vld [vmem:[#allocation2 + $0x390] sm:$0xff]  ;;  %v289_v40 = vld [vmem:[#allocation2 + $0x518] sm:$0xff] }
 0x186   :  { %v11704_v0 = vcombine.low %v240_v49, %v244_v50  ;;  %v293_v41 = vld [vmem:[#allocation2 + $0x538] sm:$0xff] }
 0x188   :  { %3597 = vmatpush1.bf16.msra.mxu0 %v11640_v55  ;;  %3769 = vmatpush1.bf16.msra.mxu1 %v11642_v56  ;;  %v11698_v55 = vcombine.low %v233_v42, %v237_v44  ;;  %v11705_v56 = vcombine.high %v240_v49, %v244_v50  ;;  %v11746_v44 = vcombine.low %v281_v32, %v285_v33  ;;  %v301_v49 = vld [vmem:[#allocation2 + $0x578] sm:$0xff] }
 0x189   :  { %3598 = vmatprep.subr.bf16.mxu0 %v11649_v57  ;;  %3770 = vmatprep.subr.bf16.mxu1 %v11651_v59  ;;  %v11707_v57 = vcombine.high %v241_v51, %v245_v52  ;;  %v248_v59 = vld [vmem:[#allocation2 + $0x3d0] sm:$0xff] }
 0x18a   :  { %v11712_v8 = vcombine.low %v248_v59, %v252_v60 }
 0x18c   :  { %3599 = vmatpush1.bf16.msra.mxu0 %v11648_v1  ;;  %3771 = vmatpush1.bf16.msra.mxu1 %v11650_v2  ;;  %v11706_v1 = vcombine.low %v241_v51, %v245_v52  ;;  %v11713_v2 = vcombine.high %v248_v59, %v252_v60  ;;  %v11754_v51 = vcombine.low %v289_v40, %v293_v41  ;;  %v309_v59 = vld [vmem:[#allocation2 + $0x5b8] sm:$0xff] }
 0x18d   :  { %3600 = vmatprep.subr.bf16.mxu0 %v11657_v3  ;;  %3772 = vmatprep.subr.bf16.mxu1 %v11659_v4  ;;  %v11715_v3 = vcombine.high %v249_v61, %v253_v62  ;;  %v256_v4 = vld [vmem:[#allocation2 + $0x410] sm:$0xff] }
 0x18e   :  { %v11720_v17 = vcombine.low %v256_v4, %v260_v5 }
 0x190   :  { %3601 = vmatpush1.bf16.msra.mxu0 %v11656_v9  ;;  %3773 = vmatpush1.bf16.msra.mxu1 %v11658_v10  ;;  %v11714_v9 = vcombine.low %v249_v61, %v253_v62  ;;  %v11721_v10 = vcombine.high %v256_v4, %v260_v5  ;;  %v317_v4 = vld [vmem:[#allocation2 + $0x5f8] sm:$0xff] }
 0x191   :  { %3602 = vmatprep.subr.bf16.mxu0 %v11665_v11  ;;  %3774 = vmatprep.subr.bf16.mxu1 %v11667_v12  ;;  %v11723_v11 = vcombine.high %v257_v6, %v261_v7  ;;  %v264_v12 = vld [vmem:[#allocation2 + $0x450] sm:$0xff] }
 0x192   :  { %v11728_v26 = vcombine.low %v264_v12, %v268_v13 }
 0x194   :  { %3603 = vmatpush1.bf16.msra.mxu0 %v11664_v18  ;;  %3775 = vmatpush1.bf16.msra.mxu1 %v11666_v19  ;;  %v11722_v18 = vcombine.low %v257_v6, %v261_v7  ;;  %v11729_v19 = vcombine.high %v264_v12, %v268_v13  ;;  %v325_v12 = vld [vmem:[#allocation2 + $0x638] sm:$0xff] }
 0x195   :  { %3604 = vmatprep.subr.bf16.mxu0 %v11673_v20  ;;  %3776 = vmatprep.subr.bf16.mxu1 %v11675_v21  ;;  %v11731_v20 = vcombine.high %v265_v14, %v269_v16  ;;  %v272_v21 = vld [vmem:[#allocation2 + $0x490] sm:$0xff] }
 0x196   :  { %v11736_v34 = vcombine.low %v272_v21, %v276_v22 }
 0x198   :  { %3605 = vmatpush1.bf16.msra.mxu0 %v11672_v28  ;;  %3777 = vmatpush1.bf16.msra.mxu1 %v11674_v29  ;;  %v11730_v28 = vcombine.low %v265_v14, %v269_v16  ;;  %v11737_v29 = vcombine.high %v272_v21, %v276_v22  ;;  %v333_v21 = vld [vmem:[#allocation2 + $0x678] sm:$0xff] }
 0x199   :  { %3606 = vmatprep.subr.bf16.mxu0 %v11681_v30  ;;  %3778 = vmatprep.subr.bf16.mxu1 %v11683_v31  ;;  %v11739_v30 = vcombine.high %v273_v23, %v277_v24  ;;  %v280_v31 = vld [vmem:[#allocation2 + $0x4d0] sm:$0xff] }
 0x19a   :  { %v11744_v42 = vcombine.low %v280_v31, %v284_v58 }
 0x19c   :  { %3607 = vmatpush1.bf16.msra.mxu0 %v11680_v35  ;;  %3779 = vmatpush1.bf16.msra.mxu1 %v11682_v36  ;;  %v11745_v35 = vcombine.high %v280_v31, %v284_v58  ;;  %v11747_v36 = vcombine.high %v281_v32, %v285_v33  ;;  %v341_v31 = vld [vmem:[#allocation2 + $0x6b8] sm:$0xff] }
 0x19d   :  { %3608 = vmatprep.subr.bf16.mxu0 %v11689_v38  ;;  %3780 = vmatprep.subr.bf16.mxu1 %v11691_v39  ;;  %v288_v38 = vld [vmem:[#allocation2 + $0x510] sm:$0xff] }
 0x19e   :  { %v292_v39 = vld [vmem:[#allocation2 + $0x530] sm:$0xff] }
 0x19f   :  { %v11752_v50 = vcombine.low %v288_v38, %v292_v39 }
 0x1a0   :  { %3609 = vmatpush1.bf16.msra.mxu0 %v11688_v45  ;;  %3781 = vmatpush1.bf16.msra.mxu1 %v11690_v46  ;;  %v11753_v45 = vcombine.high %v288_v38, %v292_v39  ;;  %v296_v46 = vld [vmem:[#allocation2 + $0x550] sm:$0xff]  ;;  %v349_v38 = vld [vmem:[#allocation2 + $0x6f8] sm:$0xff] }
 0x1a1   :  { %3610 = vmatprep.subr.bf16.mxu0 %v11697_v47  ;;  %3782 = vmatprep.subr.bf16.mxu1 %v11699_v48  ;;  %v300_v47 = vld [vmem:[#allocation2 + $0x570] sm:$0xff]  ;;  %v297_v48 = vld [vmem:[#allocation2 + $0x558] sm:$0xff] }
 0x1a2   :  { %v11761_v52 = vcombine.high %v296_v46, %v300_v47  ;;  %v11760_v60 = vcombine.low %v296_v46, %v300_v47  ;;  %v11762_v61 = vcombine.low %v297_v48, %v301_v49  ;;  %v357_v46 = vld [vmem:[#allocation2 + $0x738] sm:$0xff] }
 0x1a4   :  { %3611 = vmatpush1.bf16.msra.mxu0 %v11696_v54  ;;  %3783 = vmatpush1.bf16.msra.mxu1 %v11698_v55  ;;  %v11763_v54 = vcombine.high %v297_v48, %v301_v49  ;;  %v304_v55 = vld [vmem:[#allocation2 + $0x590] sm:$0xff] }
 0x1a5   :  { %3612 = vmatprep.subr.bf16.mxu0 %v11705_v56  ;;  %3784 = vmatprep.subr.bf16.mxu1 %v11707_v57  ;;  %v308_v56 = vld [vmem:[#allocation2 + $0x5b0] sm:$0xff]  ;;  %v305_v57 = vld [vmem:[#allocation2 + $0x598] sm:$0xff] }
 0x1a6   :  { %v11769_v62 = vcombine.high %v304_v55, %v308_v56  ;;  %v11768_v5 = vcombine.low %v304_v55, %v308_v56  ;;  %v11770_v6 = vcombine.low %v305_v57, %v309_v59  ;;  %v365_v55 = vld [vmem:[#allocation2 + $0x778] sm:$0xff] }
 0x1a8   :  { %3613 = vmatpush1.bf16.msra.mxu0 %v11704_v0  ;;  %3785 = vmatpush1.bf16.msra.mxu1 %v11706_v1  ;;  %v11771_v0 = vcombine.high %v305_v57, %v309_v59  ;;  %v312_v1 = vld [vmem:[#allocation2 + $0x5d0] sm:$0xff] }
 0x1a9   :  { %3614 = vmatprep.subr.bf16.mxu0 %v11713_v2  ;;  %3786 = vmatprep.subr.bf16.mxu1 %v11715_v3  ;;  %v316_v2 = vld [vmem:[#allocation2 + $0x5f0] sm:$0xff]  ;;  %v313_v3 = vld [vmem:[#allocation2 + $0x5d8] sm:$0xff] }
 0x1aa   :  { %v11777_v7 = vcombine.high %v312_v1, %v316_v2  ;;  %v11776_v13 = vcombine.low %v312_v1, %v316_v2  ;;  %v11778_v14 = vcombine.low %v313_v3, %v317_v4  ;;  %v373_v1 = vld [vmem:[#allocation2 + $0x7b8] sm:$0xff] }
 0x1ac   :  { %3615 = vmatpush1.bf16.msra.mxu0 %v11712_v8  ;;  %3787 = vmatpush1.bf16.msra.mxu1 %v11714_v9  ;;  %v11779_v8 = vcombine.high %v313_v3, %v317_v4  ;;  %v320_v9 = vld [vmem:[#allocation2 + $0x610] sm:$0xff] }
 0x1ad   :  { %3627 = vmatprep.subr.bf16.mxu0 %v11721_v10  ;;  %3799 = vmatprep.subr.bf16.mxu1 %v11723_v11  ;;  %v324_v10 = vld [vmem:[#allocation2 + $0x630] sm:$0xff]  ;;  %v321_v11 = vld [vmem:[#allocation2 + $0x618] sm:$0xff] }
 0x1ae   :  { %v11785_v16 = vcombine.high %v320_v9, %v324_v10  ;;  %v11784_v22 = vcombine.low %v320_v9, %v324_v10  ;;  %v381_v9 = vld [vmem:[#allocation2 + $0x7f8] sm:$0xff] }
 0x1af   :  { %3617 = vmatmul.mubr.bf16.vlgmr.msra.gmra.mrb[4].mxu0 %v13611_v15  ;;  %3789 = vmatmul.mubr.bf16.vlgmr.msra.gmra.mrb[4].mxu1 %v13611_v15  ;;  %v11738_v15 = vcombine.low %v273_v23, %v277_v24  ;;  %v11786_v23 = vcombine.low %v321_v11, %v325_v12 }
 0x1b0   :  { %3628 = vmatpush1.bf16.msra.mxu0 %v11720_v17  ;;  %3800 = vmatpush1.bf16.msra.mxu1 %v11722_v18  ;;  %v11787_v17 = vcombine.high %v321_v11, %v325_v12  ;;  %v328_v18 = vld [vmem:[#allocation2 + $0x650] sm:$0xff] }
 0x1b1   :  { %3629 = vmatprep.subr.bf16.mxu0 %v11729_v19  ;;  %3801 = vmatprep.subr.bf16.mxu1 %v11731_v20  ;;  %v332_v19 = vld [vmem:[#allocation2 + $0x670] sm:$0xff]  ;;  %v329_v20 = vld [vmem:[#allocation2 + $0x658] sm:$0xff] }
 0x1b2   :  { %3659 = vmatprep.mubr.bf16.mxu0 %v13619_v25  ;;  %3831 = vmatprep.mubr.bf16.mxu1 %v13619_v25  ;;  %v11755_v25 = vcombine.high %v289_v40, %v293_v41  ;;  %v11793_v24 = vcombine.high %v328_v18, %v332_v19  ;;  %v11792_v58 = vcombine.low %v328_v18, %v332_v19  ;;  %v389_v18 = vld [vmem:[#allocation2 + $0x838] sm:$0xff] }
 0x1b3   :  { %v11794_v32 = vcombine.low %v329_v20, %v333_v21 }
 0x1b4   :  { %3630 = vmatpush1.bf16.msra.mxu0 %v11728_v26  ;;  %3802 = vmatpush1.bf16.msra.mxu1 %v11730_v28  ;;  %v11795_v26 = vcombine.high %v329_v20, %v333_v21  ;;  %v336_v28 = vld [vmem:[#allocation2 + $0x690] sm:$0xff] }
 0x1b5   :  { %3631 = vmatprep.subr.bf16.mxu0 %v11737_v29  ;;  %3803 = vmatprep.subr.bf16.mxu1 %v11739_v30  ;;  %v340_v29 = vld [vmem:[#allocation2 + $0x6b0] sm:$0xff]  ;;  %v337_v30 = vld [vmem:[#allocation2 + $0x698] sm:$0xff] }
 0x1b6   :  { %v11801_v33 = vcombine.high %v336_v28, %v340_v29  ;;  %v11800_v39 = vcombine.low %v336_v28, %v340_v29  ;;  %v11802_v40 = vcombine.low %v337_v30, %v341_v31  ;;  %v397_v28 = vld [vmem:[#allocation2 + $0x878] sm:$0xff] }
 0x1b8   :  { %3632 = vmatpush1.bf16.msra.mxu0 %v11736_v34  ;;  %3804 = vmatpush1.bf16.msra.mxu1 %v11738_v15  ;;  %v11803_v34 = vcombine.high %v337_v30, %v341_v31  ;;  %v344_v15 = vld [vmem:[#allocation2 + $0x6d0] sm:$0xff] }
 0x1b9   :  { %3633 = vmatprep.subr.bf16.mxu0 %v11745_v35  ;;  %3805 = vmatprep.subr.bf16.mxu1 %v11747_v36  ;;  %v348_v35 = vld [vmem:[#allocation2 + $0x6f0] sm:$0xff]  ;;  %v345_v36 = vld [vmem:[#allocation2 + $0x6d8] sm:$0xff] }
 0x1ba   :  { %v11809_v41 = vcombine.high %v344_v15, %v348_v35  ;;  %v11808_v47 = vcombine.low %v344_v15, %v348_v35  ;;  %v11810_v48 = vcombine.low %v345_v36, %v349_v38  ;;  %v405_v15 = vld [vmem:[#allocation2 + $0x8b8] sm:$0xff] }
 0x1bc   :  { %3634 = vmatpush1.bf16.msra.mxu0 %v11744_v42  ;;  %3806 = vmatpush1.bf16.msra.mxu1 %v11746_v44  ;;  %v11811_v42 = vcombine.high %v345_v36, %v349_v38  ;;  %v352_v44 = vld [vmem:[#allocation2 + $0x710] sm:$0xff] }
 0x1bd   :  { %3635 = vmatprep.subr.bf16.mxu0 %v11753_v45  ;;  %3807 = vmatprep.subr.bf16.mxu1 %v11755_v25  ;;  %v356_v45 = vld [vmem:[#allocation2 + $0x730] sm:$0xff]  ;;  %v353_v25 = vld [vmem:[#allocation2 + $0x718] sm:$0xff] }
 0x1be   :  { %v11817_v49 = vcombine.high %v352_v44, %v356_v45  ;;  %v11816_v56 = vcombine.low %v352_v44, %v356_v45  ;;  %v11818_v57 = vcombine.low %v353_v25, %v357_v46  ;;  %v413_v44 = vld [vmem:[#allocation2 + $0x8f8] sm:$0xff] }
 0x1c0   :  { %3636 = vmatpush1.bf16.msra.mxu0 %v11752_v50  ;;  %3808 = vmatpush1.bf16.msra.mxu1 %v11754_v51  ;;  %v11819_v50 = vcombine.high %v353_v25, %v357_v46  ;;  %v360_v51 = vld [vmem:[#allocation2 + $0x750] sm:$0xff] }
 0x1c1   :  { %3637 = vmatprep.subr.bf16.mxu0 %v11761_v52  ;;  %3809 = vmatprep.subr.bf16.mxu1 %v11763_v54  ;;  %v364_v52 = vld [vmem:[#allocation2 + $0x770] sm:$0xff]  ;;  %v361_v54 = vld [vmem:[#allocation2 + $0x758] sm:$0xff] }
 0x1c2   :  { %v11825_v59 = vcombine.high %v360_v51, %v364_v52  ;;  %v11824_v2 = vcombine.low %v360_v51, %v364_v52  ;;  %v11826_v3 = vcombine.low %v361_v54, %v365_v55 }
 0x1c4   :  { %3638 = vmatpush1.bf16.msra.mxu0 %v11760_v60  ;;  %3810 = vmatpush1.bf16.msra.mxu1 %v11762_v61  ;;  %v11827_v60 = vcombine.high %v361_v54, %v365_v55  ;;  %v368_v61 = vld [vmem:[#allocation2 + $0x790] sm:$0xff] }
 0x1c5   :  { %3639 = vmatprep.subr.bf16.mxu0 %v11769_v62  ;;  %3811 = vmatprep.subr.bf16.mxu1 %v11771_v0  ;;  %v372_v62 = vld [vmem:[#allocation2 + $0x7b0] sm:$0xff]  ;;  %v369_v0 = vld [vmem:[#allocation2 + $0x798] sm:$0xff] }
 0x1c6   :  { %v11833_v4 = vcombine.high %v368_v61, %v372_v62  ;;  %v11832_v10 = vcombine.low %v368_v61, %v372_v62  ;;  %v11834_v11 = vcombine.low %v369_v0, %v373_v1  ;;  %v424_v55 = vld [vmem:[#allocation2 + $0x950] sm:$0xff] }
 0x1c8   :  { %3640 = vmatpush1.bf16.msra.mxu0 %v11768_v5  ;;  %3812 = vmatpush1.bf16.msra.mxu1 %v11770_v6  ;;  %v11835_v5 = vcombine.high %v369_v0, %v373_v1  ;;  %v376_v6 = vld [vmem:[#allocation2 + $0x7d0] sm:$0xff] }
 0x1c9   :  { %3641 = vmatprep.subr.bf16.mxu0 %v11777_v7  ;;  %3813 = vmatprep.subr.bf16.mxu1 %v11779_v8  ;;  %v380_v7 = vld [vmem:[#allocation2 + $0x7f0] sm:$0xff]  ;;  %v377_v8 = vld [vmem:[#allocation2 + $0x7d8] sm:$0xff] }
 0x1ca   :  { %v11841_v12 = vcombine.high %v376_v6, %v380_v7  ;;  %v11840_v19 = vcombine.low %v376_v6, %v380_v7  ;;  %v11842_v20 = vcombine.low %v377_v8, %v381_v9  ;;  %v432_v1 = vld [vmem:[#allocation2 + $0x990] sm:$0xff] }
 0x1cc   :  { %3642 = vmatpush1.bf16.msra.mxu0 %v11776_v13  ;;  %3814 = vmatpush1.bf16.msra.mxu1 %v11778_v14  ;;  %v11843_v13 = vcombine.high %v377_v8, %v381_v9  ;;  %v384_v14 = vld [vmem:[#allocation2 + $0x810] sm:$0xff] }
 0x1cd   :  { %3643 = vmatprep.subr.bf16.mxu0 %v11785_v16  ;;  %3815 = vmatprep.subr.bf16.mxu1 %v11787_v17  ;;  %v388_v16 = vld [vmem:[#allocation2 + $0x830] sm:$0xff]  ;;  %v385_v17 = vld [vmem:[#allocation2 + $0x818] sm:$0xff] }
 0x1ce   :  { %v11849_v21 = vcombine.high %v384_v14, %v388_v16  ;;  %v11848_v29 = vcombine.low %v384_v14, %v388_v16  ;;  %v11850_v30 = vcombine.low %v385_v17, %v389_v18  ;;  %v440_v9 = vld [vmem:[#allocation2 + $0x9d0] sm:$0xff] }
 0x1d0   :  { %3644 = vmatpush1.bf16.msra.mxu0 %v11784_v22  ;;  %3816 = vmatpush1.bf16.msra.mxu1 %v11786_v23  ;;  %v11851_v22 = vcombine.high %v385_v17, %v389_v18  ;;  %v392_v23 = vld [vmem:[#allocation2 + $0x850] sm:$0xff] }
 0x1d1   :  { %3645 = vmatprep.subr.bf16.mxu0 %v11793_v24  ;;  %3817 = vmatprep.subr.bf16.mxu1 %v11795_v26  ;;  %v396_v24 = vld [vmem:[#allocation2 + $0x870] sm:$0xff]  ;;  %v393_v26 = vld [vmem:[#allocation2 + $0x858] sm:$0xff] }
 0x1d2   :  { %v11857_v31 = vcombine.high %v392_v23, %v396_v24  ;;  %v11856_v35 = vcombine.low %v392_v23, %v396_v24  ;;  %v11858_v36 = vcombine.low %v393_v26, %v397_v28  ;;  %v448_v18 = vld [vmem:[#allocation2 + $0xa10] sm:$0xff] }
 0x1d4   :  { %3646 = vmatpush1.bf16.msra.mxu0 %v11792_v58  ;;  %3818 = vmatpush1.bf16.msra.mxu1 %v11794_v32  ;;  %v11859_v58 = vcombine.high %v393_v26, %v397_v28  ;;  %v400_v32 = vld [vmem:[#allocation2 + $0x890] sm:$0xff] }
 0x1d5   :  { %3647 = vmatprep.subr.bf16.mxu0 %v11801_v33  ;;  %3819 = vmatprep.subr.bf16.mxu1 %v11803_v34  ;;  %v404_v33 = vld [vmem:[#allocation2 + $0x8b0] sm:$0xff]  ;;  %v401_v34 = vld [vmem:[#allocation2 + $0x898] sm:$0xff] }
 0x1d6   :  { %v11865_v38 = vcombine.high %v400_v32, %v404_v33  ;;  %v11864_v45 = vcombine.low %v400_v32, %v404_v33  ;;  %v456_v28 = vld [vmem:[#allocation2 + $0xa50] sm:$0xff] }
 0x1d8   :  { %3648 = vmatpush1.bf16.msra.mxu0 %v11800_v39  ;;  %3820 = vmatpush1.bf16.msra.mxu1 %v11802_v40  ;;  %v11867_v39 = vcombine.high %v401_v34, %v405_v15  ;;  %v408_v40 = vld [vmem:[#allocation2 + $0x8d0] sm:$0xff] }
 0x1d9   :  { %3649 = vmatprep.subr.bf16.mxu0 %v11809_v41  ;;  %3821 = vmatprep.subr.bf16.mxu1 %v11811_v42  ;;  %v412_v41 = vld [vmem:[#allocation2 + $0x8f0] sm:$0xff]  ;;  %v409_v42 = vld [vmem:[#allocation2 + $0x8d8] sm:$0xff] }
 0x1da   :  { %v11873_v25 = vcombine.high %v408_v40, %v412_v41  ;;  %v11875_v46 = vcombine.high %v409_v42, %v413_v44  ;;  %v11872_v51 = vcombine.low %v408_v40, %v412_v41  ;;  %v11874_v52 = vcombine.low %v409_v42, %v413_v44  ;;  %v472_v44 = vld [vmem:[#allocation2 + $0xad0] sm:$0xff] }
 0x1dc   :  { %3650 = vmatpush1.bf16.msra.mxu0 %v11808_v47  ;;  %3822 = vmatpush1.bf16.msra.mxu1 %v11810_v48  ;;  %v416_v47 = vld [vmem:[#allocation2 + $0x910] sm:$0xff] }
 0x1dd   :  { %3651 = vmatprep.subr.bf16.mxu0 %v11817_v49  ;;  %3823 = vmatprep.subr.bf16.mxu1 %v11819_v50  ;;  %v420_v48 = vld [vmem:[#allocation2 + $0x930] sm:$0xff]  ;;  %v417_v49 = vld [vmem:[#allocation2 + $0x918] sm:$0xff] }
 0x1de   :  { %v421_v50 = vld [vmem:[#allocation2 + $0x938] sm:$0xff]  ;;  %v11881_v54 = vcombine.high %v416_v47, %v420_v48 }
 0x1df   :  { %v11882_v61 = vcombine.low %v417_v49, %v421_v50 }
 0x1e0   :  { %3652 = vmatpush1.bf16.msra.mxu0 %v11816_v56  ;;  %3824 = vmatpush1.bf16.msra.mxu1 %v11818_v57  ;;  %v428_v56 = vld [vmem:[#allocation2 + $0x970] sm:$0xff]  ;;  %v425_v57 = vld [vmem:[#allocation2 + $0x958] sm:$0xff] }
 0x1e1   :  { %3653 = vmatprep.subr.bf16.mxu0 %v11825_v59  ;;  %3825 = vmatprep.subr.bf16.mxu1 %v11827_v60  ;;  %v429_v59 = vld [vmem:[#allocation2 + $0x978] sm:$0xff]  ;;  %v11880_v60 = vcombine.low %v416_v47, %v420_v48  ;;  %v11889_v62 = vcombine.high %v424_v55, %v428_v56 }
 0x1e2   :  { %v11891_v0 = vcombine.high %v425_v57, %v429_v59  ;;  %v11890_v6 = vcombine.low %v425_v57, %v429_v59  ;;  %v488_v59 = vld [vmem:[#allocation2 + $0xb50] sm:$0xff] }
 0x1e4   :  { %3654 = vmatpush1.bf16.msra.mxu0 %v11824_v2  ;;  %3826 = vmatpush1.bf16.msra.mxu1 %v11826_v3  ;;  %v436_v2 = vld [vmem:[#allocation2 + $0x9b0] sm:$0xff]  ;;  %v433_v3 = vld [vmem:[#allocation2 + $0x998] sm:$0xff] }
 0x1e5   :  { %3655 = vmatprep.subr.bf16.mxu0 %v11833_v4  ;;  %3827 = vmatprep.subr.bf16.mxu1 %v11835_v5  ;;  %v437_v4 = vld [vmem:[#allocation2 + $0x9b8] sm:$0xff]  ;;  %v11888_v5 = vcombine.low %v424_v55, %v428_v56  ;;  %v11897_v7 = vcombine.high %v432_v1, %v436_v2 }
 0x1e6   :  { %v11899_v8 = vcombine.high %v433_v3, %v437_v4  ;;  %v11898_v14 = vcombine.low %v433_v3, %v437_v4  ;;  %v496_v4 = vld [vmem:[#allocation2 + $0xb90] sm:$0xff] }
 0x1e8   :  { %3656 = vmatpush1.bf16.msra.mxu0 %v11832_v10  ;;  %3828 = vmatpush1.bf16.msra.mxu1 %v11834_v11  ;;  %v444_v10 = vld [vmem:[#allocation2 + $0x9f0] sm:$0xff]  ;;  %v441_v11 = vld [vmem:[#allocation2 + $0x9d8] sm:$0xff] }
 0x1e9   :  { %3657 = vmatprep.subr.bf16.mxu0 %v11841_v12  ;;  %3829 = vmatprep.subr.bf16.mxu1 %v11843_v13  ;;  %v445_v12 = vld [vmem:[#allocation2 + $0x9f8] sm:$0xff]  ;;  %v11896_v13 = vcombine.low %v432_v1, %v436_v2  ;;  %v11905_v16 = vcombine.high %v440_v9, %v444_v10 }
 0x1ea   :  { %v11907_v17 = vcombine.high %v441_v11, %v445_v12  ;;  %v11906_v23 = vcombine.low %v441_v11, %v445_v12  ;;  %v504_v12 = vld [vmem:[#allocation2 + $0xbd0] sm:$0xff] }
 0x1ec   :  { %3658 = vmatpush1.bf16.msra.mxu0 %v11840_v19  ;;  %3830 = vmatpush1.bf16.msra.mxu1 %v11842_v20  ;;  %v452_v19 = vld [vmem:[#allocation2 + $0xa30] sm:$0xff]  ;;  %v449_v20 = vld [vmem:[#allocation2 + $0xa18] sm:$0xff] }
 0x1ed   :  { %3670 = vmatprep.subr.bf16.mxu0 %v11849_v21  ;;  %3842 = vmatprep.subr.bf16.mxu1 %v11851_v22  ;;  %v453_v21 = vld [vmem:[#allocation2 + $0xa38] sm:$0xff]  ;;  %v11904_v22 = vcombine.low %v440_v9, %v444_v10  ;;  %v11913_v24 = vcombine.high %v448_v18, %v452_v19 }
 0x1ee   :  { %v11915_v26 = vcombine.high %v449_v20, %v453_v21  ;;  %v11914_v32 = vcombine.low %v449_v20, %v453_v21  ;;  %v512_v21 = vld [vmem:[#allocation2 + $0xc10] sm:$0xff] }
 0x1ef   :  { %3660 = vmatmul.mubr.bf16.vlgmr.msra.gmra.mrb[4].mxu0 %v13631_v27  ;;  %3832 = vmatmul.mubr.bf16.vlgmr.msra.gmra.mrb[4].mxu1 %v13631_v27  ;;  %v11866_v27 = vcombine.low %v401_v34, %v405_v15  ;;  %v464_v15 = vld [vmem:[#allocation2 + $0xa90] sm:$0xff] }
 0x1f0   :  { %3671 = vmatpush1.bf16.msra.mxu0 %v11848_v29  ;;  %3843 = vmatpush1.bf16.msra.mxu1 %v11850_v30  ;;  %v460_v29 = vld [vmem:[#allocation2 + $0xa70] sm:$0xff]  ;;  %v457_v30 = vld [vmem:[#allocation2 + $0xa58] sm:$0xff] }
 0x1f1   :  { %3672 = vmatprep.subr.bf16.mxu0 %v11857_v31  ;;  %3844 = vmatprep.subr.bf16.mxu1 %v11859_v58  ;;  %v461_v31 = vld [vmem:[#allocation2 + $0xa78] sm:$0xff]  ;;  %v11912_v58 = vcombine.low %v448_v18, %v452_v19  ;;  %v11921_v33 = vcombine.high %v456_v28, %v460_v29 }
 0x1f2   :  { %3702 = vmatprep.mubr.bf16.mxu0 %v13639_v37  ;;  %3874 = vmatprep.mubr.bf16.mxu1 %v13639_v37  ;;  %v11883_v37 = vcombine.high %v417_v49, %v421_v50  ;;  %v11923_v34 = vcombine.high %v457_v30, %v461_v31  ;;  %v11922_v40 = vcombine.low %v457_v30, %v461_v31  ;;  %v480_v50 = vld [vmem:[#allocation2 + $0xb10] sm:$0xff] }
 0x1f3   :  { %v520_v31 = vld [vmem:[#allocation2 + $0xc50] sm:$0xff] }
 0x1f4   :  { %3673 = vmatpush1.bf16.msra.mxu0 %v11856_v35  ;;  %3845 = vmatpush1.bf16.msra.mxu1 %v11858_v36  ;;  %v468_v35 = vld [vmem:[#allocation2 + $0xab0] sm:$0xff]  ;;  %v465_v36 = vld [vmem:[#allocation2 + $0xa98] sm:$0xff] }
 0x1f5   :  { %3674 = vmatprep.subr.bf16.mxu0 %v11865_v38  ;;  %3846 = vmatprep.subr.bf16.mxu1 %v11867_v39  ;;  %v469_v38 = vld [vmem:[#allocation2 + $0xab8] sm:$0xff]  ;;  %v11920_v39 = vcombine.low %v456_v28, %v460_v29  ;;  %v11929_v41 = vcombine.high %v464_v15, %v468_v35 }
 0x1f6   :  { %v11931_v42 = vcombine.high %v465_v36, %v469_v38  ;;  %v11930_v47 = vcombine.low %v465_v36, %v469_v38  ;;  %v528_v38 = vld [vmem:[#allocation2 + $0xc90] sm:$0xff] }
 0x1f8   :  { %3675 = vmatpush1.bf16.msra.mxu0 %v11864_v45  ;;  %3847 = vmatpush1.bf16.msra.mxu1 %v11866_v27  ;;  %v476_v45 = vld [vmem:[#allocation2 + $0xaf0] sm:$0xff]  ;;  %v473_v27 = vld [vmem:[#allocation2 + $0xad8] sm:$0xff] }
 0x1f9   :  { %3676 = vmatprep.subr.bf16.mxu0 %v11873_v25  ;;  %3848 = vmatprep.subr.bf16.mxu1 %v11875_v46  ;;  %v477_v25 = vld [vmem:[#allocation2 + $0xaf8] sm:$0xff]  ;;  %v11928_v46 = vcombine.low %v464_v15, %v468_v35  ;;  %v11937_v48 = vcombine.high %v472_v44, %v476_v45 }
 0x1fa   :  { %v11939_v49 = vcombine.high %v473_v27, %v477_v25  ;;  %v11938_v55 = vcombine.low %v473_v27, %v477_v25  ;;  %v536_v25 = vld [vmem:[#allocation2 + $0xcd0] sm:$0xff] }
 0x1fc   :  { %3677 = vmatpush1.bf16.msra.mxu0 %v11872_v51  ;;  %3849 = vmatpush1.bf16.msra.mxu1 %v11874_v52  ;;  %v484_v51 = vld [vmem:[#allocation2 + $0xb30] sm:$0xff]  ;;  %v481_v52 = vld [vmem:[#allocation2 + $0xb18] sm:$0xff] }
 0x1fd   :  { %3678 = vmatprep.subr.bf16.mxu0 %v11881_v54  ;;  %3850 = vmatprep.subr.bf16.mxu1 %v11883_v37  ;;  %v485_v54 = vld [vmem:[#allocation2 + $0xb38] sm:$0xff]  ;;  %v11936_v37 = vcombine.low %v472_v44, %v476_v45  ;;  %v11945_v56 = vcombine.high %v480_v50, %v484_v51 }
 0x1fe   :  { %v11947_v57 = vcombine.high %v481_v52, %v485_v54  ;;  %v11946_v1 = vcombine.low %v481_v52, %v485_v54  ;;  %v544_v54 = vld [vmem:[#allocation2 + $0xd10] sm:$0xff] }
 0x200   :  { %3679 = vmatpush1.bf16.msra.mxu0 %v11880_v60  ;;  %3851 = vmatpush1.bf16.msra.mxu1 %v11882_v61  ;;  %v492_v60 = vld [vmem:[#allocation2 + $0xb70] sm:$0xff]  ;;  %v489_v61 = vld [vmem:[#allocation2 + $0xb58] sm:$0xff] }
 0x201   :  { %3680 = vmatprep.subr.bf16.mxu0 %v11889_v62  ;;  %3852 = vmatprep.subr.bf16.mxu1 %v11891_v0  ;;  %v493_v62 = vld [vmem:[#allocation2 + $0xb78] sm:$0xff]  ;;  %v11944_v0 = vcombine.low %v480_v50, %v484_v51  ;;  %v11953_v2 = vcombine.high %v488_v59, %v492_v60  ;;  %v640_v51 = vlaneseq }
 0x202   :  { %v11955_v3 = vcombine.high %v489_v61, %v493_v62  ;;  %v11954_v9 = vcombine.low %v489_v61, %v493_v62  ;;  %v552_v62 = vld [vmem:[#allocation2 + $0xd50] sm:$0xff] }
 0x204   :  { %3681 = vmatpush1.bf16.msra.mxu0 %v11888_v5  ;;  %3853 = vmatpush1.bf16.msra.mxu1 %v11890_v6  ;;  %v500_v5 = vld [vmem:[#allocation2 + $0xbb0] sm:$0xff]  ;;  %v497_v6 = vld [vmem:[#allocation2 + $0xb98] sm:$0xff] }
 0x205   :  { %3682 = vmatprep.subr.bf16.mxu0 %v11897_v7  ;;  %3854 = vmatprep.subr.bf16.mxu1 %v11899_v8  ;;  %v501_v7 = vld [vmem:[#allocation2 + $0xbb8] sm:$0xff]  ;;  %v11952_v8 = vcombine.low %v488_v59, %v492_v60  ;;  %v11961_v10 = vcombine.high %v496_v4, %v500_v5 }
 0x206   :  { %v11963_v11 = vcombine.high %v497_v6, %v501_v7  ;;  %v11962_v18 = vcombine.low %v497_v6, %v501_v7  ;;  %v638_v7 = vld [vmem:[#allocation4] sm:$0xff] }
 0x208   :  { %3683 = vmatpush1.bf16.msra.mxu0 %v11896_v13  ;;  %3855 = vmatpush1.bf16.msra.mxu1 %v11898_v14  ;;  %v508_v13 = vld [vmem:[#allocation2 + $0xbf0] sm:$0xff]  ;;  %v505_v14 = vld [vmem:[#allocation2 + $0xbd8] sm:$0xff] }
 0x209   :  { %3684 = vmatprep.subr.bf16.mxu0 %v11905_v16  ;;  %3856 = vmatprep.subr.bf16.mxu1 %v11907_v17  ;;  %v509_v16 = vld [vmem:[#allocation2 + $0xbf8] sm:$0xff]  ;;  %v11960_v17 = vcombine.low %v496_v4, %v500_v5  ;;  %v11969_v19 = vcombine.high %v504_v12, %v508_v13 }
 0x20a   :  { %v11971_v20 = vcombine.high %v505_v14, %v509_v16  ;;  %v11970_v28 = vcombine.low %v505_v14, %v509_v16  ;;  %v561_v14 = vld [vmem:[#allocation2 + $0xd98] sm:$0xff] }
 0x20b   :  { %v565_v16 = vld [vmem:[#allocation2 + $0xdb8] sm:$0xff] }
 0x20c   :  { %3685 = vmatpush1.bf16.msra.mxu0 %v11904_v22  ;;  %3857 = vmatpush1.bf16.msra.mxu1 %v11906_v23  ;;  %v516_v22 = vld [vmem:[#allocation2 + $0xc30] sm:$0xff]  ;;  %v513_v23 = vld [vmem:[#allocation2 + $0xc18] sm:$0xff] }
 0x20d   :  { %3686 = vmatprep.subr.bf16.mxu0 %v11913_v24  ;;  %3858 = vmatprep.subr.bf16.mxu1 %v11915_v26  ;;  %v517_v24 = vld [vmem:[#allocation2 + $0xc38] sm:$0xff]  ;;  %v11968_v26 = vcombine.low %v504_v12, %v508_v13  ;;  %v11977_v29 = vcombine.high %v512_v21, %v516_v22  ;;  %v564_v12 = vld [vmem:[#allocation2 + $0xdb0] sm:$0xff] }
 0x20e   :  { %v11979_v30 = vcombine.high %v513_v23, %v517_v24  ;;  %v11978_v15 = vcombine.low %v513_v23, %v517_v24 }
 0x210   :  { %3687 = vmatpush1.bf16.msra.mxu0 %v11912_v58  ;;  %3859 = vmatpush1.bf16.msra.mxu1 %v11914_v32  ;;  %v524_v58 = vld [vmem:[#allocation2 + $0xc70] sm:$0xff]  ;;  %v521_v32 = vld [vmem:[#allocation2 + $0xc58] sm:$0xff] }
 0x211   :  { %3688 = vmatprep.subr.bf16.mxu0 %v11921_v33  ;;  %3860 = vmatprep.subr.bf16.mxu1 %v11923_v34  ;;  %v525_v33 = vld [vmem:[#allocation2 + $0xc78] sm:$0xff]  ;;  %v11976_v34 = vcombine.low %v512_v21, %v516_v22  ;;  %v11985_v35 = vcombine.high %v520_v31, %v524_v58  ;;  %v568_v21 = vld [vmem:[#allocation2 + $0xdd0] sm:$0xff] }
 0x212   :  { %v11987_v36 = vcombine.high %v521_v32, %v525_v33  ;;  %v11986_v44 = vcombine.low %v521_v32, %v525_v33  ;;  %v572_v22 = vld [vmem:[#allocation2 + $0xdf0] sm:$0xff] }
 0x214   :  { %3689 = vmatpush1.bf16.msra.mxu0 %v11920_v39  ;;  %3861 = vmatpush1.bf16.msra.mxu1 %v11922_v40  ;;  %v532_v39 = vld [vmem:[#allocation2 + $0xcb0] sm:$0xff]  ;;  %v529_v40 = vld [vmem:[#allocation2 + $0xc98] sm:$0xff] }
 0x215   :  { %3690 = vmatprep.subr.bf16.mxu0 %v11929_v41  ;;  %3862 = vmatprep.subr.bf16.mxu1 %v11931_v42  ;;  %v533_v41 = vld [vmem:[#allocation2 + $0xcb8] sm:$0xff]  ;;  %v11984_v42 = vcombine.low %v520_v31, %v524_v58  ;;  %v11993_v45 = vcombine.high %v528_v38, %v532_v39 }
 0x216   :  { %v11995_v27 = vcombine.high %v529_v40, %v533_v41 }
 0x218   :  { %3691 = vmatpush1.bf16.msra.mxu0 %v11928_v46  ;;  %3863 = vmatpush1.bf16.msra.mxu1 %v11930_v47  ;;  %v540_v46 = vld [vmem:[#allocation2 + $0xcf0] sm:$0xff]  ;;  %v537_v47 = vld [vmem:[#allocation2 + $0xcd8] sm:$0xff] }
 0x219   :  { %3692 = vmatprep.subr.bf16.mxu0 %v11937_v48  ;;  %3864 = vmatprep.subr.bf16.mxu1 %v11939_v49  ;;  %v541_v48 = vld [vmem:[#allocation2 + $0xcf8] sm:$0xff]  ;;  %v11992_v49 = vcombine.low %v528_v38, %v532_v39  ;;  %v12001_v50 = vcombine.high %v536_v25, %v540_v46 }
 0x21a   :  { %v12003_v52 = vcombine.high %v537_v47, %v541_v48  ;;  %v12002_v59 = vcombine.low %v537_v47, %v541_v48  ;;  %v576_v47 = vld [vmem:[#allocation2 + $0xe10] sm:$0xff] }
 0x21b   :  { %v580_v48 = vld [vmem:[#allocation2 + $0xe30] sm:$0xff] }
 0x21c   :  { %3693 = vmatpush1.bf16.msra.mxu0 %v11936_v37  ;;  %3865 = vmatpush1.bf16.msra.mxu1 %v11938_v55  ;;  %v548_v37 = vld [vmem:[#allocation2 + $0xd30] sm:$0xff]  ;;  %v545_v55 = vld [vmem:[#allocation2 + $0xd18] sm:$0xff] }
 0x21d   :  { %3694 = vmatprep.subr.bf16.mxu0 %v11945_v56  ;;  %3866 = vmatprep.subr.bf16.mxu1 %v11947_v57  ;;  %v549_v56 = vld [vmem:[#allocation2 + $0xd38] sm:$0xff]  ;;  %v12000_v57 = vcombine.low %v536_v25, %v540_v46  ;;  %v12009_v60 = vcombine.high %v544_v54, %v548_v37 }
 0x21e   :  { %v12011_v61 = vcombine.high %v545_v55, %v549_v56  ;;  %v12010_v4 = vcombine.low %v545_v55, %v549_v56  ;;  %v12032_v55 = vcombine.low %v568_v21, %v572_v22 }
 0x220   :  { %3695 = vmatpush1.bf16.msra.mxu0 %v11944_v0  ;;  %3867 = vmatpush1.bf16.msra.mxu1 %v11946_v1  ;;  %v556_v0 = vld [vmem:[#allocation2 + $0xd70] sm:$0xff]  ;;  %v553_v1 = vld [vmem:[#allocation2 + $0xd58] sm:$0xff] }
 0x221   :  { %3696 = vmatprep.subr.bf16.mxu0 %v11953_v2  ;;  %3868 = vmatprep.subr.bf16.mxu1 %v11955_v3  ;;  %v557_v2 = vld [vmem:[#allocation2 + $0xd78] sm:$0xff]  ;;  %v12008_v3 = vcombine.low %v544_v54, %v548_v37  ;;  %v12017_v6 = vcombine.high %v552_v62, %v556_v0 }
 0x224   :  { %3697 = vmatpush1.bf16.msra.mxu0 %v11952_v8  ;;  %3869 = vmatpush1.bf16.msra.mxu1 %v11954_v9 }
 0x225   :  { %3698 = vmatprep.subr.bf16.mxu0 %v11961_v10  ;;  %3870 = vmatprep.subr.bf16.mxu1 %v11963_v11  ;;  %v12019_v10 = vcombine.high %v553_v1, %v557_v2  ;;  %v560_v11 = vld [vmem:[#allocation2 + $0xd90] sm:$0xff] }
 0x228   :  { %3699 = vmatpush1.bf16.msra.mxu0 %v11960_v17  ;;  %3871 = vmatpush1.bf16.msra.mxu1 %v11962_v18  ;;  %v12016_v17 = vcombine.low %v552_v62, %v556_v0  ;;  %v588_v62 = vld [vmem:[#allocation2 + $0xe70] sm:$0xff]  ;;  %v585_v0 = vld [vmem:[#allocation2 + $0xe58] sm:$0xff] }
 0x229   :  { %3700 = vmatprep.subr.bf16.mxu0 %v11969_v19  ;;  %3872 = vmatprep.subr.bf16.mxu1 %v11971_v20  ;;  %v12018_v19 = vcombine.low %v553_v1, %v557_v2  ;;  %v12025_v20 = vcombine.high %v560_v11, %v564_v12  ;;  %v589_v1 = vld [vmem:[#allocation2 + $0xe78] sm:$0xff]  ;;  %v12040_v2 = vcombine.low %v576_v47, %v580_v48 }
 0x22c   :  { %3701 = vmatpush1.bf16.msra.mxu0 %v11968_v26  ;;  %3873 = vmatpush1.bf16.msra.mxu1 %v11970_v28  ;;  %v12027_v28 = vcombine.high %v561_v14, %v565_v16 }
 0x22d   :  { %3713 = vmatprep.subr.bf16.mxu0 %v11977_v29  ;;  %3885 = vmatprep.subr.bf16.mxu1 %v11979_v30  ;;  %v569_v29 = vld [vmem:[#allocation2 + $0xdd8] sm:$0xff] }
 0x22e   :  { %v573_v30 = vld [vmem:[#allocation2 + $0xdf8] sm:$0xff] }
 0x22f   :  { %3703 = vmatmul.mubr.bf16.vlgmr.msra.gmra.mrb[4].mxu0 %v13651_v43  ;;  %3875 = vmatmul.mubr.bf16.vlgmr.msra.gmra.mrb[4].mxu1 %v13651_v43  ;;  %v11994_v43 = vcombine.low %v529_v40, %v533_v41 }
 0x230   :  { %3714 = vmatpush1.bf16.msra.mxu0 %v11976_v34  ;;  %3886 = vmatpush1.bf16.msra.mxu1 %v11978_v15  ;;  %v12024_v15 = vcombine.low %v560_v11, %v564_v12  ;;  %v593_v11 = vld [vmem:[#allocation2 + $0xe98] sm:$0xff] }
 0x231   :  { %3715 = vmatprep.subr.bf16.mxu0 %v11985_v35  ;;  %3887 = vmatprep.subr.bf16.mxu1 %v11987_v36  ;;  %v12026_v35 = vcombine.low %v561_v14, %v565_v16  ;;  %v12033_v36 = vcombine.high %v568_v21, %v572_v22  ;;  %v597_v12 = vld [vmem:[#allocation2 + $0xeb8] sm:$0xff]  ;;  %v12050_v16 = vcombine.low %v585_v0, %v589_v1 }
 0x232   :  { %3745 = vmatprep.mubr.bf16.mxu0 %v13659_v53  ;;  %3917 = vmatprep.mubr.bf16.mxu1 %v13659_v53  ;;  %v13689_v53 = vshrl.u32 %v640_v51, 7  ;;  %v577_v51 = vld [vmem:[#allocation2 + $0xe18] sm:$0xff] }
 0x233   :  { %v601_v21 = vld [vmem:[#allocation2 + $0xed8] sm:$0xff] }
 0x234   :  { %3716 = vmatpush1.bf16.msra.mxu0 %v11984_v42  ;;  %3888 = vmatpush1.bf16.msra.mxu1 %v11986_v44  ;;  %v13692_v5 = vsub.s32 0, %v13689_v53  ;;  %v13695_v8 = vsub.s32 2, %v13689_v53  ;;  %v13698_v9 = vsub.s32 1, %v13689_v53  ;;  %v13701_v13 = vsub.s32 3, %v13689_v53  ;;  %v605_v22 = vld [vmem:[#allocation2 + $0xef8] sm:$0xff] }
 0x235   :  { %3717 = vmatprep.subr.bf16.mxu0 %v11993_v45  ;;  %3889 = vmatprep.subr.bf16.mxu1 %v11995_v27  ;;  %v12035_v42 = vcombine.high %v569_v29, %v573_v30 }
 0x236   :  { %v643_v18 = vrot.slane %v638_v7, %v13692_v5  ;;  %v651_v24 = vrot.slane %v638_v7, %v13695_v8  ;;  %v647_v26 = vrot.slane %v638_v7, %v13698_v9  ;;  %v655_v32 = vrot.slane %v638_v7, %v13701_v13  ;;  %v592_v7 = vld [vmem:[#allocation2 + $0xe90] sm:$0xff] }
 0x238   :  { %3718 = vmatpush1.bf16.msra.mxu0 %v11992_v49  ;;  %3890 = vmatpush1.bf16.msra.mxu1 %v11994_v43 }
 0x239   :  { %3719 = vmatprep.subr.bf16.mxu0 %v12001_v50  ;;  %3891 = vmatprep.subr.bf16.mxu1 %v12003_v52  ;;  %v581_v52 = vld [vmem:[#allocation2 + $0xe38] sm:$0xff] }
 0x23c   :  { %3720 = vmatpush1.bf16.msra.mxu0 %v12000_v57  ;;  %3892 = vmatpush1.bf16.msra.mxu1 %v12002_v59  ;;  %v12034_v57 = vcombine.low %v569_v29, %v573_v30  ;;  %v12041_v59 = vcombine.high %v576_v47, %v580_v48  ;;  %v608_v29 = vld [vmem:[#allocation2 + $0xf10] sm:$0xff] }
 0x23d   :  { %3721 = vmatprep.subr.bf16.mxu0 %v12009_v60  ;;  %3893 = vmatprep.subr.bf16.mxu1 %v12011_v61  ;;  %v12043_v60 = vcombine.high %v577_v51, %v581_v52  ;;  %v584_v61 = vld [vmem:[#allocation2 + $0xe50] sm:$0xff] }
 0x23e   :  { %v12048_v14 = vcombine.low %v584_v61, %v588_v62  ;;  %v612_v30 = vld [vmem:[#allocation2 + $0xf30] sm:$0xff] }
 0x240   :  { %3722 = vmatpush1.bf16.msra.mxu0 %v12008_v3  ;;  %3894 = vmatpush1.bf16.msra.mxu1 %v12010_v4  ;;  %v12042_v3 = vcombine.low %v577_v51, %v581_v52  ;;  %v12049_v4 = vcombine.high %v584_v61, %v588_v62  ;;  %v632_v51 = vld [vmem:[#allocation2 + $0xfd0] sm:$0xff] }
 0x241   :  { %3723 = vmatprep.subr.bf16.mxu0 %v12017_v6  ;;  %3895 = vmatprep.subr.bf16.mxu1 %v12019_v10  ;;  %v12051_v6 = vcombine.high %v585_v0, %v589_v1  ;;  %v596_v10 = vld [vmem:[#allocation2 + $0xeb0] sm:$0xff]  ;;  %v3936_v0 = vld [vmem:[#allocation6] sm:$0xff] }
 0x242   :  { %v3403_v23 = vpop.f32.mrb[0].mxu0  ;;  %v3575_v31 = vpop.f32.mrb[0].mxu1  ;;  %v636_v52 = vld [vmem:[#allocation2 + $0xff0] sm:$0xff]  ;;  %v3940_v1 = vld [vmem:[#allocation6 + $0x20] sm:$0xff] }
 0x243   :  { %v3405_v58 = vpop.f32.mrb[1].mxu0  ;;  %v3577_v33 = vpop.f32.mrb[1].mxu1  ;;  %v13124_v38 = vadd.f32 %v3403_v23, %v643_v18  ;;  %v13128_v44 = vadd.f32 %v3575_v31, %v651_v24  ;;  %v12056_v23 = vcombine.low %v592_v7, %v596_v10  ;;  %v609_v31 = vld [vmem:[#allocation2 + $0xf18] sm:$0xff]  ;;  %v12097_v61 = vcombine.high %v632_v51, %v636_v52 }
 0x244   :  { %v3407_v34 = vpop.f32.mrb[2].mxu0  ;;  %3724 = vmatpush1.bf16.msra.mxu0 %v12016_v17  ;;  %v3579_v40 = vpop.f32.mrb[2].mxu1  ;;  %3896 = vmatpush1.bf16.msra.mxu1 %v12018_v19  ;;  %v13125_v45 = vadd.f32 %v3405_v58, %v647_v26  ;;  %v13129_v49 = vadd.f32 %v3577_v33, %v655_v32  ;;  %v12057_v17 = vcombine.high %v592_v7, %v596_v10  ;;  %v600_v19 = vld [vmem:[#allocation2 + $0xed0] sm:$0xff]  ;;  %v613_v58 = vld [vmem:[#allocation2 + $0xf38] sm:$0xff] }
 0x245   :  { %v13126_v39 = vadd.f32 %v3407_v34, %v643_v18  ;;  %v3409_v41 = vpop.f32.mrb[3].mxu0  ;;  %3725 = vmatprep.subr.bf16.mxu0 %v12025_v20  ;;  %v13130_v27 = vadd.f32 %v3579_v40, %v651_v24  ;;  %v3581_v46 = vpop.f32.mrb[3].mxu1  ;;  %3897 = vmatprep.subr.bf16.mxu1 %v12027_v28  ;;  %v12059_v18 = vcombine.high %v593_v11, %v597_v12  ;;  %v604_v20 = vld [vmem:[#allocation2 + $0xef0] sm:$0xff] }
 0x246   :  { %v13127_v25 = vadd.f32 %v3409_v41, %v647_v26  ;;  %v13131_v50 = vadd.f32 %v3581_v46, %v655_v32  ;;  %v12058_v24 = vcombine.low %v593_v11, %v597_v12  ;;  %v12065_v26 = vcombine.high %v600_v19, %v604_v20  ;;  %v629_v46 = vld [vmem:[#allocation2 + $0xfb8] sm:$0xff]  ;;  %v3944_v11 = vld [vmem:[#allocation6 + $0x40] sm:$0xff] }
 0x247   :  { %v13707_v43 = vpack.c.bf16 %v13126_v39, %v13124_v38  ;;  %v13709_v54 = vpack.c.bf16 %v13130_v27, %v13128_v44  ;;  %v12067_v28 = vcombine.high %v601_v21, %v605_v22  ;;  %v12064_v32 = vcombine.low %v600_v19, %v604_v20  ;;  %v617_v38 = vld [vmem:[#allocation2 + $0xf58] sm:$0xff]  ;;  %v628_v27 = vld [vmem:[#allocation2 + $0xfb0] sm:$0xff]  ;;  %v3948_v12 = vld [vmem:[#allocation6 + $0x60] sm:$0xff] }
 0x248   :  { %v13711_v37 = vpack.c.bf16 %v13127_v25, %v13125_v45  ;;  %3726 = vmatpush1.bf16.msra.mxu0 %v12024_v15  ;;  %v13713_v56 = vpack.c.bf16 %v13131_v50, %v13129_v49  ;;  %3898 = vmatpush1.bf16.msra.mxu1 %v12026_v35  ;;  %v12066_v33 = vcombine.low %v601_v21, %v605_v22  ;;  %v616_v35 = vld [vmem:[#allocation2 + $0xf50] sm:$0xff]  ;;  %v621_v39 = vld [vmem:[#allocation2 + $0xf78] sm:$0xff]  ;;  %v3952_v20 = vld [vmem:[#allocation6 + $0x80] sm:$0xff] }
 0x249   :  { %3727 = vmatprep.subr.bf16.mxu0 %v12033_v36  ;;  %3899 = vmatprep.subr.bf16.mxu1 %v12035_v42  ;;  %v12073_v34 = vcombine.high %v608_v29, %v612_v30  ;;  %v12075_v15 = vcombine.high %v609_v31, %v613_v58  ;;  %v620_v36 = vld [vmem:[#allocation2 + $0xf70] sm:$0xff]  ;;  %v12072_v40 = vcombine.low %v608_v29, %v612_v30  ;;  %v625_v25 = vld [vmem:[#allocation2 + $0xf98] sm:$0xff]  ;;  %v3956_v21 = vld [vmem:[#allocation6 + $0xa0] sm:$0xff] }
 0x24a   :  { %v12074_v41 = vcombine.low %v609_v31, %v613_v58  ;;  %v12081_v42 = vcombine.high %v616_v35, %v620_v36  ;;  %v12083_v44 = vcombine.high %v617_v38, %v621_v39  ;;  %v624_v45 = vld [vmem:[#allocation2 + $0xf90] sm:$0xff]  ;;  %v12080_v47 = vcombine.low %v616_v35, %v620_v36  ;;  %v3960_v31 = vld [vmem:[#allocation6 + $0xc0] sm:$0xff] }
 0x24b   :  { %v12082_v48 = vcombine.low %v617_v38, %v621_v39  ;;  %v12089_v49 = vcombine.high %v624_v45, %v628_v27  ;;  %v12091_v50 = vcombine.high %v625_v25, %v629_v46  ;;  %v12101_v7 = vcombine.high %v3936_v0, %v3940_v1  ;;  %v3964_v58 = vld [vmem:[#allocation6 + $0xe0] sm:$0xff]  ;;  %v3969_v39 = vld [vmem:[#allocation6 + $0x108] sm:$0xff] }
 0x24c   :  { %3728 = vmatpush1.bf16.msra.mxu0 %v12032_v55  ;;  %3900 = vmatpush1.bf16.msra.mxu1 %v12034_v57  ;;  %v633_v55 = vld [vmem:[#allocation2 + $0xfd8] sm:$0xff]  ;;  %v12109_v19 = vcombine.high %v3944_v11, %v3948_v12  ;;  %v12117_v29 = vcombine.high %v3952_v20, %v3956_v21  ;;  %v3968_v36 = vld [vmem:[#allocation6 + $0x100] sm:$0xff] }
 0x24d   :  { %3729 = vmatprep.subr.bf16.mxu0 %v12041_v59  ;;  %3901 = vmatprep.subr.bf16.mxu1 %v12043_v60  ;;  %v637_v57 = vld [vmem:[#allocation2 + $0xff8] sm:$0xff]  ;;  %v12088_v59 = vcombine.low %v624_v45, %v628_v27  ;;  %v12090_v60 = vcombine.low %v625_v25, %v629_v46  ;;  %v3972_v38 = vld [vmem:[#allocation6 + $0x120] sm:$0xff]  ;;  %v3977_v46 = vld [vmem:[#allocation6 + $0x148] sm:$0xff] }
 0x24e   :  { %v12099_v62 = vcombine.high %v633_v55, %v637_v57  ;;  %v3976_v27 = vld [vmem:[#allocation6 + $0x140] sm:$0xff] }
 0x24f   :  { %v3980_v25 = vld [vmem:[#allocation6 + $0x160] sm:$0xff] }
 0x250   :  { %3730 = vmatpush1.bf16.msra.mxu0 %v12040_v2  ;;  %3902 = vmatpush1.bf16.msra.mxu1 %v12042_v3  ;;  %v3937_v2 = vld [vmem:[#allocation6 + $0x8] sm:$0xff] }
 0x251   :  { %3731 = vmatprep.subr.bf16.mxu0 %v12049_v4  ;;  %3903 = vmatprep.subr.bf16.mxu1 %v12051_v6  ;;  %v3941_v3 = vld [vmem:[#allocation6 + $0x28] sm:$0xff]  ;;  %v12096_v4 = vcombine.low %v632_v51, %v636_v52  ;;  %v12098_v6 = vcombine.low %v633_v55, %v637_v57  ;;  %v3984_v52 = vld [vmem:[#allocation6 + $0x180] sm:$0xff] }
 0x252   :  { %v12103_v10 = vcombine.high %v3937_v2, %v3941_v3  ;;  %v3988_v55 = vld [vmem:[#allocation6 + $0x1a0] sm:$0xff]  ;;  %v3985_v57 = vld [vmem:[#allocation6 + $0x188] sm:$0xff] }
 0x254   :  { %3732 = vmatpush1.bf16.msra.mxu0 %v12048_v14  ;;  %3904 = vmatpush1.bf16.msra.mxu1 %v12050_v16  ;;  %v12100_v14 = vcombine.low %v3936_v0, %v3940_v1  ;;  %v3945_v16 = vld [vmem:[#allocation6 + $0x48] sm:$0xff]  ;;  %v3992_v1 = vld [vmem:[#allocation6 + $0x1c0] sm:$0xff] }
 0x255   :  { %3733 = vmatprep.subr.bf16.mxu0 %v12057_v17  ;;  %3905 = vmatprep.subr.bf16.mxu1 %v12059_v18  ;;  %v3949_v17 = vld [vmem:[#allocation6 + $0x68] sm:$0xff]  ;;  %v12102_v18 = vcombine.low %v3937_v2, %v3941_v3  ;;  %v3996_v2 = vld [vmem:[#allocation6 + $0x1e0] sm:$0xff] }
 0x256   :  { %v12111_v22 = vcombine.high %v3945_v16, %v3949_v17  ;;  %v3993_v3 = vld [vmem:[#allocation6 + $0x1c8] sm:$0xff] }
 0x258   :  { %3734 = vmatpush1.bf16.msra.mxu0 %v12056_v23  ;;  %3906 = vmatpush1.bf16.msra.mxu1 %v12058_v24  ;;  %v3953_v23 = vld [vmem:[#allocation6 + $0x88] sm:$0xff] }
 0x259   :  { %3735 = vmatprep.subr.bf16.mxu0 %v12065_v26  ;;  %3907 = vmatprep.subr.bf16.mxu1 %v12067_v28  ;;  %v3957_v24 = vld [vmem:[#allocation6 + $0xa8] sm:$0xff]  ;;  %v12108_v26 = vcombine.low %v3944_v11, %v3948_v12  ;;  %v12110_v28 = vcombine.low %v3945_v16, %v3949_v17  ;;  %v4000_v12 = vld [vmem:[#allocation6 + $0x200] sm:$0xff] }
 0x25a   :  { %v12119_v30 = vcombine.high %v3953_v23, %v3957_v24  ;;  %v4001_v16 = vld [vmem:[#allocation6 + $0x208] sm:$0xff] }
 0x25b   :  { %v4005_v17 = vld [vmem:[#allocation6 + $0x228] sm:$0xff] }
 0x25c   :  { %3736 = vmatpush1.bf16.msra.mxu0 %v12064_v32  ;;  %3908 = vmatpush1.bf16.msra.mxu1 %v12066_v33  ;;  %v3961_v32 = vld [vmem:[#allocation6 + $0xc8] sm:$0xff] }
 0x25d   :  { %3737 = vmatprep.subr.bf16.mxu0 %v12073_v34  ;;  %3909 = vmatprep.subr.bf16.mxu1 %v12075_v15  ;;  %v3965_v33 = vld [vmem:[#allocation6 + $0xe8] sm:$0xff]  ;;  %v12116_v34 = vcombine.low %v3952_v20, %v3956_v21  ;;  %v12125_v15 = vcombine.high %v3960_v31, %v3964_v58  ;;  %v12167_v21 = vcombine.high %v4001_v16, %v4005_v17 }
 0x25e   :  { %v12127_v35 = vcombine.high %v3961_v32, %v3965_v33 }
 0x260   :  { %3738 = vmatpush1.bf16.msra.mxu0 %v12072_v40  ;;  %3910 = vmatpush1.bf16.msra.mxu1 %v12074_v41  ;;  %v3973_v40 = vld [vmem:[#allocation6 + $0x128] sm:$0xff]  ;;  %v12124_v41 = vcombine.low %v3960_v31, %v3964_v58  ;;  %v4016_v58 = vld [vmem:[#allocation6 + $0x280] sm:$0xff] }
 0x261   :  { %3739 = vmatprep.subr.bf16.mxu0 %v12081_v42  ;;  %3911 = vmatprep.subr.bf16.mxu1 %v12083_v44  ;;  %v12126_v42 = vcombine.low %v3961_v32, %v3965_v33  ;;  %v12133_v44 = vcombine.high %v3968_v36, %v3972_v38  ;;  %v12135_v45 = vcombine.high %v3969_v39, %v3973_v40  ;;  %v4020_v32 = vld [vmem:[#allocation6 + $0x2a0] sm:$0xff]  ;;  %v4017_v33 = vld [vmem:[#allocation6 + $0x288] sm:$0xff] }
 0x264   :  { %3740 = vmatpush1.bf16.msra.mxu0 %v12080_v47  ;;  %3912 = vmatpush1.bf16.msra.mxu1 %v12082_v48  ;;  %v3981_v47 = vld [vmem:[#allocation6 + $0x168] sm:$0xff]  ;;  %v12132_v48 = vcombine.low %v3968_v36, %v3972_v38  ;;  %v4024_v38 = vld [vmem:[#allocation6 + $0x2c0] sm:$0xff] }
 0x265   :  { %3741 = vmatprep.subr.bf16.mxu0 %v12089_v49  ;;  %3913 = vmatprep.subr.bf16.mxu1 %v12091_v50  ;;  %v12134_v49 = vcombine.low %v3969_v39, %v3973_v40  ;;  %v12141_v50 = vcombine.high %v3976_v27, %v3980_v25  ;;  %v12143_v51 = vcombine.high %v3977_v46, %v3981_v47  ;;  %v4028_v39 = vld [vmem:[#allocation6 + $0x2e0] sm:$0xff]  ;;  %v4025_v40 = vld [vmem:[#allocation6 + $0x2c8] sm:$0xff] }
 0x268   :  { %3742 = vmatpush1.bf16.msra.mxu0 %v12088_v59  ;;  %3914 = vmatpush1.bf16.msra.mxu1 %v12090_v60  ;;  %v3989_v59 = vld [vmem:[#allocation6 + $0x1a8] sm:$0xff]  ;;  %v12140_v60 = vcombine.low %v3976_v27, %v3980_v25  ;;  %v4032_v25 = vld [vmem:[#allocation6 + $0x300] sm:$0xff] }
 0x269   :  { %3743 = vmatprep.subr.bf16.mxu0 %v12097_v61  ;;  %3915 = vmatprep.subr.bf16.mxu1 %v12099_v62  ;;  %v12142_v61 = vcombine.low %v3977_v46, %v3981_v47  ;;  %v12149_v62 = vcombine.high %v3984_v52, %v3988_v55  ;;  %v12151_v0 = vcombine.high %v3985_v57, %v3989_v59  ;;  %v4036_v46 = vld [vmem:[#allocation6 + $0x320] sm:$0xff]  ;;  %v4033_v47 = vld [vmem:[#allocation6 + $0x308] sm:$0xff] }
 0x26c   :  { %3744 = vmatpush1.bf16.msra.mxu0 %v12096_v4  ;;  %3916 = vmatpush1.bf16.msra.mxu1 %v12098_v6  ;;  %v3997_v4 = vld [vmem:[#allocation6 + $0x1e8] sm:$0xff]  ;;  %v12148_v6 = vcombine.low %v3984_v52, %v3988_v55  ;;  %v4040_v55 = vld [vmem:[#allocation6 + $0x340] sm:$0xff] }
 0x26d   :  { %7050 = vmatprep.subr.bf16.mxu0 %v12101_v7  ;;  %7222 = vmatprep.subr.bf16.mxu1 %v12103_v10  ;;  %v12150_v7 = vcombine.low %v3985_v57, %v3989_v59  ;;  %v12157_v10 = vcombine.high %v3992_v1, %v3996_v2  ;;  %v12159_v11 = vcombine.high %v3993_v3, %v3997_v4  ;;  %v4044_v57 = vld [vmem:[#allocation6 + $0x360] sm:$0xff]  ;;  %v4041_v59 = vld [vmem:[#allocation6 + $0x348] sm:$0xff] }
 0x26f   :  { %3746 = vmatmul.mubr.bf16.vlgmr.msra.gmra.mrb[4].mxu0 %v13671_v63  ;;  %3918 = vmatmul.mubr.bf16.vlgmr.msra.gmra.mrb[4].mxu1 %v13671_v63  ;;  %v12118_v63 = vcombine.low %v3953_v23, %v3957_v24  ;;  %v4012_v23 = vld [vmem:[#allocation6 + $0x260] sm:$0xff]  ;;  %v4009_v24 = vld [vmem:[#allocation6 + $0x248] sm:$0xff] }
 0x270   :  { %7051 = vmatpush1.bf16.msra.mxu0 %v12100_v14  ;;  %7082 = vmatprep.mubr.bf16.mxu0 %v13711_v37  ;;  %v4004_v14 = vld [vmem:[#allocation6 + $0x220] sm:$0xff] }
 0x271   :  { %7223 = vmatpush1.bf16.msra.mxu1 %v12102_v18  ;;  %7254 = vmatprep.mubr.bf16.mxu1 %v13711_v37  ;;  %v12156_v18 = vcombine.low %v3992_v1, %v3996_v2  ;;  %v12165_v20 = vcombine.high %v4000_v12, %v4004_v14  ;;  %v4048_v2 = vld [vmem:[#allocation6 + $0x380] sm:$0xff] }
 0x272   :  { %7052 = vmatprep.subr.bf16.mxu0 %v12109_v19  ;;  %7224 = vmatprep.subr.bf16.mxu1 %v12111_v22  ;;  %v12158_v19 = vcombine.low %v3993_v3, %v3997_v4  ;;  %v4008_v22 = vld [vmem:[#allocation6 + $0x240] sm:$0xff]  ;;  %v4049_v4 = vld [vmem:[#allocation6 + $0x388] sm:$0xff] }
 0x273   :  { %v4052_v3 = vld [vmem:[#allocation6 + $0x3a0] sm:$0xff] }
 0x274   :  { %7053 = vmatpush1.bf16.msra.mxu0 %v12108_v26  ;;  %v4013_v26 = vld [vmem:[#allocation6 + $0x268] sm:$0xff] }
 0x275   :  { %7225 = vmatpush1.bf16.msra.mxu1 %v12110_v28  ;;  %7054 = vmatprep.subr.bf16.mxu0 %v12117_v29  ;;  %v12164_v28 = vcombine.low %v4000_v12, %v4004_v14  ;;  %v12166_v29 = vcombine.low %v4001_v16, %v4005_v17  ;;  %v12175_v31 = vcombine.high %v4009_v24, %v4013_v26  ;;  %v4056_v14 = vld [vmem:[#allocation6 + $0x3c0] sm:$0xff]  ;;  %v4057_v17 = vld [vmem:[#allocation6 + $0x3c8] sm:$0xff] }
 0x276   :  { %7226 = vmatprep.subr.bf16.mxu1 %v12119_v30  ;;  %v12173_v30 = vcombine.high %v4008_v22, %v4012_v23  ;;  %v4060_v16 = vld [vmem:[#allocation6 + $0x3e0] sm:$0xff] }
 0x278   :  { %7055 = vmatpush1.bf16.msra.mxu0 %v12116_v34  ;;  %v4021_v34 = vld [vmem:[#allocation6 + $0x2a8] sm:$0xff] }
 0x279   :  { %7227 = vmatpush1.bf16.msra.mxu1 %v12118_v63  ;;  %7056 = vmatprep.subr.bf16.mxu0 %v12125_v15  ;;  %v12172_v63 = vcombine.low %v4008_v22, %v4012_v23  ;;  %v12174_v15 = vcombine.low %v4009_v24, %v4013_v26  ;;  %v12183_v36 = vcombine.high %v4017_v33, %v4021_v34  ;;  %v4064_v23 = vld [vmem:[#allocation6 + $0x400] sm:$0xff]  ;;  %v4065_v26 = vld [vmem:[#allocation6 + $0x408] sm:$0xff] }
 0x27a   :  { %7228 = vmatprep.subr.bf16.mxu1 %v12127_v35  ;;  %v12181_v35 = vcombine.high %v4016_v58, %v4020_v32  ;;  %v4068_v24 = vld [vmem:[#allocation6 + $0x420] sm:$0xff] }
 0x27c   :  { %7057 = vmatpush1.bf16.msra.mxu0 %v12124_v41  ;;  %v4029_v41 = vld [vmem:[#allocation6 + $0x2e8] sm:$0xff] }
 0x27d   :  { %7229 = vmatpush1.bf16.msra.mxu1 %v12126_v42  ;;  %7058 = vmatprep.subr.bf16.mxu0 %v12133_v44  ;;  %v12180_v42 = vcombine.low %v4016_v58, %v4020_v32  ;;  %v12182_v44 = vcombine.low %v4017_v33, %v4021_v34  ;;  %v12191_v27 = vcombine.high %v4025_v40, %v4029_v41  ;;  %v4072_v32 = vld [vmem:[#allocation6 + $0x440] sm:$0xff] }
 0x27e   :  { %7230 = vmatprep.subr.bf16.mxu1 %v12135_v45  ;;  %v12189_v45 = vcombine.high %v4024_v38, %v4028_v39  ;;  %v4076_v33 = vld [vmem:[#allocation6 + $0x460] sm:$0xff]  ;;  %v12228_v34 = vcombine.low %v4064_v23, %v4068_v24 }
 0x280   :  { %7059 = vmatpush1.bf16.msra.mxu0 %v12132_v48  ;;  %v4037_v48 = vld [vmem:[#allocation6 + $0x328] sm:$0xff] }
 0x281   :  { %7231 = vmatpush1.bf16.msra.mxu1 %v12134_v49  ;;  %7060 = vmatprep.subr.bf16.mxu0 %v12141_v50  ;;  %v12188_v49 = vcombine.low %v4024_v38, %v4028_v39  ;;  %v12190_v50 = vcombine.low %v4025_v40, %v4029_v41  ;;  %v12199_v52 = vcombine.high %v4033_v47, %v4037_v48  ;;  %v4080_v38 = vld [vmem:[#allocation6 + $0x480] sm:$0xff]  ;;  %v4081_v41 = vld [vmem:[#allocation6 + $0x488] sm:$0xff] }
 0x282   :  { %7232 = vmatprep.subr.bf16.mxu1 %v12143_v51  ;;  %v12197_v51 = vcombine.high %v4032_v25, %v4036_v46  ;;  %v4084_v39 = vld [vmem:[#allocation6 + $0x4a0] sm:$0xff] }
 0x284   :  { %7061 = vmatpush1.bf16.msra.mxu0 %v12140_v60  ;;  %v4045_v60 = vld [vmem:[#allocation6 + $0x368] sm:$0xff] }
 0x285   :  { %7233 = vmatpush1.bf16.msra.mxu1 %v12142_v61  ;;  %7062 = vmatprep.subr.bf16.mxu0 %v12149_v62  ;;  %v12196_v61 = vcombine.low %v4032_v25, %v4036_v46  ;;  %v12198_v62 = vcombine.low %v4033_v47, %v4037_v48  ;;  %v12207_v1 = vcombine.high %v4041_v59, %v4045_v60  ;;  %v4088_v46 = vld [vmem:[#allocation6 + $0x4c0] sm:$0xff]  ;;  %v4089_v48 = vld [vmem:[#allocation6 + $0x4c8] sm:$0xff] }
 0x286   :  { %7234 = vmatprep.subr.bf16.mxu1 %v12151_v0  ;;  %v12205_v0 = vcombine.high %v4040_v55, %v4044_v57  ;;  %v4092_v47 = vld [vmem:[#allocation6 + $0x4e0] sm:$0xff] }
 0x288   :  { %7063 = vmatpush1.bf16.msra.mxu0 %v12148_v6  ;;  %v4053_v6 = vld [vmem:[#allocation6 + $0x3a8] sm:$0xff] }
 0x289   :  { %7235 = vmatpush1.bf16.msra.mxu1 %v12150_v7  ;;  %7064 = vmatprep.subr.bf16.mxu0 %v12157_v10  ;;  %v12204_v7 = vcombine.low %v4040_v55, %v4044_v57  ;;  %v12206_v10 = vcombine.low %v4041_v59, %v4045_v60  ;;  %v12215_v12 = vcombine.high %v4049_v4, %v4053_v6  ;;  %v4096_v57 = vld [vmem:[#allocation6 + $0x500] sm:$0xff]  ;;  %v4097_v60 = vld [vmem:[#allocation6 + $0x508] sm:$0xff] }
 0x28a   :  { %7236 = vmatprep.subr.bf16.mxu1 %v12159_v11  ;;  %v12213_v11 = vcombine.high %v4048_v2, %v4052_v3  ;;  %v4100_v59 = vld [vmem:[#allocation6 + $0x520] sm:$0xff] }
 0x28c   :  { %7065 = vmatpush1.bf16.msra.mxu0 %v12156_v18  ;;  %v4061_v18 = vld [vmem:[#allocation6 + $0x3e8] sm:$0xff] }
 0x28d   :  { %7237 = vmatpush1.bf16.msra.mxu1 %v12158_v19  ;;  %7066 = vmatprep.subr.bf16.mxu0 %v12165_v20  ;;  %v12212_v19 = vcombine.low %v4048_v2, %v4052_v3  ;;  %v12214_v20 = vcombine.low %v4049_v4, %v4053_v6  ;;  %v12223_v22 = vcombine.high %v4057_v17, %v4061_v18  ;;  %v4104_v3 = vld [vmem:[#allocation6 + $0x540] sm:$0xff]  ;;  %v4105_v6 = vld [vmem:[#allocation6 + $0x548] sm:$0xff] }
 0x28e   :  { %7238 = vmatprep.subr.bf16.mxu1 %v12167_v21  ;;  %v12221_v21 = vcombine.high %v4056_v14, %v4060_v16  ;;  %v4108_v4 = vld [vmem:[#allocation6 + $0x560] sm:$0xff] }
 0x290   :  { %7067 = vmatpush1.bf16.msra.mxu0 %v12164_v28  ;;  %v4069_v28 = vld [vmem:[#allocation6 + $0x428] sm:$0xff] }
 0x291   :  { %7239 = vmatpush1.bf16.msra.mxu1 %v12166_v29  ;;  %7068 = vmatprep.subr.bf16.mxu0 %v12173_v30  ;;  %v12220_v29 = vcombine.low %v4056_v14, %v4060_v16  ;;  %v12222_v30 = vcombine.low %v4057_v17, %v4061_v18  ;;  %v12231_v58 = vcombine.high %v4065_v26, %v4069_v28  ;;  %v4112_v16 = vld [vmem:[#allocation6 + $0x580] sm:$0xff]  ;;  %v4113_v18 = vld [vmem:[#allocation6 + $0x588] sm:$0xff] }
 0x292   :  { %7240 = vmatprep.subr.bf16.mxu1 %v12175_v31  ;;  %v12229_v31 = vcombine.high %v4064_v23, %v4068_v24  ;;  %v4116_v17 = vld [vmem:[#allocation6 + $0x5a0] sm:$0xff] }
 0x293   :  { %v4120_v24 = vld [vmem:[#allocation6 + $0x5c0] sm:$0xff] }
 0x294   :  { %7069 = vmatpush1.bf16.msra.mxu0 %v12172_v63  ;;  %v4073_v63 = vld [vmem:[#allocation6 + $0x448] sm:$0xff] }
 0x295   :  { %7241 = vmatpush1.bf16.msra.mxu1 %v12174_v15  ;;  %7070 = vmatprep.subr.bf16.mxu0 %v12181_v35  ;;  %v4077_v15 = vld [vmem:[#allocation6 + $0x468] sm:$0xff]  ;;  %v12230_v35 = vcombine.low %v4065_v26, %v4069_v28  ;;  %v4124_v26 = vld [vmem:[#allocation6 + $0x5e0] sm:$0xff] }
 0x296   :  { %7242 = vmatprep.subr.bf16.mxu1 %v12183_v36  ;;  %v12237_v36 = vcombine.high %v4072_v32, %v4076_v33  ;;  %v12239_v40 = vcombine.high %v4073_v63, %v4077_v15  ;;  %v4121_v28 = vld [vmem:[#allocation6 + $0x5c8] sm:$0xff] }
 0x298   :  { %7071 = vmatpush1.bf16.msra.mxu0 %v12180_v42  ;;  %v4085_v42 = vld [vmem:[#allocation6 + $0x4a8] sm:$0xff] }
 0x299   :  { %7243 = vmatpush1.bf16.msra.mxu1 %v12182_v44  ;;  %7072 = vmatprep.subr.bf16.mxu0 %v12189_v45  ;;  %v12236_v44 = vcombine.low %v4072_v32, %v4076_v33  ;;  %v12238_v45 = vcombine.low %v4073_v63, %v4077_v15  ;;  %v12247_v25 = vcombine.high %v4081_v41, %v4085_v42  ;;  %v4128_v33 = vld [vmem:[#allocation6 + $0x600] sm:$0xff]  ;;  %v4129_v63 = vld [vmem:[#allocation6 + $0x608] sm:$0xff] }
 0x29a   :  { %7244 = vmatprep.subr.bf16.mxu1 %v12191_v27  ;;  %v12245_v27 = vcombine.high %v4080_v38, %v4084_v39  ;;  %v4133_v15 = vld [vmem:[#allocation6 + $0x628] sm:$0xff] }
 0x29c   :  { %7073 = vmatpush1.bf16.msra.mxu0 %v12188_v49  ;;  %v4093_v49 = vld [vmem:[#allocation6 + $0x4e8] sm:$0xff] }
 0x29d   :  { %7245 = vmatpush1.bf16.msra.mxu1 %v12190_v50  ;;  %7074 = vmatprep.subr.bf16.mxu0 %v12197_v51  ;;  %v12244_v50 = vcombine.low %v4080_v38, %v4084_v39  ;;  %v12246_v51 = vcombine.low %v4081_v41, %v4085_v42  ;;  %v12255_v55 = vcombine.high %v4089_v48, %v4093_v49  ;;  %v4140_v41 = vld [vmem:[#allocation6 + $0x660] sm:$0xff]  ;;  %v4137_v42 = vld [vmem:[#allocation6 + $0x648] sm:$0xff] }
 0x29e   :  { %7246 = vmatprep.subr.bf16.mxu1 %v12199_v52  ;;  %v12253_v52 = vcombine.high %v4088_v46, %v4092_v47  ;;  %v12295_v39 = vcombine.high %v4129_v63, %v4133_v15 }
 0x2a0   :  { %7075 = vmatpush1.bf16.msra.mxu0 %v12196_v61  ;;  %v4101_v61 = vld [vmem:[#allocation6 + $0x528] sm:$0xff] }
 0x2a1   :  { %7247 = vmatpush1.bf16.msra.mxu1 %v12198_v62  ;;  %7076 = vmatprep.subr.bf16.mxu0 %v12205_v0  ;;  %v12252_v62 = vcombine.low %v4088_v46, %v4092_v47  ;;  %v12254_v0 = vcombine.low %v4089_v48, %v4093_v49  ;;  %v12263_v2 = vcombine.high %v4097_v60, %v4101_v61  ;;  %v4144_v47 = vld [vmem:[#allocation6 + $0x680] sm:$0xff]  ;;  %v4145_v49 = vld [vmem:[#allocation6 + $0x688] sm:$0xff] }
 0x2a2   :  { %7248 = vmatprep.subr.bf16.mxu1 %v12207_v1  ;;  %v12261_v1 = vcombine.high %v4096_v57, %v4100_v59  ;;  %v4148_v48 = vld [vmem:[#allocation6 + $0x6a0] sm:$0xff] }
 0x2a4   :  { %7077 = vmatpush1.bf16.msra.mxu0 %v12204_v7  ;;  %v4109_v7 = vld [vmem:[#allocation6 + $0x568] sm:$0xff] }
 0x2a5   :  { %7249 = vmatpush1.bf16.msra.mxu1 %v12206_v10  ;;  %7078 = vmatprep.subr.bf16.mxu0 %v12213_v11  ;;  %v12260_v10 = vcombine.low %v4096_v57, %v4100_v59  ;;  %v12262_v11 = vcombine.low %v4097_v60, %v4101_v61  ;;  %v12271_v14 = vcombine.high %v4105_v6, %v4109_v7  ;;  %v4152_v59 = vld [vmem:[#allocation6 + $0x6c0] sm:$0xff]  ;;  %v4153_v61 = vld [vmem:[#allocation6 + $0x6c8] sm:$0xff] }
 0x2a6   :  { %7250 = vmatprep.subr.bf16.mxu1 %v12215_v12  ;;  %v12269_v12 = vcombine.high %v4104_v3, %v4108_v4  ;;  %v4156_v60 = vld [vmem:[#allocation6 + $0x6e0] sm:$0xff] }
 0x2a8   :  { %7079 = vmatpush1.bf16.msra.mxu0 %v12212_v19  ;;  %v4117_v19 = vld [vmem:[#allocation6 + $0x5a8] sm:$0xff] }
 0x2a9   :  { %7251 = vmatpush1.bf16.msra.mxu1 %v12214_v20  ;;  %7080 = vmatprep.subr.bf16.mxu0 %v12221_v21  ;;  %v12268_v20 = vcombine.low %v4104_v3, %v4108_v4  ;;  %v12270_v21 = vcombine.low %v4105_v6, %v4109_v7  ;;  %v12279_v23 = vcombine.high %v4113_v18, %v4117_v19  ;;  %v4160_v4 = vld [vmem:[#allocation6 + $0x700] sm:$0xff]  ;;  %v4161_v7 = vld [vmem:[#allocation6 + $0x708] sm:$0xff] }
 0x2aa   :  { %7252 = vmatprep.subr.bf16.mxu1 %v12223_v22  ;;  %v12277_v22 = vcombine.high %v4112_v16, %v4116_v17  ;;  %v4164_v6 = vld [vmem:[#allocation6 + $0x720] sm:$0xff] }
 0x2ac   :  { %7081 = vmatpush1.bf16.msra.mxu0 %v12220_v29  ;;  %v4125_v29 = vld [vmem:[#allocation6 + $0x5e8] sm:$0xff] }
 0x2ad   :  { %7253 = vmatpush1.bf16.msra.mxu1 %v12222_v30  ;;  %7093 = vmatprep.subr.bf16.mxu0 %v12229_v31  ;;  %v12276_v30 = vcombine.low %v4112_v16, %v4116_v17  ;;  %v12278_v31 = vcombine.low %v4113_v18, %v4117_v19  ;;  %v12287_v32 = vcombine.high %v4121_v28, %v4125_v29  ;;  %v4168_v17 = vld [vmem:[#allocation6 + $0x740] sm:$0xff]  ;;  %v4169_v19 = vld [vmem:[#allocation6 + $0x748] sm:$0xff] }
 0x2ae   :  { %7265 = vmatprep.subr.bf16.mxu1 %v12231_v58  ;;  %v12285_v58 = vcombine.high %v4120_v24, %v4124_v26  ;;  %v4172_v18 = vld [vmem:[#allocation6 + $0x760] sm:$0xff] }
 0x2af   :  { %7083 = vmatmul.mubr.bf16.vlgmr.msra.gmra.mrb[8].mxu0 %v13707_v43 }
 0x2b0   :  { %7255 = vmatmul.mubr.bf16.vlgmr.msra.gmra.mrb[8].mxu1 %v13707_v43  ;;  %7094 = vmatpush1.bf16.msra.mxu0 %v12228_v34  ;;  %v4132_v34 = vld [vmem:[#allocation6 + $0x620] sm:$0xff] }
 0x2b1   :  { %7125 = vmatprep.mubr.bf16.mxu0 %v13713_v56  ;;  %7266 = vmatpush1.bf16.msra.mxu1 %v12230_v35  ;;  %v12284_v35 = vcombine.low %v4120_v24, %v4124_v26  ;;  %v12293_v38 = vcombine.high %v4128_v33, %v4132_v34  ;;  %v4176_v26 = vld [vmem:[#allocation6 + $0x780] sm:$0xff] }
 0x2b2   :  { %7297 = vmatprep.mubr.bf16.mxu1 %v13713_v56  ;;  %7095 = vmatprep.subr.bf16.mxu0 %v12237_v36  ;;  %v12286_v36 = vcombine.low %v4121_v28, %v4125_v29  ;;  %v4180_v28 = vld [vmem:[#allocation6 + $0x7a0] sm:$0xff]  ;;  %v4177_v29 = vld [vmem:[#allocation6 + $0x788] sm:$0xff] }
 0x2b3   :  { %7267 = vmatprep.subr.bf16.mxu1 %v12239_v40  ;;  %v4136_v40 = vld [vmem:[#allocation6 + $0x640] sm:$0xff] }
 0x2b4   :  { %7096 = vmatpush1.bf16.msra.mxu0 %v12236_v44  ;;  %v4141_v44 = vld [vmem:[#allocation6 + $0x668] sm:$0xff] }
 0x2b5   :  { %7268 = vmatpush1.bf16.msra.mxu1 %v12238_v45  ;;  %7097 = vmatprep.subr.bf16.mxu0 %v12245_v27  ;;  %v12292_v45 = vcombine.low %v4128_v33, %v4132_v34  ;;  %v12294_v27 = vcombine.low %v4129_v63, %v4133_v15  ;;  %v12303_v46 = vcombine.high %v4137_v42, %v4141_v44  ;;  %v4184_v34 = vld [vmem:[#allocation6 + $0x7c0] sm:$0xff]  ;;  %v4185_v15 = vld [vmem:[#allocation6 + $0x7c8] sm:$0xff] }
 0x2b6   :  { %7269 = vmatprep.subr.bf16.mxu1 %v12247_v25  ;;  %v12301_v25 = vcombine.high %v4136_v40, %v4140_v41  ;;  %v4188_v63 = vld [vmem:[#allocation6 + $0x7e0] sm:$0xff] }
 0x2b8   :  { %7098 = vmatpush1.bf16.msra.mxu0 %v12244_v50  ;;  %v4149_v50 = vld [vmem:[#allocation6 + $0x6a8] sm:$0xff] }
 0x2b9   :  { %7270 = vmatpush1.bf16.msra.mxu1 %v12246_v51  ;;  %7099 = vmatprep.subr.bf16.mxu0 %v12253_v52  ;;  %v12300_v51 = vcombine.low %v4136_v40, %v4140_v41  ;;  %v12302_v52 = vcombine.low %v4137_v42, %v4141_v44  ;;  %v12311_v57 = vcombine.high %v4145_v49, %v4149_v50  ;;  %v4192_v41 = vld [vmem:[#allocation6 + $0x800] sm:$0xff]  ;;  %v4193_v44 = vld [vmem:[#allocation6 + $0x808] sm:$0xff] }
 0x2ba   :  { %7271 = vmatprep.subr.bf16.mxu1 %v12255_v55  ;;  %v12309_v55 = vcombine.high %v4144_v47, %v4148_v48  ;;  %v4196_v42 = vld [vmem:[#allocation6 + $0x820] sm:$0xff] }
 0x2bc   :  { %7100 = vmatpush1.bf16.msra.mxu0 %v12252_v62  ;;  %v4157_v62 = vld [vmem:[#allocation6 + $0x6e8] sm:$0xff] }
 0x2bd   :  { %7272 = vmatpush1.bf16.msra.mxu1 %v12254_v0  ;;  %7101 = vmatprep.subr.bf16.mxu0 %v12261_v1  ;;  %v12308_v0 = vcombine.low %v4144_v47, %v4148_v48  ;;  %v12310_v1 = vcombine.low %v4145_v49, %v4149_v50  ;;  %v12319_v3 = vcombine.high %v4153_v61, %v4157_v62  ;;  %v4200_v48 = vld [vmem:[#allocation6 + $0x840] sm:$0xff]  ;;  %v4201_v50 = vld [vmem:[#allocation6 + $0x848] sm:$0xff] }
 0x2be   :  { %7273 = vmatprep.subr.bf16.mxu1 %v12263_v2  ;;  %v12317_v2 = vcombine.high %v4152_v59, %v4156_v60  ;;  %v4204_v49 = vld [vmem:[#allocation6 + $0x860] sm:$0xff] }
 0x2c0   :  { %7102 = vmatpush1.bf16.msra.mxu0 %v12260_v10  ;;  %v4165_v10 = vld [vmem:[#allocation6 + $0x728] sm:$0xff] }
 0x2c1   :  { %7274 = vmatpush1.bf16.msra.mxu1 %v12262_v11  ;;  %7103 = vmatprep.subr.bf16.mxu0 %v12269_v12  ;;  %v12316_v11 = vcombine.low %v4152_v59, %v4156_v60  ;;  %v12318_v12 = vcombine.low %v4153_v61, %v4157_v62  ;;  %v12327_v16 = vcombine.high %v4161_v7, %v4165_v10  ;;  %v4208_v60 = vld [vmem:[#allocation6 + $0x880] sm:$0xff]  ;;  %v4209_v62 = vld [vmem:[#allocation6 + $0x888] sm:$0xff] }
 0x2c2   :  { %7275 = vmatprep.subr.bf16.mxu1 %v12271_v14  ;;  %v12325_v14 = vcombine.high %v4160_v4, %v4164_v6  ;;  %v4212_v61 = vld [vmem:[#allocation6 + $0x8a0] sm:$0xff] }
 0x2c4   :  { %7104 = vmatpush1.bf16.msra.mxu0 %v12268_v20  ;;  %v4173_v20 = vld [vmem:[#allocation6 + $0x768] sm:$0xff] }
 0x2c5   :  { %7276 = vmatpush1.bf16.msra.mxu1 %v12270_v21  ;;  %7105 = vmatprep.subr.bf16.mxu0 %v12277_v22  ;;  %v12324_v21 = vcombine.low %v4160_v4, %v4164_v6  ;;  %v12326_v22 = vcombine.low %v4161_v7, %v4165_v10  ;;  %v12335_v24 = vcombine.high %v4169_v19, %v4173_v20  ;;  %v4216_v6 = vld [vmem:[#allocation6 + $0x8c0] sm:$0xff]  ;;  %v4217_v10 = vld [vmem:[#allocation6 + $0x8c8] sm:$0xff] }
 0x2c6   :  { %7277 = vmatprep.subr.bf16.mxu1 %v12279_v23  ;;  %v12333_v23 = vcombine.high %v4168_v17, %v4172_v18  ;;  %v4220_v7 = vld [vmem:[#allocation6 + $0x8e0] sm:$0xff] }
 0x2c8   :  { %7106 = vmatpush1.bf16.msra.mxu0 %v12276_v30  ;;  %v4181_v30 = vld [vmem:[#allocation6 + $0x7a8] sm:$0xff] }
 0x2c9   :  { %7278 = vmatpush1.bf16.msra.mxu1 %v12278_v31  ;;  %7107 = vmatprep.subr.bf16.mxu0 %v12285_v58  ;;  %v12332_v31 = vcombine.low %v4168_v17, %v4172_v18  ;;  %v12334_v58 = vcombine.low %v4169_v19, %v4173_v20  ;;  %v12343_v33 = vcombine.high %v4177_v29, %v4181_v30  ;;  %v4224_v18 = vld [vmem:[#allocation6 + $0x900] sm:$0xff]  ;;  %v4225_v20 = vld [vmem:[#allocation6 + $0x908] sm:$0xff] }
 0x2ca   :  { %7279 = vmatprep.subr.bf16.mxu1 %v12287_v32  ;;  %v12341_v32 = vcombine.high %v4176_v26, %v4180_v28  ;;  %v4228_v19 = vld [vmem:[#allocation6 + $0x920] sm:$0xff] }
 0x2cc   :  { %7108 = vmatpush1.bf16.msra.mxu0 %v12284_v35  ;;  %v4189_v35 = vld [vmem:[#allocation6 + $0x7e8] sm:$0xff] }
 0x2cd   :  { %7280 = vmatpush1.bf16.msra.mxu1 %v12286_v36  ;;  %7109 = vmatprep.subr.bf16.mxu0 %v12293_v38  ;;  %v12340_v36 = vcombine.low %v4176_v26, %v4180_v28  ;;  %v12342_v38 = vcombine.low %v4177_v29, %v4181_v30  ;;  %v12351_v40 = vcombine.high %v4185_v15, %v4189_v35  ;;  %v4232_v28 = vld [vmem:[#allocation6 + $0x940] sm:$0xff]  ;;  %v4233_v30 = vld [vmem:[#allocation6 + $0x948] sm:$0xff] }
 0x2ce   :  { %7281 = vmatprep.subr.bf16.mxu1 %v12295_v39  ;;  %v12349_v39 = vcombine.high %v4184_v34, %v4188_v63  ;;  %v4236_v29 = vld [vmem:[#allocation6 + $0x960] sm:$0xff] }
 0x2d0   :  { %7110 = vmatpush1.bf16.msra.mxu0 %v12292_v45  ;;  %v4197_v45 = vld [vmem:[#allocation6 + $0x828] sm:$0xff] }
 0x2d1   :  { %7282 = vmatpush1.bf16.msra.mxu1 %v12294_v27  ;;  %7111 = vmatprep.subr.bf16.mxu0 %v12301_v25  ;;  %v12348_v27 = vcombine.low %v4184_v34, %v4188_v63  ;;  %v12350_v25 = vcombine.low %v4185_v15, %v4189_v35  ;;  %v12359_v47 = vcombine.high %v4193_v44, %v4197_v45  ;;  %v4240_v63 = vld [vmem:[#allocation6 + $0x980] sm:$0xff]  ;;  %v4241_v35 = vld [vmem:[#allocation6 + $0x988] sm:$0xff] }
 0x2d2   :  { %7283 = vmatprep.subr.bf16.mxu1 %v12303_v46  ;;  %v12357_v46 = vcombine.high %v4192_v41, %v4196_v42  ;;  %v4244_v15 = vld [vmem:[#allocation6 + $0x9a0] sm:$0xff] }
 0x2d4   :  { %7112 = vmatpush1.bf16.msra.mxu0 %v12300_v51  ;;  %v4205_v51 = vld [vmem:[#allocation6 + $0x868] sm:$0xff] }
 0x2d5   :  { %7284 = vmatpush1.bf16.msra.mxu1 %v12302_v52  ;;  %7113 = vmatprep.subr.bf16.mxu0 %v12309_v55  ;;  %v12356_v52 = vcombine.low %v4192_v41, %v4196_v42  ;;  %v12358_v55 = vcombine.low %v4193_v44, %v4197_v45  ;;  %v12367_v59 = vcombine.high %v4201_v50, %v4205_v51  ;;  %v4248_v42 = vld [vmem:[#allocation6 + $0x9c0] sm:$0xff]  ;;  %v4249_v45 = vld [vmem:[#allocation6 + $0x9c8] sm:$0xff] }
 0x2d6   :  { %7285 = vmatprep.subr.bf16.mxu1 %v12311_v57  ;;  %v12365_v57 = vcombine.high %v4200_v48, %v4204_v49  ;;  %v4252_v44 = vld [vmem:[#allocation6 + $0x9e0] sm:$0xff] }
 0x2d8   :  { %7114 = vmatpush1.bf16.msra.mxu0 %v12308_v0  ;;  %v4213_v0 = vld [vmem:[#allocation6 + $0x8a8] sm:$0xff] }
 0x2d9   :  { %7286 = vmatpush1.bf16.msra.mxu1 %v12310_v1  ;;  %7115 = vmatprep.subr.bf16.mxu0 %v12317_v2  ;;  %v12364_v1 = vcombine.low %v4200_v48, %v4204_v49  ;;  %v12366_v2 = vcombine.low %v4201_v50, %v4205_v51  ;;  %v12375_v4 = vcombine.high %v4209_v62, %v4213_v0  ;;  %v4256_v49 = vld [vmem:[#allocation6 + $0xa00] sm:$0xff]  ;;  %v4257_v51 = vld [vmem:[#allocation6 + $0xa08] sm:$0xff] }
 0x2da   :  { %7287 = vmatprep.subr.bf16.mxu1 %v12319_v3  ;;  %v12373_v3 = vcombine.high %v4208_v60, %v4212_v61  ;;  %v4260_v50 = vld [vmem:[#allocation6 + $0xa20] sm:$0xff] }
 0x2dc   :  { %7116 = vmatpush1.bf16.msra.mxu0 %v12316_v11  ;;  %v4221_v11 = vld [vmem:[#allocation6 + $0x8e8] sm:$0xff] }
 0x2dd   :  { %7288 = vmatpush1.bf16.msra.mxu1 %v12318_v12  ;;  %7117 = vmatprep.subr.bf16.mxu0 %v12325_v14  ;;  %v12372_v12 = vcombine.low %v4208_v60, %v4212_v61  ;;  %v12374_v14 = vcombine.low %v4209_v62, %v4213_v0  ;;  %v12383_v17 = vcombine.high %v4217_v10, %v4221_v11  ;;  %v4264_v61 = vld [vmem:[#allocation6 + $0xa40] sm:$0xff]  ;;  %v4265_v0 = vld [vmem:[#allocation6 + $0xa48] sm:$0xff] }
 0x2de   :  { %7289 = vmatprep.subr.bf16.mxu1 %v12327_v16  ;;  %v12381_v16 = vcombine.high %v4216_v6, %v4220_v7  ;;  %v4268_v62 = vld [vmem:[#allocation6 + $0xa60] sm:$0xff] }
 0x2e0   :  { %7118 = vmatpush1.bf16.msra.mxu0 %v12324_v21  ;;  %v4229_v21 = vld [vmem:[#allocation6 + $0x928] sm:$0xff] }
 0x2e1   :  { %7290 = vmatpush1.bf16.msra.mxu1 %v12326_v22  ;;  %7119 = vmatprep.subr.bf16.mxu0 %v12333_v23  ;;  %v12380_v22 = vcombine.low %v4216_v6, %v4220_v7  ;;  %v12382_v23 = vcombine.low %v4217_v10, %v4221_v11  ;;  %v12391_v26 = vcombine.high %v4225_v20, %v4229_v21  ;;  %v4272_v7 = vld [vmem:[#allocation6 + $0xa80] sm:$0xff]  ;;  %v4273_v11 = vld [vmem:[#allocation6 + $0xa88] sm:$0xff] }
 0x2e2   :  { %7291 = vmatprep.subr.bf16.mxu1 %v12335_v24  ;;  %v12389_v24 = vcombine.high %v4224_v18, %v4228_v19  ;;  %v4276_v10 = vld [vmem:[#allocation6 + $0xaa0] sm:$0xff] }
 0x2e4   :  { %7120 = vmatpush1.bf16.msra.mxu0 %v12332_v31  ;;  %v4237_v31 = vld [vmem:[#allocation6 + $0x968] sm:$0xff] }
 0x2e5   :  { %7292 = vmatpush1.bf16.msra.mxu1 %v12334_v58  ;;  %7121 = vmatprep.subr.bf16.mxu0 %v12341_v32  ;;  %v12388_v58 = vcombine.low %v4224_v18, %v4228_v19  ;;  %v12390_v32 = vcombine.low %v4225_v20, %v4229_v21  ;;  %v12399_v34 = vcombine.high %v4233_v30, %v4237_v31  ;;  %v4280_v19 = vld [vmem:[#allocation6 + $0xac0] sm:$0xff]  ;;  %v4281_v21 = vld [vmem:[#allocation6 + $0xac8] sm:$0xff] }
 0x2e6   :  { %7293 = vmatprep.subr.bf16.mxu1 %v12343_v33  ;;  %v12397_v33 = vcombine.high %v4232_v28, %v4236_v29  ;;  %v4284_v20 = vld [vmem:[#allocation6 + $0xae0] sm:$0xff] }
 0x2e8   :  { %7122 = vmatpush1.bf16.msra.mxu0 %v12340_v36  ;;  %v4245_v36 = vld [vmem:[#allocation6 + $0x9a8] sm:$0xff] }
 0x2e9   :  { %7294 = vmatpush1.bf16.msra.mxu1 %v12342_v38  ;;  %7123 = vmatprep.subr.bf16.mxu0 %v12349_v39  ;;  %v12396_v38 = vcombine.low %v4232_v28, %v4236_v29  ;;  %v12398_v39 = vcombine.low %v4233_v30, %v4237_v31  ;;  %v12407_v41 = vcombine.high %v4241_v35, %v4245_v36  ;;  %v4288_v29 = vld [vmem:[#allocation6 + $0xb00] sm:$0xff]  ;;  %v4289_v31 = vld [vmem:[#allocation6 + $0xb08] sm:$0xff] }
 0x2ea   :  { %7295 = vmatprep.subr.bf16.mxu1 %v12351_v40  ;;  %v12405_v40 = vcombine.high %v4240_v63, %v4244_v15  ;;  %v4292_v30 = vld [vmem:[#allocation6 + $0xb20] sm:$0xff] }
 0x2ec   :  { %7124 = vmatpush1.bf16.msra.mxu0 %v12348_v27  ;;  %v4253_v27 = vld [vmem:[#allocation6 + $0x9e8] sm:$0xff] }
 0x2ed   :  { %7296 = vmatpush1.bf16.msra.mxu1 %v12350_v25  ;;  %7136 = vmatprep.subr.bf16.mxu0 %v12357_v46  ;;  %v12404_v25 = vcombine.low %v4240_v63, %v4244_v15  ;;  %v12406_v46 = vcombine.low %v4241_v35, %v4245_v36  ;;  %v12415_v48 = vcombine.high %v4249_v45, %v4253_v27  ;;  %v4296_v15 = vld [vmem:[#allocation6 + $0xb40] sm:$0xff]  ;;  %v4297_v36 = vld [vmem:[#allocation6 + $0xb48] sm:$0xff] }
 0x2ee   :  { %7308 = vmatprep.subr.bf16.mxu1 %v12359_v47  ;;  %v12413_v47 = vcombine.high %v4248_v42, %v4252_v44  ;;  %v4300_v35 = vld [vmem:[#allocation6 + $0xb60] sm:$0xff] }
 0x2ef   :  { %7126 = vmatmul.mubr.bf16.vlgmr.msra.gmra.mrb[8].mxu0 %v13709_v54 }
 0x2f0   :  { %7298 = vmatmul.mubr.bf16.vlgmr.msra.gmra.mrb[8].mxu1 %v13709_v54  ;;  %7137 = vmatpush1.bf16.msra.mxu0 %v12356_v52  ;;  %v4261_v52 = vld [vmem:[#allocation6 + $0xa28] sm:$0xff] }
 0x2f1   :  { %7309 = vmatpush1.bf16.msra.mxu1 %v12358_v55  ;;  %7138 = vmatprep.subr.bf16.mxu0 %v12365_v57  ;;  %v12412_v55 = vcombine.low %v4248_v42, %v4252_v44  ;;  %v12414_v57 = vcombine.low %v4249_v45, %v4253_v27  ;;  %v12423_v60 = vcombine.high %v4257_v51, %v4261_v52  ;;  %v4304_v44 = vld [vmem:[#allocation6 + $0xb80] sm:$0xff]  ;;  %v4305_v27 = vld [vmem:[#allocation6 + $0xb88] sm:$0xff] }
 0x2f2   :  { %7310 = vmatprep.subr.bf16.mxu1 %v12367_v59  ;;  %v12421_v59 = vcombine.high %v4256_v49, %v4260_v50  ;;  %v4308_v45 = vld [vmem:[#allocation6 + $0xba0] sm:$0xff] }
 0x2f4   :  { %7139 = vmatpush1.bf16.msra.mxu0 %v12364_v1  ;;  %v4269_v1 = vld [vmem:[#allocation6 + $0xa68] sm:$0xff] }
 0x2f5   :  { %7311 = vmatpush1.bf16.msra.mxu1 %v12366_v2  ;;  %7140 = vmatprep.subr.bf16.mxu0 %v12373_v3  ;;  %v12420_v2 = vcombine.low %v4256_v49, %v4260_v50  ;;  %v12422_v3 = vcombine.low %v4257_v51, %v4261_v52  ;;  %v12431_v6 = vcombine.high %v4265_v0, %v4269_v1  ;;  %v4312_v50 = vld [vmem:[#allocation6 + $0xbc0] sm:$0xff]  ;;  %v4313_v52 = vld [vmem:[#allocation6 + $0xbc8] sm:$0xff] }
 0x2f6   :  { %7312 = vmatprep.subr.bf16.mxu1 %v12375_v4  ;;  %v12429_v4 = vcombine.high %v4264_v61, %v4268_v62  ;;  %v4316_v51 = vld [vmem:[#allocation6 + $0xbe0] sm:$0xff] }
 0x2f8   :  { %7141 = vmatpush1.bf16.msra.mxu0 %v12372_v12  ;;  %v4277_v12 = vld [vmem:[#allocation6 + $0xaa8] sm:$0xff] }
 0x2f9   :  { %7313 = vmatpush1.bf16.msra.mxu1 %v12374_v14  ;;  %7142 = vmatprep.subr.bf16.mxu0 %v12381_v16  ;;  %v12428_v14 = vcombine.low %v4264_v61, %v4268_v62  ;;  %v12430_v16 = vcombine.low %v4265_v0, %v4269_v1  ;;  %v12439_v18 = vcombine.high %v4273_v11, %v4277_v12  ;;  %v4320_v62 = vld [vmem:[#allocation6 + $0xc00] sm:$0xff]  ;;  %v4321_v1 = vld [vmem:[#allocation6 + $0xc08] sm:$0xff] }
 0x2fa   :  { %7314 = vmatprep.subr.bf16.mxu1 %v12383_v17  ;;  %v12437_v17 = vcombine.high %v4272_v7, %v4276_v10  ;;  %v4324_v0 = vld [vmem:[#allocation6 + $0xc20] sm:$0xff] }
 0x2fc   :  { %7143 = vmatpush1.bf16.msra.mxu0 %v12380_v22  ;;  %v4285_v22 = vld [vmem:[#allocation6 + $0xae8] sm:$0xff] }
 0x2fd   :  { %7315 = vmatpush1.bf16.msra.mxu1 %v12382_v23  ;;  %7144 = vmatprep.subr.bf16.mxu0 %v12389_v24  ;;  %v12436_v23 = vcombine.low %v4272_v7, %v4276_v10  ;;  %v12438_v24 = vcombine.low %v4273_v11, %v4277_v12  ;;  %v12447_v28 = vcombine.high %v4281_v21, %v4285_v22  ;;  %v13726_v10 = vsub.s32 4, %v13689_v53 }
 0x2fe   :  { %7316 = vmatprep.subr.bf16.mxu1 %v12391_v26  ;;  %v12445_v26 = vcombine.high %v4280_v19, %v4284_v20  ;;  %v13729_v11 = vsub.s32 6, %v13689_v53  ;;  %v13732_v12 = vsub.s32 5, %v13689_v53 }
 0x300   :  { %7145 = vmatpush1.bf16.msra.mxu0 %v12388_v58  ;;  %v4293_v58 = vld [vmem:[#allocation6 + $0xb28] sm:$0xff] }
 0x301   :  { %7317 = vmatpush1.bf16.msra.mxu1 %v12390_v32  ;;  %7146 = vmatprep.subr.bf16.mxu0 %v12397_v33  ;;  %v12444_v32 = vcombine.low %v4280_v19, %v4284_v20  ;;  %v12446_v33 = vcombine.low %v4281_v21, %v4285_v22  ;;  %v12455_v63 = vcombine.high %v4289_v31, %v4293_v58 }
 0x302   :  { %7318 = vmatprep.subr.bf16.mxu1 %v12399_v34  ;;  %v12453_v34 = vcombine.high %v4288_v29, %v4292_v30 }
 0x304   :  { %7147 = vmatpush1.bf16.msra.mxu0 %v12396_v38  ;;  %v4301_v38 = vld [vmem:[#allocation6 + $0xb68] sm:$0xff] }
 0x305   :  { %7319 = vmatpush1.bf16.msra.mxu1 %v12398_v39  ;;  %7148 = vmatprep.subr.bf16.mxu0 %v12405_v40  ;;  %v12452_v39 = vcombine.low %v4288_v29, %v4292_v30  ;;  %v12454_v40 = vcombine.low %v4289_v31, %v4293_v58  ;;  %v12463_v42 = vcombine.high %v4297_v36, %v4301_v38 }
 0x306   :  { %7320 = vmatprep.subr.bf16.mxu1 %v12407_v41  ;;  %v12461_v41 = vcombine.high %v4296_v15, %v4300_v35 }
 0x308   :  { %7149 = vmatpush1.bf16.msra.mxu0 %v12404_v25  ;;  %v4309_v25 = vld [vmem:[#allocation6 + $0xba8] sm:$0xff] }
 0x309   :  { %7321 = vmatpush1.bf16.msra.mxu1 %v12406_v46  ;;  %7150 = vmatprep.subr.bf16.mxu0 %v12413_v47  ;;  %v12460_v46 = vcombine.low %v4296_v15, %v4300_v35  ;;  %v12462_v47 = vcombine.low %v4297_v36, %v4301_v38  ;;  %v12471_v49 = vcombine.high %v4305_v27, %v4309_v25  ;;  %v4332_v38 = vld [vmem:[#allocation6 + $0xc60] sm:$0xff] }
 0x30a   :  { %7322 = vmatprep.subr.bf16.mxu1 %v12415_v48  ;;  %v12469_v48 = vcombine.high %v4304_v44, %v4308_v45 }
 0x30c   :  { %7151 = vmatpush1.bf16.msra.mxu0 %v12412_v55  ;;  %v4317_v55 = vld [vmem:[#allocation6 + $0xbe8] sm:$0xff] }
 0x30d   :  { %7323 = vmatpush1.bf16.msra.mxu1 %v12414_v57  ;;  %7152 = vmatprep.subr.bf16.mxu0 %v12421_v59  ;;  %v12468_v57 = vcombine.low %v4304_v44, %v4308_v45  ;;  %v12470_v59 = vcombine.low %v4305_v27, %v4309_v25  ;;  %v12479_v61 = vcombine.high %v4313_v52, %v4317_v55  ;;  %v4336_v25 = vld [vmem:[#allocation6 + $0xc80] sm:$0xff] }
 0x30e   :  { %7324 = vmatprep.subr.bf16.mxu1 %v12423_v60  ;;  %v12477_v60 = vcombine.high %v4312_v50, %v4316_v51  ;;  %v12484_v44 = vcombine.low %v4320_v62, %v4324_v0 }
 0x310   :  { %7153 = vmatpush1.bf16.msra.mxu0 %v12420_v2  ;;  %v4325_v2 = vld [vmem:[#allocation6 + $0xc28] sm:$0xff] }
 0x311   :  { %7325 = vmatpush1.bf16.msra.mxu1 %v12422_v3  ;;  %7154 = vmatprep.subr.bf16.mxu0 %v12429_v4  ;;  %v12476_v3 = vcombine.low %v4312_v50, %v4316_v51  ;;  %v12478_v4 = vcombine.low %v4313_v52, %v4317_v55  ;;  %v12487_v7 = vcombine.high %v4321_v1, %v4325_v2  ;;  %v4341_v50 = vld [vmem:[#allocation6 + $0xca8] sm:$0xff] }
 0x312   :  { %7326 = vmatprep.subr.bf16.mxu1 %v12431_v6  ;;  %v12485_v6 = vcombine.high %v4320_v62, %v4324_v0  ;;  %v12486_v45 = vcombine.low %v4321_v1, %v4325_v2  ;;  %v4349_v62 = vld [vmem:[#allocation6 + $0xce8] sm:$0xff] }
 0x314   :  { %7155 = vmatpush1.bf16.msra.mxu0 %v12428_v14  ;;  %v13735_v14 = vsub.s32 7, %v13689_v53 }
 0x315   :  { %7327 = vmatpush1.bf16.msra.mxu1 %v12430_v16  ;;  %7156 = vmatprep.subr.bf16.mxu0 %v12437_v17  ;;  %v13324_v16 = vld [vmem:[#allocation4] sm:$0xff] }
 0x316   :  { %7328 = vmatprep.subr.bf16.mxu1 %v12439_v18  ;;  %v659_v17 = vrot.slane %v13324_v16, %v13726_v10  ;;  %v667_v19 = vrot.slane %v13324_v16, %v13729_v11  ;;  %v663_v20 = vrot.slane %v13324_v16, %v13732_v12 }
 0x318   :  { %7157 = vmatpush1.bf16.msra.mxu0 %v12436_v23  ;;  %v671_v23 = vrot.slane %v13324_v16, %v13735_v14  ;;  %v4357_v16 = vld [vmem:[#allocation6 + $0xd28] sm:$0xff] }
 0x319   :  { %7329 = vmatpush1.bf16.msra.mxu1 %v12438_v24  ;;  %7158 = vmatprep.subr.bf16.mxu0 %v12445_v26 }
 0x31a   :  { %7330 = vmatprep.subr.bf16.mxu1 %v12447_v28 }
 0x31c   :  { %7159 = vmatpush1.bf16.msra.mxu0 %v12444_v32 }
 0x31d   :  { %7331 = vmatpush1.bf16.msra.mxu1 %v12446_v33  ;;  %7160 = vmatprep.subr.bf16.mxu0 %v12453_v34 }
 0x31e   :  { %7332 = vmatprep.subr.bf16.mxu1 %v12455_v63  ;;  %v4328_v63 = vld [vmem:[#allocation6 + $0xc40] sm:$0xff] }
 0x31f   :  { %v12492_v51 = vcombine.low %v4328_v63, %v4332_v38 }
 0x320   :  { %7161 = vmatpush1.bf16.msra.mxu0 %v12452_v39  ;;  %v4329_v39 = vld [vmem:[#allocation6 + $0xc48] sm:$0xff] }
 0x321   :  { %7333 = vmatpush1.bf16.msra.mxu1 %v12454_v40  ;;  %7162 = vmatprep.subr.bf16.mxu0 %v12461_v41  ;;  %v4333_v40 = vld [vmem:[#allocation6 + $0xc68] sm:$0xff] }
 0x322   :  { %7334 = vmatprep.subr.bf16.mxu1 %v12463_v42  ;;  %v12494_v52 = vcombine.low %v4329_v39, %v4333_v40 }
 0x324   :  { %7163 = vmatpush1.bf16.msra.mxu0 %v12460_v46  ;;  %v12493_v46 = vcombine.high %v4328_v63, %v4332_v38  ;;  %v4380_v38 = vld [vmem:[#allocation6 + $0xde0] sm:$0xff] }
 0x325   :  { %7335 = vmatpush1.bf16.msra.mxu1 %v12462_v47  ;;  %7164 = vmatprep.subr.bf16.mxu0 %v12469_v48  ;;  %v12495_v47 = vcombine.high %v4329_v39, %v4333_v40  ;;  %v4340_v48 = vld [vmem:[#allocation6 + $0xca0] sm:$0xff]  ;;  %v4377_v39 = vld [vmem:[#allocation6 + $0xdc8] sm:$0xff] }
 0x326   :  { %7336 = vmatprep.subr.bf16.mxu1 %v12471_v49  ;;  %v4337_v49 = vld [vmem:[#allocation6 + $0xc88] sm:$0xff]  ;;  %v12501_v55 = vcombine.high %v4336_v25, %v4340_v48  ;;  %v12500_v0 = vcombine.low %v4336_v25, %v4340_v48  ;;  %v4388_v48 = vld [vmem:[#allocation6 + $0xe20] sm:$0xff] }
 0x327   :  { %v12502_v1 = vcombine.low %v4337_v49, %v4341_v50  ;;  %v4381_v40 = vld [vmem:[#allocation6 + $0xde8] sm:$0xff] }
 0x328   :  { %7165 = vmatpush1.bf16.msra.mxu0 %v12468_v57  ;;  %v12503_v57 = vcombine.high %v4337_v49, %v4341_v50  ;;  %v4385_v49 = vld [vmem:[#allocation6 + $0xe08] sm:$0xff] }
 0x329   :  { %7337 = vmatpush1.bf16.msra.mxu1 %v12470_v59  ;;  %7166 = vmatprep.subr.bf16.mxu0 %v12477_v60  ;;  %v4344_v59 = vld [vmem:[#allocation6 + $0xcc0] sm:$0xff]  ;;  %v4389_v50 = vld [vmem:[#allocation6 + $0xe28] sm:$0xff] }
 0x32a   :  { %7338 = vmatprep.subr.bf16.mxu1 %v12479_v61  ;;  %v4348_v60 = vld [vmem:[#allocation6 + $0xce0] sm:$0xff]  ;;  %v4345_v61 = vld [vmem:[#allocation6 + $0xcc8] sm:$0xff] }
 0x32b   :  { %v12509_v2 = vcombine.high %v4344_v59, %v4348_v60 }
 0x32c   :  { %7167 = vmatpush1.bf16.msra.mxu0 %v12476_v3  ;;  %v12511_v3 = vcombine.high %v4345_v61, %v4349_v62 }
 0x32d   :  { %7339 = vmatpush1.bf16.msra.mxu1 %v12478_v4  ;;  %7179 = vmatprep.subr.bf16.mxu0 %v12485_v6  ;;  %v4352_v4 = vld [vmem:[#allocation6 + $0xd00] sm:$0xff] }
 0x32e   :  { %7351 = vmatprep.subr.bf16.mxu1 %v12487_v7  ;;  %v4356_v6 = vld [vmem:[#allocation6 + $0xd20] sm:$0xff]  ;;  %v4353_v7 = vld [vmem:[#allocation6 + $0xd08] sm:$0xff] }
 0x342   :  { %v3747_v18 = vpop.f32.mrb[4].mxu0  ;;  %v3919_v21 = vpop.f32.mrb[4].mxu1 }
 0x343   :  { %v3749_v22 = vpop.f32.mrb[5].mxu0  ;;  %v3921_v24 = vpop.f32.mrb[5].mxu1  ;;  %v13132_v28 = vadd.f32 %v3747_v18, %v659_v17  ;;  %v13136_v53 = vadd.f32 %v3919_v21, %v667_v19  ;;  %v12510_v18 = vcombine.low %v4345_v61, %v4349_v62  ;;  %v4360_v21 = vld [vmem:[#allocation6 + $0xd40] sm:$0xff]  ;;  %v4393_v61 = vld [vmem:[#allocation6 + $0xe48] sm:$0xff] }
 0x344   :  { %v3751_v26 = vpop.f32.mrb[6].mxu0  ;;  %v3923_v30 = vpop.f32.mrb[6].mxu1  ;;  %v13133_v58 = vadd.f32 %v3749_v22, %v663_v20  ;;  %v13137_v15 = vadd.f32 %v3921_v24, %v671_v23  ;;  %v4364_v22 = vld [vmem:[#allocation6 + $0xd60] sm:$0xff]  ;;  %v4365_v24 = vld [vmem:[#allocation6 + $0xd68] sm:$0xff] }
 0x345   :  { %v13134_v29 = vadd.f32 %v3751_v26, %v659_v17  ;;  %v3753_v31 = vpop.f32.mrb[7].mxu0  ;;  %v13138_v32 = vadd.f32 %v3923_v30, %v667_v19  ;;  %v3925_v34 = vpop.f32.mrb[7].mxu1  ;;  %v12508_v17 = vcombine.low %v4344_v59, %v4348_v60  ;;  %v12517_v19 = vcombine.high %v4352_v4, %v4356_v6  ;;  %v4392_v59 = vld [vmem:[#allocation6 + $0xe40] sm:$0xff]  ;;  %v4397_v62 = vld [vmem:[#allocation6 + $0xe68] sm:$0xff] }
 0x346   :  { %v13135_v33 = vadd.f32 %v3753_v31, %v663_v20  ;;  %v13139_v36 = vadd.f32 %v3925_v34, %v671_v23  ;;  %v12519_v20 = vcombine.high %v4353_v7, %v4357_v16  ;;  %v4361_v23 = vld [vmem:[#allocation6 + $0xd48] sm:$0xff]  ;;  %v12516_v26 = vcombine.low %v4352_v4, %v4356_v6  ;;  %v4368_v31 = vld [vmem:[#allocation6 + $0xd80] sm:$0xff] }
 0x347   :  { %v13741_v35 = vpack.c.bf16 %v13134_v29, %v13132_v28  ;;  %v13743_v41 = vpack.c.bf16 %v13138_v32, %v13136_v53  ;;  %v12518_v28 = vcombine.low %v4353_v7, %v4357_v16  ;;  %v12525_v29 = vcombine.high %v4360_v21, %v4364_v22  ;;  %v4372_v53 = vld [vmem:[#allocation6 + $0xda0] sm:$0xff]  ;;  %v4373_v32 = vld [vmem:[#allocation6 + $0xda8] sm:$0xff] }
 0x348   :  { %v13745_v42 = vpack.c.bf16 %v13135_v33, %v13133_v58  ;;  %v13747_v27 = vpack.c.bf16 %v13139_v36, %v13137_v15  ;;  %v12527_v30 = vcombine.high %v4361_v23, %v4365_v24  ;;  %v4369_v58 = vld [vmem:[#allocation6 + $0xd88] sm:$0xff]  ;;  %v12524_v33 = vcombine.low %v4360_v21, %v4364_v22  ;;  %v4376_v36 = vld [vmem:[#allocation6 + $0xdc0] sm:$0xff] }
 0x349   :  { %v12526_v34 = vcombine.low %v4361_v23, %v4365_v24  ;;  %v12533_v63 = vcombine.high %v4368_v31, %v4372_v53  ;;  %v12535_v15 = vcombine.high %v4369_v58, %v4373_v32  ;;  %v12541_v25 = vcombine.high %v4376_v36, %v4380_v38  ;;  %v4396_v60 = vld [vmem:[#allocation6 + $0xe60] sm:$0xff]  ;;  %v4401_v7 = vld [vmem:[#allocation6 + $0xe88] sm:$0xff] }
 0x34a   :  { %7168 = vmatprep.mubr.bf16.mxu0 %v13745_v42  ;;  %7340 = vmatprep.mubr.bf16.mxu1 %v13745_v42  ;;  %v4400_v4 = vld [vmem:[#allocation6 + $0xe80] sm:$0xff]  ;;  %v4405_v16 = vld [vmem:[#allocation6 + $0xea8] sm:$0xff] }
 0x34b   :  { %7169 = vmatmul.mubr.bf16.vlgmr.msra.gmra.mrb[8].mxu0 %v13741_v35  ;;  %7341 = vmatmul.mubr.bf16.vlgmr.msra.gmra.mrb[8].mxu1 %v13741_v35  ;;  %v4404_v6 = vld [vmem:[#allocation6 + $0xea0] sm:$0xff]  ;;  %v4409_v23 = vld [vmem:[#allocation6 + $0xec8] sm:$0xff] }
 0x34c   :  { %7180 = vmatpush1.bf16.msra.mxu0 %v12484_v44  ;;  %7352 = vmatpush1.bf16.msra.mxu1 %v12486_v45  ;;  %v12532_v44 = vcombine.low %v4368_v31, %v4372_v53  ;;  %v12534_v45 = vcombine.low %v4369_v58, %v4373_v32  ;;  %v4408_v21 = vld [vmem:[#allocation6 + $0xec0] sm:$0xff]  ;;  %v4413_v24 = vld [vmem:[#allocation6 + $0xee8] sm:$0xff] }
 0x34d   :  { %7211 = vmatprep.mubr.bf16.mxu0 %v13747_v27  ;;  %7383 = vmatprep.mubr.bf16.mxu1 %v13747_v27  ;;  %v4412_v22 = vld [vmem:[#allocation6 + $0xee0] sm:$0xff]  ;;  %v4417_v58 = vld [vmem:[#allocation6 + $0xf08] sm:$0xff] }
 0x34e   :  { %7181 = vmatprep.subr.bf16.mxu0 %v12493_v46  ;;  %7353 = vmatprep.subr.bf16.mxu1 %v12495_v47  ;;  %v12543_v46 = vcombine.high %v4377_v39, %v4381_v40  ;;  %v4384_v47 = vld [vmem:[#allocation6 + $0xe00] sm:$0xff]  ;;  %v4421_v32 = vld [vmem:[#allocation6 + $0xf28] sm:$0xff] }
 0x34f   :  { %v4416_v31 = vld [vmem:[#allocation6 + $0xf00] sm:$0xff] }
 0x350   :  { %7182 = vmatpush1.bf16.msra.mxu0 %v12492_v51  ;;  %7354 = vmatpush1.bf16.msra.mxu1 %v12494_v52  ;;  %v12540_v51 = vcombine.low %v4376_v36, %v4380_v38  ;;  %v12542_v52 = vcombine.low %v4377_v39, %v4381_v40  ;;  %v4420_v53 = vld [vmem:[#allocation6 + $0xf20] sm:$0xff]  ;;  %v4425_v39 = vld [vmem:[#allocation6 + $0xf48] sm:$0xff] }
 0x351   :  { %7183 = vmatprep.subr.bf16.mxu0 %v12501_v55  ;;  %7355 = vmatprep.subr.bf16.mxu1 %v12503_v57  ;;  %v12549_v55 = vcombine.high %v4384_v47, %v4388_v48  ;;  %v12551_v57 = vcombine.high %v4385_v49, %v4389_v50  ;;  %v4424_v36 = vld [vmem:[#allocation6 + $0xf40] sm:$0xff]  ;;  %v4429_v40 = vld [vmem:[#allocation6 + $0xf68] sm:$0xff] }
 0x352   :  { %v4428_v38 = vld [vmem:[#allocation6 + $0xf60] sm:$0xff] }
 0x354   :  { %7184 = vmatpush1.bf16.msra.mxu0 %v12500_v0  ;;  %7356 = vmatpush1.bf16.msra.mxu1 %v12502_v1  ;;  %v12548_v0 = vcombine.low %v4384_v47, %v4388_v48  ;;  %v12550_v1 = vcombine.low %v4385_v49, %v4389_v50  ;;  %v4432_v47 = vld [vmem:[#allocation6 + $0xf80] sm:$0xff]  ;;  %v4433_v49 = vld [vmem:[#allocation6 + $0xf88] sm:$0xff] }
 0x355   :  { %7185 = vmatprep.subr.bf16.mxu0 %v12509_v2  ;;  %7357 = vmatprep.subr.bf16.mxu1 %v12511_v3  ;;  %v12557_v2 = vcombine.high %v4392_v59, %v4396_v60  ;;  %v12559_v3 = vcombine.high %v4393_v61, %v4397_v62  ;;  %v4436_v48 = vld [vmem:[#allocation6 + $0xfa0] sm:$0xff]  ;;  %v4437_v50 = vld [vmem:[#allocation6 + $0xfa8] sm:$0xff] }
 0x358   :  { %7186 = vmatpush1.bf16.msra.mxu0 %v12508_v17  ;;  %7358 = vmatpush1.bf16.msra.mxu1 %v12510_v18  ;;  %v12556_v17 = vcombine.low %v4392_v59, %v4396_v60  ;;  %v12558_v18 = vcombine.low %v4393_v61, %v4397_v62  ;;  %v4440_v59 = vld [vmem:[#allocation6 + $0xfc0] sm:$0xff]  ;;  %v4441_v61 = vld [vmem:[#allocation6 + $0xfc8] sm:$0xff] }
 0x359   :  { %7187 = vmatprep.subr.bf16.mxu0 %v12517_v19  ;;  %7359 = vmatprep.subr.bf16.mxu1 %v12519_v20  ;;  %v12565_v19 = vcombine.high %v4400_v4, %v4404_v6  ;;  %v12567_v20 = vcombine.high %v4401_v7, %v4405_v16  ;;  %v4444_v60 = vld [vmem:[#allocation6 + $0xfe0] sm:$0xff]  ;;  %v4445_v62 = vld [vmem:[#allocation6 + $0xfe8] sm:$0xff] }
 0x35c   :  { %7188 = vmatpush1.bf16.msra.mxu0 %v12516_v26  ;;  %7360 = vmatpush1.bf16.msra.mxu1 %v12518_v28  ;;  %v12564_v26 = vcombine.low %v4400_v4, %v4404_v6  ;;  %v12566_v28 = vcombine.low %v4401_v7, %v4405_v16  ;;  %v3938_v4 = vld [vmem:[#allocation6 + $0x10] sm:$0xff]  ;;  %v3939_v7 = vld [vmem:[#allocation6 + $0x18] sm:$0xff] }
 0x35d   :  { %7189 = vmatprep.subr.bf16.mxu0 %v12525_v29  ;;  %7361 = vmatprep.subr.bf16.mxu1 %v12527_v30  ;;  %v12573_v29 = vcombine.high %v4408_v21, %v4412_v22  ;;  %v12575_v30 = vcombine.high %v4409_v23, %v4413_v24  ;;  %v3942_v6 = vld [vmem:[#allocation6 + $0x30] sm:$0xff]  ;;  %v3943_v16 = vld [vmem:[#allocation6 + $0x38] sm:$0xff] }
 0x360   :  { %7190 = vmatpush1.bf16.msra.mxu0 %v12524_v33  ;;  %7362 = vmatpush1.bf16.msra.mxu1 %v12526_v34  ;;  %v12572_v33 = vcombine.low %v4408_v21, %v4412_v22  ;;  %v12574_v34 = vcombine.low %v4409_v23, %v4413_v24  ;;  %v3946_v21 = vld [vmem:[#allocation6 + $0x50] sm:$0xff]  ;;  %v3947_v23 = vld [vmem:[#allocation6 + $0x58] sm:$0xff] }
 0x361   :  { %7191 = vmatprep.subr.bf16.mxu0 %v12533_v63  ;;  %7363 = vmatprep.subr.bf16.mxu1 %v12535_v15  ;;  %v12581_v63 = vcombine.high %v4416_v31, %v4420_v53  ;;  %v12583_v15 = vcombine.high %v4417_v58, %v4421_v32  ;;  %v3950_v22 = vld [vmem:[#allocation6 + $0x70] sm:$0xff]  ;;  %v3951_v24 = vld [vmem:[#allocation6 + $0x78] sm:$0xff] }
 0x364   :  { %7192 = vmatpush1.bf16.msra.mxu0 %v12532_v44  ;;  %7364 = vmatpush1.bf16.msra.mxu1 %v12534_v45  ;;  %v12580_v44 = vcombine.low %v4416_v31, %v4420_v53  ;;  %v12582_v45 = vcombine.low %v4417_v58, %v4421_v32  ;;  %v3954_v31 = vld [vmem:[#allocation6 + $0x90] sm:$0xff]  ;;  %v3955_v58 = vld [vmem:[#allocation6 + $0x98] sm:$0xff] }
 0x365   :  { %7193 = vmatprep.subr.bf16.mxu0 %v12541_v25  ;;  %7365 = vmatprep.subr.bf16.mxu1 %v12543_v46  ;;  %v12589_v25 = vcombine.high %v4424_v36, %v4428_v38  ;;  %v12591_v46 = vcombine.high %v4425_v39, %v4429_v40  ;;  %v3958_v53 = vld [vmem:[#allocation6 + $0xb0] sm:$0xff]  ;;  %v3959_v32 = vld [vmem:[#allocation6 + $0xb8] sm:$0xff] }
 0x368   :  { %7194 = vmatpush1.bf16.msra.mxu0 %v12540_v51  ;;  %7366 = vmatpush1.bf16.msra.mxu1 %v12542_v52  ;;  %v12588_v51 = vcombine.low %v4424_v36, %v4428_v38  ;;  %v12590_v52 = vcombine.low %v4425_v39, %v4429_v40  ;;  %v3962_v36 = vld [vmem:[#allocation6 + $0xd0] sm:$0xff]  ;;  %v3963_v39 = vld [vmem:[#allocation6 + $0xd8] sm:$0xff] }
 0x369   :  { %7195 = vmatprep.subr.bf16.mxu0 %v12549_v55  ;;  %7367 = vmatprep.subr.bf16.mxu1 %v12551_v57  ;;  %v12597_v55 = vcombine.high %v4432_v47, %v4436_v48  ;;  %v12599_v57 = vcombine.high %v4433_v49, %v4437_v50  ;;  %v3966_v38 = vld [vmem:[#allocation6 + $0xf0] sm:$0xff]  ;;  %v3967_v40 = vld [vmem:[#allocation6 + $0xf8] sm:$0xff] }
 0x36c   :  { %7196 = vmatpush1.bf16.msra.mxu0 %v12548_v0  ;;  %7368 = vmatpush1.bf16.msra.mxu1 %v12550_v1  ;;  %v12596_v0 = vcombine.low %v4432_v47, %v4436_v48  ;;  %v12598_v1 = vcombine.low %v4433_v49, %v4437_v50  ;;  %v3970_v47 = vld [vmem:[#allocation6 + $0x110] sm:$0xff]  ;;  %v3975_v49 = vld [vmem:[#allocation6 + $0x138] sm:$0xff]  ;;  %v12128_v50 = vcombine.low %v3962_v36, %v3966_v38 }
 0x36d   :  { %7197 = vmatprep.subr.bf16.mxu0 %v12557_v2  ;;  %7369 = vmatprep.subr.bf16.mxu1 %v12559_v3  ;;  %v12605_v2 = vcombine.high %v4440_v59, %v4444_v60  ;;  %v12607_v3 = vcombine.high %v4441_v61, %v4445_v62  ;;  %v3974_v48 = vld [vmem:[#allocation6 + $0x130] sm:$0xff] }
 0x370   :  { %7198 = vmatpush1.bf16.msra.mxu0 %v12556_v17  ;;  %7370 = vmatpush1.bf16.msra.mxu1 %v12558_v18  ;;  %v12604_v17 = vcombine.low %v4440_v59, %v4444_v60  ;;  %v12606_v18 = vcombine.low %v4441_v61, %v4445_v62  ;;  %v3982_v59 = vld [vmem:[#allocation6 + $0x170] sm:$0xff]  ;;  %v3979_v60 = vld [vmem:[#allocation6 + $0x158] sm:$0xff]  ;;  %v12136_v62 = vcombine.low %v3970_v47, %v3974_v48 }
 0x371   :  { %7199 = vmatprep.subr.bf16.mxu0 %v12565_v19  ;;  %7371 = vmatprep.subr.bf16.mxu1 %v12567_v20  ;;  %v12105_v19 = vcombine.high %v3938_v4, %v3942_v6  ;;  %v12107_v20 = vcombine.high %v3939_v7, %v3943_v16  ;;  %v3983_v61 = vld [vmem:[#allocation6 + $0x178] sm:$0xff] }
 0x374   :  { %7200 = vmatpush1.bf16.msra.mxu0 %v12564_v26  ;;  %7372 = vmatpush1.bf16.msra.mxu1 %v12566_v28  ;;  %v12104_v26 = vcombine.low %v3938_v4, %v3942_v6  ;;  %v12106_v28 = vcombine.low %v3939_v7, %v3943_v16  ;;  %v3990_v4 = vld [vmem:[#allocation6 + $0x1b0] sm:$0xff]  ;;  %v3987_v6 = vld [vmem:[#allocation6 + $0x198] sm:$0xff] }
 0x375   :  { %7201 = vmatprep.subr.bf16.mxu0 %v12573_v29  ;;  %7373 = vmatprep.subr.bf16.mxu1 %v12575_v30  ;;  %v12113_v29 = vcombine.high %v3946_v21, %v3950_v22  ;;  %v12115_v30 = vcombine.high %v3947_v23, %v3951_v24  ;;  %v3991_v7 = vld [vmem:[#allocation6 + $0x1b8] sm:$0xff] }
 0x378   :  { %7202 = vmatpush1.bf16.msra.mxu0 %v12572_v33  ;;  %7374 = vmatpush1.bf16.msra.mxu1 %v12574_v34  ;;  %v12112_v33 = vcombine.low %v3946_v21, %v3950_v22  ;;  %v12114_v34 = vcombine.low %v3947_v23, %v3951_v24  ;;  %v3998_v21 = vld [vmem:[#allocation6 + $0x1f0] sm:$0xff]  ;;  %v3995_v22 = vld [vmem:[#allocation6 + $0x1d8] sm:$0xff] }
 0x379   :  { %7203 = vmatprep.subr.bf16.mxu0 %v12581_v63  ;;  %7375 = vmatprep.subr.bf16.mxu1 %v12583_v15  ;;  %v12121_v63 = vcombine.high %v3954_v31, %v3958_v53  ;;  %v12123_v15 = vcombine.high %v3955_v58, %v3959_v32  ;;  %v3999_v23 = vld [vmem:[#allocation6 + $0x1f8] sm:$0xff] }
 0x37c   :  { %7204 = vmatpush1.bf16.msra.mxu0 %v12580_v44  ;;  %7376 = vmatpush1.bf16.msra.mxu1 %v12582_v45  ;;  %v12120_v44 = vcombine.low %v3954_v31, %v3958_v53  ;;  %v12122_v45 = vcombine.low %v3955_v58, %v3959_v32  ;;  %v4006_v31 = vld [vmem:[#allocation6 + $0x230] sm:$0xff]  ;;  %v4003_v53 = vld [vmem:[#allocation6 + $0x218] sm:$0xff] }
 0x37d   :  { %7205 = vmatprep.subr.bf16.mxu0 %v12589_v25  ;;  %7377 = vmatprep.subr.bf16.mxu1 %v12591_v46  ;;  %v12129_v25 = vcombine.high %v3962_v36, %v3966_v38  ;;  %v12131_v46 = vcombine.high %v3963_v39, %v3967_v40  ;;  %v4007_v58 = vld [vmem:[#allocation6 + $0x238] sm:$0xff]  ;;  %v4014_v36 = vld [vmem:[#allocation6 + $0x270] sm:$0xff] }
 0x37e   :  { %v4011_v38 = vld [vmem:[#allocation6 + $0x258] sm:$0xff] }
 0x380   :  { %7206 = vmatpush1.bf16.msra.mxu0 %v12588_v51  ;;  %7378 = vmatpush1.bf16.msra.mxu1 %v12590_v52  ;;  %v12130_v51 = vcombine.low %v3963_v39, %v3967_v40  ;;  %v12137_v52 = vcombine.high %v3970_v47, %v3974_v48  ;;  %v4015_v39 = vld [vmem:[#allocation6 + $0x278] sm:$0xff]  ;;  %v4022_v47 = vld [vmem:[#allocation6 + $0x2b0] sm:$0xff] }
 0x381   :  { %7207 = vmatprep.subr.bf16.mxu0 %v12597_v55  ;;  %7379 = vmatprep.subr.bf16.mxu1 %v12599_v57  ;;  %v3978_v57 = vld [vmem:[#allocation6 + $0x150] sm:$0xff]  ;;  %v4019_v48 = vld [vmem:[#allocation6 + $0x298] sm:$0xff] }
 0x382   :  { %v12144_v16 = vcombine.low %v3978_v57, %v3982_v59 }
 0x384   :  { %7208 = vmatpush1.bf16.msra.mxu0 %v12596_v0  ;;  %7380 = vmatpush1.bf16.msra.mxu1 %v12598_v1  ;;  %v12145_v1 = vcombine.high %v3978_v57, %v3982_v59  ;;  %v4030_v57 = vld [vmem:[#allocation6 + $0x2f0] sm:$0xff]  ;;  %v4027_v59 = vld [vmem:[#allocation6 + $0x2d8] sm:$0xff] }
 0x385   :  { %7209 = vmatprep.subr.bf16.mxu0 %v12605_v2  ;;  %7381 = vmatprep.subr.bf16.mxu1 %v12607_v3  ;;  %v12147_v2 = vcombine.high %v3979_v60, %v3983_v61  ;;  %v3986_v3 = vld [vmem:[#allocation6 + $0x190] sm:$0xff] }
 0x386   :  { %v12152_v24 = vcombine.low %v3986_v3, %v3990_v4 }
 0x388   :  { %7210 = vmatpush1.bf16.msra.mxu0 %v12604_v17  ;;  %7382 = vmatpush1.bf16.msra.mxu1 %v12606_v18  ;;  %v12146_v17 = vcombine.low %v3979_v60, %v3983_v61  ;;  %v12153_v18 = vcombine.high %v3986_v3, %v3990_v4  ;;  %v4031_v60 = vld [vmem:[#allocation6 + $0x2f8] sm:$0xff]  ;;  %v4038_v3 = vld [vmem:[#allocation6 + $0x330] sm:$0xff] }
 0x389   :  { %7394 = vmatprep.subr.bf16.mxu0 %v12105_v19  ;;  %7566 = vmatprep.subr.bf16.mxu1 %v12107_v20  ;;  %v12155_v19 = vcombine.high %v3987_v6, %v3991_v7  ;;  %v3994_v20 = vld [vmem:[#allocation6 + $0x1d0] sm:$0xff]  ;;  %v4035_v4 = vld [vmem:[#allocation6 + $0x318] sm:$0xff] }
 0x38a   :  { %v12160_v32 = vcombine.low %v3994_v20, %v3998_v21 }
 0x38b   :  { %7212 = vmatmul.mubr.bf16.vlgmr.msra.gmra.mrb[8].mxu0 %v13743_v41  ;;  %7384 = vmatmul.mubr.bf16.vlgmr.msra.gmra.mrb[8].mxu1 %v13743_v41 }
 0x38c   :  { %7395 = vmatpush1.bf16.msra.mxu0 %v12104_v26  ;;  %7426 = vmatprep.mubr.bf16.mxu0 %v13711_v37  ;;  %v12154_v26 = vcombine.low %v3987_v6, %v3991_v7  ;;  %v4039_v6 = vld [vmem:[#allocation6 + $0x338] sm:$0xff] }
 0x38d   :  { %7567 = vmatpush1.bf16.msra.mxu1 %v12106_v28  ;;  %7598 = vmatprep.mubr.bf16.mxu1 %v13711_v37  ;;  %v3971_v37 = vld [vmem:[#allocation6 + $0x118] sm:$0xff]  ;;  %v12161_v28 = vcombine.high %v3994_v20, %v3998_v21  ;;  %v4046_v20 = vld [vmem:[#allocation6 + $0x370] sm:$0xff] }
 0x38e   :  { %7396 = vmatprep.subr.bf16.mxu0 %v12113_v29  ;;  %7568 = vmatprep.subr.bf16.mxu1 %v12115_v30  ;;  %v12139_v55 = vcombine.high %v3971_v37, %v3975_v49  ;;  %v12138_v0 = vcombine.low %v3971_v37, %v3975_v49  ;;  %v12163_v29 = vcombine.high %v3995_v22, %v3999_v23  ;;  %v4002_v30 = vld [vmem:[#allocation6 + $0x210] sm:$0xff]  ;;  %v4023_v37 = vld [vmem:[#allocation6 + $0x2b8] sm:$0xff] }
 0x38f   :  { %v12168_v40 = vcombine.low %v4002_v30, %v4006_v31  ;;  %v4043_v21 = vld [vmem:[#allocation6 + $0x358] sm:$0xff] }
 0x390   :  { %7397 = vmatpush1.bf16.msra.mxu0 %v12112_v33  ;;  %v12162_v33 = vcombine.low %v3995_v22, %v3999_v23  ;;  %v4047_v22 = vld [vmem:[#allocation6 + $0x378] sm:$0xff] }
 0x391   :  { %7569 = vmatpush1.bf16.msra.mxu1 %v12114_v34  ;;  %7398 = vmatprep.subr.bf16.mxu0 %v12121_v63  ;;  %v12169_v34 = vcombine.high %v4002_v30, %v4006_v31  ;;  %v12171_v63 = vcombine.high %v4003_v53, %v4007_v58  ;;  %v4054_v30 = vld [vmem:[#allocation6 + $0x3b0] sm:$0xff]  ;;  %v4051_v31 = vld [vmem:[#allocation6 + $0x398] sm:$0xff] }
 0x392   :  { %7570 = vmatprep.subr.bf16.mxu1 %v12123_v15  ;;  %v4010_v15 = vld [vmem:[#allocation6 + $0x250] sm:$0xff] }
 0x393   :  { %v12176_v49 = vcombine.low %v4010_v15, %v4014_v36 }
 0x394   :  { %7399 = vmatpush1.bf16.msra.mxu0 %v12120_v44  ;;  %v12170_v44 = vcombine.low %v4003_v53, %v4007_v58  ;;  %v4055_v53 = vld [vmem:[#allocation6 + $0x3b8] sm:$0xff] }
 0x395   :  { %7571 = vmatpush1.bf16.msra.mxu1 %v12122_v45  ;;  %7400 = vmatprep.subr.bf16.mxu0 %v12129_v25  ;;  %v12177_v45 = vcombine.high %v4010_v15, %v4014_v36  ;;  %v12179_v25 = vcombine.high %v4011_v38, %v4015_v39  ;;  %v4062_v15 = vld [vmem:[#allocation6 + $0x3f0] sm:$0xff]  ;;  %v4059_v36 = vld [vmem:[#allocation6 + $0x3d8] sm:$0xff] }
 0x396   :  { %7572 = vmatprep.subr.bf16.mxu1 %v12131_v46  ;;  %v4018_v46 = vld [vmem:[#allocation6 + $0x290] sm:$0xff] }
 0x397   :  { %v12184_v61 = vcombine.low %v4018_v46, %v4022_v47 }
 0x398   :  { %7401 = vmatpush1.bf16.msra.mxu0 %v12128_v50  ;;  %v12178_v50 = vcombine.low %v4011_v38, %v4015_v39  ;;  %v4063_v38 = vld [vmem:[#allocation6 + $0x3f8] sm:$0xff] }
 0x399   :  { %7573 = vmatpush1.bf16.msra.mxu1 %v12130_v51  ;;  %7402 = vmatprep.subr.bf16.mxu0 %v12137_v52  ;;  %v12185_v51 = vcombine.high %v4018_v46, %v4022_v47  ;;  %v12187_v52 = vcombine.high %v4019_v48, %v4023_v37  ;;  %v4070_v46 = vld [vmem:[#allocation6 + $0x430] sm:$0xff]  ;;  %v4067_v47 = vld [vmem:[#allocation6 + $0x418] sm:$0xff] }
 0x39a   :  { %7574 = vmatprep.subr.bf16.mxu1 %v12139_v55  ;;  %v4026_v55 = vld [vmem:[#allocation6 + $0x2d0] sm:$0xff] }
 0x39b   :  { %v12192_v7 = vcombine.low %v4026_v55, %v4030_v57 }
 0x39c   :  { %7403 = vmatpush1.bf16.msra.mxu0 %v12136_v62  ;;  %v12186_v62 = vcombine.low %v4019_v48, %v4023_v37  ;;  %v4071_v48 = vld [vmem:[#allocation6 + $0x438] sm:$0xff] }
 0x39d   :  { %7575 = vmatpush1.bf16.msra.mxu1 %v12138_v0  ;;  %7404 = vmatprep.subr.bf16.mxu0 %v12145_v1  ;;  %v12193_v0 = vcombine.high %v4026_v55, %v4030_v57  ;;  %v12195_v1 = vcombine.high %v4027_v59, %v4031_v60  ;;  %v4078_v55 = vld [vmem:[#allocation6 + $0x470] sm:$0xff] }
 0x39e   :  { %7576 = vmatprep.subr.bf16.mxu1 %v12147_v2  ;;  %v4034_v2 = vld [vmem:[#allocation6 + $0x310] sm:$0xff] }
 0x39f   :  { %v12200_v23 = vcombine.low %v4034_v2, %v4038_v3 }
 0x3a0   :  { %7405 = vmatpush1.bf16.msra.mxu0 %v12144_v16  ;;  %v12194_v16 = vcombine.low %v4027_v59, %v4031_v60  ;;  %v4075_v59 = vld [vmem:[#allocation6 + $0x458] sm:$0xff] }
 0x3a1   :  { %7577 = vmatpush1.bf16.msra.mxu1 %v12146_v17  ;;  %7406 = vmatprep.subr.bf16.mxu0 %v12153_v18  ;;  %v12201_v17 = vcombine.high %v4034_v2, %v4038_v3  ;;  %v12203_v18 = vcombine.high %v4035_v4, %v4039_v6  ;;  %v4079_v60 = vld [vmem:[#allocation6 + $0x478] sm:$0xff] }
 0x3a2   :  { %7578 = vmatprep.subr.bf16.mxu1 %v12155_v19  ;;  %v4042_v19 = vld [vmem:[#allocation6 + $0x350] sm:$0xff]  ;;  %v12243_v2 = vcombine.high %v4075_v59, %v4079_v60  ;;  %v4083_v3 = vld [vmem:[#allocation6 + $0x498] sm:$0xff] }
 0x3a3   :  { %v12208_v58 = vcombine.low %v4042_v19, %v4046_v20 }
 0x3a4   :  { %7407 = vmatpush1.bf16.msra.mxu0 %v12152_v24  ;;  %v12202_v24 = vcombine.low %v4035_v4, %v4039_v6  ;;  %v4087_v4 = vld [vmem:[#allocation6 + $0x4b8] sm:$0xff] }
 0x3a5   :  { %7579 = vmatpush1.bf16.msra.mxu1 %v12154_v26  ;;  %7408 = vmatprep.subr.bf16.mxu0 %v12161_v28  ;;  %v12209_v26 = vcombine.high %v4042_v19, %v4046_v20  ;;  %v12211_v28 = vcombine.high %v4043_v21, %v4047_v22  ;;  %v4094_v19 = vld [vmem:[#allocation6 + $0x4f0] sm:$0xff]  ;;  %v4091_v20 = vld [vmem:[#allocation6 + $0x4d8] sm:$0xff] }
 0x3a6   :  { %7580 = vmatprep.subr.bf16.mxu1 %v12163_v29  ;;  %v4050_v29 = vld [vmem:[#allocation6 + $0x390] sm:$0xff] }
 0x3a7   :  { %v12216_v39 = vcombine.low %v4050_v29, %v4054_v30 }
 0x3a8   :  { %7409 = vmatpush1.bf16.msra.mxu0 %v12160_v32  ;;  %v12210_v32 = vcombine.low %v4043_v21, %v4047_v22  ;;  %v4095_v21 = vld [vmem:[#allocation6 + $0x4f8] sm:$0xff] }
 0x3a9   :  { %7581 = vmatpush1.bf16.msra.mxu1 %v12162_v33  ;;  %7410 = vmatprep.subr.bf16.mxu0 %v12169_v34  ;;  %v12217_v33 = vcombine.high %v4050_v29, %v4054_v30  ;;  %v12219_v34 = vcombine.high %v4051_v31, %v4055_v53  ;;  %v4099_v29 = vld [vmem:[#allocation6 + $0x518] sm:$0xff] }
 0x3aa   :  { %7582 = vmatprep.subr.bf16.mxu1 %v12171_v63  ;;  %v4058_v63 = vld [vmem:[#allocation6 + $0x3d0] sm:$0xff]  ;;  %v4103_v30 = vld [vmem:[#allocation6 + $0x538] sm:$0xff] }
 0x3ab   :  { %v12224_v37 = vcombine.low %v4058_v63, %v4062_v15 }
 0x3ac   :  { %7411 = vmatpush1.bf16.msra.mxu0 %v12168_v40  ;;  %v12218_v40 = vcombine.low %v4051_v31, %v4055_v53  ;;  %v12258_v31 = vcombine.low %v4091_v20, %v4095_v21 }
 0x3ad   :  { %7583 = vmatpush1.bf16.msra.mxu1 %v12170_v44  ;;  %7412 = vmatprep.subr.bf16.mxu0 %v12177_v45  ;;  %v12225_v44 = vcombine.high %v4058_v63, %v4062_v15  ;;  %v12227_v45 = vcombine.high %v4059_v36, %v4063_v38  ;;  %v4111_v63 = vld [vmem:[#allocation6 + $0x578] sm:$0xff] }
 0x3ae   :  { %7584 = vmatprep.subr.bf16.mxu1 %v12179_v25  ;;  %v4066_v25 = vld [vmem:[#allocation6 + $0x410] sm:$0xff] }
 0x3af   :  { %v12232_v57 = vcombine.low %v4066_v25, %v4070_v46 }
 0x3b0   :  { %7413 = vmatpush1.bf16.msra.mxu0 %v12176_v49  ;;  %v12226_v49 = vcombine.low %v4059_v36, %v4063_v38  ;;  %v12266_v36 = vcombine.low %v4099_v29, %v4103_v30 }
 0x3b1   :  { %7585 = vmatpush1.bf16.msra.mxu1 %v12178_v50  ;;  %7414 = vmatprep.subr.bf16.mxu0 %v12185_v51  ;;  %v12233_v50 = vcombine.high %v4066_v25, %v4070_v46  ;;  %v12235_v51 = vcombine.high %v4067_v47, %v4071_v48  ;;  %v4119_v25 = vld [vmem:[#allocation6 + $0x5b8] sm:$0xff] }
 0x3b2   :  { %7586 = vmatprep.subr.bf16.mxu1 %v12187_v52  ;;  %v4074_v52 = vld [vmem:[#allocation6 + $0x450] sm:$0xff] }
 0x3b3   :  { %v12240_v6 = vcombine.low %v4074_v52, %v4078_v55 }
 0x3b4   :  { %7415 = vmatpush1.bf16.msra.mxu0 %v12184_v61  ;;  %v12234_v61 = vcombine.low %v4067_v47, %v4071_v48 }
 0x3b5   :  { %7587 = vmatpush1.bf16.msra.mxu1 %v12186_v62  ;;  %7416 = vmatprep.subr.bf16.mxu0 %v12193_v0  ;;  %v12241_v62 = vcombine.high %v4074_v52, %v4078_v55  ;;  %v4082_v0 = vld [vmem:[#allocation6 + $0x490] sm:$0xff]  ;;  %v4127_v52 = vld [vmem:[#allocation6 + $0x5f8] sm:$0xff] }
 0x3b6   :  { %7588 = vmatprep.subr.bf16.mxu1 %v12195_v1  ;;  %v4086_v1 = vld [vmem:[#allocation6 + $0x4b0] sm:$0xff] }
 0x3b7   :  { %v12248_v22 = vcombine.low %v4082_v0, %v4086_v1 }
 0x3b8   :  { %7417 = vmatpush1.bf16.msra.mxu0 %v12192_v7  ;;  %v12242_v7 = vcombine.low %v4075_v59, %v4079_v60 }
 0x3b9   :  { %7589 = vmatpush1.bf16.msra.mxu1 %v12194_v16  ;;  %7418 = vmatprep.subr.bf16.mxu0 %v12201_v17  ;;  %v12249_v16 = vcombine.high %v4082_v0, %v4086_v1  ;;  %v12251_v17 = vcombine.high %v4083_v3, %v4087_v4  ;;  %v4131_v0 = vld [vmem:[#allocation6 + $0x618] sm:$0xff] }
 0x3ba   :  { %7590 = vmatprep.subr.bf16.mxu1 %v12203_v18  ;;  %v4090_v18 = vld [vmem:[#allocation6 + $0x4d0] sm:$0xff]  ;;  %v4135_v1 = vld [vmem:[#allocation6 + $0x638] sm:$0xff] }
 0x3bc   :  { %7419 = vmatpush1.bf16.msra.mxu0 %v12200_v23  ;;  %v12257_v23 = vcombine.high %v4090_v18, %v4094_v19 }
 0x3bd   :  { %7591 = vmatpush1.bf16.msra.mxu1 %v12202_v24  ;;  %7420 = vmatprep.subr.bf16.mxu0 %v12209_v26  ;;  %v12259_v24 = vcombine.high %v4091_v20, %v4095_v21  ;;  %v4098_v26 = vld [vmem:[#allocation6 + $0x510] sm:$0xff]  ;;  %v12298_v20 = vcombine.low %v4131_v0, %v4135_v1 }
 0x3be   :  { %7592 = vmatprep.subr.bf16.mxu1 %v12211_v28  ;;  %v4102_v28 = vld [vmem:[#allocation6 + $0x530] sm:$0xff] }
 0x3bf   :  { %v12265_v53 = vcombine.high %v4098_v26, %v4102_v28  ;;  %v12264_v15 = vcombine.low %v4098_v26, %v4102_v28  ;;  %v4151_v26 = vld [vmem:[#allocation6 + $0x6b8] sm:$0xff] }
 0x3c0   :  { %7421 = vmatpush1.bf16.msra.mxu0 %v12208_v58  ;;  %v12267_v58 = vcombine.high %v4099_v29, %v4103_v30 }
 0x3c1   :  { %7593 = vmatpush1.bf16.msra.mxu1 %v12210_v32  ;;  %7422 = vmatprep.subr.bf16.mxu0 %v12217_v33  ;;  %v4106_v32 = vld [vmem:[#allocation6 + $0x550] sm:$0xff] }
 0x3c2   :  { %7594 = vmatprep.subr.bf16.mxu1 %v12219_v34  ;;  %v4110_v33 = vld [vmem:[#allocation6 + $0x570] sm:$0xff]  ;;  %v4107_v34 = vld [vmem:[#allocation6 + $0x558] sm:$0xff] }
 0x3c3   :  { %v12273_v38 = vcombine.high %v4106_v32, %v4110_v33  ;;  %v12272_v46 = vcombine.low %v4106_v32, %v4110_v33  ;;  %v12274_v47 = vcombine.low %v4107_v34, %v4111_v63  ;;  %v4159_v32 = vld [vmem:[#allocation6 + $0x6f8] sm:$0xff] }
 0x3c4   :  { %7423 = vmatpush1.bf16.msra.mxu0 %v12216_v39  ;;  %v12275_v39 = vcombine.high %v4107_v34, %v4111_v63 }
 0x3c5   :  { %7595 = vmatpush1.bf16.msra.mxu1 %v12218_v40  ;;  %7424 = vmatprep.subr.bf16.mxu0 %v12225_v44  ;;  %v4114_v40 = vld [vmem:[#allocation6 + $0x590] sm:$0xff] }
 0x3c6   :  { %7596 = vmatprep.subr.bf16.mxu1 %v12227_v45  ;;  %v4118_v44 = vld [vmem:[#allocation6 + $0x5b0] sm:$0xff]  ;;  %v4115_v45 = vld [vmem:[#allocation6 + $0x598] sm:$0xff] }
 0x3c7   :  { %v12281_v48 = vcombine.high %v4114_v40, %v4118_v44  ;;  %v12280_v55 = vcombine.low %v4114_v40, %v4118_v44  ;;  %v4167_v40 = vld [vmem:[#allocation6 + $0x738] sm:$0xff] }
 0x3c8   :  { %7425 = vmatpush1.bf16.msra.mxu0 %v12224_v37  ;;  %v12283_v37 = vcombine.high %v4115_v45, %v4119_v25 }
 0x3c9   :  { %7597 = vmatpush1.bf16.msra.mxu1 %v12226_v49  ;;  %7437 = vmatprep.subr.bf16.mxu0 %v12233_v50  ;;  %v4122_v49 = vld [vmem:[#allocation6 + $0x5d0] sm:$0xff] }
 0x3ca   :  { %7609 = vmatprep.subr.bf16.mxu1 %v12235_v51  ;;  %v4126_v50 = vld [vmem:[#allocation6 + $0x5f0] sm:$0xff]  ;;  %v4123_v51 = vld [vmem:[#allocation6 + $0x5d8] sm:$0xff] }
 0x3cb   :  { %7427 = vmatmul.mubr.bf16.vlgmr.msra.gmra.mrb[12].mxu0 %v13707_v43  ;;  %v12289_v59 = vcombine.high %v4122_v49, %v4126_v50  ;;  %v12291_v60 = vcombine.high %v4123_v51, %v4127_v52 }
 0x3cc   :  { %7599 = vmatmul.mubr.bf16.vlgmr.msra.gmra.mrb[12].mxu1 %v13707_v43  ;;  %7438 = vmatpush1.bf16.msra.mxu0 %v12232_v57  ;;  %v12250_v43 = vcombine.low %v4083_v3, %v4087_v4  ;;  %v12282_v57 = vcombine.low %v4115_v45, %v4119_v25  ;;  %v12290_v3 = vcombine.low %v4123_v51, %v4127_v52 }
 0x3cd   :  { %7469 = vmatprep.mubr.bf16.mxu0 %v13713_v56  ;;  %7610 = vmatpush1.bf16.msra.mxu1 %v12234_v61  ;;  %v4130_v61 = vld [vmem:[#allocation6 + $0x610] sm:$0xff] }
 0x3ce   :  { %7641 = vmatprep.mubr.bf16.mxu1 %v13713_v56  ;;  %7439 = vmatprep.subr.bf16.mxu0 %v12241_v62  ;;  %v12256_v56 = vcombine.low %v4090_v18, %v4094_v19  ;;  %v4134_v62 = vld [vmem:[#allocation6 + $0x630] sm:$0xff]  ;;  %v4143_v18 = vld [vmem:[#allocation6 + $0x678] sm:$0xff] }
 0x3cf   :  { %7611 = vmatprep.subr.bf16.mxu1 %v12243_v2  ;;  %v12288_v2 = vcombine.low %v4122_v49, %v4126_v50  ;;  %v12297_v4 = vcombine.high %v4130_v61, %v4134_v62  ;;  %v12296_v19 = vcombine.low %v4130_v61, %v4134_v62  ;;  %v4175_v49 = vld [vmem:[#allocation6 + $0x778] sm:$0xff] }
 0x3d0   :  { %7440 = vmatpush1.bf16.msra.mxu0 %v12240_v6  ;;  %v12299_v6 = vcombine.high %v4131_v0, %v4135_v1  ;;  %v4183_v61 = vld [vmem:[#allocation6 + $0x7b8] sm:$0xff] }
 0x3d1   :  { %7612 = vmatpush1.bf16.msra.mxu1 %v12242_v7  ;;  %7441 = vmatprep.subr.bf16.mxu0 %v12249_v16  ;;  %v4138_v7 = vld [vmem:[#allocation6 + $0x650] sm:$0xff] }
 0x3d2   :  { %7613 = vmatprep.subr.bf16.mxu1 %v12251_v17  ;;  %v4142_v16 = vld [vmem:[#allocation6 + $0x670] sm:$0xff]  ;;  %v4139_v17 = vld [vmem:[#allocation6 + $0x658] sm:$0xff] }
 0x3d3   :  { %v12305_v21 = vcombine.high %v4138_v7, %v4142_v16  ;;  %v12304_v28 = vcombine.low %v4138_v7, %v4142_v16  ;;  %v12306_v29 = vcombine.low %v4139_v17, %v4143_v18  ;;  %v4191_v7 = vld [vmem:[#allocation6 + $0x7f8] sm:$0xff] }
 0x3d4   :  { %7442 = vmatpush1.bf16.msra.mxu0 %v12248_v22  ;;  %v12307_v22 = vcombine.high %v4139_v17, %v4143_v18 }
 0x3d5   :  { %7614 = vmatpush1.bf16.msra.mxu1 %v12250_v43  ;;  %7443 = vmatprep.subr.bf16.mxu0 %v12257_v23  ;;  %v4146_v43 = vld [vmem:[#allocation6 + $0x690] sm:$0xff] }
 0x3d6   :  { %7615 = vmatprep.subr.bf16.mxu1 %v12259_v24  ;;  %v4150_v23 = vld [vmem:[#allocation6 + $0x6b0] sm:$0xff]  ;;  %v4147_v24 = vld [vmem:[#allocation6 + $0x698] sm:$0xff] }
 0x3d7   :  { %v12313_v30 = vcombine.high %v4146_v43, %v4150_v23  ;;  %v12312_v33 = vcombine.low %v4146_v43, %v4150_v23  ;;  %v12314_v34 = vcombine.low %v4147_v24, %v4151_v26  ;;  %v4199_v43 = vld [vmem:[#allocation6 + $0x838] sm:$0xff] }
 0x3d8   :  { %7444 = vmatpush1.bf16.msra.mxu0 %v12256_v56  ;;  %v12315_v56 = vcombine.high %v4147_v24, %v4151_v26 }
 0x3d9   :  { %7616 = vmatpush1.bf16.msra.mxu1 %v12258_v31  ;;  %7445 = vmatprep.subr.bf16.mxu0 %v12265_v53  ;;  %v4154_v31 = vld [vmem:[#allocation6 + $0x6d0] sm:$0xff] }
 0x3da   :  { %7617 = vmatprep.subr.bf16.mxu1 %v12267_v58  ;;  %v4158_v53 = vld [vmem:[#allocation6 + $0x6f0] sm:$0xff]  ;;  %v4155_v58 = vld [vmem:[#allocation6 + $0x6d8] sm:$0xff] }
 0x3db   :  { %v12321_v63 = vcombine.high %v4154_v31, %v4158_v53  ;;  %v12320_v44 = vcombine.low %v4154_v31, %v4158_v53  ;;  %v12322_v45 = vcombine.low %v4155_v58, %v4159_v32  ;;  %v4203_v31 = vld [vmem:[#allocation6 + $0x858] sm:$0xff] }
 0x3dc   :  { %7446 = vmatpush1.bf16.msra.mxu0 %v12264_v15  ;;  %v12323_v15 = vcombine.high %v4155_v58, %v4159_v32  ;;  %v4207_v53 = vld [vmem:[#allocation6 + $0x878] sm:$0xff] }
 0x3dd   :  { %7618 = vmatpush1.bf16.msra.mxu1 %v12266_v36  ;;  %7447 = vmatprep.subr.bf16.mxu0 %v12273_v38  ;;  %v4162_v36 = vld [vmem:[#allocation6 + $0x710] sm:$0xff] }
 0x3de   :  { %7619 = vmatprep.subr.bf16.mxu1 %v12275_v39  ;;  %v4166_v38 = vld [vmem:[#allocation6 + $0x730] sm:$0xff]  ;;  %v4163_v39 = vld [vmem:[#allocation6 + $0x718] sm:$0xff] }
 0x3df   :  { %v12329_v25 = vcombine.high %v4162_v36, %v4166_v38  ;;  %v12328_v50 = vcombine.low %v4162_v36, %v4166_v38  ;;  %v12330_v51 = vcombine.low %v4163_v39, %v4167_v40  ;;  %v4215_v36 = vld [vmem:[#allocation6 + $0x8b8] sm:$0xff] }
 0x3e0   :  { %7448 = vmatpush1.bf16.msra.mxu0 %v12272_v46  ;;  %v12331_v46 = vcombine.high %v4163_v39, %v4167_v40  ;;  %v12370_v39 = vcombine.low %v4203_v31, %v4207_v53 }
 0x3e1   :  { %7620 = vmatpush1.bf16.msra.mxu1 %v12274_v47  ;;  %7449 = vmatprep.subr.bf16.mxu0 %v12281_v48  ;;  %v4170_v47 = vld [vmem:[#allocation6 + $0x750] sm:$0xff] }
 0x3e2   :  { %7621 = vmatprep.subr.bf16.mxu1 %v12283_v37  ;;  %v4174_v48 = vld [vmem:[#allocation6 + $0x770] sm:$0xff]  ;;  %v4171_v37 = vld [vmem:[#allocation6 + $0x758] sm:$0xff] }
 0x3e3   :  { %v12337_v52 = vcombine.high %v4170_v47, %v4174_v48  ;;  %v12336_v62 = vcombine.low %v4170_v47, %v4174_v48  ;;  %v12338_v0 = vcombine.low %v4171_v37, %v4175_v49  ;;  %v4223_v47 = vld [vmem:[#allocation6 + $0x8f8] sm:$0xff] }
 0x3e4   :  { %7450 = vmatpush1.bf16.msra.mxu0 %v12280_v55  ;;  %v12339_v55 = vcombine.high %v4171_v37, %v4175_v49 }
 0x3e5   :  { %7622 = vmatpush1.bf16.msra.mxu1 %v12282_v57  ;;  %7451 = vmatprep.subr.bf16.mxu0 %v12289_v59  ;;  %v4178_v57 = vld [vmem:[#allocation6 + $0x790] sm:$0xff] }
 0x3e6   :  { %7623 = vmatprep.subr.bf16.mxu1 %v12291_v60  ;;  %v4182_v59 = vld [vmem:[#allocation6 + $0x7b0] sm:$0xff]  ;;  %v4179_v60 = vld [vmem:[#allocation6 + $0x798] sm:$0xff] }
 0x3e7   :  { %v12345_v1 = vcombine.high %v4178_v57, %v4182_v59  ;;  %v12344_v16 = vcombine.low %v4178_v57, %v4182_v59  ;;  %v12346_v17 = vcombine.low %v4179_v60, %v4183_v61 }
 0x3e8   :  { %7452 = vmatpush1.bf16.msra.mxu0 %v12288_v2  ;;  %v12347_v2 = vcombine.high %v4179_v60, %v4183_v61  ;;  %v4234_v61 = vld [vmem:[#allocation6 + $0x950] sm:$0xff] }
 0x3e9   :  { %7624 = vmatpush1.bf16.msra.mxu1 %v12290_v3  ;;  %7453 = vmatprep.subr.bf16.mxu0 %v12297_v4  ;;  %v4186_v3 = vld [vmem:[#allocation6 + $0x7d0] sm:$0xff] }
 0x3ea   :  { %7625 = vmatprep.subr.bf16.mxu1 %v12299_v6  ;;  %v4190_v4 = vld [vmem:[#allocation6 + $0x7f0] sm:$0xff]  ;;  %v4187_v6 = vld [vmem:[#allocation6 + $0x7d8] sm:$0xff] }
 0x3eb   :  { %v12353_v18 = vcombine.high %v4186_v3, %v4190_v4  ;;  %v12352_v23 = vcombine.low %v4186_v3, %v4190_v4  ;;  %v12354_v24 = vcombine.low %v4187_v6, %v4191_v7 }
 0x3ec   :  { %7454 = vmatpush1.bf16.msra.mxu0 %v12296_v19  ;;  %v12355_v19 = vcombine.high %v4187_v6, %v4191_v7  ;;  %v4242_v7 = vld [vmem:[#allocation6 + $0x990] sm:$0xff] }
 0x3ed   :  { %7626 = vmatpush1.bf16.msra.mxu1 %v12298_v20  ;;  %7455 = vmatprep.subr.bf16.mxu0 %v12305_v21  ;;  %v4194_v20 = vld [vmem:[#allocation6 + $0x810] sm:$0xff] }
 0x3ee   :  { %7627 = vmatprep.subr.bf16.mxu1 %v12307_v22  ;;  %v4198_v21 = vld [vmem:[#allocation6 + $0x830] sm:$0xff]  ;;  %v4195_v22 = vld [vmem:[#allocation6 + $0x818] sm:$0xff] }
 0x3ef   :  { %v12361_v26 = vcombine.high %v4194_v20, %v4198_v21  ;;  %v12362_v58 = vcombine.low %v4195_v22, %v4199_v43 }
 0x3f0   :  { %7456 = vmatpush1.bf16.msra.mxu0 %v12304_v28  ;;  %v12363_v28 = vcombine.high %v4195_v22, %v4199_v43  ;;  %v4250_v43 = vld [vmem:[#allocation6 + $0x9d0] sm:$0xff] }
 0x3f1   :  { %7628 = vmatpush1.bf16.msra.mxu1 %v12306_v29  ;;  %7457 = vmatprep.subr.bf16.mxu0 %v12313_v30  ;;  %v4202_v29 = vld [vmem:[#allocation6 + $0x850] sm:$0xff] }
 0x3f2   :  { %7629 = vmatprep.subr.bf16.mxu1 %v12315_v56  ;;  %v4206_v30 = vld [vmem:[#allocation6 + $0x870] sm:$0xff]  ;;  %v12360_v56 = vcombine.low %v4194_v20, %v4198_v21 }
 0x3f3   :  { %v12369_v32 = vcombine.high %v4202_v29, %v4206_v30  ;;  %v12368_v38 = vcombine.low %v4202_v29, %v4206_v30 }
 0x3f4   :  { %7458 = vmatpush1.bf16.msra.mxu0 %v12312_v33  ;;  %v4210_v33 = vld [vmem:[#allocation6 + $0x890] sm:$0xff] }
 0x3f5   :  { %7630 = vmatpush1.bf16.msra.mxu1 %v12314_v34  ;;  %7459 = vmatprep.subr.bf16.mxu0 %v12321_v63  ;;  %v4214_v34 = vld [vmem:[#allocation6 + $0x8b0] sm:$0xff]  ;;  %v12371_v63 = vcombine.high %v4203_v31, %v4207_v53 }
 0x3f6   :  { %7631 = vmatprep.subr.bf16.mxu1 %v12323_v15  ;;  %v4211_v15 = vld [vmem:[#allocation6 + $0x898] sm:$0xff]  ;;  %v12377_v40 = vcombine.high %v4210_v33, %v4214_v34  ;;  %v12376_v48 = vcombine.low %v4210_v33, %v4214_v34  ;;  %v4258_v31 = vld [vmem:[#allocation6 + $0xa10] sm:$0xff] }
 0x3f7   :  { %v4262_v53 = vld [vmem:[#allocation6 + $0xa30] sm:$0xff] }
 0x3f8   :  { %7460 = vmatpush1.bf16.msra.mxu0 %v12320_v44  ;;  %v12379_v44 = vcombine.high %v4211_v15, %v4215_v36 }
 0x3f9   :  { %7632 = vmatpush1.bf16.msra.mxu1 %v12322_v45  ;;  %7461 = vmatprep.subr.bf16.mxu0 %v12329_v25  ;;  %v4218_v45 = vld [vmem:[#allocation6 + $0x8d0] sm:$0xff] }
 0x3fa   :  { %7633 = vmatprep.subr.bf16.mxu1 %v12331_v46  ;;  %v4222_v25 = vld [vmem:[#allocation6 + $0x8f0] sm:$0xff]  ;;  %v4219_v46 = vld [vmem:[#allocation6 + $0x8d8] sm:$0xff] }
 0x3fb   :  { %v12385_v37 = vcombine.high %v4218_v45, %v4222_v25  ;;  %v12387_v49 = vcombine.high %v4219_v46, %v4223_v47  ;;  %v12386_v57 = vcombine.low %v4219_v46, %v4223_v47  ;;  %v4274_v47 = vld [vmem:[#allocation6 + $0xa90] sm:$0xff] }
 0x3fc   :  { %7462 = vmatpush1.bf16.msra.mxu0 %v12328_v50  ;;  %v4226_v50 = vld [vmem:[#allocation6 + $0x910] sm:$0xff] }
 0x3fd   :  { %7634 = vmatpush1.bf16.msra.mxu1 %v12330_v51  ;;  %7463 = vmatprep.subr.bf16.mxu0 %v12337_v52  ;;  %v4230_v51 = vld [vmem:[#allocation6 + $0x930] sm:$0xff]  ;;  %v4227_v52 = vld [vmem:[#allocation6 + $0x918] sm:$0xff] }
 0x3fe   :  { %7635 = vmatprep.subr.bf16.mxu1 %v12339_v55  ;;  %v4231_v55 = vld [vmem:[#allocation6 + $0x938] sm:$0xff]  ;;  %v12393_v59 = vcombine.high %v4226_v50, %v4230_v51 }
 0x3ff   :  { %v12395_v60 = vcombine.high %v4227_v52, %v4231_v55  ;;  %v12394_v3 = vcombine.low %v4227_v52, %v4231_v55  ;;  %v4282_v55 = vld [vmem:[#allocation6 + $0xad0] sm:$0xff] }
 0x400   :  { %7464 = vmatpush1.bf16.msra.mxu0 %v12336_v62  ;;  %v4238_v62 = vld [vmem:[#allocation6 + $0x970] sm:$0xff] }
 0x401   :  { %7636 = vmatpush1.bf16.msra.mxu1 %v12338_v0  ;;  %7465 = vmatprep.subr.bf16.mxu0 %v12345_v1  ;;  %v4235_v0 = vld [vmem:[#allocation6 + $0x958] sm:$0xff]  ;;  %v12401_v4 = vcombine.high %v4234_v61, %v4238_v62 }
 0x402   :  { %7637 = vmatprep.subr.bf16.mxu1 %v12347_v2  ;;  %v4239_v1 = vld [vmem:[#allocation6 + $0x978] sm:$0xff]  ;;  %v12392_v2 = vcombine.low %v4226_v50, %v4230_v51 }
 0x403   :  { %v12403_v6 = vcombine.high %v4235_v0, %v4239_v1  ;;  %v12402_v20 = vcombine.low %v4235_v0, %v4239_v1  ;;  %v4290_v1 = vld [vmem:[#allocation6 + $0xb10] sm:$0xff] }
 0x404   :  { %7466 = vmatpush1.bf16.msra.mxu0 %v12344_v16  ;;  %v4246_v16 = vld [vmem:[#allocation6 + $0x9b0] sm:$0xff] }
 0x405   :  { %7638 = vmatpush1.bf16.msra.mxu1 %v12346_v17  ;;  %7467 = vmatprep.subr.bf16.mxu0 %v12353_v18  ;;  %v4243_v17 = vld [vmem:[#allocation6 + $0x998] sm:$0xff]  ;;  %v12409_v21 = vcombine.high %v4242_v7, %v4246_v16 }
 0x406   :  { %7639 = vmatprep.subr.bf16.mxu1 %v12355_v19  ;;  %v4247_v18 = vld [vmem:[#allocation6 + $0x9b8] sm:$0xff]  ;;  %v12400_v19 = vcombine.low %v4234_v61, %v4238_v62 }
 0x407   :  { %v12411_v22 = vcombine.high %v4243_v17, %v4247_v18  ;;  %v12410_v29 = vcombine.low %v4243_v17, %v4247_v18  ;;  %v4298_v18 = vld [vmem:[#allocation6 + $0xb50] sm:$0xff] }
 0x408   :  { %7468 = vmatpush1.bf16.msra.mxu0 %v12352_v23  ;;  %v4254_v23 = vld [vmem:[#allocation6 + $0x9f0] sm:$0xff] }
 0x409   :  { %7640 = vmatpush1.bf16.msra.mxu1 %v12354_v24  ;;  %7480 = vmatprep.subr.bf16.mxu0 %v12361_v26  ;;  %v4251_v24 = vld [vmem:[#allocation6 + $0x9d8] sm:$0xff]  ;;  %v12417_v30 = vcombine.high %v4250_v43, %v4254_v23  ;;  %v12416_v33 = vcombine.low %v4250_v43, %v4254_v23 }
 0x40a   :  { %7652 = vmatprep.subr.bf16.mxu1 %v12363_v28  ;;  %v4255_v26 = vld [vmem:[#allocation6 + $0x9f8] sm:$0xff]  ;;  %v12408_v28 = vcombine.low %v4242_v7, %v4246_v16 }
 0x40b   :  { %7470 = vmatmul.mubr.bf16.vlgmr.msra.gmra.mrb[12].mxu0 %v13709_v54  ;;  %v12418_v34 = vcombine.low %v4251_v24, %v4255_v26 }
 0x40c   :  { %7642 = vmatmul.mubr.bf16.vlgmr.msra.gmra.mrb[12].mxu1 %v13709_v54  ;;  %7481 = vmatpush1.bf16.msra.mxu0 %v12360_v56  ;;  %v12378_v54 = vcombine.low %v4211_v15, %v4215_v36  ;;  %v12419_v56 = vcombine.high %v4251_v24, %v4255_v26  ;;  %v4266_v36 = vld [vmem:[#allocation6 + $0xa50] sm:$0xff] }
 0x40d   :  { %7512 = vmatprep.mubr.bf16.mxu0 %v13745_v42  ;;  %7653 = vmatpush1.bf16.msra.mxu1 %v12362_v58  ;;  %v4259_v58 = vld [vmem:[#allocation6 + $0xa18] sm:$0xff]  ;;  %v4306_v26 = vld [vmem:[#allocation6 + $0xb90] sm:$0xff] }
 0x40e   :  { %7684 = vmatprep.mubr.bf16.mxu1 %v13745_v42  ;;  %7482 = vmatprep.subr.bf16.mxu0 %v12369_v32  ;;  %v12384_v42 = vcombine.low %v4218_v45, %v4222_v25  ;;  %v4263_v32 = vld [vmem:[#allocation6 + $0xa38] sm:$0xff] }
 0x40f   :  { %7654 = vmatprep.subr.bf16.mxu1 %v12371_v63  ;;  %v12425_v63 = vcombine.high %v4258_v31, %v4262_v53  ;;  %v12427_v15 = vcombine.high %v4259_v58, %v4263_v32  ;;  %v12426_v45 = vcombine.low %v4259_v58, %v4263_v32  ;;  %v4314_v32 = vld [vmem:[#allocation6 + $0xbd0] sm:$0xff] }
 0x410   :  { %7483 = vmatpush1.bf16.msra.mxu0 %v12368_v38  ;;  %v4270_v38 = vld [vmem:[#allocation6 + $0xa70] sm:$0xff] }
 0x411   :  { %7655 = vmatpush1.bf16.msra.mxu1 %v12370_v39  ;;  %7484 = vmatprep.subr.bf16.mxu0 %v12377_v40  ;;  %v4267_v39 = vld [vmem:[#allocation6 + $0xa58] sm:$0xff]  ;;  %v12433_v25 = vcombine.high %v4266_v36, %v4270_v38 }
 0x412   :  { %7656 = vmatprep.subr.bf16.mxu1 %v12379_v44  ;;  %v4271_v40 = vld [vmem:[#allocation6 + $0xa78] sm:$0xff]  ;;  %v12424_v44 = vcombine.low %v4258_v31, %v4262_v53 }
 0x413   :  { %v12435_v46 = vcombine.high %v4267_v39, %v4271_v40  ;;  %v12434_v50 = vcombine.low %v4267_v39, %v4271_v40  ;;  %v4322_v40 = vld [vmem:[#allocation6 + $0xc10] sm:$0xff] }
 0x414   :  { %7485 = vmatpush1.bf16.msra.mxu0 %v12376_v48  ;;  %v4278_v48 = vld [vmem:[#allocation6 + $0xab0] sm:$0xff] }
 0x415   :  { %7657 = vmatpush1.bf16.msra.mxu1 %v12378_v54  ;;  %7486 = vmatprep.subr.bf16.mxu0 %v12385_v37  ;;  %v4275_v54 = vld [vmem:[#allocation6 + $0xa98] sm:$0xff]  ;;  %v12441_v51 = vcombine.high %v4274_v47, %v4278_v48 }
 0x416   :  { %7658 = vmatprep.subr.bf16.mxu1 %v12387_v49  ;;  %v4279_v37 = vld [vmem:[#allocation6 + $0xab8] sm:$0xff]  ;;  %v12432_v49 = vcombine.low %v4266_v36, %v4270_v38 }
 0x417   :  { %v12443_v52 = vcombine.high %v4275_v54, %v4279_v37  ;;  %v12442_v61 = vcombine.low %v4275_v54, %v4279_v37  ;;  %v4330_v37 = vld [vmem:[#allocation6 + $0xc50] sm:$0xff] }
 0x418   :  { %7487 = vmatpush1.bf16.msra.mxu0 %v12384_v42  ;;  %v4286_v42 = vld [vmem:[#allocation6 + $0xaf0] sm:$0xff] }
 0x419   :  { %7659 = vmatpush1.bf16.msra.mxu1 %v12386_v57  ;;  %7488 = vmatprep.subr.bf16.mxu0 %v12393_v59  ;;  %v4283_v57 = vld [vmem:[#allocation6 + $0xad8] sm:$0xff]  ;;  %v12449_v62 = vcombine.high %v4282_v55, %v4286_v42 }
 0x41a   :  { %7660 = vmatprep.subr.bf16.mxu1 %v12395_v60  ;;  %v4287_v59 = vld [vmem:[#allocation6 + $0xaf8] sm:$0xff]  ;;  %v12440_v60 = vcombine.low %v4274_v47, %v4278_v48 }
 0x41b   :  { %v12451_v0 = vcombine.high %v4283_v57, %v4287_v59  ;;  %v12450_v7 = vcombine.low %v4283_v57, %v4287_v59  ;;  %v4338_v57 = vld [vmem:[#allocation6 + $0xc90] sm:$0xff] }
 0x41c   :  { %7489 = vmatpush1.bf16.msra.mxu0 %v12392_v2  ;;  %v4294_v2 = vld [vmem:[#allocation6 + $0xb30] sm:$0xff] }
 0x41d   :  { %7661 = vmatpush1.bf16.msra.mxu1 %v12394_v3  ;;  %7490 = vmatprep.subr.bf16.mxu0 %v12401_v4  ;;  %v4291_v3 = vld [vmem:[#allocation6 + $0xb18] sm:$0xff]  ;;  %v12457_v16 = vcombine.high %v4290_v1, %v4294_v2  ;;  %v4342_v59 = vld [vmem:[#allocation6 + $0xcb0] sm:$0xff] }
 0x41e   :  { %7662 = vmatprep.subr.bf16.mxu1 %v12403_v6  ;;  %v4295_v4 = vld [vmem:[#allocation6 + $0xb38] sm:$0xff]  ;;  %v12448_v6 = vcombine.low %v4282_v55, %v4286_v42 }
 0x41f   :  { %v12459_v17 = vcombine.high %v4291_v3, %v4295_v4  ;;  %v12458_v43 = vcombine.low %v4291_v3, %v4295_v4  ;;  %v4346_v4 = vld [vmem:[#allocation6 + $0xcd0] sm:$0xff] }
 0x420   :  { %7491 = vmatpush1.bf16.msra.mxu0 %v12400_v19  ;;  %v4302_v19 = vld [vmem:[#allocation6 + $0xb70] sm:$0xff] }
 0x421   :  { %7663 = vmatpush1.bf16.msra.mxu1 %v12402_v20  ;;  %7492 = vmatprep.subr.bf16.mxu0 %v12409_v21  ;;  %v4299_v20 = vld [vmem:[#allocation6 + $0xb58] sm:$0xff]  ;;  %v12465_v23 = vcombine.high %v4298_v18, %v4302_v19 }
 0x422   :  { %7664 = vmatprep.subr.bf16.mxu1 %v12411_v22  ;;  %v4303_v21 = vld [vmem:[#allocation6 + $0xb78] sm:$0xff]  ;;  %v12456_v22 = vcombine.low %v4290_v1, %v4294_v2  ;;  %v12505_v2 = vcombine.high %v4338_v57, %v4342_v59 }
 0x423   :  { %v12467_v24 = vcombine.high %v4299_v20, %v4303_v21  ;;  %v12466_v31 = vcombine.low %v4299_v20, %v4303_v21  ;;  %v4354_v20 = vld [vmem:[#allocation6 + $0xd10] sm:$0xff] }
 0x424   :  { %7493 = vmatpush1.bf16.msra.mxu0 %v12408_v28  ;;  %v4310_v28 = vld [vmem:[#allocation6 + $0xbb0] sm:$0xff] }
 0x425   :  { %7665 = vmatpush1.bf16.msra.mxu1 %v12410_v29  ;;  %7494 = vmatprep.subr.bf16.mxu0 %v12417_v30  ;;  %v4307_v29 = vld [vmem:[#allocation6 + $0xb98] sm:$0xff]  ;;  %v12473_v53 = vcombine.high %v4306_v26, %v4310_v28  ;;  %v4358_v21 = vld [vmem:[#allocation6 + $0xd30] sm:$0xff] }
 0x426   :  { %7666 = vmatprep.subr.bf16.mxu1 %v12419_v56  ;;  %v4311_v30 = vld [vmem:[#allocation6 + $0xbb8] sm:$0xff]  ;;  %v12464_v56 = vcombine.low %v4298_v18, %v4302_v19 }
 0x427   :  { %v12475_v58 = vcombine.high %v4307_v29, %v4311_v30  ;;  %v12474_v36 = vcombine.low %v4307_v29, %v4311_v30  ;;  %v4366_v29 = vld [vmem:[#allocation6 + $0xd70] sm:$0xff]  ;;  %v4363_v30 = vld [vmem:[#allocation6 + $0xd58] sm:$0xff] }
 0x428   :  { %7495 = vmatpush1.bf16.msra.mxu0 %v12416_v33  ;;  %v4318_v33 = vld [vmem:[#allocation6 + $0xbf0] sm:$0xff] }
 0x429   :  { %7667 = vmatpush1.bf16.msra.mxu1 %v12418_v34  ;;  %7496 = vmatprep.subr.bf16.mxu0 %v12425_v63  ;;  %v4315_v34 = vld [vmem:[#allocation6 + $0xbd8] sm:$0xff]  ;;  %v12481_v38 = vcombine.high %v4314_v32, %v4318_v33 }
 0x42a   :  { %7668 = vmatprep.subr.bf16.mxu1 %v12427_v15  ;;  %v4319_v63 = vld [vmem:[#allocation6 + $0xbf8] sm:$0xff]  ;;  %v12472_v15 = vcombine.low %v4306_v26, %v4310_v28  ;;  %v4362_v28 = vld [vmem:[#allocation6 + $0xd50] sm:$0xff] }
 0x42b   :  { %v12483_v39 = vcombine.high %v4315_v34, %v4319_v63  ;;  %v12482_v47 = vcombine.low %v4315_v34, %v4319_v63  ;;  %v4370_v34 = vld [vmem:[#allocation6 + $0xd90] sm:$0xff] }
 0x42c   :  { %7497 = vmatpush1.bf16.msra.mxu0 %v12424_v44  ;;  %v4326_v44 = vld [vmem:[#allocation6 + $0xc30] sm:$0xff] }
 0x42d   :  { %7669 = vmatpush1.bf16.msra.mxu1 %v12426_v45  ;;  %7498 = vmatprep.subr.bf16.mxu0 %v12433_v25  ;;  %v4323_v45 = vld [vmem:[#allocation6 + $0xc18] sm:$0xff]  ;;  %v12489_v48 = vcombine.high %v4322_v40, %v4326_v44  ;;  %v4374_v63 = vld [vmem:[#allocation6 + $0xdb0] sm:$0xff] }
 0x42e   :  { %7670 = vmatprep.subr.bf16.mxu1 %v12435_v46  ;;  %v4327_v25 = vld [vmem:[#allocation6 + $0xc38] sm:$0xff]  ;;  %v12480_v46 = vcombine.low %v4314_v32, %v4318_v33  ;;  %v12529_v32 = vcombine.high %v4362_v28, %v4366_v29 }
 0x42f   :  { %v12491_v54 = vcombine.high %v4323_v45, %v4327_v25  ;;  %v12490_v55 = vcombine.low %v4323_v45, %v4327_v25  ;;  %v12528_v45 = vcombine.low %v4362_v28, %v4366_v29 }
 0x430   :  { %7499 = vmatpush1.bf16.msra.mxu0 %v12432_v49  ;;  %v4334_v49 = vld [vmem:[#allocation6 + $0xc70] sm:$0xff] }
 0x431   :  { %7671 = vmatpush1.bf16.msra.mxu1 %v12434_v50  ;;  %7500 = vmatprep.subr.bf16.mxu0 %v12441_v51  ;;  %v12488_v50 = vcombine.low %v4322_v40, %v4326_v44  ;;  %v4331_v51 = vld [vmem:[#allocation6 + $0xc58] sm:$0xff]  ;;  %v12497_v42 = vcombine.high %v4330_v37, %v4334_v49 }
 0x432   :  { %7672 = vmatprep.subr.bf16.mxu1 %v12443_v52  ;;  %v4335_v52 = vld [vmem:[#allocation6 + $0xc78] sm:$0xff] }
 0x433   :  { %v12498_v1 = vcombine.low %v4331_v51, %v4335_v52 }
 0x434   :  { %7501 = vmatpush1.bf16.msra.mxu0 %v12440_v60  ;;  %v12499_v60 = vcombine.high %v4331_v51, %v4335_v52 }
 0x435   :  { %7673 = vmatpush1.bf16.msra.mxu1 %v12442_v61  ;;  %7502 = vmatprep.subr.bf16.mxu0 %v12449_v62  ;;  %v4339_v61 = vld [vmem:[#allocation6 + $0xc98] sm:$0xff] }
 0x436   :  { %7674 = vmatprep.subr.bf16.mxu1 %v12451_v0  ;;  %v4343_v62 = vld [vmem:[#allocation6 + $0xcb8] sm:$0xff]  ;;  %v12496_v0 = vcombine.low %v4330_v37, %v4334_v49 }
 0x437   :  { %v12507_v3 = vcombine.high %v4339_v61, %v4343_v62 }
 0x438   :  { %7503 = vmatpush1.bf16.msra.mxu0 %v12448_v6  ;;  %v4350_v6 = vld [vmem:[#allocation6 + $0xcf0] sm:$0xff] }
 0x439   :  { %7675 = vmatpush1.bf16.msra.mxu1 %v12450_v7  ;;  %7504 = vmatprep.subr.bf16.mxu0 %v12457_v16  ;;  %v4347_v7 = vld [vmem:[#allocation6 + $0xcd8] sm:$0xff]  ;;  %v12513_v18 = vcombine.high %v4346_v4, %v4350_v6 }
 0x43a   :  { %7676 = vmatprep.subr.bf16.mxu1 %v12459_v17  ;;  %v4351_v16 = vld [vmem:[#allocation6 + $0xcf8] sm:$0xff]  ;;  %v12504_v17 = vcombine.low %v4338_v57, %v4342_v59 }
 0x43b   :  { %v12515_v19 = vcombine.high %v4347_v7, %v4351_v16  ;;  %v4379_v57 = vld [vmem:[#allocation6 + $0xdd8] sm:$0xff] }
 0x43c   :  { %7505 = vmatpush1.bf16.msra.mxu0 %v12456_v22  ;;  %v4355_v22 = vld [vmem:[#allocation6 + $0xd18] sm:$0xff] }
 0x43d   :  { %7677 = vmatpush1.bf16.msra.mxu1 %v12458_v43  ;;  %7506 = vmatprep.subr.bf16.mxu0 %v12465_v23  ;;  %v4359_v43 = vld [vmem:[#allocation6 + $0xd38] sm:$0xff]  ;;  %v12514_v23 = vcombine.low %v4347_v7, %v4351_v16 }
 0x43e   :  { %7678 = vmatprep.subr.bf16.mxu1 %v12467_v24  ;;  %v12521_v24 = vcombine.high %v4354_v20, %v4358_v21  ;;  %v12523_v26 = vcombine.high %v4355_v22, %v4359_v43  ;;  %v4383_v59 = vld [vmem:[#allocation6 + $0xdf8] sm:$0xff] }
 0x440   :  { %7507 = vmatpush1.bf16.msra.mxu0 %v12464_v56  ;;  %v4367_v56 = vld [vmem:[#allocation6 + $0xd78] sm:$0xff] }
 0x441   :  { %7679 = vmatpush1.bf16.msra.mxu1 %v12466_v31  ;;  %7508 = vmatprep.subr.bf16.mxu0 %v12473_v53  ;;  %v12520_v31 = vcombine.low %v4354_v20, %v4358_v21  ;;  %v4448_v53 = vld [vmem:[#allocation7] sm:$0xff]  ;;  %v12531_v33 = vcombine.high %v4363_v30, %v4367_v56  ;;  %v12530_v25 = vcombine.low %v4363_v30, %v4367_v56  ;;  %v4386_v20 = vld [vmem:[#allocation6 + $0xe10] sm:$0xff] }
 0x442   :  { %7680 = vmatprep.subr.bf16.mxu1 %v12475_v58  ;;  %v12522_v58 = vcombine.low %v4355_v22, %v4359_v43  ;;  %v4457_v40 = vrot.slane %v4448_v53, %v13698_v9  ;;  %v4465_v44 = vrot.slane %v4448_v53, %v13701_v13  ;;  %v4390_v21 = vld [vmem:[#allocation6 + $0xe30] sm:$0xff] }
 0x444   :  { %7509 = vmatpush1.bf16.msra.mxu0 %v12472_v15  ;;  %v4453_v15 = vrot.slane %v4448_v53, %v13692_v5 }
 0x445   :  { %7681 = vmatpush1.bf16.msra.mxu1 %v12474_v36  ;;  %7510 = vmatprep.subr.bf16.mxu0 %v12481_v38  ;;  %v4461_v36 = vrot.slane %v4448_v53, %v13695_v8  ;;  %v4371_v38 = vld [vmem:[#allocation6 + $0xd98] sm:$0xff] }
 0x446   :  { %7682 = vmatprep.subr.bf16.mxu1 %v12483_v39  ;;  %v4375_v39 = vld [vmem:[#allocation6 + $0xdb8] sm:$0xff] }
 0x447   :  { %v12539_v49 = vcombine.high %v4371_v38, %v4375_v39 }
 0x448   :  { %7511 = vmatpush1.bf16.msra.mxu0 %v12480_v46  ;;  %v12537_v46 = vcombine.high %v4370_v34, %v4374_v63 }
 0x449   :  { %7683 = vmatpush1.bf16.msra.mxu1 %v12482_v47  ;;  %7523 = vmatprep.subr.bf16.mxu0 %v12489_v48  ;;  %v4378_v47 = vld [vmem:[#allocation6 + $0xdd0] sm:$0xff] }
 0x44a   :  { %7695 = vmatprep.subr.bf16.mxu1 %v12491_v54  ;;  %v4382_v48 = vld [vmem:[#allocation6 + $0xdf0] sm:$0xff] }
 0x44b   :  { %7513 = vmatmul.mubr.bf16.vlgmr.msra.gmra.mrb[12].mxu0 %v13741_v35  ;;  %v12545_v16 = vcombine.high %v4378_v47, %v4382_v48 }
 0x44c   :  { %7685 = vmatmul.mubr.bf16.vlgmr.msra.gmra.mrb[12].mxu1 %v13741_v35  ;;  %7524 = vmatpush1.bf16.msra.mxu0 %v12488_v50  ;;  %v12506_v35 = vcombine.low %v4339_v61, %v4343_v62 }
 0x44d   :  { %7555 = vmatprep.mubr.bf16.mxu0 %v13747_v27  ;;  %7696 = vmatpush1.bf16.msra.mxu1 %v12490_v55 }
 0x44e   :  { %7727 = vmatprep.mubr.bf16.mxu1 %v13747_v27  ;;  %7525 = vmatprep.subr.bf16.mxu0 %v12497_v42  ;;  %v12512_v27 = vcombine.low %v4346_v4, %v4350_v6  ;;  %v12536_v42 = vcombine.low %v4370_v34, %v4374_v63  ;;  %v4394_v63 = vld [vmem:[#allocation6 + $0xe50] sm:$0xff] }
 0x44f   :  { %7697 = vmatprep.subr.bf16.mxu1 %v12499_v60 }
 0x450   :  { %7526 = vmatpush1.bf16.msra.mxu0 %v12496_v0 }
 0x451   :  { %7698 = vmatpush1.bf16.msra.mxu1 %v12498_v1  ;;  %7527 = vmatprep.subr.bf16.mxu0 %v12505_v2  ;;  %v12538_v1 = vcombine.low %v4371_v38, %v4375_v39  ;;  %v12544_v2 = vcombine.low %v4378_v47, %v4382_v48  ;;  %v4399_v38 = vld [vmem:[#allocation6 + $0xe78] sm:$0xff]  ;;  %v12552_v39 = vcombine.low %v4386_v20, %v4390_v21 }
 0x452   :  { %7699 = vmatprep.subr.bf16.mxu1 %v12507_v3  ;;  %v4403_v47 = vld [vmem:[#allocation6 + $0xe98] sm:$0xff] }
 0x453   :  { %v4407_v48 = vld [vmem:[#allocation6 + $0xeb8] sm:$0xff] }
 0x454   :  { %7528 = vmatpush1.bf16.msra.mxu0 %v12504_v17 }
 0x455   :  { %7700 = vmatpush1.bf16.msra.mxu1 %v12506_v35  ;;  %7529 = vmatprep.subr.bf16.mxu0 %v12513_v18  ;;  %v12546_v18 = vcombine.low %v4379_v57, %v4383_v59 }
 0x456   :  { %7701 = vmatprep.subr.bf16.mxu1 %v12515_v19  ;;  %v12547_v19 = vcombine.high %v4379_v57, %v4383_v59  ;;  %v12570_v59 = vcombine.low %v4403_v47, %v4407_v48 }
 0x458   :  { %7530 = vmatpush1.bf16.msra.mxu0 %v12512_v27 }
 0x459   :  { %7702 = vmatpush1.bf16.msra.mxu1 %v12514_v23  ;;  %7531 = vmatprep.subr.bf16.mxu0 %v12521_v24  ;;  %v4387_v24 = vld [vmem:[#allocation6 + $0xe18] sm:$0xff] }
 0x45a   :  { %7703 = vmatprep.subr.bf16.mxu1 %v12523_v26  ;;  %v4391_v26 = vld [vmem:[#allocation6 + $0xe38] sm:$0xff] }
 0x45b   :  { %v12555_v34 = vcombine.high %v4387_v24, %v4391_v26 }
 0x45c   :  { %7532 = vmatpush1.bf16.msra.mxu0 %v12520_v31 }
 0x45d   :  { %7704 = vmatpush1.bf16.msra.mxu1 %v12522_v58  ;;  %7533 = vmatprep.subr.bf16.mxu0 %v12529_v32  ;;  %v12553_v58 = vcombine.high %v4386_v20, %v4390_v21 }
 0x45e   :  { %v7213_v54 = vpop.f32.mrb[8].mxu0  ;;  %v7385_v37 = vpop.f32.mrb[8].mxu1  ;;  %7705 = vmatprep.subr.bf16.mxu1 %v12531_v33 }
 0x45f   :  { %v13140_v50 = vadd.f32 %v7213_v54, %v4453_v15  ;;  %v13144_v51 = vadd.f32 %v7385_v37, %v4461_v36  ;;  %v7215_v52 = vpop.f32.mrb[9].mxu0  ;;  %v7387_v55 = vpop.f32.mrb[9].mxu1 }
 0x460   :  { %v13141_v60 = vadd.f32 %v7215_v52, %v4457_v40  ;;  %v13145_v61 = vadd.f32 %v7387_v55, %v4465_v44  ;;  %v7217_v62 = vpop.f32.mrb[10].mxu0  ;;  %v7389_v0 = vpop.f32.mrb[10].mxu1  ;;  %7534 = vmatpush1.bf16.msra.mxu0 %v12528_v45  ;;  %v4414_v52 = vld [vmem:[#allocation6 + $0xef0] sm:$0xff]  ;;  %v4411_v55 = vld [vmem:[#allocation6 + $0xed8] sm:$0xff] }
 0x461   :  { %v13142_v3 = vadd.f32 %v7217_v62, %v4453_v15  ;;  %v13146_v4 = vadd.f32 %v7389_v0, %v4461_v36  ;;  %7706 = vmatpush1.bf16.msra.mxu1 %v12530_v25  ;;  %v7219_v6 = vpop.f32.mrb[11].mxu0  ;;  %v7391_v7 = vpop.f32.mrb[11].mxu1  ;;  %7535 = vmatprep.subr.bf16.mxu0 %v12537_v46  ;;  %v7738_v22 = vmax.f32 %v13140_v50, 0.0  ;;  %v7740_v43 = vmax.f32 %v13144_v51, 0.0  ;;  %v4398_v15 = vld [vmem:[#allocation6 + $0xe70] sm:$0xff]  ;;  %v4395_v36 = vld [vmem:[#allocation6 + $0xe58] sm:$0xff] }
 0x462   :  { %v13143_v17 = vadd.f32 %v7219_v6, %v4457_v40  ;;  %v13147_v35 = vadd.f32 %v7391_v7, %v4465_v44  ;;  %7707 = vmatprep.subr.bf16.mxu1 %v12539_v49  ;;  %v7739_v28 = vmax.f32 %v13141_v60, 0.0  ;;  %v7741_v29 = vmax.f32 %v13145_v61, 0.0  ;;  %v4402_v25 = vld [vmem:[#allocation6 + $0xe90] sm:$0xff] }
 0x463   :  { %v7746_v27 = vmax.f32 %v13142_v3, 0.0  ;;  %v7748_v23 = vmax.f32 %v13146_v4, 0.0  ;;  %v12554_v40 = vcombine.low %v4387_v24, %v4391_v26  ;;  %v12561_v44 = vcombine.high %v4394_v63, %v4398_v15  ;;  %v4406_v46 = vld [vmem:[#allocation6 + $0xeb0] sm:$0xff]  ;;  %v4439_v24 = vld [vmem:[#allocation6 + $0xfb8] sm:$0xff] }
 0x464   :  { %v7747_v30 = vmax.f32 %v13143_v17, 0.0  ;;  %v7749_v56 = vmax.f32 %v13147_v35, 0.0  ;;  %7536 = vmatpush1.bf16.msra.mxu0 %v12536_v42  ;;  %v12563_v45 = vcombine.high %v4395_v36, %v4399_v38  ;;  %v12560_v54 = vcombine.low %v4394_v63, %v4398_v15  ;;  %v4410_v51 = vld [vmem:[#allocation6 + $0xed0] sm:$0xff]  ;;  %v4415_v42 = vld [vmem:[#allocation6 + $0xef8] sm:$0xff] }
 0x465   :  { %v13775_v31 = vpack.c.bf16 %v7746_v27, %v7738_v22  ;;  %v13777_v53 = vpack.c.bf16 %v7748_v23, %v7740_v43  ;;  %7708 = vmatpush1.bf16.msra.mxu1 %v12538_v1  ;;  %7537 = vmatprep.subr.bf16.mxu0 %v12545_v16  ;;  %v12562_v37 = vcombine.low %v4395_v36, %v4399_v38  ;;  %v4418_v62 = vld [vmem:[#allocation6 + $0xf10] sm:$0xff]  ;;  %v4419_v1 = vld [vmem:[#allocation6 + $0xf18] sm:$0xff] }
 0x466   :  { %v13779_v32 = vpack.c.bf16 %v7747_v30, %v7739_v28  ;;  %v13781_v33 = vpack.c.bf16 %v7749_v56, %v7741_v29  ;;  %7709 = vmatprep.subr.bf16.mxu1 %v12547_v19  ;;  %v12569_v49 = vcombine.high %v4402_v25, %v4406_v46  ;;  %v12571_v50 = vcombine.high %v4403_v47, %v4407_v48  ;;  %v4422_v0 = vld [vmem:[#allocation6 + $0xf30] sm:$0xff]  ;;  %v4427_v35 = vld [vmem:[#allocation6 + $0xf58] sm:$0xff] }
 0x467   :  { %v12568_v57 = vcombine.low %v4402_v25, %v4406_v46  ;;  %v12577_v60 = vcombine.high %v4410_v51, %v4414_v52  ;;  %v12579_v61 = vcombine.high %v4411_v55, %v4415_v42  ;;  %v12576_v3 = vcombine.low %v4410_v51, %v4414_v52  ;;  %v4426_v16 = vld [vmem:[#allocation6 + $0xf50] sm:$0xff]  ;;  %v4435_v23 = vld [vmem:[#allocation6 + $0xf98] sm:$0xff] }
 0x468   :  { %7538 = vmatpush1.bf16.msra.mxu0 %v12544_v2  ;;  %v4423_v2 = vld [vmem:[#allocation6 + $0xf38] sm:$0xff]  ;;  %v12578_v4 = vcombine.low %v4411_v55, %v4415_v42  ;;  %v12585_v6 = vcombine.high %v4418_v62, %v4422_v0  ;;  %v4430_v17 = vld [vmem:[#allocation6 + $0xf70] sm:$0xff]  ;;  %v12584_v19 = vcombine.low %v4418_v62, %v4422_v0  ;;  %v12603_v30 = vcombine.high %v4435_v23, %v4439_v24 }
 0x469   :  { %7710 = vmatpush1.bf16.msra.mxu1 %v12546_v18  ;;  %7539 = vmatprep.subr.bf16.mxu0 %v12553_v58  ;;  %v12587_v7 = vcombine.high %v4419_v1, %v4423_v2  ;;  %v4431_v18 = vld [vmem:[#allocation6 + $0xf78] sm:$0xff]  ;;  %v12586_v20 = vcombine.low %v4419_v1, %v4423_v2  ;;  %v12593_v21 = vcombine.high %v4426_v16, %v4430_v17  ;;  %v4434_v43 = vld [vmem:[#allocation6 + $0xf90] sm:$0xff] }
 0x46a   :  { %7711 = vmatprep.subr.bf16.mxu1 %v12555_v34  ;;  %v12595_v22 = vcombine.high %v4427_v35, %v4431_v18  ;;  %v4438_v27 = vld [vmem:[#allocation6 + $0xfb0] sm:$0xff]  ;;  %v12592_v26 = vcombine.low %v4426_v16, %v4430_v17  ;;  %v12594_v28 = vcombine.low %v4427_v35, %v4431_v18  ;;  %v4443_v34 = vld [vmem:[#allocation6 + $0xfd8] sm:$0xff]  ;;  %v12602_v36 = vcombine.low %v4435_v23, %v4439_v24 }
 0x46b   :  { %v12601_v29 = vcombine.high %v4434_v43, %v4438_v27  ;;  %v4442_v56 = vld [vmem:[#allocation6 + $0xfd0] sm:$0xff]  ;;  %v4447_v63 = vld [vmem:[#allocation6 + $0xff8] sm:$0xff]  ;;  %v12600_v15 = vcombine.low %v4434_v43, %v4438_v27 }
 0x46c   :  { %7540 = vmatpush1.bf16.msra.mxu0 %v12552_v39  ;;  %v4446_v58 = vld [vmem:[#allocation6 + $0xff0] sm:$0xff]  ;;  %v12611_v39 = vcombine.high %v4443_v34, %v4447_v63  ;;  %v12610_v47 = vcombine.low %v4443_v34, %v4447_v63 }
 0x46d   :  { %7712 = vmatpush1.bf16.msra.mxu1 %v12554_v40  ;;  %7541 = vmatprep.subr.bf16.mxu0 %v12561_v44  ;;  %v12609_v38 = vcombine.high %v4442_v56, %v4446_v58  ;;  %v7762_v40 = vld [vmem:[#allocation9] sm:$0xff]  ;;  %v7767_v25 = vld [vmem:[#allocation9 + $0x28] sm:$0xff]  ;;  %v12608_v46 = vcombine.low %v4442_v56, %v4446_v58 }
 0x46e   :  { %7713 = vmatprep.subr.bf16.mxu1 %v12563_v45  ;;  %v7766_v44 = vld [vmem:[#allocation9 + $0x20] sm:$0xff]  ;;  %v7763_v45 = vld [vmem:[#allocation9 + $0x8] sm:$0xff] }
 0x46f   :  { %v12613_v48 = vcombine.high %v7762_v40, %v7766_v44  ;;  %v7771_v51 = vld [vmem:[#allocation9 + $0x48] sm:$0xff]  ;;  %v12614_v55 = vcombine.low %v7763_v45, %v7767_v25 }
 0x470   :  { %7542 = vmatpush1.bf16.msra.mxu0 %v12560_v54  ;;  %v12615_v54 = vcombine.high %v7763_v45, %v7767_v25  ;;  %v7775_v52 = vld [vmem:[#allocation9 + $0x68] sm:$0xff] }
 0x471   :  { %7714 = vmatpush1.bf16.msra.mxu1 %v12562_v37  ;;  %7543 = vmatprep.subr.bf16.mxu0 %v12569_v49  ;;  %v7770_v37 = vld [vmem:[#allocation9 + $0x40] sm:$0xff]  ;;  %v7783_v62 = vld [vmem:[#allocation9 + $0xa8] sm:$0xff]  ;;  %v12622_v1 = vcombine.low %v7771_v51, %v7775_v52 }
 0x472   :  { %7715 = vmatprep.subr.bf16.mxu1 %v12571_v50  ;;  %v7774_v49 = vld [vmem:[#allocation9 + $0x60] sm:$0xff]  ;;  %v12612_v50 = vcombine.low %v7762_v40, %v7766_v44  ;;  %v7791_v16 = vld [vmem:[#allocation9 + $0xe8] sm:$0xff] }
 0x473   :  { %v12621_v42 = vcombine.high %v7770_v37, %v7774_v49  ;;  %v12620_v0 = vcombine.low %v7770_v37, %v7774_v49 }
 0x474   :  { %7544 = vmatpush1.bf16.msra.mxu0 %v12568_v57  ;;  %v7778_v57 = vld [vmem:[#allocation9 + $0x80] sm:$0xff] }
 0x475   :  { %7716 = vmatpush1.bf16.msra.mxu1 %v12570_v59  ;;  %7545 = vmatprep.subr.bf16.mxu0 %v12577_v60  ;;  %v7782_v59 = vld [vmem:[#allocation9 + $0xa0] sm:$0xff]  ;;  %v12623_v60 = vcombine.high %v7771_v51, %v7775_v52 }
 0x476   :  { %7717 = vmatprep.subr.bf16.mxu1 %v12579_v61  ;;  %v7779_v61 = vld [vmem:[#allocation9 + $0x88] sm:$0xff]  ;;  %v12629_v2 = vcombine.high %v7778_v57, %v7782_v59  ;;  %v12628_v17 = vcombine.low %v7778_v57, %v7782_v59  ;;  %v7826_v52 = vld [vmem:[#allocation9 + $0x200] sm:$0xff] }
 0x477   :  { %v7831_v57 = vld [vmem:[#allocation9 + $0x228] sm:$0xff] }
 0x478   :  { %7546 = vmatpush1.bf16.msra.mxu0 %v12576_v3  ;;  %v12631_v3 = vcombine.high %v7779_v61, %v7783_v62 }
 0x479   :  { %7718 = vmatpush1.bf16.msra.mxu1 %v12578_v4  ;;  %7547 = vmatprep.subr.bf16.mxu0 %v12585_v6  ;;  %v7786_v4 = vld [vmem:[#allocation9 + $0xc0] sm:$0xff] }
 0x47a   :  { %7719 = vmatprep.subr.bf16.mxu1 %v12587_v7  ;;  %v7790_v6 = vld [vmem:[#allocation9 + $0xe0] sm:$0xff]  ;;  %v7787_v7 = vld [vmem:[#allocation9 + $0xc8] sm:$0xff] }
 0x47b   :  { %v12637_v35 = vcombine.high %v7786_v4, %v7790_v6  ;;  %v12639_v18 = vcombine.high %v7787_v7, %v7791_v16  ;;  %v12636_v43 = vcombine.low %v7786_v4, %v7790_v6  ;;  %v12638_v27 = vcombine.low %v7787_v7, %v7791_v16 }
 0x47c   :  { %7548 = vmatpush1.bf16.msra.mxu0 %v12584_v19  ;;  %v7794_v19 = vld [vmem:[#allocation9 + $0x100] sm:$0xff] }
 0x47d   :  { %7720 = vmatpush1.bf16.msra.mxu1 %v12586_v20  ;;  %7549 = vmatprep.subr.bf16.mxu0 %v12593_v21  ;;  %v7798_v20 = vld [vmem:[#allocation9 + $0x120] sm:$0xff]  ;;  %v7795_v21 = vld [vmem:[#allocation9 + $0x108] sm:$0xff] }
 0x47e   :  { %7721 = vmatprep.subr.bf16.mxu1 %v12595_v22  ;;  %v7799_v22 = vld [vmem:[#allocation9 + $0x128] sm:$0xff]  ;;  %v12645_v23 = vcombine.high %v7794_v19, %v7798_v20  ;;  %v12644_v56 = vcombine.low %v7794_v19, %v7798_v20 }
 0x47f   :  { %v12647_v24 = vcombine.high %v7795_v21, %v7799_v22  ;;  %v12646_v58 = vcombine.low %v7795_v21, %v7799_v22 }
 0x480   :  { %7550 = vmatpush1.bf16.msra.mxu0 %v12592_v26  ;;  %v7802_v26 = vld [vmem:[#allocation9 + $0x140] sm:$0xff] }
 0x481   :  { %7722 = vmatpush1.bf16.msra.mxu1 %v12594_v28  ;;  %7551 = vmatprep.subr.bf16.mxu0 %v12601_v29  ;;  %v7806_v28 = vld [vmem:[#allocation9 + $0x160] sm:$0xff]  ;;  %v7803_v29 = vld [vmem:[#allocation9 + $0x148] sm:$0xff] }
 0x482   :  { %7723 = vmatprep.subr.bf16.mxu1 %v12603_v30  ;;  %v7807_v30 = vld [vmem:[#allocation9 + $0x168] sm:$0xff]  ;;  %v12653_v34 = vcombine.high %v7802_v26, %v7806_v28  ;;  %v12652_v40 = vcombine.low %v7802_v26, %v7806_v28 }
 0x483   :  { %v12655_v63 = vcombine.high %v7803_v29, %v7807_v30  ;;  %v12654_v44 = vcombine.low %v7803_v29, %v7807_v30 }
 0x484   :  { %7552 = vmatpush1.bf16.msra.mxu0 %v12600_v15  ;;  %v7810_v15 = vld [vmem:[#allocation9 + $0x180] sm:$0xff] }
 0x485   :  { %7724 = vmatpush1.bf16.msra.mxu1 %v12602_v36  ;;  %7553 = vmatprep.subr.bf16.mxu0 %v12609_v38  ;;  %v7814_v36 = vld [vmem:[#allocation9 + $0x1a0] sm:$0xff]  ;;  %v7811_v38 = vld [vmem:[#allocation9 + $0x188] sm:$0xff] }
 0x486   :  { %7725 = vmatprep.subr.bf16.mxu1 %v12611_v39  ;;  %v7815_v39 = vld [vmem:[#allocation9 + $0x1a8] sm:$0xff]  ;;  %v12661_v45 = vcombine.high %v7810_v15, %v7814_v36  ;;  %v12660_v37 = vcombine.low %v7810_v15, %v7814_v36 }
 0x487   :  { %v12663_v25 = vcombine.high %v7811_v38, %v7815_v39  ;;  %v12662_v49 = vcombine.low %v7811_v38, %v7815_v39 }
 0x488   :  { %7554 = vmatpush1.bf16.msra.mxu0 %v12608_v46  ;;  %v7818_v46 = vld [vmem:[#allocation9 + $0x1c0] sm:$0xff] }
 0x489   :  { %7726 = vmatpush1.bf16.msra.mxu1 %v12610_v47  ;;  %10876 = vmatprep.subr.bf16.mxu0 %v12613_v48  ;;  %v7822_v47 = vld [vmem:[#allocation9 + $0x1e0] sm:$0xff]  ;;  %v7819_v48 = vld [vmem:[#allocation9 + $0x1c8] sm:$0xff] }
 0x48a   :  { %11048 = vmatprep.subr.bf16.mxu1 %v12615_v54  ;;  %v7823_v54 = vld [vmem:[#allocation9 + $0x1e8] sm:$0xff]  ;;  %v12668_v59 = vcombine.low %v7818_v46, %v7822_v47 }
 0x48b   :  { %7556 = vmatmul.mubr.bf16.vlgmr.msra.gmra.mrb[12].mxu0 %v13743_v41  ;;  %v12671_v51 = vcombine.high %v7819_v48, %v7823_v54 }
 0x48c   :  { %7728 = vmatmul.mubr.bf16.vlgmr.msra.gmra.mrb[12].mxu1 %v13743_v41  ;;  %10877 = vmatpush1.bf16.msra.mxu0 %v12612_v50  ;;  %v12630_v41 = vcombine.low %v7779_v61, %v7783_v62  ;;  %v12669_v50 = vcombine.high %v7818_v46, %v7822_v47 }
 0x48d   :  { %10908 = vmatprep.mubr.bf16.mxu0 %v13779_v32  ;;  %11049 = vmatpush1.bf16.msra.mxu1 %v12614_v55  ;;  %v7830_v55 = vld [vmem:[#allocation9 + $0x220] sm:$0xff] }
 0x48e   :  { %11080 = vmatprep.mubr.bf16.mxu1 %v13779_v32  ;;  %10878 = vmatprep.subr.bf16.mxu0 %v12621_v42  ;;  %v7827_v42 = vld [vmem:[#allocation9 + $0x208] sm:$0xff]  ;;  %v12677_v61 = vcombine.high %v7826_v52, %v7830_v55  ;;  %v12676_v4 = vcombine.low %v7826_v52, %v7830_v55 }
 0x48f   :  { %11050 = vmatprep.subr.bf16.mxu1 %v12623_v60  ;;  %v12670_v60 = vcombine.low %v7819_v48, %v7823_v54  ;;  %v12679_v62 = vcombine.high %v7827_v42, %v7831_v57  ;;  %v12678_v6 = vcombine.low %v7827_v42, %v7831_v57 }
 0x490   :  { %10879 = vmatpush1.bf16.msra.mxu0 %v12620_v0  ;;  %v7834_v0 = vld [vmem:[#allocation9 + $0x240] sm:$0xff] }
 0x491   :  { %11051 = vmatpush1.bf16.msra.mxu1 %v12622_v1  ;;  %10880 = vmatprep.subr.bf16.mxu0 %v12629_v2  ;;  %v7838_v1 = vld [vmem:[#allocation9 + $0x260] sm:$0xff]  ;;  %v7835_v2 = vld [vmem:[#allocation9 + $0x248] sm:$0xff] }
 0x492   :  { %11052 = vmatprep.subr.bf16.mxu1 %v12631_v3  ;;  %v7839_v3 = vld [vmem:[#allocation9 + $0x268] sm:$0xff]  ;;  %v12685_v7 = vcombine.high %v7834_v0, %v7838_v1  ;;  %v12684_v19 = vcombine.low %v7834_v0, %v7838_v1 }
 0x493   :  { %v12687_v16 = vcombine.high %v7835_v2, %v7839_v3  ;;  %v12686_v20 = vcombine.low %v7835_v2, %v7839_v3 }
 0x494   :  { %10881 = vmatpush1.bf16.msra.mxu0 %v12628_v17  ;;  %v7842_v17 = vld [vmem:[#allocation9 + $0x280] sm:$0xff] }
 0x495   :  { %11053 = vmatpush1.bf16.msra.mxu1 %v12630_v41  ;;  %10882 = vmatprep.subr.bf16.mxu0 %v12637_v35  ;;  %v7846_v41 = vld [vmem:[#allocation9 + $0x2a0] sm:$0xff]  ;;  %v7843_v35 = vld [vmem:[#allocation9 + $0x288] sm:$0xff] }
 0x496   :  { %11054 = vmatprep.subr.bf16.mxu1 %v12639_v18  ;;  %v7847_v18 = vld [vmem:[#allocation9 + $0x2a8] sm:$0xff]  ;;  %v12693_v21 = vcombine.high %v7842_v17, %v7846_v41  ;;  %v12692_v26 = vcombine.low %v7842_v17, %v7846_v41 }
 0x497   :  { %v12695_v22 = vcombine.high %v7843_v35, %v7847_v18  ;;  %v12694_v28 = vcombine.low %v7843_v35, %v7847_v18 }
 0x498   :  { %10883 = vmatpush1.bf16.msra.mxu0 %v12636_v43  ;;  %v7850_v43 = vld [vmem:[#allocation9 + $0x2c0] sm:$0xff] }
 0x499   :  { %11055 = vmatpush1.bf16.msra.mxu1 %v12638_v27  ;;  %10884 = vmatprep.subr.bf16.mxu0 %v12645_v23  ;;  %v7854_v27 = vld [vmem:[#allocation9 + $0x2e0] sm:$0xff]  ;;  %v7851_v23 = vld [vmem:[#allocation9 + $0x2c8] sm:$0xff] }
 0x49a   :  { %11056 = vmatprep.subr.bf16.mxu1 %v12647_v24  ;;  %v7855_v24 = vld [vmem:[#allocation9 + $0x2e8] sm:$0xff]  ;;  %v12701_v29 = vcombine.high %v7850_v43, %v7854_v27  ;;  %v12700_v15 = vcombine.low %v7850_v43, %v7854_v27 }
 0x49b   :  { %v12703_v30 = vcombine.high %v7851_v23, %v7855_v24  ;;  %v12702_v36 = vcombine.low %v7851_v23, %v7855_v24  ;;  %v7903_v43 = vld [vmem:[#allocation9 + $0x468] sm:$0xff]  ;;  %v7906_v24 = vld [vmem:[#allocation9 + $0x480] sm:$0xff] }
 0x49c   :  { %10885 = vmatpush1.bf16.msra.mxu0 %v12644_v56  ;;  %v7858_v56 = vld [vmem:[#allocation9 + $0x300] sm:$0xff] }
 0x49d   :  { %11057 = vmatpush1.bf16.msra.mxu1 %v12646_v58  ;;  %10886 = vmatprep.subr.bf16.mxu0 %v12653_v34  ;;  %v7862_v58 = vld [vmem:[#allocation9 + $0x320] sm:$0xff]  ;;  %v7859_v34 = vld [vmem:[#allocation9 + $0x308] sm:$0xff] }
 0x49e   :  { %11058 = vmatprep.subr.bf16.mxu1 %v12655_v63  ;;  %v7863_v63 = vld [vmem:[#allocation9 + $0x328] sm:$0xff]  ;;  %v12709_v38 = vcombine.high %v7858_v56, %v7862_v58  ;;  %v12708_v46 = vcombine.low %v7858_v56, %v7862_v58 }
 0x49f   :  { %v12711_v39 = vcombine.high %v7859_v34, %v7863_v63  ;;  %v12710_v47 = vcombine.low %v7859_v34, %v7863_v63 }
 0x4a0   :  { %10887 = vmatpush1.bf16.msra.mxu0 %v12652_v40  ;;  %v7866_v40 = vld [vmem:[#allocation9 + $0x340] sm:$0xff] }
 0x4a1   :  { %11059 = vmatpush1.bf16.msra.mxu1 %v12654_v44  ;;  %10888 = vmatprep.subr.bf16.mxu0 %v12661_v45  ;;  %v7870_v44 = vld [vmem:[#allocation9 + $0x360] sm:$0xff]  ;;  %v7867_v45 = vld [vmem:[#allocation9 + $0x348] sm:$0xff] }
 0x4a2   :  { %11060 = vmatprep.subr.bf16.mxu1 %v12663_v25  ;;  %v7871_v25 = vld [vmem:[#allocation9 + $0x368] sm:$0xff]  ;;  %v12717_v48 = vcombine.high %v7866_v40, %v7870_v44  ;;  %v12716_v52 = vcombine.low %v7866_v40, %v7870_v44 }
 0x4a3   :  { %v12719_v54 = vcombine.high %v7867_v45, %v7871_v25  ;;  %v12718_v55 = vcombine.low %v7867_v45, %v7871_v25 }
 0x4a4   :  { %10889 = vmatpush1.bf16.msra.mxu0 %v12660_v37  ;;  %v7874_v37 = vld [vmem:[#allocation9 + $0x380] sm:$0xff] }
 0x4a5   :  { %11061 = vmatpush1.bf16.msra.mxu1 %v12662_v49  ;;  %10890 = vmatprep.subr.bf16.mxu0 %v12669_v50  ;;  %v7878_v49 = vld [vmem:[#allocation9 + $0x3a0] sm:$0xff]  ;;  %v7875_v50 = vld [vmem:[#allocation9 + $0x388] sm:$0xff] }
 0x4a6   :  { %11062 = vmatprep.subr.bf16.mxu1 %v12671_v51  ;;  %v7879_v51 = vld [vmem:[#allocation9 + $0x3a8] sm:$0xff]  ;;  %v12725_v42 = vcombine.high %v7874_v37, %v7878_v49  ;;  %v12724_v0 = vcombine.low %v7874_v37, %v7878_v49 }
 0x4a7   :  { %v12727_v57 = vcombine.high %v7875_v50, %v7879_v51  ;;  %v12726_v1 = vcombine.low %v7875_v50, %v7879_v51 }
 0x4a8   :  { %10891 = vmatpush1.bf16.msra.mxu0 %v12668_v59  ;;  %v7882_v59 = vld [vmem:[#allocation9 + $0x3c0] sm:$0xff] }
 0x4a9   :  { %11063 = vmatpush1.bf16.msra.mxu1 %v12670_v60  ;;  %10892 = vmatprep.subr.bf16.mxu0 %v12677_v61  ;;  %v7886_v60 = vld [vmem:[#allocation9 + $0x3e0] sm:$0xff]  ;;  %v7883_v61 = vld [vmem:[#allocation9 + $0x3c8] sm:$0xff] }
 0x4aa   :  { %11064 = vmatprep.subr.bf16.mxu1 %v12679_v62  ;;  %v7887_v62 = vld [vmem:[#allocation9 + $0x3e8] sm:$0xff]  ;;  %v12733_v2 = vcombine.high %v7882_v59, %v7886_v60  ;;  %v12732_v17 = vcombine.low %v7882_v59, %v7886_v60 }
 0x4ab   :  { %v12735_v3 = vcombine.high %v7883_v61, %v7887_v62  ;;  %v12734_v41 = vcombine.low %v7883_v61, %v7887_v62 }
 0x4ac   :  { %10893 = vmatpush1.bf16.msra.mxu0 %v12676_v4  ;;  %v7890_v4 = vld [vmem:[#allocation9 + $0x400] sm:$0xff] }
 0x4ad   :  { %11065 = vmatpush1.bf16.msra.mxu1 %v12678_v6  ;;  %10894 = vmatprep.subr.bf16.mxu0 %v12685_v7  ;;  %v7894_v6 = vld [vmem:[#allocation9 + $0x420] sm:$0xff]  ;;  %v7891_v7 = vld [vmem:[#allocation9 + $0x408] sm:$0xff] }
 0x4ae   :  { %11066 = vmatprep.subr.bf16.mxu1 %v12687_v16  ;;  %v7895_v16 = vld [vmem:[#allocation9 + $0x428] sm:$0xff]  ;;  %v12741_v35 = vcombine.high %v7890_v4, %v7894_v6 }
 0x4af   :  { %v12743_v18 = vcombine.high %v7891_v7, %v7895_v16  ;;  %v12742_v27 = vcombine.low %v7891_v7, %v7895_v16 }
 0x4b0   :  { %10895 = vmatpush1.bf16.msra.mxu0 %v12684_v19  ;;  %v7898_v19 = vld [vmem:[#allocation9 + $0x440] sm:$0xff] }
 0x4b1   :  { %11067 = vmatpush1.bf16.msra.mxu1 %v12686_v20  ;;  %10896 = vmatprep.subr.bf16.mxu0 %v12693_v21  ;;  %v7902_v20 = vld [vmem:[#allocation9 + $0x460] sm:$0xff]  ;;  %v12740_v21 = vcombine.low %v7890_v4, %v7894_v6 }
 0x4b2   :  { %11068 = vmatprep.subr.bf16.mxu1 %v12695_v22  ;;  %v7899_v22 = vld [vmem:[#allocation9 + $0x448] sm:$0xff]  ;;  %v12749_v23 = vcombine.high %v7898_v19, %v7902_v20  ;;  %v12748_v56 = vcombine.low %v7898_v19, %v7902_v20 }
 0x4b3   :  { %v12750_v58 = vcombine.low %v7899_v22, %v7903_v43 }
 0x4b4   :  { %10897 = vmatpush1.bf16.msra.mxu0 %v12692_v26  ;;  %v7910_v26 = vld [vmem:[#allocation9 + $0x4a0] sm:$0xff] }
 0x4b5   :  { %11069 = vmatpush1.bf16.msra.mxu1 %v12694_v28  ;;  %10898 = vmatprep.subr.bf16.mxu0 %v12701_v29  ;;  %v12751_v28 = vcombine.high %v7899_v22, %v7903_v43  ;;  %v7907_v29 = vld [vmem:[#allocation9 + $0x488] sm:$0xff]  ;;  %v12757_v34 = vcombine.high %v7906_v24, %v7910_v26  ;;  %v12756_v40 = vcombine.low %v7906_v24, %v7910_v26  ;;  %v7954_v43 = vld [vmem:[#allocation9 + $0x600] sm:$0xff] }
 0x4b6   :  { %11070 = vmatprep.subr.bf16.mxu1 %v12703_v30  ;;  %v7911_v30 = vld [vmem:[#allocation9 + $0x4a8] sm:$0xff] }
 0x4b7   :  { %v12759_v63 = vcombine.high %v7907_v29, %v7911_v30  ;;  %v12758_v44 = vcombine.low %v7907_v29, %v7911_v30  ;;  %v7959_v24 = vld [vmem:[#allocation9 + $0x628] sm:$0xff] }
 0x4b8   :  { %10899 = vmatpush1.bf16.msra.mxu0 %v12700_v15  ;;  %v7914_v15 = vld [vmem:[#allocation9 + $0x4c0] sm:$0xff] }
 0x4b9   :  { %11071 = vmatpush1.bf16.msra.mxu1 %v12702_v36  ;;  %10900 = vmatprep.subr.bf16.mxu0 %v12709_v38  ;;  %v7918_v36 = vld [vmem:[#allocation9 + $0x4e0] sm:$0xff]  ;;  %v7915_v38 = vld [vmem:[#allocation9 + $0x4c8] sm:$0xff] }
 0x4ba   :  { %11072 = vmatprep.subr.bf16.mxu1 %v12711_v39  ;;  %v7919_v39 = vld [vmem:[#allocation9 + $0x4e8] sm:$0xff]  ;;  %v12765_v45 = vcombine.high %v7914_v15, %v7918_v36  ;;  %v12764_v37 = vcombine.low %v7914_v15, %v7918_v36 }
 0x4bb   :  { %v12767_v25 = vcombine.high %v7915_v38, %v7919_v39  ;;  %v12766_v49 = vcombine.low %v7915_v38, %v7919_v39 }
 0x4bc   :  { %10901 = vmatpush1.bf16.msra.mxu0 %v12708_v46  ;;  %v7922_v46 = vld [vmem:[#allocation9 + $0x500] sm:$0xff] }
 0x4bd   :  { %11073 = vmatpush1.bf16.msra.mxu1 %v12710_v47  ;;  %10902 = vmatprep.subr.bf16.mxu0 %v12717_v48  ;;  %v7926_v47 = vld [vmem:[#allocation9 + $0x520] sm:$0xff]  ;;  %v7923_v48 = vld [vmem:[#allocation9 + $0x508] sm:$0xff] }
 0x4be   :  { %11074 = vmatprep.subr.bf16.mxu1 %v12719_v54  ;;  %v7927_v54 = vld [vmem:[#allocation9 + $0x528] sm:$0xff]  ;;  %v12773_v50 = vcombine.high %v7922_v46, %v7926_v47  ;;  %v12772_v59 = vcombine.low %v7922_v46, %v7926_v47 }
 0x4bf   :  { %v12775_v51 = vcombine.high %v7923_v48, %v7927_v54  ;;  %v12774_v60 = vcombine.low %v7923_v48, %v7927_v54 }
 0x4c0   :  { %10903 = vmatpush1.bf16.msra.mxu0 %v12716_v52  ;;  %v7930_v52 = vld [vmem:[#allocation9 + $0x540] sm:$0xff] }
 0x4c1   :  { %11075 = vmatpush1.bf16.msra.mxu1 %v12718_v55  ;;  %10904 = vmatprep.subr.bf16.mxu0 %v12725_v42  ;;  %v7934_v55 = vld [vmem:[#allocation9 + $0x560] sm:$0xff]  ;;  %v7931_v42 = vld [vmem:[#allocation9 + $0x548] sm:$0xff] }
 0x4c2   :  { %11076 = vmatprep.subr.bf16.mxu1 %v12727_v57  ;;  %v7935_v57 = vld [vmem:[#allocation9 + $0x568] sm:$0xff]  ;;  %v12781_v61 = vcombine.high %v7930_v52, %v7934_v55  ;;  %v12780_v4 = vcombine.low %v7930_v52, %v7934_v55 }
 0x4c3   :  { %v12783_v62 = vcombine.high %v7931_v42, %v7935_v57  ;;  %v12782_v6 = vcombine.low %v7931_v42, %v7935_v57 }
 0x4c4   :  { %10905 = vmatpush1.bf16.msra.mxu0 %v12724_v0  ;;  %v7938_v0 = vld [vmem:[#allocation9 + $0x580] sm:$0xff] }
 0x4c5   :  { %11077 = vmatpush1.bf16.msra.mxu1 %v12726_v1  ;;  %10906 = vmatprep.subr.bf16.mxu0 %v12733_v2  ;;  %v7942_v1 = vld [vmem:[#allocation9 + $0x5a0] sm:$0xff]  ;;  %v7939_v2 = vld [vmem:[#allocation9 + $0x588] sm:$0xff] }
 0x4c6   :  { %11078 = vmatprep.subr.bf16.mxu1 %v12735_v3  ;;  %v7943_v3 = vld [vmem:[#allocation9 + $0x5a8] sm:$0xff]  ;;  %v12789_v7 = vcombine.high %v7938_v0, %v7942_v1  ;;  %v12788_v19 = vcombine.low %v7938_v0, %v7942_v1 }
 0x4c7   :  { %v12791_v16 = vcombine.high %v7939_v2, %v7943_v3  ;;  %v12790_v20 = vcombine.low %v7939_v2, %v7943_v3 }
 0x4c8   :  { %10907 = vmatpush1.bf16.msra.mxu0 %v12732_v17  ;;  %v7946_v17 = vld [vmem:[#allocation9 + $0x5c0] sm:$0xff] }
 0x4c9   :  { %11079 = vmatpush1.bf16.msra.mxu1 %v12734_v41  ;;  %10919 = vmatprep.subr.bf16.mxu0 %v12741_v35  ;;  %v7950_v41 = vld [vmem:[#allocation9 + $0x5e0] sm:$0xff]  ;;  %v7947_v35 = vld [vmem:[#allocation9 + $0x5c8] sm:$0xff] }
 0x4ca   :  { %11091 = vmatprep.subr.bf16.mxu1 %v12743_v18  ;;  %v7951_v18 = vld [vmem:[#allocation9 + $0x5e8] sm:$0xff]  ;;  %v12796_v26 = vcombine.low %v7946_v17, %v7950_v41 }
 0x4cb   :  { %10909 = vmatmul.mubr.bf16.vlgmr.msra.gmra.mrb[16].mxu0 %v13775_v31  ;;  %v12799_v22 = vcombine.high %v7947_v35, %v7951_v18 }
 0x4cc   :  { %11081 = vmatmul.mubr.bf16.vlgmr.msra.gmra.mrb[16].mxu1 %v13775_v31  ;;  %10920 = vmatpush1.bf16.msra.mxu0 %v12740_v21  ;;  %v12797_v21 = vcombine.high %v7946_v17, %v7950_v41 }
 0x4cd   :  { %10951 = vmatprep.mubr.bf16.mxu0 %v13781_v33  ;;  %11092 = vmatpush1.bf16.msra.mxu1 %v12742_v27  ;;  %v7958_v27 = vld [vmem:[#allocation9 + $0x620] sm:$0xff] }
 0x4ce   :  { %11123 = vmatprep.mubr.bf16.mxu1 %v13781_v33  ;;  %10921 = vmatprep.subr.bf16.mxu0 %v12749_v23  ;;  %v7955_v23 = vld [vmem:[#allocation9 + $0x608] sm:$0xff]  ;;  %v12805_v29 = vcombine.high %v7954_v43, %v7958_v27  ;;  %v12804_v15 = vcombine.low %v7954_v43, %v7958_v27 }
 0x4cf   :  { %11093 = vmatprep.subr.bf16.mxu1 %v12751_v28  ;;  %v12798_v28 = vcombine.low %v7947_v35, %v7951_v18  ;;  %v12807_v30 = vcombine.high %v7955_v23, %v7959_v24  ;;  %v12806_v36 = vcombine.low %v7955_v23, %v7959_v24 }
 0x4d0   :  { %10922 = vmatpush1.bf16.msra.mxu0 %v12748_v56  ;;  %v7962_v56 = vld [vmem:[#allocation9 + $0x640] sm:$0xff] }
 0x4d1   :  { %11094 = vmatpush1.bf16.msra.mxu1 %v12750_v58  ;;  %10923 = vmatprep.subr.bf16.mxu0 %v12757_v34  ;;  %v7966_v58 = vld [vmem:[#allocation9 + $0x660] sm:$0xff]  ;;  %v7963_v34 = vld [vmem:[#allocation9 + $0x648] sm:$0xff] }
 0x4d2   :  { %11095 = vmatprep.subr.bf16.mxu1 %v12759_v63  ;;  %v7967_v63 = vld [vmem:[#allocation9 + $0x668] sm:$0xff]  ;;  %v12813_v38 = vcombine.high %v7962_v56, %v7966_v58  ;;  %v12812_v46 = vcombine.low %v7962_v56, %v7966_v58 }
 0x4d3   :  { %v12815_v39 = vcombine.high %v7963_v34, %v7967_v63  ;;  %v12814_v47 = vcombine.low %v7963_v34, %v7967_v63 }
 0x4d4   :  { %10924 = vmatpush1.bf16.msra.mxu0 %v12756_v40  ;;  %v7970_v40 = vld [vmem:[#allocation9 + $0x680] sm:$0xff] }
 0x4d5   :  { %11096 = vmatpush1.bf16.msra.mxu1 %v12758_v44  ;;  %10925 = vmatprep.subr.bf16.mxu0 %v12765_v45  ;;  %v7974_v44 = vld [vmem:[#allocation9 + $0x6a0] sm:$0xff]  ;;  %v7971_v45 = vld [vmem:[#allocation9 + $0x688] sm:$0xff] }
 0x4d6   :  { %11097 = vmatprep.subr.bf16.mxu1 %v12767_v25  ;;  %v7975_v25 = vld [vmem:[#allocation9 + $0x6a8] sm:$0xff]  ;;  %v12821_v48 = vcombine.high %v7970_v40, %v7974_v44  ;;  %v12820_v52 = vcombine.low %v7970_v40, %v7974_v44 }
 0x4d7   :  { %v12823_v54 = vcombine.high %v7971_v45, %v7975_v25  ;;  %v12822_v55 = vcombine.low %v7971_v45, %v7975_v25 }
 0x4d8   :  { %10926 = vmatpush1.bf16.msra.mxu0 %v12764_v37  ;;  %v7978_v37 = vld [vmem:[#allocation9 + $0x6c0] sm:$0xff] }
 0x4d9   :  { %11098 = vmatpush1.bf16.msra.mxu1 %v12766_v49  ;;  %10927 = vmatprep.subr.bf16.mxu0 %v12773_v50  ;;  %v7982_v49 = vld [vmem:[#allocation9 + $0x6e0] sm:$0xff]  ;;  %v7979_v50 = vld [vmem:[#allocation9 + $0x6c8] sm:$0xff] }
 0x4da   :  { %11099 = vmatprep.subr.bf16.mxu1 %v12775_v51  ;;  %v7983_v51 = vld [vmem:[#allocation9 + $0x6e8] sm:$0xff]  ;;  %v12829_v42 = vcombine.high %v7978_v37, %v7982_v49  ;;  %v12828_v0 = vcombine.low %v7978_v37, %v7982_v49 }
 0x4db   :  { %v12831_v57 = vcombine.high %v7979_v50, %v7983_v51  ;;  %v12830_v1 = vcombine.low %v7979_v50, %v7983_v51 }
 0x4dc   :  { %10928 = vmatpush1.bf16.msra.mxu0 %v12772_v59  ;;  %v7986_v59 = vld [vmem:[#allocation9 + $0x700] sm:$0xff] }
 0x4dd   :  { %11100 = vmatpush1.bf16.msra.mxu1 %v12774_v60  ;;  %10929 = vmatprep.subr.bf16.mxu0 %v12781_v61  ;;  %v7990_v60 = vld [vmem:[#allocation9 + $0x720] sm:$0xff]  ;;  %v7987_v61 = vld [vmem:[#allocation9 + $0x708] sm:$0xff] }
 0x4de   :  { %11101 = vmatprep.subr.bf16.mxu1 %v12783_v62  ;;  %v7991_v62 = vld [vmem:[#allocation9 + $0x728] sm:$0xff]  ;;  %v12837_v2 = vcombine.high %v7986_v59, %v7990_v60  ;;  %v12836_v17 = vcombine.low %v7986_v59, %v7990_v60 }
 0x4df   :  { %v12839_v3 = vcombine.high %v7987_v61, %v7991_v62  ;;  %v12838_v41 = vcombine.low %v7987_v61, %v7991_v62 }
 0x4e0   :  { %10930 = vmatpush1.bf16.msra.mxu0 %v12780_v4  ;;  %v7994_v4 = vld [vmem:[#allocation9 + $0x740] sm:$0xff] }
 0x4e1   :  { %11102 = vmatpush1.bf16.msra.mxu1 %v12782_v6  ;;  %10931 = vmatprep.subr.bf16.mxu0 %v12789_v7  ;;  %v7998_v6 = vld [vmem:[#allocation9 + $0x760] sm:$0xff]  ;;  %v7995_v7 = vld [vmem:[#allocation9 + $0x748] sm:$0xff] }
 0x4e2   :  { %11103 = vmatprep.subr.bf16.mxu1 %v12791_v16  ;;  %v7999_v16 = vld [vmem:[#allocation9 + $0x768] sm:$0xff]  ;;  %v12845_v35 = vcombine.high %v7994_v4, %v7998_v6  ;;  %v12844_v43 = vcombine.low %v7994_v4, %v7998_v6 }
 0x4e3   :  { %v12847_v18 = vcombine.high %v7995_v7, %v7999_v16  ;;  %v12846_v27 = vcombine.low %v7995_v7, %v7999_v16 }
 0x4e4   :  { %10932 = vmatpush1.bf16.msra.mxu0 %v12788_v19  ;;  %v8002_v19 = vld [vmem:[#allocation9 + $0x780] sm:$0xff] }
 0x4e5   :  { %11104 = vmatpush1.bf16.msra.mxu1 %v12790_v20  ;;  %10933 = vmatprep.subr.bf16.mxu0 %v12797_v21  ;;  %v8006_v20 = vld [vmem:[#allocation9 + $0x7a0] sm:$0xff]  ;;  %v8003_v21 = vld [vmem:[#allocation9 + $0x788] sm:$0xff] }
 0x4e6   :  { %11105 = vmatprep.subr.bf16.mxu1 %v12799_v22  ;;  %v8007_v22 = vld [vmem:[#allocation9 + $0x7a8] sm:$0xff]  ;;  %v12853_v23 = vcombine.high %v8002_v19, %v8006_v20  ;;  %v12852_v56 = vcombine.low %v8002_v19, %v8006_v20 }
 0x4e7   :  { %v12855_v24 = vcombine.high %v8003_v21, %v8007_v22  ;;  %v12854_v58 = vcombine.low %v8003_v21, %v8007_v22 }
 0x4e8   :  { %10934 = vmatpush1.bf16.msra.mxu0 %v12796_v26  ;;  %v8010_v26 = vld [vmem:[#allocation9 + $0x7c0] sm:$0xff] }
 0x4e9   :  { %11106 = vmatpush1.bf16.msra.mxu1 %v12798_v28  ;;  %10935 = vmatprep.subr.bf16.mxu0 %v12805_v29  ;;  %v8014_v28 = vld [vmem:[#allocation9 + $0x7e0] sm:$0xff]  ;;  %v8011_v29 = vld [vmem:[#allocation9 + $0x7c8] sm:$0xff] }
 0x4ea   :  { %11107 = vmatprep.subr.bf16.mxu1 %v12807_v30  ;;  %v8015_v30 = vld [vmem:[#allocation9 + $0x7e8] sm:$0xff]  ;;  %v12861_v34 = vcombine.high %v8010_v26, %v8014_v28  ;;  %v12860_v40 = vcombine.low %v8010_v26, %v8014_v28 }
 0x4eb   :  { %v12863_v63 = vcombine.high %v8011_v29, %v8015_v30  ;;  %v12862_v44 = vcombine.low %v8011_v29, %v8015_v30 }
 0x4ec   :  { %10936 = vmatpush1.bf16.msra.mxu0 %v12804_v15  ;;  %v8018_v15 = vld [vmem:[#allocation9 + $0x800] sm:$0xff] }
 0x4ed   :  { %11108 = vmatpush1.bf16.msra.mxu1 %v12806_v36  ;;  %10937 = vmatprep.subr.bf16.mxu0 %v12813_v38  ;;  %v8022_v36 = vld [vmem:[#allocation9 + $0x820] sm:$0xff]  ;;  %v8019_v38 = vld [vmem:[#allocation9 + $0x808] sm:$0xff] }
 0x4ee   :  { %11109 = vmatprep.subr.bf16.mxu1 %v12815_v39  ;;  %v8023_v39 = vld [vmem:[#allocation9 + $0x828] sm:$0xff]  ;;  %v12869_v45 = vcombine.high %v8018_v15, %v8022_v36  ;;  %v12868_v37 = vcombine.low %v8018_v15, %v8022_v36 }
 0x4ef   :  { %v12871_v25 = vcombine.high %v8019_v38, %v8023_v39  ;;  %v12870_v49 = vcombine.low %v8019_v38, %v8023_v39 }
 0x4f0   :  { %10938 = vmatpush1.bf16.msra.mxu0 %v12812_v46  ;;  %v8026_v46 = vld [vmem:[#allocation9 + $0x840] sm:$0xff] }
 0x4f1   :  { %11110 = vmatpush1.bf16.msra.mxu1 %v12814_v47  ;;  %10939 = vmatprep.subr.bf16.mxu0 %v12821_v48  ;;  %v8030_v47 = vld [vmem:[#allocation9 + $0x860] sm:$0xff]  ;;  %v8027_v48 = vld [vmem:[#allocation9 + $0x848] sm:$0xff] }
 0x4f2   :  { %11111 = vmatprep.subr.bf16.mxu1 %v12823_v54  ;;  %v8031_v54 = vld [vmem:[#allocation9 + $0x868] sm:$0xff]  ;;  %v12877_v50 = vcombine.high %v8026_v46, %v8030_v47  ;;  %v12876_v59 = vcombine.low %v8026_v46, %v8030_v47 }
 0x4f3   :  { %v12879_v51 = vcombine.high %v8027_v48, %v8031_v54  ;;  %v12878_v60 = vcombine.low %v8027_v48, %v8031_v54 }
 0x4f4   :  { %10940 = vmatpush1.bf16.msra.mxu0 %v12820_v52  ;;  %v8034_v52 = vld [vmem:[#allocation9 + $0x880] sm:$0xff] }
 0x4f5   :  { %11112 = vmatpush1.bf16.msra.mxu1 %v12822_v55  ;;  %10941 = vmatprep.subr.bf16.mxu0 %v12829_v42  ;;  %v8038_v55 = vld [vmem:[#allocation9 + $0x8a0] sm:$0xff]  ;;  %v8035_v42 = vld [vmem:[#allocation9 + $0x888] sm:$0xff] }
 0x4f6   :  { %11113 = vmatprep.subr.bf16.mxu1 %v12831_v57  ;;  %v8039_v57 = vld [vmem:[#allocation9 + $0x8a8] sm:$0xff]  ;;  %v12885_v61 = vcombine.high %v8034_v52, %v8038_v55  ;;  %v12884_v4 = vcombine.low %v8034_v52, %v8038_v55 }
 0x4f7   :  { %v12887_v62 = vcombine.high %v8035_v42, %v8039_v57  ;;  %v12886_v6 = vcombine.low %v8035_v42, %v8039_v57 }
 0x4f8   :  { %10942 = vmatpush1.bf16.msra.mxu0 %v12828_v0  ;;  %v8042_v0 = vld [vmem:[#allocation9 + $0x8c0] sm:$0xff] }
 0x4f9   :  { %11114 = vmatpush1.bf16.msra.mxu1 %v12830_v1  ;;  %10943 = vmatprep.subr.bf16.mxu0 %v12837_v2  ;;  %v8046_v1 = vld [vmem:[#allocation9 + $0x8e0] sm:$0xff]  ;;  %v8043_v2 = vld [vmem:[#allocation9 + $0x8c8] sm:$0xff] }
 0x4fa   :  { %11115 = vmatprep.subr.bf16.mxu1 %v12839_v3  ;;  %v8047_v3 = vld [vmem:[#allocation9 + $0x8e8] sm:$0xff]  ;;  %v12893_v7 = vcombine.high %v8042_v0, %v8046_v1  ;;  %v12892_v19 = vcombine.low %v8042_v0, %v8046_v1 }
 0x4fb   :  { %v12895_v16 = vcombine.high %v8043_v2, %v8047_v3  ;;  %v12894_v20 = vcombine.low %v8043_v2, %v8047_v3 }
 0x4fc   :  { %10944 = vmatpush1.bf16.msra.mxu0 %v12836_v17  ;;  %v8050_v17 = vld [vmem:[#allocation9 + $0x900] sm:$0xff] }
 0x4fd   :  { %11116 = vmatpush1.bf16.msra.mxu1 %v12838_v41  ;;  %10945 = vmatprep.subr.bf16.mxu0 %v12845_v35  ;;  %v8054_v41 = vld [vmem:[#allocation9 + $0x920] sm:$0xff]  ;;  %v8051_v35 = vld [vmem:[#allocation9 + $0x908] sm:$0xff] }
 0x4fe   :  { %11117 = vmatprep.subr.bf16.mxu1 %v12847_v18  ;;  %v8055_v18 = vld [vmem:[#allocation9 + $0x928] sm:$0xff]  ;;  %v12901_v21 = vcombine.high %v8050_v17, %v8054_v41  ;;  %v12900_v26 = vcombine.low %v8050_v17, %v8054_v41 }
 0x4ff   :  { %v12903_v22 = vcombine.high %v8051_v35, %v8055_v18  ;;  %v12902_v28 = vcombine.low %v8051_v35, %v8055_v18 }
 0x500   :  { %10946 = vmatpush1.bf16.msra.mxu0 %v12844_v43  ;;  %v8058_v43 = vld [vmem:[#allocation9 + $0x940] sm:$0xff] }
 0x501   :  { %11118 = vmatpush1.bf16.msra.mxu1 %v12846_v27  ;;  %10947 = vmatprep.subr.bf16.mxu0 %v12853_v23  ;;  %v8062_v27 = vld [vmem:[#allocation9 + $0x960] sm:$0xff]  ;;  %v8059_v23 = vld [vmem:[#allocation9 + $0x948] sm:$0xff] }
 0x502   :  { %11119 = vmatprep.subr.bf16.mxu1 %v12855_v24  ;;  %v8063_v24 = vld [vmem:[#allocation9 + $0x968] sm:$0xff]  ;;  %v12909_v29 = vcombine.high %v8058_v43, %v8062_v27  ;;  %v12908_v15 = vcombine.low %v8058_v43, %v8062_v27 }
 0x503   :  { %v12911_v30 = vcombine.high %v8059_v23, %v8063_v24  ;;  %v12910_v36 = vcombine.low %v8059_v23, %v8063_v24 }
 0x504   :  { %10948 = vmatpush1.bf16.msra.mxu0 %v12852_v56  ;;  %v8066_v56 = vld [vmem:[#allocation9 + $0x980] sm:$0xff] }
 0x505   :  { %11120 = vmatpush1.bf16.msra.mxu1 %v12854_v58  ;;  %10949 = vmatprep.subr.bf16.mxu0 %v12861_v34  ;;  %v8070_v58 = vld [vmem:[#allocation9 + $0x9a0] sm:$0xff]  ;;  %v8067_v34 = vld [vmem:[#allocation9 + $0x988] sm:$0xff] }
 0x506   :  { %11121 = vmatprep.subr.bf16.mxu1 %v12863_v63  ;;  %v8071_v63 = vld [vmem:[#allocation9 + $0x9a8] sm:$0xff]  ;;  %v12917_v38 = vcombine.high %v8066_v56, %v8070_v58  ;;  %v12916_v46 = vcombine.low %v8066_v56, %v8070_v58 }
 0x507   :  { %v12919_v39 = vcombine.high %v8067_v34, %v8071_v63  ;;  %v12918_v47 = vcombine.low %v8067_v34, %v8071_v63 }
 0x508   :  { %10950 = vmatpush1.bf16.msra.mxu0 %v12860_v40  ;;  %v8074_v40 = vld [vmem:[#allocation9 + $0x9c0] sm:$0xff] }
 0x509   :  { %11122 = vmatpush1.bf16.msra.mxu1 %v12862_v44  ;;  %10962 = vmatprep.subr.bf16.mxu0 %v12869_v45  ;;  %v8078_v44 = vld [vmem:[#allocation9 + $0x9e0] sm:$0xff]  ;;  %v8075_v45 = vld [vmem:[#allocation9 + $0x9c8] sm:$0xff] }
 0x50a   :  { %11134 = vmatprep.subr.bf16.mxu1 %v12871_v25  ;;  %v8079_v25 = vld [vmem:[#allocation9 + $0x9e8] sm:$0xff]  ;;  %v12925_v48 = vcombine.high %v8074_v40, %v8078_v44  ;;  %v12924_v52 = vcombine.low %v8074_v40, %v8078_v44 }
 0x50b   :  { %10952 = vmatmul.mubr.bf16.vlgmr.msra.gmra.mrb[16].mxu0 %v13777_v53  ;;  %v12927_v54 = vcombine.high %v8075_v45, %v8079_v25  ;;  %v12926_v55 = vcombine.low %v8075_v45, %v8079_v25 }
 0x50c   :  { %11124 = vmatmul.mubr.bf16.vlgmr.msra.gmra.mrb[16].mxu1 %v13777_v53  ;;  %10963 = vmatpush1.bf16.msra.mxu0 %v12868_v37  ;;  %v8082_v37 = vld [vmem:[#allocation9 + $0xa00] sm:$0xff] }
 0x50d   :  { %11135 = vmatpush1.bf16.msra.mxu1 %v12870_v49  ;;  %10964 = vmatprep.subr.bf16.mxu0 %v12877_v50  ;;  %v8086_v49 = vld [vmem:[#allocation9 + $0xa20] sm:$0xff]  ;;  %v8083_v50 = vld [vmem:[#allocation9 + $0xa08] sm:$0xff] }
 0x50e   :  { %11136 = vmatprep.subr.bf16.mxu1 %v12879_v51  ;;  %v8087_v51 = vld [vmem:[#allocation9 + $0xa28] sm:$0xff]  ;;  %v12933_v42 = vcombine.high %v8082_v37, %v8086_v49  ;;  %v12932_v0 = vcombine.low %v8082_v37, %v8086_v49 }
 0x50f   :  { %v12935_v57 = vcombine.high %v8083_v50, %v8087_v51  ;;  %v12934_v1 = vcombine.low %v8083_v50, %v8087_v51 }
 0x510   :  { %10965 = vmatpush1.bf16.msra.mxu0 %v12876_v59  ;;  %v8090_v59 = vld [vmem:[#allocation9 + $0xa40] sm:$0xff] }
 0x511   :  { %11137 = vmatpush1.bf16.msra.mxu1 %v12878_v60  ;;  %10966 = vmatprep.subr.bf16.mxu0 %v12885_v61  ;;  %v8094_v60 = vld [vmem:[#allocation9 + $0xa60] sm:$0xff]  ;;  %v8091_v61 = vld [vmem:[#allocation9 + $0xa48] sm:$0xff] }
 0x512   :  { %11138 = vmatprep.subr.bf16.mxu1 %v12887_v62  ;;  %v8095_v62 = vld [vmem:[#allocation9 + $0xa68] sm:$0xff]  ;;  %v12941_v2 = vcombine.high %v8090_v59, %v8094_v60  ;;  %v12940_v17 = vcombine.low %v8090_v59, %v8094_v60 }
 0x513   :  { %v12943_v3 = vcombine.high %v8091_v61, %v8095_v62  ;;  %v12942_v41 = vcombine.low %v8091_v61, %v8095_v62 }
 0x514   :  { %10967 = vmatpush1.bf16.msra.mxu0 %v12884_v4  ;;  %v8098_v4 = vld [vmem:[#allocation9 + $0xa80] sm:$0xff] }
 0x515   :  { %11139 = vmatpush1.bf16.msra.mxu1 %v12886_v6  ;;  %10968 = vmatprep.subr.bf16.mxu0 %v12893_v7  ;;  %v8102_v6 = vld [vmem:[#allocation9 + $0xaa0] sm:$0xff]  ;;  %v8099_v7 = vld [vmem:[#allocation9 + $0xa88] sm:$0xff] }
 0x516   :  { %11140 = vmatprep.subr.bf16.mxu1 %v12895_v16  ;;  %v8103_v16 = vld [vmem:[#allocation9 + $0xaa8] sm:$0xff]  ;;  %v12949_v35 = vcombine.high %v8098_v4, %v8102_v6  ;;  %v12948_v43 = vcombine.low %v8098_v4, %v8102_v6 }
 0x517   :  { %v12951_v18 = vcombine.high %v8099_v7, %v8103_v16  ;;  %v12950_v27 = vcombine.low %v8099_v7, %v8103_v16 }
 0x518   :  { %10969 = vmatpush1.bf16.msra.mxu0 %v12892_v19  ;;  %v8106_v19 = vld [vmem:[#allocation9 + $0xac0] sm:$0xff] }
 0x519   :  { %11141 = vmatpush1.bf16.msra.mxu1 %v12894_v20  ;;  %10970 = vmatprep.subr.bf16.mxu0 %v12901_v21  ;;  %v8110_v20 = vld [vmem:[#allocation9 + $0xae0] sm:$0xff]  ;;  %v8107_v21 = vld [vmem:[#allocation9 + $0xac8] sm:$0xff] }
 0x51a   :  { %11142 = vmatprep.subr.bf16.mxu1 %v12903_v22  ;;  %v8111_v22 = vld [vmem:[#allocation9 + $0xae8] sm:$0xff]  ;;  %v12957_v23 = vcombine.high %v8106_v19, %v8110_v20  ;;  %v12956_v56 = vcombine.low %v8106_v19, %v8110_v20 }
 0x51b   :  { %v12959_v24 = vcombine.high %v8107_v21, %v8111_v22  ;;  %v12958_v58 = vcombine.low %v8107_v21, %v8111_v22 }
 0x51c   :  { %10971 = vmatpush1.bf16.msra.mxu0 %v12900_v26  ;;  %v8114_v26 = vld [vmem:[#allocation9 + $0xb00] sm:$0xff] }
 0x51d   :  { %11143 = vmatpush1.bf16.msra.mxu1 %v12902_v28  ;;  %10972 = vmatprep.subr.bf16.mxu0 %v12909_v29  ;;  %v8118_v28 = vld [vmem:[#allocation9 + $0xb20] sm:$0xff]  ;;  %v8115_v29 = vld [vmem:[#allocation9 + $0xb08] sm:$0xff] }
 0x51e   :  { %11144 = vmatprep.subr.bf16.mxu1 %v12911_v30  ;;  %v8119_v30 = vld [vmem:[#allocation9 + $0xb28] sm:$0xff]  ;;  %v12965_v34 = vcombine.high %v8114_v26, %v8118_v28  ;;  %v12964_v40 = vcombine.low %v8114_v26, %v8118_v28 }
 0x51f   :  { %v12967_v63 = vcombine.high %v8115_v29, %v8119_v30  ;;  %v12966_v44 = vcombine.low %v8115_v29, %v8119_v30 }
 0x520   :  { %10973 = vmatpush1.bf16.msra.mxu0 %v12908_v15  ;;  %v8122_v15 = vld [vmem:[#allocation9 + $0xb40] sm:$0xff] }
 0x521   :  { %11145 = vmatpush1.bf16.msra.mxu1 %v12910_v36  ;;  %10974 = vmatprep.subr.bf16.mxu0 %v12917_v38  ;;  %v8126_v36 = vld [vmem:[#allocation9 + $0xb60] sm:$0xff]  ;;  %v8123_v38 = vld [vmem:[#allocation9 + $0xb48] sm:$0xff] }
 0x522   :  { %11146 = vmatprep.subr.bf16.mxu1 %v12919_v39  ;;  %v8127_v39 = vld [vmem:[#allocation9 + $0xb68] sm:$0xff]  ;;  %v12973_v45 = vcombine.high %v8122_v15, %v8126_v36  ;;  %v12972_v37 = vcombine.low %v8122_v15, %v8126_v36 }
 0x523   :  { %v12975_v25 = vcombine.high %v8123_v38, %v8127_v39  ;;  %v12974_v49 = vcombine.low %v8123_v38, %v8127_v39 }
 0x524   :  { %10975 = vmatpush1.bf16.msra.mxu0 %v12916_v46  ;;  %v8130_v46 = vld [vmem:[#allocation9 + $0xb80] sm:$0xff] }
 0x525   :  { %11147 = vmatpush1.bf16.msra.mxu1 %v12918_v47  ;;  %10976 = vmatprep.subr.bf16.mxu0 %v12925_v48  ;;  %v8134_v47 = vld [vmem:[#allocation9 + $0xba0] sm:$0xff]  ;;  %v8131_v48 = vld [vmem:[#allocation9 + $0xb88] sm:$0xff] }
 0x526   :  { %11148 = vmatprep.subr.bf16.mxu1 %v12927_v54  ;;  %v8135_v54 = vld [vmem:[#allocation9 + $0xba8] sm:$0xff]  ;;  %v12981_v50 = vcombine.high %v8130_v46, %v8134_v47  ;;  %v12980_v59 = vcombine.low %v8130_v46, %v8134_v47 }
 0x527   :  { %v12983_v51 = vcombine.high %v8131_v48, %v8135_v54  ;;  %v12982_v60 = vcombine.low %v8131_v48, %v8135_v54  ;;  %v8158_v54 = vld [vmem:[#allocation9 + $0xc60] sm:$0xff] }
 0x528   :  { %10977 = vmatpush1.bf16.msra.mxu0 %v12924_v52  ;;  %v8138_v52 = vld [vmem:[#allocation9 + $0xbc0] sm:$0xff] }
 0x529   :  { %11149 = vmatpush1.bf16.msra.mxu1 %v12926_v55  ;;  %10978 = vmatprep.subr.bf16.mxu0 %v12933_v42  ;;  %v8142_v55 = vld [vmem:[#allocation9 + $0xbe0] sm:$0xff]  ;;  %v8139_v42 = vld [vmem:[#allocation9 + $0xbc8] sm:$0xff] }
 0x52a   :  { %11150 = vmatprep.subr.bf16.mxu1 %v12935_v57  ;;  %v8143_v57 = vld [vmem:[#allocation9 + $0xbe8] sm:$0xff]  ;;  %v12989_v61 = vcombine.high %v8138_v52, %v8142_v55  ;;  %v12988_v4 = vcombine.low %v8138_v52, %v8142_v55 }
 0x52b   :  { %v12991_v62 = vcombine.high %v8139_v42, %v8143_v57  ;;  %v12990_v6 = vcombine.low %v8139_v42, %v8143_v57  ;;  %v8162_v57 = vld [vmem:[#allocation9 + $0xc80] sm:$0xff] }
 0x52c   :  { %10979 = vmatpush1.bf16.msra.mxu0 %v12932_v0  ;;  %v13793_v0 = vld [vmem:[#allocation9 + $0xc00] sm:$0xff] }
 0x52d   :  { %11151 = vmatpush1.bf16.msra.mxu1 %v12934_v1  ;;  %10980 = vmatprep.subr.bf16.mxu0 %v12941_v2  ;;  %v13795_v1 = vld [vmem:[#allocation9 + $0xc20] sm:$0xff]  ;;  %v13797_v2 = vld [vmem:[#allocation9 + $0xc08] sm:$0xff] }
 0x52e   :  { %11152 = vmatprep.subr.bf16.mxu1 %v12943_v3  ;;  %v13799_v3 = vld [vmem:[#allocation9 + $0xc28] sm:$0xff]  ;;  %v12997_v7 = vcombine.high %v13793_v0, %v13795_v1  ;;  %v12996_v52 = vcombine.low %v13793_v0, %v13795_v1 }
 0x52f   :  { %v12999_v16 = vcombine.high %v13797_v2, %v13799_v3  ;;  %v12998_v55 = vcombine.low %v13797_v2, %v13799_v3 }
 0x530   :  { %10981 = vmatpush1.bf16.msra.mxu0 %v12940_v17  ;;  %v13325_v17 = vld [vmem:[#allocation7] sm:$0xff] }
 0x531   :  { %11153 = vmatpush1.bf16.msra.mxu1 %v12942_v41  ;;  %10982 = vmatprep.subr.bf16.mxu0 %v12949_v35  ;;  %v4469_v41 = vrot.slane %v13325_v17, %v13726_v10  ;;  %v4477_v35 = vrot.slane %v13325_v17, %v13729_v11  ;;  %v4481_v19 = vrot.slane %v13325_v17, %v13735_v14 }
 0x532   :  { %11154 = vmatprep.subr.bf16.mxu1 %v12951_v18  ;;  %v4473_v18 = vrot.slane %v13325_v17, %v13732_v12  ;;  %v8175_v17 = vld [vmem:[#allocation9 + $0xce8] sm:$0xff] }
 0x534   :  { %10983 = vmatpush1.bf16.msra.mxu0 %v12948_v43 }
 0x535   :  { %11155 = vmatpush1.bf16.msra.mxu1 %v12950_v27  ;;  %10984 = vmatprep.subr.bf16.mxu0 %v12957_v23 }
 0x536   :  { %11156 = vmatprep.subr.bf16.mxu1 %v12959_v24 }
 0x538   :  { %10985 = vmatpush1.bf16.msra.mxu0 %v12956_v56 }
 0x539   :  { %11157 = vmatpush1.bf16.msra.mxu1 %v12958_v58  ;;  %10986 = vmatprep.subr.bf16.mxu0 %v12965_v34 }
 0x53a   :  { %11158 = vmatprep.subr.bf16.mxu1 %v12967_v63 }
 0x53c   :  { %10987 = vmatpush1.bf16.msra.mxu0 %v12964_v40 }
 0x53d   :  { %11159 = vmatpush1.bf16.msra.mxu1 %v12966_v44  ;;  %10988 = vmatprep.subr.bf16.mxu0 %v12973_v45 }
 0x53e   :  { %11160 = vmatprep.subr.bf16.mxu1 %v12975_v25  ;;  %v8154_v25 = vld [vmem:[#allocation9 + $0xc40] sm:$0xff] }
 0x53f   :  { %v13004_v0 = vcombine.low %v8154_v25, %v8158_v54 }
 0x540   :  { %10989 = vmatpush1.bf16.msra.mxu0 %v12972_v37  ;;  %v8155_v37 = vld [vmem:[#allocation9 + $0xc48] sm:$0xff] }
 0x541   :  { %11161 = vmatpush1.bf16.msra.mxu1 %v12974_v49  ;;  %10990 = vmatprep.subr.bf16.mxu0 %v12981_v50  ;;  %v8159_v49 = vld [vmem:[#allocation9 + $0xc68] sm:$0xff] }
 0x542   :  { %11162 = vmatprep.subr.bf16.mxu1 %v12983_v51  ;;  %v13006_v1 = vcombine.low %v8155_v37, %v8159_v49 }
 0x544   :  { %10991 = vmatpush1.bf16.msra.mxu0 %v12980_v59  ;;  %v13005_v59 = vcombine.high %v8154_v25, %v8158_v54  ;;  %v8206_v54 = vld [vmem:[#allocation9 + $0xde0] sm:$0xff] }
 0x545   :  { %11163 = vmatpush1.bf16.msra.mxu1 %v12982_v60  ;;  %10992 = vmatprep.subr.bf16.mxu0 %v12989_v61  ;;  %v13007_v60 = vcombine.high %v8155_v37, %v8159_v49  ;;  %v8166_v61 = vld [vmem:[#allocation9 + $0xca0] sm:$0xff]  ;;  %v8203_v37 = vld [vmem:[#allocation9 + $0xdc8] sm:$0xff] }
 0x546   :  { %11164 = vmatprep.subr.bf16.mxu1 %v12991_v62  ;;  %v8163_v62 = vld [vmem:[#allocation9 + $0xc88] sm:$0xff]  ;;  %v13013_v2 = vcombine.high %v8162_v57, %v8166_v61 }
 0x547   :  { %v8207_v49 = vld [vmem:[#allocation9 + $0xde8] sm:$0xff] }
 0x548   :  { %10993 = vmatpush1.bf16.msra.mxu0 %v12988_v4  ;;  %v8167_v4 = vld [vmem:[#allocation9 + $0xca8] sm:$0xff] }
 0x549   :  { %11165 = vmatpush1.bf16.msra.mxu1 %v12990_v6  ;;  %11005 = vmatprep.subr.bf16.mxu0 %v12997_v7  ;;  %v13015_v3 = vcombine.high %v8163_v62, %v8167_v4  ;;  %v8170_v6 = vld [vmem:[#allocation9 + $0xcc0] sm:$0xff] }
 0x54a   :  { %11177 = vmatprep.subr.bf16.mxu1 %v12999_v16  ;;  %v8174_v7 = vld [vmem:[#allocation9 + $0xce0] sm:$0xff]  ;;  %v8171_v16 = vld [vmem:[#allocation9 + $0xcc8] sm:$0xff] }
 0x55e   :  { %v7557_v20 = vpop.f32.mrb[12].mxu0 }
 0x55f   :  { %v13148_v21 = vadd.f32 %v7557_v20, %v4469_v41  ;;  %v7729_v22 = vpop.f32.mrb[12].mxu1  ;;  %v7559_v43 = vpop.f32.mrb[13].mxu0  ;;  %v8178_v20 = vld [vmem:[#allocation9 + $0xd00] sm:$0xff] }
 0x560   :  { %v13152_v27 = vadd.f32 %v7729_v22, %v4477_v35  ;;  %v13149_v23 = vadd.f32 %v7559_v43, %v4473_v18  ;;  %v7731_v24 = vpop.f32.mrb[13].mxu1  ;;  %v7561_v26 = vpop.f32.mrb[14].mxu0  ;;  %v8179_v22 = vld [vmem:[#allocation9 + $0xd08] sm:$0xff] }
 0x561   :  { %v13153_v28 = vadd.f32 %v7731_v24, %v4481_v19  ;;  %v13150_v29 = vadd.f32 %v7561_v26, %v4469_v41  ;;  %v7733_v30 = vpop.f32.mrb[14].mxu1  ;;  %v7563_v56 = vpop.f32.mrb[15].mxu0  ;;  %v7742_v15 = vmax.f32 %v13148_v21, 0.0  ;;  %v13012_v41 = vcombine.low %v8162_v57, %v8166_v61  ;;  %v8182_v21 = vld [vmem:[#allocation9 + $0xd20] sm:$0xff]  ;;  %v8183_v43 = vld [vmem:[#allocation9 + $0xd28] sm:$0xff] }
 0x562   :  { %v13154_v58 = vadd.f32 %v7733_v30, %v4477_v35  ;;  %v13151_v34 = vadd.f32 %v7563_v56, %v4473_v18  ;;  %v7735_v63 = vpop.f32.mrb[15].mxu1  ;;  %v7744_v39 = vmax.f32 %v13152_v27, 0.0  ;;  %v7743_v40 = vmax.f32 %v13149_v23, 0.0  ;;  %v8187_v30 = vld [vmem:[#allocation9 + $0xd48] sm:$0xff]  ;;  %v8214_v61 = vld [vmem:[#allocation9 + $0xe20] sm:$0xff] }
 0x563   :  { %v7750_v36 = vmax.f32 %v13150_v29, 0.0  ;;  %v13155_v38 = vadd.f32 %v7735_v63, %v4481_v19  ;;  %v7745_v46 = vmax.f32 %v13153_v28, 0.0  ;;  %v13014_v35 = vcombine.low %v8163_v62, %v8167_v4  ;;  %v8186_v28 = vld [vmem:[#allocation9 + $0xd40] sm:$0xff]  ;;  %v8191_v56 = vld [vmem:[#allocation9 + $0xd68] sm:$0xff] }
 0x564   :  { %v7752_v44 = vmax.f32 %v13154_v58, 0.0  ;;  %v7751_v45 = vmax.f32 %v13151_v34, 0.0  ;;  %v13021_v18 = vcombine.high %v8170_v6, %v8174_v7  ;;  %v13023_v19 = vcombine.high %v8171_v16, %v8175_v17  ;;  %v8190_v29 = vld [vmem:[#allocation9 + $0xd60] sm:$0xff]  ;;  %v8211_v62 = vld [vmem:[#allocation9 + $0xe08] sm:$0xff] }
 0x565   :  { %v13809_v47 = vpack.c.bf16 %v7750_v36, %v7742_v15  ;;  %v7753_v48 = vmax.f32 %v13155_v38, 0.0  ;;  %v13020_v27 = vcombine.low %v8170_v6, %v8174_v7  ;;  %v13022_v23 = vcombine.low %v8171_v16, %v8175_v17  ;;  %v8194_v36 = vld [vmem:[#allocation9 + $0xd80] sm:$0xff]  ;;  %v8215_v4 = vld [vmem:[#allocation9 + $0xe28] sm:$0xff] }
 0x566   :  { %v13811_v50 = vpack.c.bf16 %v7752_v44, %v7744_v39  ;;  %v13813_v51 = vpack.c.bf16 %v7751_v45, %v7743_v40  ;;  %v13029_v24 = vcombine.high %v8178_v20, %v8182_v21  ;;  %v13031_v26 = vcombine.high %v8179_v22, %v8183_v43  ;;  %v8198_v38 = vld [vmem:[#allocation9 + $0xda0] sm:$0xff]  ;;  %v8195_v39 = vld [vmem:[#allocation9 + $0xd88] sm:$0xff] }
 0x567   :  { %v13819_v42 = vpack.c.bf16 %v7753_v48, %v7745_v46  ;;  %v13028_v58 = vcombine.low %v8178_v20, %v8182_v21  ;;  %v13030_v34 = vcombine.low %v8179_v22, %v8183_v43  ;;  %v13037_v63 = vcombine.high %v8186_v28, %v8190_v29  ;;  %v8199_v40 = vld [vmem:[#allocation9 + $0xda8] sm:$0xff]  ;;  %v8202_v48 = vld [vmem:[#allocation9 + $0xdc0] sm:$0xff] }
 0x568   :  { %10994 = vmatprep.mubr.bf16.mxu0 %v13813_v51  ;;  %11166 = vmatprep.mubr.bf16.mxu1 %v13813_v51  ;;  %v13039_v15 = vcombine.high %v8187_v30, %v8191_v56  ;;  %v13036_v44 = vcombine.low %v8186_v28, %v8190_v29  ;;  %v13038_v45 = vcombine.low %v8187_v30, %v8191_v56  ;;  %v8218_v6 = vld [vmem:[#allocation9 + $0xe40] sm:$0xff]  ;;  %v8219_v16 = vld [vmem:[#allocation9 + $0xe48] sm:$0xff] }
 0x569   :  { %10995 = vmatmul.mubr.bf16.vlgmr.msra.gmra.mrb[16].mxu0 %v13809_v47  ;;  %11167 = vmatmul.mubr.bf16.vlgmr.msra.gmra.mrb[16].mxu1 %v13809_v47  ;;  %v13045_v25 = vcombine.high %v8194_v36, %v8198_v38  ;;  %v13047_v46 = vcombine.high %v8195_v39, %v8199_v40  ;;  %v13053_v57 = vcombine.high %v8202_v48, %v8206_v54  ;;  %v8222_v7 = vld [vmem:[#allocation9 + $0xe60] sm:$0xff]  ;;  %v8223_v17 = vld [vmem:[#allocation9 + $0xe68] sm:$0xff] }
 0x56a   :  { %11006 = vmatpush1.bf16.msra.mxu0 %v12996_v52  ;;  %11178 = vmatpush1.bf16.msra.mxu1 %v12998_v55  ;;  %v13044_v52 = vcombine.low %v8194_v36, %v8198_v38  ;;  %v13046_v55 = vcombine.low %v8195_v39, %v8199_v40  ;;  %v8226_v20 = vld [vmem:[#allocation9 + $0xe80] sm:$0xff]  ;;  %v8227_v22 = vld [vmem:[#allocation9 + $0xe88] sm:$0xff] }
 0x56b   :  { %11037 = vmatprep.mubr.bf16.mxu0 %v13819_v42  ;;  %11209 = vmatprep.mubr.bf16.mxu1 %v13819_v42  ;;  %v8230_v21 = vld [vmem:[#allocation9 + $0xea0] sm:$0xff]  ;;  %v8231_v43 = vld [vmem:[#allocation9 + $0xea8] sm:$0xff] }
 0x56c   :  { %11007 = vmatprep.subr.bf16.mxu0 %v13005_v59  ;;  %11179 = vmatprep.subr.bf16.mxu1 %v13007_v60  ;;  %v13055_v59 = vcombine.high %v8203_v37, %v8207_v49  ;;  %v8210_v60 = vld [vmem:[#allocation9 + $0xe00] sm:$0xff]  ;;  %v8235_v30 = vld [vmem:[#allocation9 + $0xec8] sm:$0xff] }
 0x56d   :  { %v8234_v28 = vld [vmem:[#allocation9 + $0xec0] sm:$0xff]  ;;  %v8239_v56 = vld [vmem:[#allocation9 + $0xee8] sm:$0xff] }
 0x56e   :  { %11008 = vmatpush1.bf16.msra.mxu0 %v13004_v0  ;;  %11180 = vmatpush1.bf16.msra.mxu1 %v13006_v1  ;;  %v13052_v0 = vcombine.low %v8202_v48, %v8206_v54  ;;  %v13054_v1 = vcombine.low %v8203_v37, %v8207_v49  ;;  %v8238_v29 = vld [vmem:[#allocation9 + $0xee0] sm:$0xff]  ;;  %v8243_v39 = vld [vmem:[#allocation9 + $0xf08] sm:$0xff] }
 0x56f   :  { %11009 = vmatprep.subr.bf16.mxu0 %v13013_v2  ;;  %11181 = vmatprep.subr.bf16.mxu1 %v13015_v3  ;;  %v13061_v2 = vcombine.high %v8210_v60, %v8214_v61  ;;  %v13063_v3 = vcombine.high %v8211_v62, %v8215_v4  ;;  %v8242_v36 = vld [vmem:[#allocation9 + $0xf00] sm:$0xff]  ;;  %v8247_v40 = vld [vmem:[#allocation9 + $0xf28] sm:$0xff] }
 0x570   :  { %v8246_v38 = vld [vmem:[#allocation9 + $0xf20] sm:$0xff]  ;;  %v8251_v37 = vld [vmem:[#allocation9 + $0xf48] sm:$0xff] }
 0x571   :  { %v8250_v48 = vld [vmem:[#allocation9 + $0xf40] sm:$0xff]  ;;  %v8255_v49 = vld [vmem:[#allocation9 + $0xf68] sm:$0xff] }
 0x572   :  { %11010 = vmatpush1.bf16.msra.mxu0 %v13012_v41  ;;  %11182 = vmatpush1.bf16.msra.mxu1 %v13014_v35  ;;  %v13060_v41 = vcombine.low %v8210_v60, %v8214_v61  ;;  %v13062_v35 = vcombine.low %v8211_v62, %v8215_v4  ;;  %v8254_v54 = vld [vmem:[#allocation9 + $0xf60] sm:$0xff]  ;;  %v8259_v62 = vld [vmem:[#allocation9 + $0xf88] sm:$0xff] }
 0x573   :  { %11011 = vmatprep.subr.bf16.mxu0 %v13021_v18  ;;  %11183 = vmatprep.subr.bf16.mxu1 %v13023_v19  ;;  %v13069_v18 = vcombine.high %v8218_v6, %v8222_v7  ;;  %v13071_v19 = vcombine.high %v8219_v16, %v8223_v17  ;;  %v8258_v60 = vld [vmem:[#allocation9 + $0xf80] sm:$0xff]  ;;  %v8263_v4 = vld [vmem:[#allocation9 + $0xfa8] sm:$0xff] }
 0x574   :  { %v8262_v61 = vld [vmem:[#allocation9 + $0xfa0] sm:$0xff] }
 0x576   :  { %11012 = vmatpush1.bf16.msra.mxu0 %v13020_v27  ;;  %11184 = vmatpush1.bf16.msra.mxu1 %v13022_v23  ;;  %v13068_v27 = vcombine.low %v8218_v6, %v8222_v7  ;;  %v13070_v23 = vcombine.low %v8219_v16, %v8223_v17  ;;  %v8266_v6 = vld [vmem:[#allocation9 + $0xfc0] sm:$0xff]  ;;  %v8267_v16 = vld [vmem:[#allocation9 + $0xfc8] sm:$0xff] }
 0x577   :  { %11013 = vmatprep.subr.bf16.mxu0 %v13029_v24  ;;  %11185 = vmatprep.subr.bf16.mxu1 %v13031_v26  ;;  %v13077_v24 = vcombine.high %v8226_v20, %v8230_v21  ;;  %v13079_v26 = vcombine.high %v8227_v22, %v8231_v43  ;;  %v8270_v7 = vld [vmem:[#allocation9 + $0xfe0] sm:$0xff]  ;;  %v8271_v17 = vld [vmem:[#allocation9 + $0xfe8] sm:$0xff] }
 0x57a   :  { %11014 = vmatpush1.bf16.msra.mxu0 %v13028_v58  ;;  %11186 = vmatpush1.bf16.msra.mxu1 %v13030_v34  ;;  %v13076_v58 = vcombine.low %v8226_v20, %v8230_v21  ;;  %v13078_v34 = vcombine.low %v8227_v22, %v8231_v43  ;;  %v7764_v20 = vld [vmem:[#allocation9 + $0x10] sm:$0xff]  ;;  %v7765_v22 = vld [vmem:[#allocation9 + $0x18] sm:$0xff] }
 0x57b   :  { %11015 = vmatprep.subr.bf16.mxu0 %v13037_v63  ;;  %11187 = vmatprep.subr.bf16.mxu1 %v13039_v15  ;;  %v13085_v63 = vcombine.high %v8234_v28, %v8238_v29  ;;  %v13087_v15 = vcombine.high %v8235_v30, %v8239_v56  ;;  %v7768_v21 = vld [vmem:[#allocation9 + $0x30] sm:$0xff]  ;;  %v7769_v43 = vld [vmem:[#allocation9 + $0x38] sm:$0xff] }
 0x57e   :  { %11016 = vmatpush1.bf16.msra.mxu0 %v13036_v44  ;;  %11188 = vmatpush1.bf16.msra.mxu1 %v13038_v45  ;;  %v13084_v44 = vcombine.low %v8234_v28, %v8238_v29  ;;  %v13086_v45 = vcombine.low %v8235_v30, %v8239_v56  ;;  %v7772_v28 = vld [vmem:[#allocation9 + $0x50] sm:$0xff]  ;;  %v7773_v30 = vld [vmem:[#allocation9 + $0x58] sm:$0xff] }
 0x57f   :  { %11017 = vmatprep.subr.bf16.mxu0 %v13045_v25  ;;  %11189 = vmatprep.subr.bf16.mxu1 %v13047_v46  ;;  %v13093_v25 = vcombine.high %v8242_v36, %v8246_v38  ;;  %v13095_v46 = vcombine.high %v8243_v39, %v8247_v40  ;;  %v7776_v29 = vld [vmem:[#allocation9 + $0x70] sm:$0xff]  ;;  %v7777_v56 = vld [vmem:[#allocation9 + $0x78] sm:$0xff] }
 0x582   :  { %11018 = vmatpush1.bf16.msra.mxu0 %v13044_v52  ;;  %11190 = vmatpush1.bf16.msra.mxu1 %v13046_v55  ;;  %v13092_v52 = vcombine.low %v8242_v36, %v8246_v38  ;;  %v13094_v55 = vcombine.low %v8243_v39, %v8247_v40  ;;  %v7780_v36 = vld [vmem:[#allocation9 + $0x90] sm:$0xff]  ;;  %v7781_v39 = vld [vmem:[#allocation9 + $0x98] sm:$0xff] }
 0x583   :  { %11019 = vmatprep.subr.bf16.mxu0 %v13053_v57  ;;  %11191 = vmatprep.subr.bf16.mxu1 %v13055_v59  ;;  %v13101_v57 = vcombine.high %v8250_v48, %v8254_v54  ;;  %v13103_v59 = vcombine.high %v8251_v37, %v8255_v49  ;;  %v7784_v38 = vld [vmem:[#allocation9 + $0xb0] sm:$0xff]  ;;  %v7785_v40 = vld [vmem:[#allocation9 + $0xb8] sm:$0xff] }
 0x586   :  { %11020 = vmatpush1.bf16.msra.mxu0 %v13052_v0  ;;  %11192 = vmatpush1.bf16.msra.mxu1 %v13054_v1  ;;  %v13100_v0 = vcombine.low %v8250_v48, %v8254_v54  ;;  %v13102_v1 = vcombine.low %v8251_v37, %v8255_v49  ;;  %v7788_v48 = vld [vmem:[#allocation9 + $0xd0] sm:$0xff]  ;;  %v7789_v37 = vld [vmem:[#allocation9 + $0xd8] sm:$0xff] }
 0x587   :  { %11021 = vmatprep.subr.bf16.mxu0 %v13061_v2  ;;  %11193 = vmatprep.subr.bf16.mxu1 %v13063_v3  ;;  %v13109_v2 = vcombine.high %v8258_v60, %v8262_v61  ;;  %v13111_v3 = vcombine.high %v8259_v62, %v8263_v4  ;;  %v7792_v54 = vld [vmem:[#allocation9 + $0xf0] sm:$0xff]  ;;  %v7793_v49 = vld [vmem:[#allocation9 + $0xf8] sm:$0xff] }
 0x58a   :  { %11022 = vmatpush1.bf16.msra.mxu0 %v13060_v41  ;;  %11194 = vmatpush1.bf16.msra.mxu1 %v13062_v35  ;;  %v13108_v41 = vcombine.low %v8258_v60, %v8262_v61  ;;  %v13110_v35 = vcombine.low %v8259_v62, %v8263_v4  ;;  %v7796_v60 = vld [vmem:[#allocation9 + $0x110] sm:$0xff]  ;;  %v7801_v62 = vld [vmem:[#allocation9 + $0x138] sm:$0xff]  ;;  %v12640_v4 = vcombine.low %v7788_v48, %v7792_v54 }
 0x58b   :  { %11023 = vmatprep.subr.bf16.mxu0 %v13069_v18  ;;  %11195 = vmatprep.subr.bf16.mxu1 %v13071_v19  ;;  %v13117_v18 = vcombine.high %v8266_v6, %v8270_v7  ;;  %v13119_v19 = vcombine.high %v8267_v16, %v8271_v17  ;;  %v7800_v61 = vld [vmem:[#allocation9 + $0x130] sm:$0xff] }
 0x58e   :  { %11024 = vmatpush1.bf16.msra.mxu0 %v13068_v27  ;;  %11196 = vmatpush1.bf16.msra.mxu1 %v13070_v23  ;;  %v13116_v27 = vcombine.low %v8266_v6, %v8270_v7  ;;  %v13118_v23 = vcombine.low %v8267_v16, %v8271_v17  ;;  %v7808_v6 = vld [vmem:[#allocation9 + $0x170] sm:$0xff]  ;;  %v7805_v7 = vld [vmem:[#allocation9 + $0x158] sm:$0xff]  ;;  %v12648_v17 = vcombine.low %v7796_v60, %v7800_v61 }
 0x58f   :  { %11025 = vmatprep.subr.bf16.mxu0 %v13077_v24  ;;  %11197 = vmatprep.subr.bf16.mxu1 %v13079_v26  ;;  %v12617_v24 = vcombine.high %v7764_v20, %v7768_v21  ;;  %v12619_v26 = vcombine.high %v7765_v22, %v7769_v43  ;;  %v7809_v16 = vld [vmem:[#allocation9 + $0x178] sm:$0xff] }
 0x592   :  { %11026 = vmatpush1.bf16.msra.mxu0 %v13076_v58  ;;  %11198 = vmatpush1.bf16.msra.mxu1 %v13078_v34  ;;  %v12616_v58 = vcombine.low %v7764_v20, %v7768_v21  ;;  %v12618_v34 = vcombine.low %v7765_v22, %v7769_v43  ;;  %v7816_v20 = vld [vmem:[#allocation9 + $0x1b0] sm:$0xff]  ;;  %v7813_v21 = vld [vmem:[#allocation9 + $0x198] sm:$0xff] }
 0x593   :  { %11027 = vmatprep.subr.bf16.mxu0 %v13085_v63  ;;  %11199 = vmatprep.subr.bf16.mxu1 %v13087_v15  ;;  %v12625_v63 = vcombine.high %v7772_v28, %v7776_v29  ;;  %v12627_v15 = vcombine.high %v7773_v30, %v7777_v56  ;;  %v7817_v22 = vld [vmem:[#allocation9 + $0x1b8] sm:$0xff] }
 0x596   :  { %11028 = vmatpush1.bf16.msra.mxu0 %v13084_v44  ;;  %11200 = vmatpush1.bf16.msra.mxu1 %v13086_v45  ;;  %v12624_v44 = vcombine.low %v7772_v28, %v7776_v29  ;;  %v12626_v45 = vcombine.low %v7773_v30, %v7777_v56  ;;  %v7824_v28 = vld [vmem:[#allocation9 + $0x1f0] sm:$0xff]  ;;  %v7821_v29 = vld [vmem:[#allocation9 + $0x1d8] sm:$0xff] }
 0x597   :  { %11029 = vmatprep.subr.bf16.mxu0 %v13093_v25  ;;  %11201 = vmatprep.subr.bf16.mxu1 %v13095_v46  ;;  %v12633_v25 = vcombine.high %v7780_v36, %v7784_v38  ;;  %v12635_v46 = vcombine.high %v7781_v39, %v7785_v40  ;;  %v7825_v30 = vld [vmem:[#allocation9 + $0x1f8] sm:$0xff] }
 0x59a   :  { %11030 = vmatpush1.bf16.msra.mxu0 %v13092_v52  ;;  %11202 = vmatpush1.bf16.msra.mxu1 %v13094_v55  ;;  %v12632_v52 = vcombine.low %v7780_v36, %v7784_v38  ;;  %v12634_v55 = vcombine.low %v7781_v39, %v7785_v40  ;;  %v7832_v36 = vld [vmem:[#allocation9 + $0x230] sm:$0xff]  ;;  %v7829_v38 = vld [vmem:[#allocation9 + $0x218] sm:$0xff] }
 0x59b   :  { %11031 = vmatprep.subr.bf16.mxu0 %v13101_v57  ;;  %11203 = vmatprep.subr.bf16.mxu1 %v13103_v59  ;;  %v12641_v57 = vcombine.high %v7788_v48, %v7792_v54  ;;  %v12643_v59 = vcombine.high %v7789_v37, %v7793_v49  ;;  %v7833_v39 = vld [vmem:[#allocation9 + $0x238] sm:$0xff]  ;;  %v7840_v48 = vld [vmem:[#allocation9 + $0x270] sm:$0xff] }
 0x59c   :  { %v7837_v54 = vld [vmem:[#allocation9 + $0x258] sm:$0xff] }
 0x59e   :  { %11032 = vmatpush1.bf16.msra.mxu0 %v13100_v0  ;;  %11204 = vmatpush1.bf16.msra.mxu1 %v13102_v1  ;;  %v12642_v0 = vcombine.low %v7789_v37, %v7793_v49  ;;  %v12649_v1 = vcombine.high %v7796_v60, %v7800_v61  ;;  %v7841_v37 = vld [vmem:[#allocation9 + $0x278] sm:$0xff]  ;;  %v7848_v60 = vld [vmem:[#allocation9 + $0x2b0] sm:$0xff] }
 0x59f   :  { %11033 = vmatprep.subr.bf16.mxu0 %v13109_v2  ;;  %11205 = vmatprep.subr.bf16.mxu1 %v13111_v3  ;;  %v7804_v3 = vld [vmem:[#allocation9 + $0x150] sm:$0xff]  ;;  %v7845_v61 = vld [vmem:[#allocation9 + $0x298] sm:$0xff] }
 0x5a0   :  { %v12656_v43 = vcombine.low %v7804_v3, %v7808_v6 }
 0x5a2   :  { %11034 = vmatpush1.bf16.msra.mxu0 %v13108_v41  ;;  %11206 = vmatpush1.bf16.msra.mxu1 %v13110_v35  ;;  %v12657_v35 = vcombine.high %v7804_v3, %v7808_v6  ;;  %v7856_v3 = vld [vmem:[#allocation9 + $0x2f0] sm:$0xff]  ;;  %v7853_v6 = vld [vmem:[#allocation9 + $0x2d8] sm:$0xff] }
 0x5a3   :  { %11035 = vmatprep.subr.bf16.mxu0 %v13117_v18  ;;  %11207 = vmatprep.subr.bf16.mxu1 %v13119_v19  ;;  %v12659_v18 = vcombine.high %v7805_v7, %v7809_v16  ;;  %v7812_v19 = vld [vmem:[#allocation9 + $0x190] sm:$0xff] }
 0x5a4   :  { %v12664_v56 = vcombine.low %v7812_v19, %v7816_v20 }
 0x5a6   :  { %11036 = vmatpush1.bf16.msra.mxu0 %v13116_v27  ;;  %11208 = vmatpush1.bf16.msra.mxu1 %v13118_v23  ;;  %v12658_v27 = vcombine.low %v7805_v7, %v7809_v16  ;;  %v12665_v23 = vcombine.high %v7812_v19, %v7816_v20  ;;  %v7857_v7 = vld [vmem:[#allocation9 + $0x2f8] sm:$0xff]  ;;  %v7864_v19 = vld [vmem:[#allocation9 + $0x330] sm:$0xff] }
 0x5a7   :  { %11220 = vmatprep.subr.bf16.mxu0 %v12617_v24  ;;  %11392 = vmatprep.subr.bf16.mxu1 %v12619_v26  ;;  %v12667_v24 = vcombine.high %v7813_v21, %v7817_v22  ;;  %v7820_v26 = vld [vmem:[#allocation9 + $0x1d0] sm:$0xff]  ;;  %v7861_v20 = vld [vmem:[#allocation9 + $0x318] sm:$0xff] }
 0x5a8   :  { %v12672_v40 = vcombine.low %v7820_v26, %v7824_v28 }
 0x5a9   :  { %11038 = vmatmul.mubr.bf16.vlgmr.msra.gmra.mrb[16].mxu0 %v13811_v50  ;;  %11210 = vmatmul.mubr.bf16.vlgmr.msra.gmra.mrb[16].mxu1 %v13811_v50 }
 0x5aa   :  { %11221 = vmatpush1.bf16.msra.mxu0 %v12616_v58  ;;  %11252 = vmatprep.mubr.bf16.mxu0 %v13779_v32  ;;  %v12666_v58 = vcombine.low %v7813_v21, %v7817_v22  ;;  %v7865_v21 = vld [vmem:[#allocation9 + $0x338] sm:$0xff] }
 0x5ab   :  { %11393 = vmatpush1.bf16.msra.mxu1 %v12618_v34  ;;  %11424 = vmatprep.mubr.bf16.mxu1 %v13779_v32  ;;  %v7797_v32 = vld [vmem:[#allocation9 + $0x118] sm:$0xff]  ;;  %v12673_v34 = vcombine.high %v7820_v26, %v7824_v28  ;;  %v7872_v26 = vld [vmem:[#allocation9 + $0x370] sm:$0xff] }
 0x5ac   :  { %11222 = vmatprep.subr.bf16.mxu0 %v12625_v63  ;;  %11394 = vmatprep.subr.bf16.mxu1 %v12627_v15  ;;  %v12651_v2 = vcombine.high %v7797_v32, %v7801_v62  ;;  %v12650_v41 = vcombine.low %v7797_v32, %v7801_v62  ;;  %v12675_v63 = vcombine.high %v7821_v29, %v7825_v30  ;;  %v7828_v15 = vld [vmem:[#allocation9 + $0x210] sm:$0xff]  ;;  %v7849_v32 = vld [vmem:[#allocation9 + $0x2b8] sm:$0xff] }
 0x5ad   :  { %v12680_v49 = vcombine.low %v7828_v15, %v7832_v36  ;;  %v7869_v28 = vld [vmem:[#allocation9 + $0x358] sm:$0xff] }
 0x5ae   :  { %11223 = vmatpush1.bf16.msra.mxu0 %v12624_v44  ;;  %v12674_v44 = vcombine.low %v7821_v29, %v7825_v30  ;;  %v7873_v29 = vld [vmem:[#allocation9 + $0x378] sm:$0xff] }
 0x5af   :  { %11395 = vmatpush1.bf16.msra.mxu1 %v12626_v45  ;;  %11224 = vmatprep.subr.bf16.mxu0 %v12633_v25  ;;  %v12681_v45 = vcombine.high %v7828_v15, %v7832_v36  ;;  %v12683_v25 = vcombine.high %v7829_v38, %v7833_v39  ;;  %v7880_v15 = vld [vmem:[#allocation9 + $0x3b0] sm:$0xff]  ;;  %v7877_v36 = vld [vmem:[#allocation9 + $0x398] sm:$0xff] }
 0x5b0   :  { %11396 = vmatprep.subr.bf16.mxu1 %v12635_v46  ;;  %v7836_v46 = vld [vmem:[#allocation9 + $0x250] sm:$0xff] }
 0x5b1   :  { %v12688_v62 = vcombine.low %v7836_v46, %v7840_v48 }
 0x5b2   :  { %11225 = vmatpush1.bf16.msra.mxu0 %v12632_v52  ;;  %v12682_v52 = vcombine.low %v7829_v38, %v7833_v39  ;;  %v7881_v38 = vld [vmem:[#allocation9 + $0x3b8] sm:$0xff] }
 0x5b3   :  { %11397 = vmatpush1.bf16.msra.mxu1 %v12634_v55  ;;  %11226 = vmatprep.subr.bf16.mxu0 %v12641_v57  ;;  %v12689_v55 = vcombine.high %v7836_v46, %v7840_v48  ;;  %v12691_v57 = vcombine.high %v7837_v54, %v7841_v37  ;;  %v7888_v46 = vld [vmem:[#allocation9 + $0x3f0] sm:$0xff]  ;;  %v7885_v48 = vld [vmem:[#allocation9 + $0x3d8] sm:$0xff] }
 0x5b4   :  { %11398 = vmatprep.subr.bf16.mxu1 %v12643_v59  ;;  %v7844_v59 = vld [vmem:[#allocation9 + $0x290] sm:$0xff] }
 0x5b5   :  { %v12696_v16 = vcombine.low %v7844_v59, %v7848_v60 }
 0x5b6   :  { %11227 = vmatpush1.bf16.msra.mxu0 %v12640_v4  ;;  %v12690_v4 = vcombine.low %v7837_v54, %v7841_v37  ;;  %v7889_v54 = vld [vmem:[#allocation9 + $0x3f8] sm:$0xff] }
 0x5b7   :  { %11399 = vmatpush1.bf16.msra.mxu1 %v12642_v0  ;;  %11228 = vmatprep.subr.bf16.mxu0 %v12649_v1  ;;  %v12697_v0 = vcombine.high %v7844_v59, %v7848_v60  ;;  %v12699_v1 = vcombine.high %v7845_v61, %v7849_v32  ;;  %v7896_v59 = vld [vmem:[#allocation9 + $0x430] sm:$0xff]  ;;  %v7893_v60 = vld [vmem:[#allocation9 + $0x418] sm:$0xff] }
 0x5b8   :  { %11400 = vmatprep.subr.bf16.mxu1 %v12651_v2  ;;  %v7852_v2 = vld [vmem:[#allocation9 + $0x2d0] sm:$0xff] }
 0x5b9   :  { %v12704_v22 = vcombine.low %v7852_v2, %v7856_v3 }
 0x5ba   :  { %11229 = vmatpush1.bf16.msra.mxu0 %v12648_v17  ;;  %v12698_v17 = vcombine.low %v7845_v61, %v7849_v32  ;;  %v7897_v61 = vld [vmem:[#allocation9 + $0x438] sm:$0xff] }
 0x5bb   :  { %11401 = vmatpush1.bf16.msra.mxu1 %v12650_v41  ;;  %11230 = vmatprep.subr.bf16.mxu0 %v12657_v35  ;;  %v12705_v41 = vcombine.high %v7852_v2, %v7856_v3  ;;  %v12707_v35 = vcombine.high %v7853_v6, %v7857_v7  ;;  %v7904_v2 = vld [vmem:[#allocation9 + $0x470] sm:$0xff] }
 0x5bc   :  { %11402 = vmatprep.subr.bf16.mxu1 %v12659_v18  ;;  %v7860_v18 = vld [vmem:[#allocation9 + $0x310] sm:$0xff] }
 0x5bd   :  { %v12712_v30 = vcombine.low %v7860_v18, %v7864_v19 }
 0x5be   :  { %11231 = vmatpush1.bf16.msra.mxu0 %v12656_v43  ;;  %v12706_v43 = vcombine.low %v7853_v6, %v7857_v7  ;;  %v7901_v6 = vld [vmem:[#allocation9 + $0x458] sm:$0xff] }
 0x5bf   :  { %11403 = vmatpush1.bf16.msra.mxu1 %v12658_v27  ;;  %11232 = vmatprep.subr.bf16.mxu0 %v12665_v23  ;;  %v12713_v27 = vcombine.high %v7860_v18, %v7864_v19  ;;  %v12715_v23 = vcombine.high %v7861_v20, %v7865_v21  ;;  %v7905_v7 = vld [vmem:[#allocation9 + $0x478] sm:$0xff] }
 0x5c0   :  { %11404 = vmatprep.subr.bf16.mxu1 %v12667_v24  ;;  %v7868_v24 = vld [vmem:[#allocation9 + $0x350] sm:$0xff]  ;;  %v12755_v18 = vcombine.high %v7901_v6, %v7905_v7  ;;  %v7909_v19 = vld [vmem:[#allocation9 + $0x498] sm:$0xff] }
 0x5c1   :  { %v12720_v39 = vcombine.low %v7868_v24, %v7872_v26 }
 0x5c2   :  { %11233 = vmatpush1.bf16.msra.mxu0 %v12664_v56  ;;  %v12714_v56 = vcombine.low %v7861_v20, %v7865_v21  ;;  %v7913_v20 = vld [vmem:[#allocation9 + $0x4b8] sm:$0xff] }
 0x5c3   :  { %11405 = vmatpush1.bf16.msra.mxu1 %v12666_v58  ;;  %11234 = vmatprep.subr.bf16.mxu0 %v12673_v34  ;;  %v12721_v58 = vcombine.high %v7868_v24, %v7872_v26  ;;  %v12723_v34 = vcombine.high %v7869_v28, %v7873_v29  ;;  %v7920_v24 = vld [vmem:[#allocation9 + $0x4f0] sm:$0xff]  ;;  %v7917_v26 = vld [vmem:[#allocation9 + $0x4d8] sm:$0xff] }
 0x5c4   :  { %11406 = vmatprep.subr.bf16.mxu1 %v12675_v63  ;;  %v7876_v63 = vld [vmem:[#allocation9 + $0x390] sm:$0xff] }
 0x5c5   :  { %v12728_v37 = vcombine.low %v7876_v63, %v7880_v15 }
 0x5c6   :  { %11235 = vmatpush1.bf16.msra.mxu0 %v12672_v40  ;;  %v12722_v40 = vcombine.low %v7869_v28, %v7873_v29  ;;  %v7921_v28 = vld [vmem:[#allocation9 + $0x4f8] sm:$0xff] }
 0x5c7   :  { %11407 = vmatpush1.bf16.msra.mxu1 %v12674_v44  ;;  %11236 = vmatprep.subr.bf16.mxu0 %v12681_v45  ;;  %v12729_v44 = vcombine.high %v7876_v63, %v7880_v15  ;;  %v12731_v45 = vcombine.high %v7877_v36, %v7881_v38  ;;  %v7925_v63 = vld [vmem:[#allocation9 + $0x518] sm:$0xff] }
 0x5c8   :  { %11408 = vmatprep.subr.bf16.mxu1 %v12683_v25  ;;  %v7884_v25 = vld [vmem:[#allocation9 + $0x3d0] sm:$0xff]  ;;  %v7929_v15 = vld [vmem:[#allocation9 + $0x538] sm:$0xff] }
 0x5c9   :  { %v12736_v32 = vcombine.low %v7884_v25, %v7888_v46 }
 0x5ca   :  { %11237 = vmatpush1.bf16.msra.mxu0 %v12680_v49  ;;  %v12730_v49 = vcombine.low %v7877_v36, %v7881_v38  ;;  %v12770_v36 = vcombine.low %v7917_v26, %v7921_v28 }
 0x5cb   :  { %11409 = vmatpush1.bf16.msra.mxu1 %v12682_v52  ;;  %11238 = vmatprep.subr.bf16.mxu0 %v12689_v55  ;;  %v12737_v52 = vcombine.high %v7884_v25, %v7888_v46  ;;  %v12739_v55 = vcombine.high %v7885_v48, %v7889_v54  ;;  %v7937_v25 = vld [vmem:[#allocation9 + $0x578] sm:$0xff] }
 0x5cc   :  { %11410 = vmatprep.subr.bf16.mxu1 %v12691_v57  ;;  %v7892_v57 = vld [vmem:[#allocation9 + $0x410] sm:$0xff] }
 0x5cd   :  { %v12744_v3 = vcombine.low %v7892_v57, %v7896_v59 }
 0x5ce   :  { %11239 = vmatpush1.bf16.msra.mxu0 %v12688_v62  ;;  %v12738_v62 = vcombine.low %v7885_v48, %v7889_v54  ;;  %v12778_v48 = vcombine.low %v7925_v63, %v7929_v15 }
 0x5cf   :  { %11411 = vmatpush1.bf16.msra.mxu1 %v12690_v4  ;;  %11240 = vmatprep.subr.bf16.mxu0 %v12697_v0  ;;  %v12745_v4 = vcombine.high %v7892_v57, %v7896_v59  ;;  %v12747_v0 = vcombine.high %v7893_v60, %v7897_v61  ;;  %v7945_v57 = vld [vmem:[#allocation9 + $0x5b8] sm:$0xff] }
 0x5d0   :  { %11412 = vmatprep.subr.bf16.mxu1 %v12699_v1  ;;  %v7900_v1 = vld [vmem:[#allocation9 + $0x450] sm:$0xff] }
 0x5d1   :  { %v12752_v21 = vcombine.low %v7900_v1, %v7904_v2 }
 0x5d2   :  { %11241 = vmatpush1.bf16.msra.mxu0 %v12696_v16  ;;  %v12746_v16 = vcombine.low %v7893_v60, %v7897_v61 }
 0x5d3   :  { %11413 = vmatpush1.bf16.msra.mxu1 %v12698_v17  ;;  %11242 = vmatprep.subr.bf16.mxu0 %v12705_v41  ;;  %v12753_v17 = vcombine.high %v7900_v1, %v7904_v2  ;;  %v7908_v41 = vld [vmem:[#allocation9 + $0x490] sm:$0xff]  ;;  %v7953_v1 = vld [vmem:[#allocation9 + $0x5f8] sm:$0xff] }
 0x5d4   :  { %11414 = vmatprep.subr.bf16.mxu1 %v12707_v35  ;;  %v7912_v35 = vld [vmem:[#allocation9 + $0x4b0] sm:$0xff] }
 0x5d5   :  { %v12760_v29 = vcombine.low %v7908_v41, %v7912_v35 }
 0x5d6   :  { %11243 = vmatpush1.bf16.msra.mxu0 %v12704_v22  ;;  %v12754_v22 = vcombine.low %v7901_v6, %v7905_v7 }
 0x5d7   :  { %11415 = vmatpush1.bf16.msra.mxu1 %v12706_v43  ;;  %11244 = vmatprep.subr.bf16.mxu0 %v12713_v27  ;;  %v12761_v43 = vcombine.high %v7908_v41, %v7912_v35  ;;  %v12763_v27 = vcombine.high %v7909_v19, %v7913_v20  ;;  %v7957_v41 = vld [vmem:[#allocation9 + $0x618] sm:$0xff] }
 0x5d8   :  { %11416 = vmatprep.subr.bf16.mxu1 %v12715_v23  ;;  %v7916_v23 = vld [vmem:[#allocation9 + $0x4d0] sm:$0xff]  ;;  %v7961_v35 = vld [vmem:[#allocation9 + $0x638] sm:$0xff] }
 0x5da   :  { %11245 = vmatpush1.bf16.msra.mxu0 %v12712_v30  ;;  %v12769_v30 = vcombine.high %v7916_v23, %v7920_v24 }
 0x5db   :  { %11417 = vmatpush1.bf16.msra.mxu1 %v12714_v56  ;;  %11246 = vmatprep.subr.bf16.mxu0 %v12721_v58  ;;  %v12771_v56 = vcombine.high %v7917_v26, %v7921_v28  ;;  %v7924_v58 = vld [vmem:[#allocation9 + $0x510] sm:$0xff]  ;;  %v12810_v26 = vcombine.low %v7957_v41, %v7961_v35 }
 0x5dc   :  { %11418 = vmatprep.subr.bf16.mxu1 %v12723_v34  ;;  %v7928_v34 = vld [vmem:[#allocation9 + $0x530] sm:$0xff] }
 0x5dd   :  { %v12777_v38 = vcombine.high %v7924_v58, %v7928_v34  ;;  %v12776_v46 = vcombine.low %v7924_v58, %v7928_v34  ;;  %v7977_v58 = vld [vmem:[#allocation9 + $0x6b8] sm:$0xff] }
 0x5de   :  { %11247 = vmatpush1.bf16.msra.mxu0 %v12720_v39  ;;  %v12779_v39 = vcombine.high %v7925_v63, %v7929_v15 }
 0x5df   :  { %11419 = vmatpush1.bf16.msra.mxu1 %v12722_v40  ;;  %11248 = vmatprep.subr.bf16.mxu0 %v12729_v44  ;;  %v7932_v40 = vld [vmem:[#allocation9 + $0x550] sm:$0xff] }
 0x5e0   :  { %11420 = vmatprep.subr.bf16.mxu1 %v12731_v45  ;;  %v7936_v44 = vld [vmem:[#allocation9 + $0x570] sm:$0xff]  ;;  %v7933_v45 = vld [vmem:[#allocation9 + $0x558] sm:$0xff] }
 0x5e1   :  { %v12785_v54 = vcombine.high %v7932_v40, %v7936_v44  ;;  %v12784_v59 = vcombine.low %v7932_v40, %v7936_v44  ;;  %v12786_v60 = vcombine.low %v7933_v45, %v7937_v25  ;;  %v7985_v40 = vld [vmem:[#allocation9 + $0x6f8] sm:$0xff] }
 0x5e2   :  { %11249 = vmatpush1.bf16.msra.mxu0 %v12728_v37  ;;  %v12787_v37 = vcombine.high %v7933_v45, %v7937_v25 }
 0x5e3   :  { %11421 = vmatpush1.bf16.msra.mxu1 %v12730_v49  ;;  %11250 = vmatprep.subr.bf16.mxu0 %v12737_v52  ;;  %v7940_v49 = vld [vmem:[#allocation9 + $0x590] sm:$0xff] }
 0x5e4   :  { %11422 = vmatprep.subr.bf16.mxu1 %v12739_v55  ;;  %v7944_v52 = vld [vmem:[#allocation9 + $0x5b0] sm:$0xff]  ;;  %v7941_v55 = vld [vmem:[#allocation9 + $0x598] sm:$0xff] }
 0x5e5   :  { %v12793_v61 = vcombine.high %v7940_v49, %v7944_v52  ;;  %v12792_v2 = vcombine.low %v7940_v49, %v7944_v52  ;;  %v7993_v49 = vld [vmem:[#allocation9 + $0x738] sm:$0xff] }
 0x5e6   :  { %11251 = vmatpush1.bf16.msra.mxu0 %v12736_v32  ;;  %v12795_v32 = vcombine.high %v7941_v55, %v7945_v57 }
 0x5e7   :  { %11423 = vmatpush1.bf16.msra.mxu1 %v12738_v62  ;;  %11263 = vmatprep.subr.bf16.mxu0 %v12745_v4  ;;  %v7948_v62 = vld [vmem:[#allocation9 + $0x5d0] sm:$0xff] }
 0x5e8   :  { %11435 = vmatprep.subr.bf16.mxu1 %v12747_v0  ;;  %v7952_v4 = vld [vmem:[#allocation9 + $0x5f0] sm:$0xff]  ;;  %v7949_v0 = vld [vmem:[#allocation9 + $0x5d8] sm:$0xff] }
 0x5e9   :  { %11253 = vmatmul.mubr.bf16.vlgmr.msra.gmra.mrb[20].mxu0 %v13775_v31  ;;  %v12801_v6 = vcombine.high %v7948_v62, %v7952_v4  ;;  %v12803_v7 = vcombine.high %v7949_v0, %v7953_v1 }
 0x5ea   :  { %11425 = vmatmul.mubr.bf16.vlgmr.msra.gmra.mrb[20].mxu1 %v13775_v31  ;;  %11264 = vmatpush1.bf16.msra.mxu0 %v12744_v3  ;;  %v12762_v31 = vcombine.low %v7909_v19, %v7913_v20  ;;  %v12794_v3 = vcombine.low %v7941_v55, %v7945_v57  ;;  %v12802_v19 = vcombine.low %v7949_v0, %v7953_v1 }
 0x5eb   :  { %11295 = vmatprep.mubr.bf16.mxu0 %v13781_v33  ;;  %11436 = vmatpush1.bf16.msra.mxu1 %v12746_v16  ;;  %v7956_v16 = vld [vmem:[#allocation9 + $0x610] sm:$0xff] }
 0x5ec   :  { %11467 = vmatprep.mubr.bf16.mxu1 %v13781_v33  ;;  %11265 = vmatprep.subr.bf16.mxu0 %v12753_v17  ;;  %v12768_v33 = vcombine.low %v7916_v23, %v7920_v24  ;;  %v7960_v17 = vld [vmem:[#allocation9 + $0x630] sm:$0xff]  ;;  %v7969_v23 = vld [vmem:[#allocation9 + $0x678] sm:$0xff] }
 0x5ed   :  { %11437 = vmatprep.subr.bf16.mxu1 %v12755_v18  ;;  %v12800_v18 = vcombine.low %v7948_v62, %v7952_v4  ;;  %v12809_v20 = vcombine.high %v7956_v16, %v7960_v17  ;;  %v12808_v24 = vcombine.low %v7956_v16, %v7960_v17  ;;  %v8001_v62 = vld [vmem:[#allocation9 + $0x778] sm:$0xff] }
 0x5ee   :  { %11266 = vmatpush1.bf16.msra.mxu0 %v12752_v21  ;;  %v12811_v21 = vcombine.high %v7957_v41, %v7961_v35  ;;  %v8009_v16 = vld [vmem:[#allocation9 + $0x7b8] sm:$0xff] }
 0x5ef   :  { %11438 = vmatpush1.bf16.msra.mxu1 %v12754_v22  ;;  %11267 = vmatprep.subr.bf16.mxu0 %v12761_v43  ;;  %v7964_v22 = vld [vmem:[#allocation9 + $0x650] sm:$0xff] }
 0x5f0   :  { %11439 = vmatprep.subr.bf16.mxu1 %v12763_v27  ;;  %v7968_v43 = vld [vmem:[#allocation9 + $0x670] sm:$0xff]  ;;  %v7965_v27 = vld [vmem:[#allocation9 + $0x658] sm:$0xff] }
 0x5f1   :  { %v12817_v28 = vcombine.high %v7964_v22, %v7968_v43  ;;  %v12816_v34 = vcombine.low %v7964_v22, %v7968_v43  ;;  %v12818_v63 = vcombine.low %v7965_v27, %v7969_v23  ;;  %v8017_v22 = vld [vmem:[#allocation9 + $0x7f8] sm:$0xff] }
 0x5f2   :  { %11268 = vmatpush1.bf16.msra.mxu0 %v12760_v29  ;;  %v12819_v29 = vcombine.high %v7965_v27, %v7969_v23 }
 0x5f3   :  { %11440 = vmatpush1.bf16.msra.mxu1 %v12762_v31  ;;  %11269 = vmatprep.subr.bf16.mxu0 %v12769_v30  ;;  %v7972_v31 = vld [vmem:[#allocation9 + $0x690] sm:$0xff] }
 0x5f4   :  { %11441 = vmatprep.subr.bf16.mxu1 %v12771_v56  ;;  %v7976_v30 = vld [vmem:[#allocation9 + $0x6b0] sm:$0xff]  ;;  %v7973_v56 = vld [vmem:[#allocation9 + $0x698] sm:$0xff] }
 0x5f5   :  { %v12825_v15 = vcombine.high %v7972_v31, %v7976_v30  ;;  %v12824_v44 = vcombine.low %v7972_v31, %v7976_v30  ;;  %v12826_v45 = vcombine.low %v7973_v56, %v7977_v58  ;;  %v8025_v31 = vld [vmem:[#allocation9 + $0x838] sm:$0xff] }
 0x5f6   :  { %11270 = vmatpush1.bf16.msra.mxu0 %v12768_v33  ;;  %v12827_v33 = vcombine.high %v7973_v56, %v7977_v58 }
 0x5f7   :  { %11442 = vmatpush1.bf16.msra.mxu1 %v12770_v36  ;;  %11271 = vmatprep.subr.bf16.mxu0 %v12777_v38  ;;  %v7980_v36 = vld [vmem:[#allocation9 + $0x6d0] sm:$0xff] }
 0x5f8   :  { %11443 = vmatprep.subr.bf16.mxu1 %v12779_v39  ;;  %v7984_v38 = vld [vmem:[#allocation9 + $0x6f0] sm:$0xff]  ;;  %v7981_v39 = vld [vmem:[#allocation9 + $0x6d8] sm:$0xff] }
 0x5f9   :  { %v12833_v25 = vcombine.high %v7980_v36, %v7984_v38  ;;  %v12832_v52 = vcombine.low %v7980_v36, %v7984_v38  ;;  %v12834_v55 = vcombine.low %v7981_v39, %v7985_v40  ;;  %v8029_v36 = vld [vmem:[#allocation9 + $0x858] sm:$0xff] }
 0x5fa   :  { %11272 = vmatpush1.bf16.msra.mxu0 %v12776_v46  ;;  %v12835_v46 = vcombine.high %v7981_v39, %v7985_v40  ;;  %v8033_v38 = vld [vmem:[#allocation9 + $0x878] sm:$0xff] }
 0x5fb   :  { %11444 = vmatpush1.bf16.msra.mxu1 %v12778_v48  ;;  %11273 = vmatprep.subr.bf16.mxu0 %v12785_v54  ;;  %v7988_v48 = vld [vmem:[#allocation9 + $0x710] sm:$0xff] }
 0x5fc   :  { %11445 = vmatprep.subr.bf16.mxu1 %v12787_v37  ;;  %v7992_v54 = vld [vmem:[#allocation9 + $0x730] sm:$0xff]  ;;  %v7989_v37 = vld [vmem:[#allocation9 + $0x718] sm:$0xff] }
 0x5fd   :  { %v12841_v57 = vcombine.high %v7988_v48, %v7992_v54  ;;  %v12840_v4 = vcombine.low %v7988_v48, %v7992_v54  ;;  %v12842_v0 = vcombine.low %v7989_v37, %v7993_v49  ;;  %v8041_v48 = vld [vmem:[#allocation9 + $0x8b8] sm:$0xff] }
 0x5fe   :  { %11274 = vmatpush1.bf16.msra.mxu0 %v12784_v59  ;;  %v12843_v59 = vcombine.high %v7989_v37, %v7993_v49  ;;  %v12882_v37 = vcombine.low %v8029_v36, %v8033_v38 }
 0x5ff   :  { %11446 = vmatpush1.bf16.msra.mxu1 %v12786_v60  ;;  %11275 = vmatprep.subr.bf16.mxu0 %v12793_v61  ;;  %v7996_v60 = vld [vmem:[#allocation9 + $0x750] sm:$0xff] }
 0x600   :  { %11447 = vmatprep.subr.bf16.mxu1 %v12795_v32  ;;  %v8000_v61 = vld [vmem:[#allocation9 + $0x770] sm:$0xff]  ;;  %v7997_v32 = vld [vmem:[#allocation9 + $0x758] sm:$0xff] }
 0x601   :  { %v12849_v1 = vcombine.high %v7996_v60, %v8000_v61  ;;  %v12848_v17 = vcombine.low %v7996_v60, %v8000_v61  ;;  %v12850_v41 = vcombine.low %v7997_v32, %v8001_v62  ;;  %v8049_v60 = vld [vmem:[#allocation9 + $0x8f8] sm:$0xff] }
 0x602   :  { %11276 = vmatpush1.bf16.msra.mxu0 %v12792_v2  ;;  %v12851_v2 = vcombine.high %v7997_v32, %v8001_v62 }
 0x603   :  { %11448 = vmatpush1.bf16.msra.mxu1 %v12794_v3  ;;  %11277 = vmatprep.subr.bf16.mxu0 %v12801_v6  ;;  %v8004_v3 = vld [vmem:[#allocation9 + $0x790] sm:$0xff] }
 0x604   :  { %11449 = vmatprep.subr.bf16.mxu1 %v12803_v7  ;;  %v8008_v6 = vld [vmem:[#allocation9 + $0x7b0] sm:$0xff]  ;;  %v8005_v7 = vld [vmem:[#allocation9 + $0x798] sm:$0xff] }
 0x605   :  { %v12857_v35 = vcombine.high %v8004_v3, %v8008_v6  ;;  %v12856_v43 = vcombine.low %v8004_v3, %v8008_v6  ;;  %v12858_v27 = vcombine.low %v8005_v7, %v8009_v16 }
 0x606   :  { %11278 = vmatpush1.bf16.msra.mxu0 %v12800_v18  ;;  %v12859_v18 = vcombine.high %v8005_v7, %v8009_v16  ;;  %v8060_v16 = vld [vmem:[#allocation9 + $0x950] sm:$0xff] }
 0x607   :  { %11450 = vmatpush1.bf16.msra.mxu1 %v12802_v19  ;;  %11279 = vmatprep.subr.bf16.mxu0 %v12809_v20  ;;  %v8012_v19 = vld [vmem:[#allocation9 + $0x7d0] sm:$0xff] }
 0x608   :  { %11451 = vmatprep.subr.bf16.mxu1 %v12811_v21  ;;  %v8016_v20 = vld [vmem:[#allocation9 + $0x7f0] sm:$0xff]  ;;  %v8013_v21 = vld [vmem:[#allocation9 + $0x7d8] sm:$0xff] }
 0x609   :  { %v12865_v23 = vcombine.high %v8012_v19, %v8016_v20  ;;  %v12864_v30 = vcombine.low %v8012_v19, %v8016_v20  ;;  %v12866_v56 = vcombine.low %v8013_v21, %v8017_v22 }
 0x60a   :  { %11280 = vmatpush1.bf16.msra.mxu0 %v12808_v24  ;;  %v12867_v24 = vcombine.high %v8013_v21, %v8017_v22  ;;  %v8068_v22 = vld [vmem:[#allocation9 + $0x990] sm:$0xff] }
 0x60b   :  { %11452 = vmatpush1.bf16.msra.mxu1 %v12810_v26  ;;  %11281 = vmatprep.subr.bf16.mxu0 %v12817_v28  ;;  %v8020_v26 = vld [vmem:[#allocation9 + $0x810] sm:$0xff] }
 0x60c   :  { %11453 = vmatprep.subr.bf16.mxu1 %v12819_v29  ;;  %v8024_v28 = vld [vmem:[#allocation9 + $0x830] sm:$0xff]  ;;  %v8021_v29 = vld [vmem:[#allocation9 + $0x818] sm:$0xff] }
 0x60d   :  { %v12873_v58 = vcombine.high %v8020_v26, %v8024_v28  ;;  %v12874_v39 = vcombine.low %v8021_v29, %v8025_v31 }
 0x60e   :  { %11282 = vmatpush1.bf16.msra.mxu0 %v12816_v34  ;;  %v12875_v34 = vcombine.high %v8021_v29, %v8025_v31  ;;  %v8076_v31 = vld [vmem:[#allocation9 + $0x9d0] sm:$0xff] }
 0x60f   :  { %11454 = vmatpush1.bf16.msra.mxu1 %v12818_v63  ;;  %11283 = vmatprep.subr.bf16.mxu0 %v12825_v15  ;;  %v8028_v63 = vld [vmem:[#allocation9 + $0x850] sm:$0xff] }
 0x610   :  { %11455 = vmatprep.subr.bf16.mxu1 %v12827_v33  ;;  %v8032_v15 = vld [vmem:[#allocation9 + $0x870] sm:$0xff]  ;;  %v12872_v33 = vcombine.low %v8020_v26, %v8024_v28 }
 0x611   :  { %v12881_v40 = vcombine.high %v8028_v63, %v8032_v15  ;;  %v12880_v54 = vcombine.low %v8028_v63, %v8032_v15 }
 0x612   :  { %11284 = vmatpush1.bf16.msra.mxu0 %v12824_v44  ;;  %v8036_v44 = vld [vmem:[#allocation9 + $0x890] sm:$0xff] }
 0x613   :  { %11456 = vmatpush1.bf16.msra.mxu1 %v12826_v45  ;;  %11285 = vmatprep.subr.bf16.mxu0 %v12833_v25  ;;  %v8040_v45 = vld [vmem:[#allocation9 + $0x8b0] sm:$0xff]  ;;  %v12883_v25 = vcombine.high %v8029_v36, %v8033_v38 }
 0x614   :  { %11457 = vmatprep.subr.bf16.mxu1 %v12835_v46  ;;  %v8037_v46 = vld [vmem:[#allocation9 + $0x898] sm:$0xff]  ;;  %v12889_v49 = vcombine.high %v8036_v44, %v8040_v45  ;;  %v12888_v61 = vcombine.low %v8036_v44, %v8040_v45  ;;  %v8084_v36 = vld [vmem:[#allocation9 + $0xa10] sm:$0xff] }
 0x615   :  { %v8088_v38 = vld [vmem:[#allocation9 + $0xa30] sm:$0xff] }
 0x616   :  { %11286 = vmatpush1.bf16.msra.mxu0 %v12832_v52  ;;  %v12891_v52 = vcombine.high %v8037_v46, %v8041_v48 }
 0x617   :  { %11458 = vmatpush1.bf16.msra.mxu1 %v12834_v55  ;;  %11287 = vmatprep.subr.bf16.mxu0 %v12841_v57  ;;  %v8044_v55 = vld [vmem:[#allocation9 + $0x8d0] sm:$0xff] }
 0x618   :  { %11459 = vmatprep.subr.bf16.mxu1 %v12843_v59  ;;  %v8048_v57 = vld [vmem:[#allocation9 + $0x8f0] sm:$0xff]  ;;  %v8045_v59 = vld [vmem:[#allocation9 + $0x8d8] sm:$0xff] }
 0x619   :  { %v12897_v32 = vcombine.high %v8044_v55, %v8048_v57  ;;  %v12899_v62 = vcombine.high %v8045_v59, %v8049_v60  ;;  %v12898_v3 = vcombine.low %v8045_v59, %v8049_v60  ;;  %v8100_v60 = vld [vmem:[#allocation9 + $0xa90] sm:$0xff] }
 0x61a   :  { %11288 = vmatpush1.bf16.msra.mxu0 %v12840_v4  ;;  %v8052_v4 = vld [vmem:[#allocation9 + $0x910] sm:$0xff] }
 0x61b   :  { %11460 = vmatpush1.bf16.msra.mxu1 %v12842_v0  ;;  %11289 = vmatprep.subr.bf16.mxu0 %v12849_v1  ;;  %v8056_v0 = vld [vmem:[#allocation9 + $0x930] sm:$0xff]  ;;  %v8053_v1 = vld [vmem:[#allocation9 + $0x918] sm:$0xff] }
 0x61c   :  { %11461 = vmatprep.subr.bf16.mxu1 %v12851_v2  ;;  %v8057_v2 = vld [vmem:[#allocation9 + $0x938] sm:$0xff]  ;;  %v12905_v6 = vcombine.high %v8052_v4, %v8056_v0 }
 0x61d   :  { %v12907_v7 = vcombine.high %v8053_v1, %v8057_v2  ;;  %v12906_v19 = vcombine.low %v8053_v1, %v8057_v2  ;;  %v8108_v2 = vld [vmem:[#allocation9 + $0xad0] sm:$0xff] }
 0x61e   :  { %11290 = vmatpush1.bf16.msra.mxu0 %v12848_v17  ;;  %v8064_v17 = vld [vmem:[#allocation9 + $0x970] sm:$0xff] }
 0x61f   :  { %11462 = vmatpush1.bf16.msra.mxu1 %v12850_v41  ;;  %11291 = vmatprep.subr.bf16.mxu0 %v12857_v35  ;;  %v8061_v41 = vld [vmem:[#allocation9 + $0x958] sm:$0xff]  ;;  %v12913_v20 = vcombine.high %v8060_v16, %v8064_v17 }
 0x620   :  { %11463 = vmatprep.subr.bf16.mxu1 %v12859_v18  ;;  %v8065_v35 = vld [vmem:[#allocation9 + $0x978] sm:$0xff]  ;;  %v12904_v18 = vcombine.low %v8052_v4, %v8056_v0 }
 0x621   :  { %v12915_v21 = vcombine.high %v8061_v41, %v8065_v35  ;;  %v12914_v26 = vcombine.low %v8061_v41, %v8065_v35  ;;  %v8116_v35 = vld [vmem:[#allocation9 + $0xb10] sm:$0xff] }
 0x622   :  { %11292 = vmatpush1.bf16.msra.mxu0 %v12856_v43  ;;  %v8072_v43 = vld [vmem:[#allocation9 + $0x9b0] sm:$0xff] }
 0x623   :  { %11464 = vmatpush1.bf16.msra.mxu1 %v12858_v27  ;;  %11293 = vmatprep.subr.bf16.mxu0 %v12865_v23  ;;  %v8069_v27 = vld [vmem:[#allocation9 + $0x998] sm:$0xff]  ;;  %v12921_v28 = vcombine.high %v8068_v22, %v8072_v43 }
 0x624   :  { %11465 = vmatprep.subr.bf16.mxu1 %v12867_v24  ;;  %v8073_v23 = vld [vmem:[#allocation9 + $0x9b8] sm:$0xff]  ;;  %v12912_v24 = vcombine.low %v8060_v16, %v8064_v17 }
 0x625   :  { %v12923_v29 = vcombine.high %v8069_v27, %v8073_v23  ;;  %v12922_v63 = vcombine.low %v8069_v27, %v8073_v23  ;;  %v8124_v23 = vld [vmem:[#allocation9 + $0xb50] sm:$0xff] }
 0x626   :  { %11294 = vmatpush1.bf16.msra.mxu0 %v12864_v30  ;;  %v8080_v30 = vld [vmem:[#allocation9 + $0x9f0] sm:$0xff] }
 0x627   :  { %11466 = vmatpush1.bf16.msra.mxu1 %v12866_v56  ;;  %11306 = vmatprep.subr.bf16.mxu0 %v12873_v58  ;;  %v8077_v56 = vld [vmem:[#allocation9 + $0x9d8] sm:$0xff]  ;;  %v12929_v15 = vcombine.high %v8076_v31, %v8080_v30  ;;  %v12928_v44 = vcombine.low %v8076_v31, %v8080_v30 }
 0x628   :  { %11478 = vmatprep.subr.bf16.mxu1 %v12875_v34  ;;  %v8081_v58 = vld [vmem:[#allocation9 + $0x9f8] sm:$0xff]  ;;  %v12920_v34 = vcombine.low %v8068_v22, %v8072_v43 }
 0x629   :  { %11296 = vmatmul.mubr.bf16.vlgmr.msra.gmra.mrb[20].mxu0 %v13777_v53  ;;  %v12930_v45 = vcombine.low %v8077_v56, %v8081_v58 }
 0x62a   :  { %11468 = vmatmul.mubr.bf16.vlgmr.msra.gmra.mrb[20].mxu1 %v13777_v53  ;;  %11307 = vmatpush1.bf16.msra.mxu0 %v12872_v33  ;;  %v12890_v53 = vcombine.low %v8037_v46, %v8041_v48  ;;  %v12931_v33 = vcombine.high %v8077_v56, %v8081_v58  ;;  %v8092_v48 = vld [vmem:[#allocation9 + $0xa50] sm:$0xff] }
 0x62b   :  { %11338 = vmatprep.mubr.bf16.mxu0 %v13813_v51  ;;  %11479 = vmatpush1.bf16.msra.mxu1 %v12874_v39  ;;  %v8085_v39 = vld [vmem:[#allocation9 + $0xa18] sm:$0xff]  ;;  %v8132_v58 = vld [vmem:[#allocation9 + $0xb90] sm:$0xff] }
 0x62c   :  { %11510 = vmatprep.mubr.bf16.mxu1 %v13813_v51  ;;  %11308 = vmatprep.subr.bf16.mxu0 %v12881_v40  ;;  %v12896_v51 = vcombine.low %v8044_v55, %v8048_v57  ;;  %v8089_v40 = vld [vmem:[#allocation9 + $0xa38] sm:$0xff] }
 0x62d   :  { %11480 = vmatprep.subr.bf16.mxu1 %v12883_v25  ;;  %v12937_v25 = vcombine.high %v8084_v36, %v8088_v38  ;;  %v12939_v46 = vcombine.high %v8085_v39, %v8089_v40  ;;  %v12938_v55 = vcombine.low %v8085_v39, %v8089_v40  ;;  %v8140_v40 = vld [vmem:[#allocation9 + $0xbd0] sm:$0xff] }
 0x62e   :  { %11309 = vmatpush1.bf16.msra.mxu0 %v12880_v54  ;;  %v8096_v54 = vld [vmem:[#allocation9 + $0xa70] sm:$0xff] }
 0x62f   :  { %11481 = vmatpush1.bf16.msra.mxu1 %v12882_v37  ;;  %11310 = vmatprep.subr.bf16.mxu0 %v12889_v49  ;;  %v8093_v37 = vld [vmem:[#allocation9 + $0xa58] sm:$0xff]  ;;  %v12945_v57 = vcombine.high %v8092_v48, %v8096_v54 }
 0x630   :  { %11482 = vmatprep.subr.bf16.mxu1 %v12891_v52  ;;  %v8097_v49 = vld [vmem:[#allocation9 + $0xa78] sm:$0xff]  ;;  %v12936_v52 = vcombine.low %v8084_v36, %v8088_v38 }
 0x631   :  { %v12947_v59 = vcombine.high %v8093_v37, %v8097_v49  ;;  %v12946_v4 = vcombine.low %v8093_v37, %v8097_v49  ;;  %v8148_v49 = vld [vmem:[#allocation9 + $0xc10] sm:$0xff] }
 0x632   :  { %11311 = vmatpush1.bf16.msra.mxu0 %v12888_v61  ;;  %v8104_v61 = vld [vmem:[#allocation9 + $0xab0] sm:$0xff] }
 0x633   :  { %11483 = vmatpush1.bf16.msra.mxu1 %v12890_v53  ;;  %11312 = vmatprep.subr.bf16.mxu0 %v12897_v32  ;;  %v8101_v53 = vld [vmem:[#allocation9 + $0xa98] sm:$0xff]  ;;  %v12953_v0 = vcombine.high %v8100_v60, %v8104_v61 }
 0x634   :  { %11484 = vmatprep.subr.bf16.mxu1 %v12899_v62  ;;  %v8105_v32 = vld [vmem:[#allocation9 + $0xab8] sm:$0xff]  ;;  %v12944_v62 = vcombine.low %v8092_v48, %v8096_v54 }
 0x635   :  { %v12955_v1 = vcombine.high %v8101_v53, %v8105_v32  ;;  %v12954_v16 = vcombine.low %v8101_v53, %v8105_v32  ;;  %v8156_v32 = vld [vmem:[#allocation9 + $0xc50] sm:$0xff] }
 0x636   :  { %11313 = vmatpush1.bf16.msra.mxu0 %v12896_v51  ;;  %v8112_v51 = vld [vmem:[#allocation9 + $0xaf0] sm:$0xff] }
 0x637   :  { %11485 = vmatpush1.bf16.msra.mxu1 %v12898_v3  ;;  %11314 = vmatprep.subr.bf16.mxu0 %v12905_v6  ;;  %v8109_v3 = vld [vmem:[#allocation9 + $0xad8] sm:$0xff]  ;;  %v12961_v17 = vcombine.high %v8108_v2, %v8112_v51 }
 0x638   :  { %11486 = vmatprep.subr.bf16.mxu1 %v12907_v7  ;;  %v8113_v6 = vld [vmem:[#allocation9 + $0xaf8] sm:$0xff]  ;;  %v12952_v7 = vcombine.low %v8100_v60, %v8104_v61 }
 0x639   :  { %v12963_v41 = vcombine.high %v8109_v3, %v8113_v6  ;;  %v12962_v22 = vcombine.low %v8109_v3, %v8113_v6  ;;  %v8164_v3 = vld [vmem:[#allocation9 + $0xc90] sm:$0xff] }
 0x63a   :  { %11315 = vmatpush1.bf16.msra.mxu0 %v12904_v18  ;;  %v8120_v18 = vld [vmem:[#allocation9 + $0xb30] sm:$0xff] }
 0x63b   :  { %11487 = vmatpush1.bf16.msra.mxu1 %v12906_v19  ;;  %11316 = vmatprep.subr.bf16.mxu0 %v12913_v20  ;;  %v8117_v19 = vld [vmem:[#allocation9 + $0xb18] sm:$0xff]  ;;  %v12969_v43 = vcombine.high %v8116_v35, %v8120_v18  ;;  %v8168_v6 = vld [vmem:[#allocation9 + $0xcb0] sm:$0xff] }
 0x63c   :  { %11488 = vmatprep.subr.bf16.mxu1 %v12915_v21  ;;  %v8121_v20 = vld [vmem:[#allocation9 + $0xb38] sm:$0xff]  ;;  %v12960_v21 = vcombine.low %v8108_v2, %v8112_v51 }
 0x63d   :  { %v12971_v27 = vcombine.high %v8117_v19, %v8121_v20  ;;  %v12970_v31 = vcombine.low %v8117_v19, %v8121_v20  ;;  %v8172_v20 = vld [vmem:[#allocation9 + $0xcd0] sm:$0xff] }
 0x63e   :  { %11317 = vmatpush1.bf16.msra.mxu0 %v12912_v24  ;;  %v8128_v24 = vld [vmem:[#allocation9 + $0xb70] sm:$0xff] }
 0x63f   :  { %11489 = vmatpush1.bf16.msra.mxu1 %v12914_v26  ;;  %11318 = vmatprep.subr.bf16.mxu0 %v12921_v28  ;;  %v8125_v26 = vld [vmem:[#allocation9 + $0xb58] sm:$0xff]  ;;  %v12977_v30 = vcombine.high %v8124_v23, %v8128_v24 }
 0x640   :  { %11490 = vmatprep.subr.bf16.mxu1 %v12923_v29  ;;  %v8129_v28 = vld [vmem:[#allocation9 + $0xb78] sm:$0xff]  ;;  %v12968_v29 = vcombine.low %v8116_v35, %v8120_v18  ;;  %v13017_v18 = vcombine.high %v8164_v3, %v8168_v6 }
 0x641   :  { %v12979_v56 = vcombine.high %v8125_v26, %v8129_v28  ;;  %v12978_v36 = vcombine.low %v8125_v26, %v8129_v28  ;;  %v8180_v26 = vld [vmem:[#allocation9 + $0xd10] sm:$0xff] }
 0x642   :  { %11319 = vmatpush1.bf16.msra.mxu0 %v12920_v34  ;;  %v8136_v34 = vld [vmem:[#allocation9 + $0xbb0] sm:$0xff] }
 0x643   :  { %11491 = vmatpush1.bf16.msra.mxu1 %v12922_v63  ;;  %11320 = vmatprep.subr.bf16.mxu0 %v12929_v15  ;;  %v8133_v63 = vld [vmem:[#allocation9 + $0xb98] sm:$0xff]  ;;  %v12985_v38 = vcombine.high %v8132_v58, %v8136_v34  ;;  %v8184_v28 = vld [vmem:[#allocation9 + $0xd30] sm:$0xff] }
 0x644   :  { %11492 = vmatprep.subr.bf16.mxu1 %v12931_v33  ;;  %v8137_v15 = vld [vmem:[#allocation9 + $0xbb8] sm:$0xff]  ;;  %v12976_v33 = vcombine.low %v8124_v23, %v8128_v24 }
 0x645   :  { %v12987_v39 = vcombine.high %v8133_v63, %v8137_v15  ;;  %v12986_v48 = vcombine.low %v8133_v63, %v8137_v15  ;;  %v8192_v63 = vld [vmem:[#allocation9 + $0xd70] sm:$0xff]  ;;  %v8189_v15 = vld [vmem:[#allocation9 + $0xd58] sm:$0xff] }
 0x646   :  { %11321 = vmatpush1.bf16.msra.mxu0 %v12928_v44  ;;  %v8144_v44 = vld [vmem:[#allocation9 + $0xbf0] sm:$0xff] }
 0x647   :  { %11493 = vmatpush1.bf16.msra.mxu1 %v12930_v45  ;;  %11322 = vmatprep.subr.bf16.mxu0 %v12937_v25  ;;  %v8141_v45 = vld [vmem:[#allocation9 + $0xbd8] sm:$0xff]  ;;  %v12993_v54 = vcombine.high %v8140_v40, %v8144_v44 }
 0x648   :  { %11494 = vmatprep.subr.bf16.mxu1 %v12939_v46  ;;  %v8145_v25 = vld [vmem:[#allocation9 + $0xbf8] sm:$0xff]  ;;  %v12984_v46 = vcombine.low %v8132_v58, %v8136_v34  ;;  %v8188_v34 = vld [vmem:[#allocation9 + $0xd50] sm:$0xff] }
 0x649   :  { %v12995_v37 = vcombine.high %v8141_v45, %v8145_v25  ;;  %v12994_v60 = vcombine.low %v8141_v45, %v8145_v25  ;;  %v8196_v45 = vld [vmem:[#allocation9 + $0xd90] sm:$0xff] }
 0x64a   :  { %11323 = vmatpush1.bf16.msra.mxu0 %v12936_v52  ;;  %v8152_v52 = vld [vmem:[#allocation9 + $0xc30] sm:$0xff] }
 0x64b   :  { %11495 = vmatpush1.bf16.msra.mxu1 %v12938_v55  ;;  %11324 = vmatprep.subr.bf16.mxu0 %v12945_v57  ;;  %v8149_v55 = vld [vmem:[#allocation9 + $0xc18] sm:$0xff]  ;;  %v13001_v61 = vcombine.high %v8148_v49, %v8152_v52  ;;  %v8200_v25 = vld [vmem:[#allocation9 + $0xdb0] sm:$0xff] }
 0x64c   :  { %11496 = vmatprep.subr.bf16.mxu1 %v12947_v59  ;;  %v8153_v57 = vld [vmem:[#allocation9 + $0xc38] sm:$0xff]  ;;  %v12992_v59 = vcombine.low %v8140_v40, %v8144_v44  ;;  %v13041_v40 = vcombine.high %v8188_v34, %v8192_v63 }
 0x64d   :  { %v13003_v53 = vcombine.high %v8149_v55, %v8153_v57  ;;  %v13002_v2 = vcombine.low %v8149_v55, %v8153_v57  ;;  %v13040_v55 = vcombine.low %v8188_v34, %v8192_v63 }
 0x64e   :  { %11325 = vmatpush1.bf16.msra.mxu0 %v12944_v62  ;;  %v8160_v62 = vld [vmem:[#allocation9 + $0xc70] sm:$0xff] }
 0x64f   :  { %11497 = vmatpush1.bf16.msra.mxu1 %v12946_v4  ;;  %11326 = vmatprep.subr.bf16.mxu0 %v12953_v0  ;;  %v13000_v4 = vcombine.low %v8148_v49, %v8152_v52  ;;  %v8157_v0 = vld [vmem:[#allocation9 + $0xc58] sm:$0xff]  ;;  %v13009_v51 = vcombine.high %v8156_v32, %v8160_v62 }
 0x650   :  { %11498 = vmatprep.subr.bf16.mxu1 %v12955_v1  ;;  %v8161_v1 = vld [vmem:[#allocation9 + $0xc78] sm:$0xff] }
 0x651   :  { %v13010_v35 = vcombine.low %v8157_v0, %v8161_v1 }
 0x652   :  { %11327 = vmatpush1.bf16.msra.mxu0 %v12952_v7  ;;  %v13011_v7 = vcombine.high %v8157_v0, %v8161_v1  ;;  %v8205_v1 = vld [vmem:[#allocation9 + $0xdd8] sm:$0xff] }
 0x653   :  { %11499 = vmatpush1.bf16.msra.mxu1 %v12954_v16  ;;  %11328 = vmatprep.subr.bf16.mxu0 %v12961_v17  ;;  %v8165_v16 = vld [vmem:[#allocation9 + $0xc98] sm:$0xff] }
 0x654   :  { %11500 = vmatprep.subr.bf16.mxu1 %v12963_v41  ;;  %v8169_v17 = vld [vmem:[#allocation9 + $0xcb8] sm:$0xff]  ;;  %v13008_v41 = vcombine.low %v8156_v32, %v8160_v62 }
 0x655   :  { %v13019_v19 = vcombine.high %v8165_v16, %v8169_v17 }
 0x656   :  { %11329 = vmatpush1.bf16.msra.mxu0 %v12960_v21  ;;  %v8176_v21 = vld [vmem:[#allocation9 + $0xcf0] sm:$0xff] }
 0x657   :  { %11501 = vmatpush1.bf16.msra.mxu1 %v12962_v22  ;;  %11330 = vmatprep.subr.bf16.mxu0 %v12969_v43  ;;  %v8173_v22 = vld [vmem:[#allocation9 + $0xcd8] sm:$0xff]  ;;  %v13025_v23 = vcombine.high %v8172_v20, %v8176_v21 }
 0x658   :  { %11502 = vmatprep.subr.bf16.mxu1 %v12971_v27  ;;  %v8177_v43 = vld [vmem:[#allocation9 + $0xcf8] sm:$0xff]  ;;  %v13016_v27 = vcombine.low %v8164_v3, %v8168_v6  ;;  %v13048_v6 = vcombine.low %v8196_v45, %v8200_v25 }
 0x659   :  { %v13027_v24 = vcombine.high %v8173_v22, %v8177_v43 }
 0x65a   :  { %11331 = vmatpush1.bf16.msra.mxu0 %v12968_v29  ;;  %v8181_v29 = vld [vmem:[#allocation9 + $0xd18] sm:$0xff] }
 0x65b   :  { %11503 = vmatpush1.bf16.msra.mxu1 %v12970_v31  ;;  %11332 = vmatprep.subr.bf16.mxu0 %v12977_v30  ;;  %v8185_v31 = vld [vmem:[#allocation9 + $0xd38] sm:$0xff]  ;;  %v13026_v30 = vcombine.low %v8173_v22, %v8177_v43  ;;  %v8212_v22 = vld [vmem:[#allocation9 + $0xe10] sm:$0xff] }
 0x65c   :  { %11504 = vmatprep.subr.bf16.mxu1 %v12979_v56  ;;  %v13033_v56 = vcombine.high %v8180_v26, %v8184_v28  ;;  %v13035_v58 = vcombine.high %v8181_v29, %v8185_v31  ;;  %v8216_v43 = vld [vmem:[#allocation9 + $0xe30] sm:$0xff] }
 0x65e   :  { %11333 = vmatpush1.bf16.msra.mxu0 %v12976_v33  ;;  %v8193_v33 = vld [vmem:[#allocation9 + $0xd78] sm:$0xff] }
 0x65f   :  { %11505 = vmatpush1.bf16.msra.mxu1 %v12978_v36  ;;  %11334 = vmatprep.subr.bf16.mxu0 %v12985_v38  ;;  %v13032_v36 = vcombine.low %v8180_v26, %v8184_v28  ;;  %v13843_v38 = vld [vmem:[#allocation10] sm:$0xff]  ;;  %v13043_v44 = vcombine.high %v8189_v15, %v8193_v33  ;;  %v13042_v57 = vcombine.low %v8189_v15, %v8193_v33  ;;  %v8228_v15 = vld [vmem:[#allocation9 + $0xe90] sm:$0xff] }
 0x660   :  { %11506 = vmatprep.subr.bf16.mxu1 %v12987_v39  ;;  %v13034_v39 = vcombine.low %v8181_v29, %v8185_v31  ;;  %v8283_v49 = vrot.slane %v13843_v38, %v13698_v9  ;;  %v8291_v52 = vrot.slane %v13843_v38, %v13701_v13  ;;  %v8209_v9 = vld [vmem:[#allocation9 + $0xdf8] sm:$0xff]  ;;  %v13065_v26 = vcombine.high %v8212_v22, %v8216_v43  ;;  %v8220_v29 = vld [vmem:[#allocation9 + $0xe50] sm:$0xff] }
 0x661   :  { %v8224_v31 = vld [vmem:[#allocation9 + $0xe70] sm:$0xff] }
 0x662   :  { %11335 = vmatpush1.bf16.msra.mxu0 %v12984_v46  ;;  %v8279_v46 = vrot.slane %v13843_v38, %v13692_v5  ;;  %v13073_v34 = vcombine.high %v8220_v29, %v8224_v31  ;;  %v8232_v33 = vld [vmem:[#allocation9 + $0xeb0] sm:$0xff] }
 0x663   :  { %11507 = vmatpush1.bf16.msra.mxu1 %v12986_v48  ;;  %11336 = vmatprep.subr.bf16.mxu0 %v12993_v54  ;;  %v8287_v48 = vrot.slane %v13843_v38, %v13695_v8  ;;  %v8197_v54 = vld [vmem:[#allocation9 + $0xd98] sm:$0xff]  ;;  %v8208_v8 = vld [vmem:[#allocation9 + $0xdf0] sm:$0xff] }
 0x664   :  { %11508 = vmatprep.subr.bf16.mxu1 %v12995_v37  ;;  %v8201_v37 = vld [vmem:[#allocation9 + $0xdb8] sm:$0xff] }
 0x665   :  { %v13051_v5 = vcombine.high %v8197_v54, %v8201_v37 }
 0x666   :  { %11337 = vmatpush1.bf16.msra.mxu0 %v12992_v59  ;;  %v13049_v59 = vcombine.high %v8196_v45, %v8200_v25  ;;  %v13081_v45 = vcombine.high %v8228_v15, %v8232_v33 }
 0x667   :  { %11509 = vmatpush1.bf16.msra.mxu1 %v12994_v60  ;;  %11349 = vmatprep.subr.bf16.mxu0 %v13001_v61 }
 0x668   :  { %11521 = vmatprep.subr.bf16.mxu1 %v13003_v53  ;;  %v8204_v53 = vld [vmem:[#allocation9 + $0xdd0] sm:$0xff] }
 0x669   :  { %11339 = vmatmul.mubr.bf16.vlgmr.msra.gmra.mrb[20].mxu0 %v13809_v47 }
 0x66a   :  { %11511 = vmatmul.mubr.bf16.vlgmr.msra.gmra.mrb[20].mxu1 %v13809_v47  ;;  %11350 = vmatpush1.bf16.msra.mxu0 %v13000_v4  ;;  %v13018_v47 = vcombine.low %v8165_v16, %v8169_v17 }
 0x66b   :  { %11381 = vmatprep.mubr.bf16.mxu0 %v13819_v42  ;;  %11522 = vmatpush1.bf16.msra.mxu1 %v13002_v2 }
 0x66c   :  { %11553 = vmatprep.mubr.bf16.mxu1 %v13819_v42  ;;  %11351 = vmatprep.subr.bf16.mxu0 %v13009_v51  ;;  %v13024_v42 = vcombine.low %v8172_v20, %v8176_v21  ;;  %v13059_v21 = vcombine.high %v8205_v1, %v8209_v9 }
 0x66d   :  { %11523 = vmatprep.subr.bf16.mxu1 %v13011_v7  ;;  %v13050_v7 = vcombine.low %v8197_v54, %v8201_v37  ;;  %v8237_v54 = vld [vmem:[#allocation9 + $0xed8] sm:$0xff] }
 0x66e   :  { %11352 = vmatpush1.bf16.msra.mxu0 %v13008_v41  ;;  %v8241_v37 = vld [vmem:[#allocation9 + $0xef8] sm:$0xff] }
 0x66f   :  { %11524 = vmatpush1.bf16.msra.mxu1 %v13010_v35  ;;  %11353 = vmatprep.subr.bf16.mxu0 %v13017_v18  ;;  %v13057_v18 = vcombine.high %v8204_v53, %v8208_v8 }
 0x670   :  { %11525 = vmatprep.subr.bf16.mxu1 %v13019_v19 }
 0x672   :  { %11354 = vmatpush1.bf16.msra.mxu0 %v13016_v27  ;;  %v8213_v27 = vld [vmem:[#allocation9 + $0xe18] sm:$0xff] }
 0x673   :  { %11526 = vmatpush1.bf16.msra.mxu1 %v13018_v47  ;;  %11355 = vmatprep.subr.bf16.mxu0 %v13025_v23  ;;  %v8217_v47 = vld [vmem:[#allocation9 + $0xe38] sm:$0xff]  ;;  %v13056_v23 = vcombine.low %v8204_v53, %v8208_v8  ;;  %v13090_v8 = vcombine.low %v8237_v54, %v8241_v37 }
 0x674   :  { %11527 = vmatprep.subr.bf16.mxu1 %v13027_v24  ;;  %v13058_v24 = vcombine.low %v8205_v1, %v8209_v9  ;;  %v13067_v28 = vcombine.high %v8213_v27, %v8217_v47  ;;  %v8253_v1 = vld [vmem:[#allocation9 + $0xf58] sm:$0xff] }
 0x675   :  { %v8257_v9 = vld [vmem:[#allocation9 + $0xf78] sm:$0xff] }
 0x676   :  { %11356 = vmatpush1.bf16.msra.mxu0 %v13024_v42  ;;  %v8221_v42 = vld [vmem:[#allocation9 + $0xe58] sm:$0xff] }
 0x677   :  { %11528 = vmatpush1.bf16.msra.mxu1 %v13026_v30  ;;  %11357 = vmatprep.subr.bf16.mxu0 %v13033_v56  ;;  %v8225_v30 = vld [vmem:[#allocation9 + $0xe78] sm:$0xff]  ;;  %v13064_v56 = vcombine.low %v8212_v22, %v8216_v43 }
 0x678   :  { %11529 = vmatprep.subr.bf16.mxu1 %v13035_v58  ;;  %v13066_v58 = vcombine.low %v8213_v27, %v8217_v47  ;;  %v13075_v63 = vcombine.high %v8221_v42, %v8225_v30  ;;  %v8269_v22 = vld [vmem:[#allocation9 + $0xfd8] sm:$0xff] }
 0x679   :  { %v8273_v43 = vld [vmem:[#allocation9 + $0xff8] sm:$0xff] }
 0x67a   :  { %11358 = vmatpush1.bf16.msra.mxu0 %v13032_v36  ;;  %v8229_v36 = vld [vmem:[#allocation9 + $0xe98] sm:$0xff] }
 0x67b   :  { %11530 = vmatpush1.bf16.msra.mxu1 %v13034_v39  ;;  %11359 = vmatprep.subr.bf16.mxu0 %v13041_v40  ;;  %v8233_v39 = vld [vmem:[#allocation9 + $0xeb8] sm:$0xff]  ;;  %v13072_v40 = vcombine.low %v8220_v29, %v8224_v31  ;;  %v8295_v29 = vrot.slane %v13843_v38, %v13726_v10  ;;  %v8303_v31 = vrot.slane %v13843_v38, %v13729_v11 }
 0x67c   :  { %v11039_v60 = vpop.f32.mrb[16].mxu0  ;;  %v11211_v61 = vpop.f32.mrb[16].mxu1  ;;  %11531 = vmatprep.subr.bf16.mxu1 %v13043_v44  ;;  %v13074_v44 = vcombine.low %v8221_v42, %v8225_v30  ;;  %v13083_v25 = vcombine.high %v8229_v36, %v8233_v39  ;;  %v8299_v42 = vrot.slane %v13843_v38, %v13732_v12  ;;  %v8307_v30 = vrot.slane %v13843_v38, %v13735_v14 }
 0x67d   :  { %v13156_v32 = vadd.f32 %v11039_v60, %v8279_v46  ;;  %v13160_v62 = vadd.f32 %v11211_v61, %v8287_v48  ;;  %v11041_v4 = vpop.f32.mrb[17].mxu0  ;;  %v11213_v0 = vpop.f32.mrb[17].mxu1  ;;  %v8248_v60 = vld [vmem:[#allocation9 + $0xf30] sm:$0xff]  ;;  %v8245_v61 = vld [vmem:[#allocation9 + $0xf18] sm:$0xff] }
 0x67e   :  { %v13157_v2 = vadd.f32 %v11041_v4, %v8283_v49  ;;  %v13161_v51 = vadd.f32 %v11213_v0, %v8291_v52  ;;  %v11043_v13 = vpop.f32.mrb[18].mxu0  ;;  %v11215_v3 = vpop.f32.mrb[18].mxu1  ;;  %11360 = vmatpush1.bf16.msra.mxu0 %v13040_v55  ;;  %v8252_v4 = vld [vmem:[#allocation9 + $0xf50] sm:$0xff] }
 0x67f   :  { %11564 = vst [vmem:[%s13918_s7] sm:$0xff] %v13156_v32  ;;  %11566 = vst [vmem:[%s13918_s7 + $0x10] sm:$0xff] %v13160_v62  ;;  %v13158_v16 = vadd.f32 %v11043_v13, %v8279_v46  ;;  %v13162_v17 = vadd.f32 %v11215_v3, %v8287_v48  ;;  %11532 = vmatpush1.bf16.msra.mxu1 %v13042_v57  ;;  %v11045_v41 = vpop.f32.mrb[19].mxu0  ;;  %v11217_v35 = vpop.f32.mrb[19].mxu1  ;;  %11361 = vmatprep.subr.bf16.mxu0 %v13049_v59  ;;  %v8236_v46 = vld [vmem:[#allocation9 + $0xed0] sm:$0xff] }
 0x680   :  { %11565 = vst [vmem:[%s13918_s7 + $0x8] sm:$0xff] %v13157_v2  ;;  %11567 = vst [vmem:[%s13918_s7 + $0x18] sm:$0xff] %v13161_v51  ;;  %v13159_v19 = vadd.f32 %v11045_v41, %v8283_v49  ;;  %v13163_v20 = vadd.f32 %v11217_v35, %v8291_v52  ;;  %11533 = vmatprep.subr.bf16.mxu1 %v13051_v5  ;;  %v8240_v48 = vld [vmem:[#allocation9 + $0xef0] sm:$0xff]  ;;  %v13080_v49 = vcombine.low %v8228_v15, %v8232_v33  ;;  %v8249_v5 = vld [vmem:[#allocation9 + $0xf38] sm:$0xff] }
 0x681   :  { %11572 = vst [vmem:[%s13918_s7 + $0x40] sm:$0xff] %v13158_v16  ;;  %11574 = vst [vmem:[%s13918_s7 + $0x50] sm:$0xff] %v13162_v17  ;;  %v13082_v52 = vcombine.low %v8229_v36, %v8233_v39  ;;  %v13089_v55 = vcombine.high %v8236_v46, %v8240_v48  ;;  %v13091_v57 = vcombine.high %v8237_v54, %v8241_v37  ;;  %v8244_v59 = vld [vmem:[#allocation9 + $0xf10] sm:$0xff]  ;;  %v8261_v16 = vld [vmem:[#allocation9 + $0xf98] sm:$0xff] }
 0x682   :  { %11573 = vst [vmem:[%s13918_s7 + $0x48] sm:$0xff] %v13159_v19  ;;  %11575 = vst [vmem:[%s13918_s7 + $0x58] sm:$0xff] %v13163_v20  ;;  %11362 = vmatpush1.bf16.msra.mxu0 %v13048_v6  ;;  %v13088_v53 = vcombine.low %v8236_v46, %v8240_v48  ;;  %v13097_v32 = vcombine.high %v8244_v59, %v8248_v60  ;;  %v13099_v62 = vcombine.high %v8245_v61, %v8249_v5  ;;  %v8256_v0 = vld [vmem:[#allocation9 + $0xf70] sm:$0xff]  ;;  %v8265_v17 = vld [vmem:[#allocation9 + $0xfb8] sm:$0xff] }
 0x683   :  { %11534 = vmatpush1.bf16.msra.mxu1 %v13050_v7  ;;  %11363 = vmatprep.subr.bf16.mxu0 %v13057_v18  ;;  %v13096_v2 = vcombine.low %v8244_v59, %v8248_v60  ;;  %v13098_v51 = vcombine.low %v8245_v61, %v8249_v5  ;;  %v13105_v13 = vcombine.high %v8252_v4, %v8256_v0  ;;  %v8260_v6 = vld [vmem:[#allocation9 + $0xf90] sm:$0xff] }
 0x684   :  { %11535 = vmatprep.subr.bf16.mxu1 %v13059_v21  ;;  %v13107_v3 = vcombine.high %v8253_v1, %v8257_v9  ;;  %v8264_v7 = vld [vmem:[#allocation9 + $0xfb0] sm:$0xff]  ;;  %v13104_v41 = vcombine.low %v8252_v4, %v8256_v0  ;;  %v13106_v35 = vcombine.low %v8253_v1, %v8257_v9  ;;  %v13115_v19 = vcombine.high %v8261_v16, %v8265_v17 }
 0x685   :  { %v13113_v18 = vcombine.high %v8260_v6, %v8264_v7  ;;  %v8268_v20 = vld [vmem:[#allocation9 + $0xfd0] sm:$0xff]  ;;  %v13112_v27 = vcombine.low %v8260_v6, %v8264_v7  ;;  %v13114_v47 = vcombine.low %v8261_v16, %v8265_v17 }
 0x686   :  { %11364 = vmatpush1.bf16.msra.mxu0 %v13056_v23  ;;  %v8272_v21 = vld [vmem:[#allocation9 + $0xff0] sm:$0xff] }
 0x687   :  { %11536 = vmatpush1.bf16.msra.mxu1 %v13058_v24  ;;  %11365 = vmatprep.subr.bf16.mxu0 %v13065_v26  ;;  %v13121_v23 = vcombine.high %v8268_v20, %v8272_v21  ;;  %v13123_v24 = vcombine.high %v8269_v22, %v8273_v43  ;;  %v13120_v26 = vcombine.low %v8268_v20, %v8272_v21 }
 0x688   :  { %11537 = vmatprep.subr.bf16.mxu1 %v13067_v28  ;;  %v13122_v28 = vcombine.low %v8269_v22, %v8273_v43 }
 0x68a   :  { %11366 = vmatpush1.bf16.msra.mxu0 %v13064_v56 }
 0x68b   :  { %11538 = vmatpush1.bf16.msra.mxu1 %v13066_v58  ;;  %11367 = vmatprep.subr.bf16.mxu0 %v13073_v34 }
 0x68c   :  { %11539 = vmatprep.subr.bf16.mxu1 %v13075_v63 }
 0x68e   :  { %11368 = vmatpush1.bf16.msra.mxu0 %v13072_v40 }
 0x68f   :  { %11540 = vmatpush1.bf16.msra.mxu1 %v13074_v44  ;;  %11369 = vmatprep.subr.bf16.mxu0 %v13081_v45 }
 0x690   :  { %11541 = vmatprep.subr.bf16.mxu1 %v13083_v25 }
 0x692   :  { %11370 = vmatpush1.bf16.msra.mxu0 %v13080_v49 }
 0x693   :  { %11542 = vmatpush1.bf16.msra.mxu1 %v13082_v52  ;;  %11371 = vmatprep.subr.bf16.mxu0 %v13089_v55 }
 0x694   :  { %11543 = vmatprep.subr.bf16.mxu1 %v13091_v57 }
 0x696   :  { %11372 = vmatpush1.bf16.msra.mxu0 %v13088_v53 }
 0x697   :  { %11544 = vmatpush1.bf16.msra.mxu1 %v13090_v8  ;;  %11373 = vmatprep.subr.bf16.mxu0 %v13097_v32 }
 0x698   :  { %11545 = vmatprep.subr.bf16.mxu1 %v13099_v62 }
 0x69a   :  { %11374 = vmatpush1.bf16.msra.mxu0 %v13096_v2 }
 0x69b   :  { %11546 = vmatpush1.bf16.msra.mxu1 %v13098_v51  ;;  %11375 = vmatprep.subr.bf16.mxu0 %v13105_v13 }
 0x69c   :  { %11547 = vmatprep.subr.bf16.mxu1 %v13107_v3 }
 0x69e   :  { %11376 = vmatpush1.bf16.msra.mxu0 %v13104_v41 }
 0x69f   :  { %11548 = vmatpush1.bf16.msra.mxu1 %v13106_v35  ;;  %11377 = vmatprep.subr.bf16.mxu0 %v13113_v18 }
 0x6a0   :  { %11549 = vmatprep.subr.bf16.mxu1 %v13115_v19 }
 0x6a2   :  { %11378 = vmatpush1.bf16.msra.mxu0 %v13112_v27 }
 0x6a3   :  { %11550 = vmatpush1.bf16.msra.mxu1 %v13114_v47  ;;  %11379 = vmatprep.subr.bf16.mxu0 %v13121_v23 }
 0x6a4   :  { %11551 = vmatprep.subr.bf16.mxu1 %v13123_v24 }
 0x6a6   :  { %11380 = vmatpush1.bf16.msra.mxu0 %v13120_v26 }
 0x6a7   :  { %11552 = vmatpush1.bf16.msra.mxu1 %v13122_v28 }
 0x6a9   :  { %11382 = vmatmul.mubr.bf16.vlgmr.msra.gmra.mrb[20].mxu0 %v13811_v50 }
 0x6aa   :  { %11554 = vmatmul.mubr.bf16.vlgmr.msra.gmra.mrb[20].mxu1 %v13811_v50 }
 0x77c   :  { %v11383_v56 = vpop.f32.mrb[20].mxu0 }
 0x77d   :  { %v13164_v58 = vadd.f32 %v11383_v56, %v8295_v29  ;;  %v11555_v34 = vpop.f32.mrb[20].mxu1  ;;  %v11385_v63 = vpop.f32.mrb[21].mxu0 }
 0x77e   :  { %v13168_v15 = vadd.f32 %v11555_v34, %v8303_v31  ;;  %v13165_v33 = vadd.f32 %v11385_v63, %v8299_v42  ;;  %v11557_v36 = vpop.f32.mrb[21].mxu1  ;;  %v11387_v50 = vpop.f32.mrb[22].mxu0 }
 0x77f   :  { %11568 = vst [vmem:[%s13918_s7 + $0x20] sm:$0xff] %v13164_v58  ;;  %v13169_v10 = vadd.f32 %v11557_v36, %v8307_v30  ;;  %v13166_v11 = vadd.f32 %v11387_v50, %v8295_v29  ;;  %v11559_v39 = vpop.f32.mrb[22].mxu1  ;;  %v11389_v40 = vpop.f32.mrb[23].mxu0 }
 0x780   :  { %11570 = vst [vmem:[%s13918_s7 + $0x30] sm:$0xff] %v13168_v15  ;;  %11569 = vst [vmem:[%s13918_s7 + $0x28] sm:$0xff] %v13165_v33  ;;  %v13170_v12 = vadd.f32 %v11559_v39, %v8303_v31  ;;  %v13167_v14 = vadd.f32 %v11389_v40, %v8299_v42  ;;  %v11561_v38 = vpop.f32.mrb[23].mxu1 }
 0x781   :  { %11571 = vst [vmem:[%s13918_s7 + $0x38] sm:$0xff] %v13169_v10  ;;  %11576 = vst [vmem:[%s13918_s7 + $0x60] sm:$0xff] %v13166_v11  ;;  %v13171_v44 = vadd.f32 %v11561_v38, %v8307_v30 }
 0x782   :  { %11578 = vst [vmem:[%s13918_s7 + $0x70] sm:$0xff] %v13170_v12  ;;  %11577 = vst [vmem:[%s13918_s7 + $0x68] sm:$0xff] %v13167_v14 }
 0x783   :  { %11579 = vst [vmem:[%s13918_s7 + $0x78] sm:$0xff] %v13171_v44 }
 0x784   :  { %11584 = vsyncpa [#allocation3], 1 }
 0x785   :  { %11585 = vsyncpa [#allocation5], 1 }
 0x786   :  { %11586 = vsyncpa [#allocation8], 1 }
 0x787   :  { %11587 = vsyncpa [#allocation11], 1 }

</bundles_post_ra>
